<compile_context>
chip_gen: v7x
topology: tpu7x:2x2x1
jax: 0.10.0
libtpu: 0.0.40
codegen_flags: <defaults>
</compile_context>

<pallas_src>
import jax
import jax.numpy as jnp
from jax.experimental import pallas as pl
from jax.experimental.pallas import tpu as pltpu

BN_EPS = 1e-5
ROW_TILE_CAP = 1024  # rows per grid step; 512-1024-row tiles hit >85% of the HBM roofline.


# ---------------------------------------------------------------------------
# helpers
# ---------------------------------------------------------------------------
def _pick_tile(rows, cap=ROW_TILE_CAP, align=16):
    """Largest row tile <= cap that divides `rows` (aligned); whole array if it is small."""
    if rows <= cap:
        return rows
    t = cap - cap % align
    while t >= align:
        if rows % t == 0:
            return t
        t -= align
    # TODO(synk): pad + mask the last tile for row counts with no aligned divisor.
    return rows


def _compiler_params(semantics, block_bytes):
    # Explicit scoped-VMEM budget (double buffering + slack), clamped so it is safe on
    # v7x's 64 MiB physical VMEM as well as v5e/v6e's 128 MiB.
    vmem = int(min(max(3 * block_bytes + (4 << 20), 16 << 20), 48 << 20))
    return pltpu.CompilerParams(dimension_semantics=semantics, vmem_limit_bytes=vmem)


def _scale_shift(stats, count, gamma, beta):
    """Fold train-mode BN into one per-channel FMA: y = h * scale + shift (f32)."""
    mean = stats[0] / count
    var = jnp.maximum(stats[1] / count - mean * mean, 0.0)   # biased var, f32 accumulation
    scale = gamma * jax.lax.rsqrt(var + BN_EPS)
    shift = beta - mean * scale
    return (scale.reshape(1, -1).astype(jnp.float32),
            shift.reshape(1, -1).astype(jnp.float32))


# ---------------------------------------------------------------------------
# kernels
# ---------------------------------------------------------------------------
def _enc_first_kernel(x_ref, w_ref, h_ref, st_ref):
    # conv1 (1x1) as a matmul; conv bias omitted (cancels under train-mode BN).
    h = jnp.dot(x_ref[...], w_ref[...], preferred_element_type=jnp.float32)
    st_ref[0:1, :] = jnp.sum(h, axis=0, keepdims=True)
    st_ref[1:2, :] = jnp.sum(h * h, axis=0, keepdims=True)
    h_ref[...] = h.astype(h_ref.dtype)


def _enc_mid_kernel(hp_ref, x_ref, s_ref, t_ref, wa_ref, wx_ref, h_ref, st_ref):
    # Fused: BN+ReLU of the previous raw conv output (one FMA) -> this layer's conv
    # (the [prev, raw-input] concat is realized by splitting the weight into two matmuls).
    a = jnp.maximum(hp_ref[...].astype(jnp.float32) * s_ref[...] + t_ref[...], 0.0)
    h = jnp.dot(a.astype(jnp.bfloat16), wa_ref[...], preferred_element_type=jnp.float32)
    h = h + jnp.dot(x_ref[...], wx_ref[...], preferred_element_type=jnp.float32)
    st_ref[0:1, :] = jnp.sum(h, axis=0, keepdims=True)
    st_ref[1:2, :] = jnp.sum(h * h, axis=0, keepdims=True)
    h_ref[...] = h.astype(h_ref.dtype)


def _enc_head_kernel(h3_ref, h2_ref, h1_ref, x_ref,
                     s3_ref, t3_ref, s2_ref, t2_ref, s1_ref, t1_ref,
                     w3_ref, w2_ref, w1_ref, wx_ref, b_ref, out_ref):
    # conv4 + parallel `f` conv (weights pre-combined per concat segment) + per-point
    # max-pool.  Grid = (pooled-row tiles [parallel], descriptors-per-point r [arbitrary]);
    # the output block stays resident across r and accumulates the max.
    r = pl.program_id(1)
    a3 = jnp.maximum(h3_ref[...].astype(jnp.float32) * s3_ref[...] + t3_ref[...], 0.0)
    a2 = jnp.maximum(h2_ref[...].astype(jnp.float32) * s2_ref[...] + t2_ref[...], 0.0)
    a1 = jnp.maximum(h1_ref[...].astype(jnp.float32) * s1_ref[...] + t1_ref[...], 0.0)
    y = jnp.dot(a3.astype(jnp.bfloat16), w3_ref[...], preferred_element_type=jnp.float32)
    y = y + jnp.dot(a2.astype(jnp.bfloat16), w2_ref[...], preferred_element_type=jnp.float32)
    y = y + jnp.dot(a1.astype(jnp.bfloat16), w1_ref[...], preferred_element_type=jnp.float32)
    y = y + jnp.dot(x_ref[...], wx_ref[...], preferred_element_type=jnp.float32)
    y = y + b_ref[...]

    @pl.when(r == 0)
    def _():
        out_ref[...] = y

    @pl.when(r != 0)
    def _():
        out_ref[...] = jnp.maximum(out_ref[...], y)


def _seg1_kernel(xp_ref, g_ref, w_ref, a_ref, st_ref):
    # seg conv1 over x_point; the global/label contribution arrives as an additive row
    # term (g_ref, includes the conv bias).  BN comes *after* the ReLU in seg_net.
    a = jnp.dot(xp_ref[...], w_ref[...], preferred_element_type=jnp.float32) + g_ref[...]
    a = jnp.maximum(a, 0.0)
    st_ref[0:1, :] = jnp.sum(a, axis=0, keepdims=True)
    st_ref[1:2, :] = jnp.sum(a * a, axis=0, keepdims=True)
    a_ref[...] = a.astype(a_ref.dtype)


def _seg2_kernel(a1_ref, s_ref, t_ref, w_ref, b_ref, a_ref, st_ref):
    z = a1_ref[...].astype(jnp.float32) * s_ref[...] + t_ref[...]   # bn1(a1); no relu here
    a = jnp.dot(z.astype(jnp.bfloat16), w_ref[...], preferred_element_type=jnp.float32)
    a = jnp.maximum(a + b_ref[...], 0.0)
    st_ref[0:1, :] = jnp.sum(a, axis=0, keepdims=True)
    st_ref[1:2, :] = jnp.sum(a * a, axis=0, keepdims=True)
    a_ref[...] = a.astype(a_ref.dtype)


def _seg_head_kernel(a2_ref, s_ref, t_ref, w3_ref, b3_ref, w4_ref, b4_ref, out_ref):
    # relu(bn2(a2)) -> conv3+relu -> conv4 -> log_softmax, all fused.
    z = jnp.maximum(a2_ref[...].astype(jnp.float32) * s_ref[...] + t_ref[...], 0.0)
    h = jnp.dot(z.astype(jnp.bfloat16), w3_ref[...], preferred_element_type=jnp.float32)
    h = jnp.maximum(h + b3_ref[...], 0.0)
    logits = jnp.dot(h.astype(jnp.bfloat16), w4_ref[...], preferred_element_type=jnp.float32)
    logits = logits + b4_ref[...]
    m = jnp.max(logits, axis=-1, keepdims=True)
    lse = m + jnp.log(jnp.sum(jnp.exp(logits - m), axis=-1, keepdims=True))
    out_ref[...] = (logits - lse).astype(out_ref.dtype)


# ---------------------------------------------------------------------------
# pallas_call wrappers
# ---------------------------------------------------------------------------
def _linear_stats_call(kernel, acts, params_, out_cols, tm, flops):
    """Row-tiled matmul layer emitting bf16 activations + per-tile (sum, sumsq) partials."""
    rows = acts[0].shape[0]
    n_tiles = rows // tm
    act_specs = [pl.BlockSpec((tm, a.shape[-1]), lambda i: (i, 0)) for a in acts]
    par_specs = [pl.BlockSpec(p.shape, lambda i: (0, 0)) for p in params_]
    out_shape = (jax.ShapeDtypeStruct((rows, out_cols), jnp.bfloat16),
                 jax.ShapeDtypeStruct((n_tiles, 2, out_cols), jnp.float32))
    out_specs = (pl.BlockSpec((tm, out_cols), lambda i: (i, 0)),
                 pl.BlockSpec((None, 2, out_cols), lambda i: (i, 0, 0)))
    block_bytes = (sum(tm * a.shape[-1] * a.dtype.itemsize for a in acts)
                   + sum(int(p.nbytes) for p in params_)
                   + tm * out_cols * 2 + 2 * out_cols * 4)
    bytes_accessed = (sum(int(a.nbytes) for a in acts) + sum(int(p.nbytes) for p in params_)
                      + rows * out_cols * 2 + n_tiles * 2 * out_cols * 4)
    h, stats = pl.pallas_call(
        kernel,
        grid=(n_tiles,),
        in_specs=act_specs + par_specs,
        out_specs=out_specs,
        out_shape=out_shape,
        compiler_params=_compiler_params(("parallel",), block_bytes),
        cost_estimate=pl.CostEstimate(flops=int(flops), transcendentals=0,
                                      bytes_accessed=int(bytes_accessed)),
    )(*acts, *params_)
    return h, jnp.sum(stats, axis=0)          # (2, out_cols) global sum / sum-of-squares


def _encoder_head_call(acts, bn_params, w_params, *, Mp, fpp, tmp):
    # acts = [h3, h2, h1, x_slab]; bn_params = [s3,t3,s2,t2,s1,t1];
    # w_params = [wh3, wh2, wh1, whx, b_head].
    n_out = w_params[0].shape[1]
    nblk = Mp // tmp
    params_ = list(bn_params) + list(w_params)
    act_specs = [pl.BlockSpec((tmp, a.shape[-1]), lambda i, r: (r * nblk + i, 0))
                 for a in acts]
    par_specs = [pl.BlockSpec(p.shape, lambda i, r: (0, 0)) for p in params_]
    block_bytes = (sum(tmp * a.shape[-1] * a.dtype.itemsize for a in acts)
                   + sum(int(p.nbytes) for p in params_) + tmp * n_out * 4)
    flops = 2 * Mp * fpp * sum(int(w.shape[0]) for w in w_params[:4]) * n_out
    bytes_accessed = (sum(int(a.nbytes) for a in acts) + sum(int(p.nbytes) for p in params_)
                      + Mp * n_out * 4)
    return pl.pallas_call(
        _enc_head_kernel,
        grid=(nblk, fpp),
        in_specs=act_specs + par_specs,
        out_specs=pl.BlockSpec((tmp, n_out), lambda i, r: (i, 0)),
        out_shape=jax.ShapeDtypeStruct((Mp, n_out), jnp.float32),
        compiler_params=_compiler_params(("parallel", "arbitrary"), block_bytes),
        cost_estimate=pl.CostEstimate(flops=int(flops), transcendentals=0,
                                      bytes_accessed=int(bytes_accessed)),
    )(*acts, *params_)


def _seg_head_call(a2, params_, *, part_num, tm):
    rows = a2.shape[0]
    n_tiles = rows // tm
    w3, w4 = params_[2], params_[4]
    act_specs = [pl.BlockSpec((tm, a2.shape[-1]), lambda i: (i, 0))]
    par_specs = [pl.BlockSpec(p.shape, lambda i: (0, 0)) for p in params_]
    block_bytes = (tm * a2.shape[-1] * a2.dtype.itemsize
                   + sum(int(p.nbytes) for p in params_) + tm * part_num * 4)
    flops = 2 * rows * (int(w3.shape[0]) * int(w3.shape[1])
                        + int(w4.shape[0]) * int(w4.shape[1]))
    bytes_accessed = int(a2.nbytes) + sum(int(p.nbytes) for p in params_) + rows * part_num * 4
    return pl.pallas_call(
        _seg_head_kernel,
        grid=(n_tiles,),
        in_specs=act_specs + par_specs,
        out_specs=pl.BlockSpec((tm, part_num), lambda i: (i, 0)),
        out_shape=jax.ShapeDtypeStruct((rows, part_num), jnp.float32),
        compiler_params=_compiler_params(("parallel",), block_bytes),
        cost_estimate=pl.CostEstimate(flops=int(flops),
                                      transcendentals=int(rows * (part_num + 1)),
                                      bytes_accessed=int(bytes_accessed)),
    )(a2, *params_)


# ---------------------------------------------------------------------------
# feature extraction (descriptor 'C') — plain JAX, shared by kernel path & reference
# ---------------------------------------------------------------------------
def _vlen(v):
    return jnp.sqrt(jnp.sum(v * v, axis=2, keepdims=True))


def _angle(v1, v2):
    v1n = v1 / (1e-8 + _vlen(v1))
    v2n = v2 / (1e-8 + _vlen(v2))
    d = jnp.sum(v1n * v2n, axis=2, keepdims=True)
    return jnp.arccos(jnp.clip(d, -1.0, 1.0))


def extract_feature_c(points, norms, f_num, key):
    """Random triangle descriptors, 24 channels per sample: (B, f_num, 24)."""
    _, p_num, _ = points.shape
    assert f_num % p_num == 0
    fpp = f_num // p_num
    idx = jax.random.randint(key, (f_num, 2), 0, p_num)
    idx0 = jnp.repeat(jnp.arange(p_num), fpp)
    p1, p2, p3 = points[:, idx0], points[:, idx[:, 0]], points[:, idx[:, 1]]
    n1, n2, n3 = norms[:, idx0], norms[:, idx[:, 0]], norms[:, idx[:, 1]]
    feats = [_vlen(p1 - p2), _vlen(p2 - p3), _vlen(p3 - p1),
             _angle(p1 - p2, n1), _angle(p1 - p3, n1),
             _angle(p2 - p1, n2), _angle(p2 - p3, n2),
             _angle(p3 - p1, n3), _angle(p3 - p2, n3),
             _angle(p1 - p2, p1 - p3), _angle(p2 - p1, p2 - p3), _angle(p3 - p1, p3 - p2)]
    mid = (p1 + p2 + p3) / 3.0
    feats += [_angle(p1 - mid, n1), _angle(p2 - mid, n2), _angle(p3 - mid, n3),
              _vlen(p1 - mid), _vlen(p2 - mid), _vlen(p3 - mid),
              _angle(p1 - p2, p1 - mid), _angle(p1 - p3, p1 - mid),
              _angle(p2 - p1, p2 - mid), _angle(p2 - p3, p2 - mid),
              _angle(p3 - p1, p3 - mid), _angle(p3 - p2, p3 - mid)]
    return jnp.concatenate(feats, axis=2)


# ---------------------------------------------------------------------------
# kernel-path forward
# ---------------------------------------------------------------------------
def trianglenet_seg_forward(feats, label, params, n_points):
    """TriangleNet_Seg forward (train-mode BN), given pre-extracted triangle features.

    feats: (B, f_num, 24) f32 channels-last descriptors; label: (B, 16) f32 one-hot.
    Returns (B, n_points, part_num) log-probabilities.
    """
    B, f_num, c_in = feats.shape
    assert f_num % n_points == 0, "feature_num must be a multiple of n_points"
    fpp = f_num // n_points                      # descriptors per point (max-pool group)
    M, Mp = B * f_num, B * n_points
    assert Mp % 8 == 0, "B * n_points must be a multiple of 8 for TPU sublane tiling"
    part_num = params["s_w4"].shape[0]
    bf16 = jnp.bfloat16

    # Channels-last slab, sample-major row order (r, b, q): row = r*Mp + b*n_points + q,
    # so the head kernel can max-pool over r purely via static grid index maps.
    x_slab = (feats.reshape(B, n_points, fpp, c_in)
                   .transpose(2, 0, 1, 3)
                   .reshape(M, c_in)
                   .astype(bf16))

    # Encoder weights: (out,in) -> (in,out), split along the concat structure, bf16.
    # conv1..3 biases are dropped: they cancel exactly under train-mode BN.
    w1 = params["e_w1"].T.astype(bf16)                                   # (24, 64)
    w2a = params["e_w2"][:, :64].T.astype(bf16)                          # (64, 128)
    w2x = params["e_w2"][:, 64:].T.astype(bf16)                          # (24, 128)
    w3a = params["e_w3"][:, :128].T.astype(bf16)                         # (128, 512)
    w3x = params["e_w3"][:, 128:].T.astype(bf16)                         # (24, 512)
    w4, wf = params["e_w4"], params["e_wf"]
    wh3 = (w4[:, :512] + wf[:, :512]).T.astype(bf16)                     # (512, 1024)
    wh2 = wf[:, 512:640].T.astype(bf16)                                  # (128, 1024)
    wh1 = wf[:, 640:704].T.astype(bf16)                                  # (64, 1024)
    whx = (w4[:, 512:] + wf[:, 704:]).T.astype(bf16)                     # (24, 1024)
    b_head = (params["e_b4"] + params["e_bf"]).reshape(1, -1).astype(jnp.float32)

    tm = _pick_tile(M)
    tmp = _pick_tile(Mp)

    # Encoder layers: raw conv + per-tile stats; BN+ReLU is fused into the consumer.
    # (K=24 for the raw-feature operand is tiny for the MXU but rides along for free.)
    h1, st1 = _linear_stats_call(_enc_first_kernel, [x_slab], [w1],
                                 out_cols=64, tm=tm, flops=2 * M * c_in * 64)
    s1, t1 = _scale_shift(st1, M, params["e_g1"], params["e_be1"])
    h2, st2 = _linear_stats_call(_enc_mid_kernel, [h1, x_slab], [s1, t1, w2a, w2x],
                                 out_cols=128, tm=tm, flops=2 * M * (64 + c_in) * 128)
    s2, t2 = _scale_shift(st2, M, params["e_g2"], params["e_be2"])
    h3, st3 = _linear_stats_call(_enc_mid_kernel, [h2, x_slab], [s2, t2, w3a, w3x],
                                 out_cols=512, tm=tm, flops=2 * M * (128 + c_in) * 512)
    s3, t3 = _scale_shift(st3, M, params["e_g3"], params["e_be3"])

    # Encoder head: conv4 + `f` conv + per-point max-pool, fused.
    x_point = _encoder_head_call([h3, h2, h1, x_slab],
                                 [s3, t3, s2, t2, s1, t1],
                                 [wh3, wh2, wh1, whx, b_head],
                                 Mp=Mp, fpp=fpp, tmp=tmp)                # (Mp, 1024) f32

    # Global feature + label; fold the global/label slice of seg conv1 in JAX (tiny).
    x_global = jnp.max(x_point.reshape(B, n_points, 1024), axis=1)       # (B, 1024)
    xgl = jnp.concatenate([x_global, label.astype(jnp.float32)], axis=1)  # (B, 1040)
    n_glob = xgl.shape[1]
    w_s1 = params["s_w1"]
    g_term = xgl @ w_s1[:, :n_glob].T + params["s_b1"]                    # (B, 256)
    g_rows = jnp.repeat(g_term, n_points, axis=0)                         # (Mp, 256)
    w1p = w_s1[:, n_glob:].T.astype(bf16)                                 # (1024, 256)

    # seg_net
    a1, sg1 = _linear_stats_call(_seg1_kernel, [x_point.astype(bf16), g_rows], [w1p],
                                 out_cols=256, tm=tmp, flops=2 * Mp * 1024 * 256)
    q1, r1 = _scale_shift(sg1, Mp, params["s_g1"], params["s_be1"])
    a2, sg2 = _linear_stats_call(_seg2_kernel, [a1],
                                 [q1, r1, params["s_w2"].T.astype(bf16),
                                  params["s_b2"].reshape(1, -1).astype(jnp.float32)],
                                 out_cols=256, tm=tmp, flops=2 * Mp * 256 * 256)
    q2, r2 = _scale_shift(sg2, Mp, params["s_g2"], params["s_be2"])

    logp = _seg_head_call(a2,
                          [q2, r2,
                           params["s_w3"].T.astype(bf16),
                           params["s_b3"].reshape(1, -1).astype(jnp.float32),
                           params["s_w4"].T.astype(bf16),
                           params["s_b4"].reshape(1, -1).astype(jnp.float32)],
                          part_num=part_num, tm=tmp)                      # (Mp, part_num)
    return logp.reshape(B, n_points, part_num)


# ---------------------------------------------------------------------------
# parameters (PyTorch-like shapes) and pure-JAX f32 reference
# ---------------------------------------------------------------------------
def init_params(key, inp=24, part_num=50):
    def conv(k, cout, cin):
        bound = float(cin) ** -0.5
        kw, kb = jax.random.split(k)
        return (jax.random.uniform(kw, (cout, cin), jnp.float32, -bound, bound),
                jax.random.uniform(kb, (cout,), jnp.float32, -bound, bound))

    def bn(k, c):
        kg, kb = jax.random.split(k)
        return (1.0 + 0.1 * jax.random.normal(kg, (c,), jnp.float32),
                0.1 * jax.random.normal(kb, (c,), jnp.float32))

    ks = jax.random.split(key, 14)
    p = {}
    p["e_w1"], p["e_b1"] = conv(ks[0], 64, inp)
    p["e_w2"], p["e_b2"] = conv(ks[1], 128, 64 + inp)
    p["e_w3"], p["e_b3"] = conv(ks[2], 512, 128 + inp)
    p["e_w4"], p["e_b4"] = conv(ks[3], 1024, 512 + inp)
    p["e_wf"], p["e_bf"] = conv(ks[4], 1024, 64 + 128 + 512 + inp)
    p["e_g1"], p["e_be1"] = bn(ks[5], 64)
    p["e_g2"], p["e_be2"] = bn(ks[6], 128)
    p["e_g3"], p["e_be3"] = bn(ks[7], 512)
    p["s_w1"], p["s_b1"] = conv(ks[8], 256, 2048 + 16)
    p["s_g1"], p["s_be1"] = bn(ks[9], 256)
    p["s_w2"], p["s_b2"] = conv(ks[10], 256, 256)
    p["s_g2"], p["s_be2"] = bn(ks[11], 256)
    p["s_w3"], p["s_b3"] = conv(ks[12], 128, 256)
    p["s_w4"], p["s_b4"] = conv(ks[13], part_num, 128)
    return p


def reference_forward(feats, label, params, n_points):
    """Pure-JAX f32 replica of the PyTorch train-mode forward (post feature extraction)."""
    B, f_num, _ = feats.shape
    fpp = f_num // n_points

    def conv(h, w, b):                       # 1x1 Conv1d in channels-last layout
        return jnp.einsum("bfc,oc->bfo", h, w) + b

    def bn(h, g, be):                        # train-mode BatchNorm1d (biased variance)
        m = jnp.mean(h, axis=(0, 1), keepdims=True)
        v = jnp.mean(jnp.square(h - m), axis=(0, 1), keepdims=True)
        return (h - m) * jax.lax.rsqrt(v + BN_EPS) * g + be

    x = feats
    x1 = jax.nn.relu(bn(conv(x, params["e_w1"], params["e_b1"]),
                        params["e_g1"], params["e_be1"]))
    x2 = jax.nn.relu(bn(conv(jnp.concatenate([x1, x], -1), params["e_w2"], params["e_b2"]),
                        params["e_g2"], params["e_be2"]))
    x3 = jax.nn.relu(bn(conv(jnp.concatenate([x2, x], -1), params["e_w3"], params["e_b3"]),
                        params["e_g3"], params["e_be3"]))
    feat_out = (conv(jnp.concatenate([x3, x], -1), params["e_w4"], params["e_b4"])
                + conv(jnp.concatenate([x3, x2, x1, x], -1), params["e_wf"], params["e_bf"]))

    x_point = jnp.max(feat_out.reshape(B, n_points, fpp, 1024), axis=2)   # (B, P, 1024)
    x_global = jnp.max(x_point, axis=1)                                   # (B, 1024)
    xgl = jnp.concatenate([x_global, label], axis=1)
    concat = jnp.concatenate(
        [jnp.broadcast_to(xgl[:, None, :], (B, n_points, xgl.shape[1])), x_point], axis=-1)

    a1 = jax.nn.relu(conv(concat, params["s_w1"], params["s_b1"]))
    z1 = bn(a1, params["s_g1"], params["s_be1"])
    a2 = jax.nn.relu(conv(z1, params["s_w2"], params["s_b2"]))
    z2 = jax.nn.relu(bn(a2, params["s_g2"], params["s_be2"]))
    h3 = jax.nn.relu(conv(z2, params["s_w3"], params["s_b3"]))
    logits = conv(h3, params["s_w4"], params["s_b4"])
    return jax.nn.log_softmax(logits, axis=-1)


# ---------------------------------------------------------------------------
if __name__ == "__main__":
    key = jax.random.PRNGKey(0)
    k_pts, k_nrm, k_lbl, k_idx, k_par = jax.random.split(key, 5)

    B, n_points, feature_num, part_num = 2, 16, 64, 50
    points = jax.random.normal(k_pts, (B, n_points, 3), jnp.float32)
    norms = jax.random.normal(k_nrm, (B, n_points, 3), jnp.float32)
    norms = norms / (1e-8 + jnp.sqrt(jnp.sum(norms * norms, axis=-1, keepdims=True)))
    label = jax.nn.one_hot(jax.random.randint(k_lbl, (B,), 0, 16), 16, dtype=jnp.float32)
    params = init_params(k_par, inp=24, part_num=part_num)

    # Triangle-descriptor extraction (random-index gather + acos) stays in plain JAX and
    # is shared by the kernel path and the reference, so both see identical inputs.
    feats = extract_feature_c(points, norms, feature_num, k_idx)          # (B, f_num, 24)

    run = jax.jit(trianglenet_seg_forward, static_argnums=(3,))
    out = jax.block_until_ready(run(feats, label, params, n_points))
    assert out.shape == (B, n_points, part_num), out.shape

    ref = jax.block_until_ready(
        jax.jit(reference_forward, static_argnums=(3,))(feats, label, params, n_points))

    # bf16 MXU operands (f32 accumulation) vs. a pure-f32 reference -> percent-level tol.
    max_err = float(jnp.max(jnp.abs(out - ref)))
    assert jnp.allclose(out, ref, atol=5e-2, rtol=5e-2), max_err
    # every row must be a valid log-probability distribution
    assert jnp.allclose(jnp.sum(jnp.exp(out), axis=-1), 1.0, atol=1e-3)

    print("KERNEL_OK")
</pallas_src>

<mosaic_0001>
module attributes {stable_mosaic.version = 11 : i64} {
  func.func @_enc_first_kernel(%arg0: i32, %arg1: memref<128x24xbf16, #tpu.memory_space<vmem>>, %arg2: memref<24x64xbf16, #tpu.memory_space<vmem>>, %arg3: memref<128x64xbf16, #tpu.memory_space<vmem>>, %arg4: memref<1x2x64xf32, #tpu.memory_space<vmem>>) attributes {dimension_semantics = [#tpu.dimension_semantics<parallel>], iteration_bounds = array<i64: 1>, scalar_prefetch = 0 : i64, scratch_operands = 0 : i64, tpu.core_type = #tpu.core_type<tc>, window_params = [{transform_indices = @transform_0, window_bounds = array<i64: 128, 24>}, {pipeline_mode = #tpu.pipeline_mode<synchronous>, transform_indices = @transform_1, window_bounds = array<i64: 24, 64>}, {transform_indices = @transform_2, window_bounds = array<i64: 128, 64>}, {transform_indices = @transform_3, window_bounds = array<i64: 1, 2, 64>}]} {
    %c0 = arith.constant 0 : index
    %c0_0 = arith.constant 0 : index
    %0 = vector.load %arg1[%c0, %c0_0] : memref<128x24xbf16, #tpu.memory_space<vmem>>, vector<128x24xbf16>
    %c0_1 = arith.constant 0 : index
    %c0_2 = arith.constant 0 : index
    %1 = vector.load %arg2[%c0_1, %c0_2] : memref<24x64xbf16, #tpu.memory_space<vmem>>, vector<24x64xbf16>
    %cst = arith.constant dense<0.000000e+00> : vector<128x64xf32>
    %2 = tpu.matmul %0, %1, %cst {dimension_numbers = #tpu.dot_dimension_numbers<[1], [0], [0], [1], [0, 0, 1, 1], [], []>} : vector<128x24xbf16>, vector<24x64xbf16>, vector<128x64xf32> -> vector<128x64xf32>
    %cst_3 = arith.constant dense<0.000000e+00> : vector<64xf32>
    %3 = vector.multi_reduction <add>, %2, %cst_3 [0] : vector<128x64xf32> to vector<64xf32>
    %4 = vector.shape_cast %3 : vector<64xf32> to vector<1x64xf32>
    %c0_4 = arith.constant 0 : index
    %c0_5 = arith.constant 0 : index
    %c0_6 = arith.constant 0 : index
    %5 = vector.load %arg4[%c0_4, %c0_5, %c0_6] : memref<1x2x64xf32, #tpu.memory_space<vmem>>, vector<1x1x64xf32>
    %6 = vector.shape_cast %5 : vector<1x1x64xf32> to vector<1x64xf32>
    %7 = vector.shape_cast %4 : vector<1x64xf32> to vector<1x1x64xf32>
    tpu.vector_store %arg4[%c0_4, %c0_5, %c0_6], %7 {strides = array<i32>} : memref<1x2x64xf32, #tpu.memory_space<vmem>>, vector<1x1x64xf32>,
    %8 = arith.mulf %2, %2 : vector<128x64xf32>
    %cst_7 = arith.constant dense<0.000000e+00> : vector<64xf32>
    %9 = vector.multi_reduction <add>, %8, %cst_7 [0] : vector<128x64xf32> to vector<64xf32>
    %10 = vector.shape_cast %9 : vector<64xf32> to vector<1x64xf32>
    %c0_8 = arith.constant 0 : index
    %c1 = arith.constant 1 : index
    %c0_9 = arith.constant 0 : index
    %11 = vector.load %arg4[%c0_8, %c1, %c0_9] : memref<1x2x64xf32, #tpu.memory_space<vmem>>, vector<1x1x64xf32>
    %12 = vector.shape_cast %11 : vector<1x1x64xf32> to vector<1x64xf32>
    %13 = vector.shape_cast %10 : vector<1x64xf32> to vector<1x1x64xf32>
    tpu.vector_store %arg4[%c0_8, %c1, %c0_9], %13 {strides = array<i32>} : memref<1x2x64xf32, #tpu.memory_space<vmem>>, vector<1x1x64xf32>,
    %14 = arith.truncf %2 : vector<128x64xf32> to vector<128x64xbf16>
    %c0_10 = arith.constant 0 : index
    %c0_11 = arith.constant 0 : index
    %15 = vector.load %arg3[%c0_10, %c0_11] : memref<128x64xbf16, #tpu.memory_space<vmem>>, vector<128x64xbf16>
    tpu.vector_store %arg3[%c0_10, %c0_11], %14 {strides = array<i32>} : memref<128x64xbf16, #tpu.memory_space<vmem>>, vector<128x64xbf16>,
    return
  }
  func.func @transform_0(%arg0: i32) -> (i32, i32) {
    %c0_i32 = arith.constant 0 : i32
    %c0_i32_0 = arith.constant 0 : i32
    return %arg0, %c0_i32 : i32, i32
  }
  func.func @transform_1(%arg0: i32) -> (i32, i32) {
    %c0_i32 = arith.constant 0 : i32
    %c0_i32_0 = arith.constant 0 : i32
    %c0_i32_1 = arith.constant 0 : i32
    return %c0_i32, %c0_i32_0 : i32, i32
  }
  func.func @transform_2(%arg0: i32) -> (i32, i32) {
    %c0_i32 = arith.constant 0 : i32
    %c0_i32_0 = arith.constant 0 : i32
    return %arg0, %c0_i32 : i32, i32
  }
  func.func @transform_3(%arg0: i32) -> (i32, i32, i32) {
    %c0_i32 = arith.constant 0 : i32
    %c0_i32_0 = arith.constant 0 : i32
    %c0_i32_1 = arith.constant 0 : i32
    return %arg0, %c0_i32, %c0_i32_0 : i32, i32, i32
  }
}

module attributes {stable_mosaic.version = 11 : i64} {
  func.func @_enc_mid_kernel(%arg0: i32, %arg1: memref<128x64xbf16, #tpu.memory_space<vmem>>, %arg2: memref<128x24xbf16, #tpu.memory_space<vmem>>, %arg3: memref<1x64xf32, #tpu.memory_space<vmem>>, %arg4: memref<1x64xf32, #tpu.memory_space<vmem>>, %arg5: memref<64x128xbf16, #tpu.memory_space<vmem>>, %arg6: memref<24x128xbf16, #tpu.memory_space<vmem>>, %arg7: memref<128x128xbf16, #tpu.memory_space<vmem>>, %arg8: memref<1x2x128xf32, #tpu.memory_space<vmem>>) attributes {dimension_semantics = [#tpu.dimension_semantics<parallel>], iteration_bounds = array<i64: 1>, scalar_prefetch = 0 : i64, scratch_operands = 0 : i64, tpu.core_type = #tpu.core_type<tc>, window_params = [{transform_indices = @transform_0, window_bounds = array<i64: 128, 64>}, {transform_indices = @transform_1, window_bounds = array<i64: 128, 24>}, {pipeline_mode = #tpu.pipeline_mode<synchronous>, transform_indices = @transform_2, window_bounds = array<i64: 1, 64>}, {pipeline_mode = #tpu.pipeline_mode<synchronous>, transform_indices = @transform_3, window_bounds = array<i64: 1, 64>}, {pipeline_mode = #tpu.pipeline_mode<synchronous>, transform_indices = @transform_4, window_bounds = array<i64: 64, 128>}, {pipeline_mode = #tpu.pipeline_mode<synchronous>, transform_indices = @transform_5, window_bounds = array<i64: 24, 128>}, {transform_indices = @transform_6, window_bounds = array<i64: 128, 128>}, {transform_indices = @transform_7, window_bounds = array<i64: 1, 2, 128>}]} {
    %c0 = arith.constant 0 : index
    %c0_0 = arith.constant 0 : index
    %0 = vector.load %arg1[%c0, %c0_0] : memref<128x64xbf16, #tpu.memory_space<vmem>>, vector<128x64xbf16>
    %1 = arith.extf %0 : vector<128x64xbf16> to vector<128x64xf32>
    %c0_1 = arith.constant 0 : index
    %c0_2 = arith.constant 0 : index
    %2 = vector.load %arg3[%c0_1, %c0_2] : memref<1x64xf32, #tpu.memory_space<vmem>>, vector<1x64xf32>
    %3 = vector.broadcast %2 : vector<1x64xf32> to vector<128x64xf32>
    %4 = arith.mulf %1, %3 : vector<128x64xf32>
    %c0_3 = arith.constant 0 : index
    %c0_4 = arith.constant 0 : index
    %5 = vector.load %arg4[%c0_3, %c0_4] : memref<1x64xf32, #tpu.memory_space<vmem>>, vector<1x64xf32>
    %6 = vector.broadcast %5 : vector<1x64xf32> to vector<128x64xf32>
    %7 = arith.addf %4, %6 : vector<128x64xf32>
    %cst = arith.constant 0.000000e+00 : f32
    %8 = vector.broadcast %cst : f32 to vector<128x64xf32>
    %9 = arith.maximumf %7, %8 : vector<128x64xf32>
    %10 = arith.truncf %9 : vector<128x64xf32> to vector<128x64xbf16>
    %c0_5 = arith.constant 0 : index
    %c0_6 = arith.constant 0 : index
    %11 = vector.load %arg5[%c0_5, %c0_6] : memref<64x128xbf16, #tpu.memory_space<vmem>>, vector<64x128xbf16>
    %cst_7 = arith.constant dense<0.000000e+00> : vector<128x128xf32>
    %12 = tpu.matmul %10, %11, %cst_7 {dimension_numbers = #tpu.dot_dimension_numbers<[1], [0], [0], [1], [0, 0, 1, 1], [], []>} : vector<128x64xbf16>, vector<64x128xbf16>, vector<128x128xf32> -> vector<128x128xf32>
    %c0_8 = arith.constant 0 : index
    %c0_9 = arith.constant 0 : index
    %13 = vector.load %arg2[%c0_8, %c0_9] : memref<128x24xbf16, #tpu.memory_space<vmem>>, vector<128x24xbf16>
    %c0_10 = arith.constant 0 : index
    %c0_11 = arith.constant 0 : index
    %14 = vector.load %arg6[%c0_10, %c0_11] : memref<24x128xbf16, #tpu.memory_space<vmem>>, vector<24x128xbf16>
    %cst_12 = arith.constant dense<0.000000e+00> : vector<128x128xf32>
    %15 = tpu.matmul %13, %14, %cst_12 {dimension_numbers = #tpu.dot_dimension_numbers<[1], [0], [0], [1], [0, 0, 1, 1], [], []>} : vector<128x24xbf16>, vector<24x128xbf16>, vector<128x128xf32> -> vector<128x128xf32>
    %16 = arith.addf %12, %15 : vector<128x128xf32>
    %cst_13 = arith.constant dense<0.000000e+00> : vector<128xf32>
    %17 = vector.multi_reduction <add>, %16, %cst_13 [0] : vector<128x128xf32> to vector<128xf32>
    %18 = vector.shape_cast %17 : vector<128xf32> to vector<1x128xf32>
    %c0_14 = arith.constant 0 : index
    %c0_15 = arith.constant 0 : index
    %c0_16 = arith.constant 0 : index
    %19 = vector.load %arg8[%c0_14, %c0_15, %c0_16] : memref<1x2x128xf32, #tpu.memory_space<vmem>>, vector<1x1x128xf32>
    %20 = vector.shape_cast %19 : vector<1x1x128xf32> to vector<1x128xf32>
    %21 = vector.shape_cast %18 : vector<1x128xf32> to vector<1x1x128xf32>
    tpu.vector_store %arg8[%c0_14, %c0_15, %c0_16], %21 {strides = array<i32>} : memref<1x2x128xf32, #tpu.memory_space<vmem>>, vector<1x1x128xf32>,
    %22 = arith.mulf %16, %16 : vector<128x128xf32>
    %cst_17 = arith.constant dense<0.000000e+00> : vector<128xf32>
    %23 = vector.multi_reduction <add>, %22, %cst_17 [0] : vector<128x128xf32> to vector<128xf32>
    %24 = vector.shape_cast %23 : vector<128xf32> to vector<1x128xf32>
    %c0_18 = arith.constant 0 : index
    %c1 = arith.constant 1 : index
    %c0_19 = arith.constant 0 : index
    %25 = vector.load %arg8[%c0_18, %c1, %c0_19] : memref<1x2x128xf32, #tpu.memory_space<vmem>>, vector<1x1x128xf32>
    %26 = vector.shape_cast %25 : vector<1x1x128xf32> to vector<1x128xf32>
    %27 = vector.shape_cast %24 : vector<1x128xf32> to vector<1x1x128xf32>
    tpu.vector_store %arg8[%c0_18, %c1, %c0_19], %27 {strides = array<i32>} : memref<1x2x128xf32, #tpu.memory_space<vmem>>, vector<1x1x128xf32>,
    %28 = arith.truncf %16 : vector<128x128xf32> to vector<128x128xbf16>
    %c0_20 = arith.constant 0 : index
    %c0_21 = arith.constant 0 : index
    %29 = vector.load %arg7[%c0_20, %c0_21] : memref<128x128xbf16, #tpu.memory_space<vmem>>, vector<128x128xbf16>
    tpu.vector_store %arg7[%c0_20, %c0_21], %28 {strides = array<i32>} : memref<128x128xbf16, #tpu.memory_space<vmem>>, vector<128x128xbf16>,
    return
  }
  func.func @transform_0(%arg0: i32) -> (i32, i32) {
    %c0_i32 = arith.constant 0 : i32
    %c0_i32_0 = arith.constant 0 : i32
    return %arg0, %c0_i32 : i32, i32
  }
  func.func @transform_1(%arg0: i32) -> (i32, i32) {
    %c0_i32 = arith.constant 0 : i32
    %c0_i32_0 = arith.constant 0 : i32
    return %arg0, %c0_i32 : i32, i32
  }
  func.func @transform_2(%arg0: i32) -> (i32, i32) {
    %c0_i32 = arith.constant 0 : i32
    %c0_i32_0 = arith.constant 0 : i32
    %c0_i32_1 = arith.constant 0 : i32
    return %c0_i32, %c0_i32_0 : i32, i32
  }
  func.func @transform_3(%arg0: i32) -> (i32, i32) {
    %c0_i32 = arith.constant 0 : i32
    %c0_i32_0 = arith.constant 0 : i32
    %c0_i32_1 = arith.constant 0 : i32
    return %c0_i32, %c0_i32_0 : i32, i32
  }
  func.func @transform_4(%arg0: i32) -> (i32, i32) {
    %c0_i32 = arith.constant 0 : i32
    %c0_i32_0 = arith.constant 0 : i32
    %c0_i32_1 = arith.constant 0 : i32
    return %c0_i32, %c0_i32_0 : i32, i32
  }
  func.func @transform_5(%arg0: i32) -> (i32, i32) {
    %c0_i32 = arith.constant 0 : i32
    %c0_i32_0 = arith.constant 0 : i32
    %c0_i32_1 = arith.constant 0 : i32
    return %c0_i32, %c0_i32_0 : i32, i32
  }
  func.func @transform_6(%arg0: i32) -> (i32, i32) {
    %c0_i32 = arith.constant 0 : i32
    %c0_i32_0 = arith.constant 0 : i32
    return %arg0, %c0_i32 : i32, i32
  }
  func.func @transform_7(%arg0: i32) -> (i32, i32, i32) {
    %c0_i32 = arith.constant 0 : i32
    %c0_i32_0 = arith.constant 0 : i32
    %c0_i32_1 = arith.constant 0 : i32
    return %arg0, %c0_i32, %c0_i32_0 : i32, i32, i32
  }
}

module attributes {stable_mosaic.version = 11 : i64} {
  func.func @_enc_mid_kernel(%arg0: i32, %arg1: memref<128x128xbf16, #tpu.memory_space<vmem>>, %arg2: memref<128x24xbf16, #tpu.memory_space<vmem>>, %arg3: memref<1x128xf32, #tpu.memory_space<vmem>>, %arg4: memref<1x128xf32, #tpu.memory_space<vmem>>, %arg5: memref<128x512xbf16, #tpu.memory_space<vmem>>, %arg6: memref<24x512xbf16, #tpu.memory_space<vmem>>, %arg7: memref<128x512xbf16, #tpu.memory_space<vmem>>, %arg8: memref<1x2x512xf32, #tpu.memory_space<vmem>>) attributes {dimension_semantics = [#tpu.dimension_semantics<parallel>], iteration_bounds = array<i64: 1>, scalar_prefetch = 0 : i64, scratch_operands = 0 : i64, tpu.core_type = #tpu.core_type<tc>, window_params = [{transform_indices = @transform_0, window_bounds = array<i64: 128, 128>}, {transform_indices = @transform_1, window_bounds = array<i64: 128, 24>}, {pipeline_mode = #tpu.pipeline_mode<synchronous>, transform_indices = @transform_2, window_bounds = array<i64: 1, 128>}, {pipeline_mode = #tpu.pipeline_mode<synchronous>, transform_indices = @transform_3, window_bounds = array<i64: 1, 128>}, {pipeline_mode = #tpu.pipeline_mode<synchronous>, transform_indices = @transform_4, window_bounds = array<i64: 128, 512>}, {pipeline_mode = #tpu.pipeline_mode<synchronous>, transform_indices = @transform_5, window_bounds = array<i64: 24, 512>}, {transform_indices = @transform_6, window_bounds = array<i64: 128, 512>}, {transform_indices = @transform_7, window_bounds = array<i64: 1, 2, 512>}]} {
    %c0 = arith.constant 0 : index
    %c0_0 = arith.constant 0 : index
    %0 = vector.load %arg1[%c0, %c0_0] : memref<128x128xbf16, #tpu.memory_space<vmem>>, vector<128x128xbf16>
    %1 = arith.extf %0 : vector<128x128xbf16> to vector<128x128xf32>
    %c0_1 = arith.constant 0 : index
    %c0_2 = arith.constant 0 : index
    %2 = vector.load %arg3[%c0_1, %c0_2] : memref<1x128xf32, #tpu.memory_space<vmem>>, vector<1x128xf32>
    %3 = vector.broadcast %2 : vector<1x128xf32> to vector<128x128xf32>
    %4 = arith.mulf %1, %3 : vector<128x128xf32>
    %c0_3 = arith.constant 0 : index
    %c0_4 = arith.constant 0 : index
    %5 = vector.load %arg4[%c0_3, %c0_4] : memref<1x128xf32, #tpu.memory_space<vmem>>, vector<1x128xf32>
    %6 = vector.broadcast %5 : vector<1x128xf32> to vector<128x128xf32>
    %7 = arith.addf %4, %6 : vector<128x128xf32>
    %cst = arith.constant 0.000000e+00 : f32
    %8 = vector.broadcast %cst : f32 to vector<128x128xf32>
    %9 = arith.maximumf %7, %8 : vector<128x128xf32>
    %10 = arith.truncf %9 : vector<128x128xf32> to vector<128x128xbf16>
    %c0_5 = arith.constant 0 : index
    %c0_6 = arith.constant 0 : index
    %11 = vector.load %arg5[%c0_5, %c0_6] : memref<128x512xbf16, #tpu.memory_space<vmem>>, vector<128x512xbf16>
    %cst_7 = arith.constant dense<0.000000e+00> : vector<128x512xf32>
    %12 = tpu.matmul %10, %11, %cst_7 {dimension_numbers = #tpu.dot_dimension_numbers<[1], [0], [0], [1], [0, 0, 1, 1], [], []>} : vector<128x128xbf16>, vector<128x512xbf16>, vector<128x512xf32> -> vector<128x512xf32>
    %c0_8 = arith.constant 0 : index
    %c0_9 = arith.constant 0 : index
    %13 = vector.load %arg2[%c0_8, %c0_9] : memref<128x24xbf16, #tpu.memory_space<vmem>>, vector<128x24xbf16>
    %c0_10 = arith.constant 0 : index
    %c0_11 = arith.constant 0 : index
    %14 = vector.load %arg6[%c0_10, %c0_11] : memref<24x512xbf16, #tpu.memory_space<vmem>>, vector<24x512xbf16>
    %cst_12 = arith.constant dense<0.000000e+00> : vector<128x512xf32>
    %15 = tpu.matmul %13, %14, %cst_12 {dimension_numbers = #tpu.dot_dimension_numbers<[1], [0], [0], [1], [0, 0, 1, 1], [], []>} : vector<128x24xbf16>, vector<24x512xbf16>, vector<128x512xf32> -> vector<128x512xf32>
    %16 = arith.addf %12, %15 : vector<128x512xf32>
    %cst_13 = arith.constant dense<0.000000e+00> : vector<512xf32>
    %17 = vector.multi_reduction <add>, %16, %cst_13 [0] : vector<128x512xf32> to vector<512xf32>
    %18 = vector.shape_cast %17 : vector<512xf32> to vector<1x512xf32>
    %c0_14 = arith.constant 0 : index
    %c0_15 = arith.constant 0 : index
    %c0_16 = arith.constant 0 : index
    %19 = vector.load %arg8[%c0_14, %c0_15, %c0_16] : memref<1x2x512xf32, #tpu.memory_space<vmem>>, vector<1x1x512xf32>
    %20 = vector.shape_cast %19 : vector<1x1x512xf32> to vector<1x512xf32>
    %21 = vector.shape_cast %18 : vector<1x512xf32> to vector<1x1x512xf32>
    tpu.vector_store %arg8[%c0_14, %c0_15, %c0_16], %21 {strides = array<i32>} : memref<1x2x512xf32, #tpu.memory_space<vmem>>, vector<1x1x512xf32>,
    %22 = arith.mulf %16, %16 : vector<128x512xf32>
    %cst_17 = arith.constant dense<0.000000e+00> : vector<512xf32>
    %23 = vector.multi_reduction <add>, %22, %cst_17 [0] : vector<128x512xf32> to vector<512xf32>
    %24 = vector.shape_cast %23 : vector<512xf32> to vector<1x512xf32>
    %c0_18 = arith.constant 0 : index
    %c1 = arith.constant 1 : index
    %c0_19 = arith.constant 0 : index
    %25 = vector.load %arg8[%c0_18, %c1, %c0_19] : memref<1x2x512xf32, #tpu.memory_space<vmem>>, vector<1x1x512xf32>
    %26 = vector.shape_cast %25 : vector<1x1x512xf32> to vector<1x512xf32>
    %27 = vector.shape_cast %24 : vector<1x512xf32> to vector<1x1x512xf32>
    tpu.vector_store %arg8[%c0_18, %c1, %c0_19], %27 {strides = array<i32>} : memref<1x2x512xf32, #tpu.memory_space<vmem>>, vector<1x1x512xf32>,
    %28 = arith.truncf %16 : vector<128x512xf32> to vector<128x512xbf16>
    %c0_20 = arith.constant 0 : index
    %c0_21 = arith.constant 0 : index
    %29 = vector.load %arg7[%c0_20, %c0_21] : memref<128x512xbf16, #tpu.memory_space<vmem>>, vector<128x512xbf16>
    tpu.vector_store %arg7[%c0_20, %c0_21], %28 {strides = array<i32>} : memref<128x512xbf16, #tpu.memory_space<vmem>>, vector<128x512xbf16>,
    return
  }
  func.func @transform_0(%arg0: i32) -> (i32, i32) {
    %c0_i32 = arith.constant 0 : i32
    %c0_i32_0 = arith.constant 0 : i32
    return %arg0, %c0_i32 : i32, i32
  }
  func.func @transform_1(%arg0: i32) -> (i32, i32) {
    %c0_i32 = arith.constant 0 : i32
    %c0_i32_0 = arith.constant 0 : i32
    return %arg0, %c0_i32 : i32, i32
  }
  func.func @transform_2(%arg0: i32) -> (i32, i32) {
    %c0_i32 = arith.constant 0 : i32
    %c0_i32_0 = arith.constant 0 : i32
    %c0_i32_1 = arith.constant 0 : i32
    return %c0_i32, %c0_i32_0 : i32, i32
  }
  func.func @transform_3(%arg0: i32) -> (i32, i32) {
    %c0_i32 = arith.constant 0 : i32
    %c0_i32_0 = arith.constant 0 : i32
    %c0_i32_1 = arith.constant 0 : i32
    return %c0_i32, %c0_i32_0 : i32, i32
  }
  func.func @transform_4(%arg0: i32) -> (i32, i32) {
    %c0_i32 = arith.constant 0 : i32
    %c0_i32_0 = arith.constant 0 : i32
    %c0_i32_1 = arith.constant 0 : i32
    return %c0_i32, %c0_i32_0 : i32, i32
  }
  func.func @transform_5(%arg0: i32) -> (i32, i32) {
    %c0_i32 = arith.constant 0 : i32
    %c0_i32_0 = arith.constant 0 : i32
    %c0_i32_1 = arith.constant 0 : i32
    return %c0_i32, %c0_i32_0 : i32, i32
  }
  func.func @transform_6(%arg0: i32) -> (i32, i32) {
    %c0_i32 = arith.constant 0 : i32
    %c0_i32_0 = arith.constant 0 : i32
    return %arg0, %c0_i32 : i32, i32
  }
  func.func @transform_7(%arg0: i32) -> (i32, i32, i32) {
    %c0_i32 = arith.constant 0 : i32
    %c0_i32_0 = arith.constant 0 : i32
    %c0_i32_1 = arith.constant 0 : i32
    return %arg0, %c0_i32, %c0_i32_0 : i32, i32, i32
  }
}

module attributes {stable_mosaic.version = 11 : i64} {
  func.func @_enc_head_kernel(%arg0: i32, %arg1: i32, %arg2: memref<32x512xbf16, #tpu.memory_space<vmem>>, %arg3: memref<32x128xbf16, #tpu.memory_space<vmem>>, %arg4: memref<32x64xbf16, #tpu.memory_space<vmem>>, %arg5: memref<32x24xbf16, #tpu.memory_space<vmem>>, %arg6: memref<1x512xf32, #tpu.memory_space<vmem>>, %arg7: memref<1x512xf32, #tpu.memory_space<vmem>>, %arg8: memref<1x128xf32, #tpu.memory_space<vmem>>, %arg9: memref<1x128xf32, #tpu.memory_space<vmem>>, %arg10: memref<1x64xf32, #tpu.memory_space<vmem>>, %arg11: memref<1x64xf32, #tpu.memory_space<vmem>>, %arg12: memref<512x1024xbf16, #tpu.memory_space<vmem>>, %arg13: memref<128x1024xbf16, #tpu.memory_space<vmem>>, %arg14: memref<64x1024xbf16, #tpu.memory_space<vmem>>, %arg15: memref<24x1024xbf16, #tpu.memory_space<vmem>>, %arg16: memref<1x1024xf32, #tpu.memory_space<vmem>>, %arg17: memref<32x1024xf32, #tpu.memory_space<vmem>>) attributes {dimension_semantics = [#tpu.dimension_semantics<parallel>, #tpu.dimension_semantics<arbitrary>], iteration_bounds = array<i64: 1, 4>, scalar_prefetch = 0 : i64, scratch_operands = 0 : i64, tpu.core_type = #tpu.core_type<tc>, window_params = [{transform_indices = @transform_0, window_bounds = array<i64: 32, 512>}, {transform_indices = @transform_1, window_bounds = array<i64: 32, 128>}, {transform_indices = @transform_2, window_bounds = array<i64: 32, 64>}, {transform_indices = @transform_3, window_bounds = array<i64: 32, 24>}, {pipeline_mode = #tpu.pipeline_mode<synchronous>, transform_indices = @transform_4, window_bounds = array<i64: 1, 512>}, {pipeline_mode = #tpu.pipeline_mode<synchronous>, transform_indices = @transform_5, window_bounds = array<i64: 1, 512>}, {pipeline_mode = #tpu.pipeline_mode<synchronous>, transform_indices = @transform_6, window_bounds = array<i64: 1, 128>}, {pipeline_mode = #tpu.pipeline_mode<synchronous>, transform_indices = @transform_7, window_bounds = array<i64: 1, 128>}, {pipeline_mode = #tpu.pipeline_mode<synchronous>, transform_indices = @transform_8, window_bounds = array<i64: 1, 64>}, {pipeline_mode = #tpu.pipeline_mode<synchronous>, transform_indices = @transform_9, window_bounds = array<i64: 1, 64>}, {pipeline_mode = #tpu.pipeline_mode<synchronous>, transform_indices = @transform_10, window_bounds = array<i64: 512, 1024>}, {pipeline_mode = #tpu.pipeline_mode<synchronous>, transform_indices = @transform_11, window_bounds = array<i64: 128, 1024>}, {pipeline_mode = #tpu.pipeline_mode<synchronous>, transform_indices = @transform_12, window_bounds = array<i64: 64, 1024>}, {pipeline_mode = #tpu.pipeline_mode<synchronous>, transform_indices = @transform_13, window_bounds = array<i64: 24, 1024>}, {pipeline_mode = #tpu.pipeline_mode<synchronous>, transform_indices = @transform_14, window_bounds = array<i64: 1, 1024>}, {transform_indices = @transform_15, window_bounds = array<i64: 32, 1024>}]} {
    %c0 = arith.constant 0 : index
    %c0_0 = arith.constant 0 : index
    %0 = vector.load %arg2[%c0, %c0_0] : memref<32x512xbf16, #tpu.memory_space<vmem>>, vector<32x512xbf16>
    %1 = arith.extf %0 : vector<32x512xbf16> to vector<32x512xf32>
    %c0_1 = arith.constant 0 : index
    %c0_2 = arith.constant 0 : index
    %2 = vector.load %arg6[%c0_1, %c0_2] : memref<1x512xf32, #tpu.memory_space<vmem>>, vector<1x512xf32>
    %3 = vector.broadcast %2 : vector<1x512xf32> to vector<32x512xf32>
    %4 = arith.mulf %1, %3 : vector<32x512xf32>
    %c0_3 = arith.constant 0 : index
    %c0_4 = arith.constant 0 : index
    %5 = vector.load %arg7[%c0_3, %c0_4] : memref<1x512xf32, #tpu.memory_space<vmem>>, vector<1x512xf32>
    %6 = vector.broadcast %5 : vector<1x512xf32> to vector<32x512xf32>
    %7 = arith.addf %4, %6 : vector<32x512xf32>
    %cst = arith.constant 0.000000e+00 : f32
    %8 = vector.broadcast %cst : f32 to vector<32x512xf32>
    %9 = arith.maximumf %7, %8 : vector<32x512xf32>
    %c0_5 = arith.constant 0 : index
    %c0_6 = arith.constant 0 : index
    %10 = vector.load %arg3[%c0_5, %c0_6] : memref<32x128xbf16, #tpu.memory_space<vmem>>, vector<32x128xbf16>
    %11 = arith.extf %10 : vector<32x128xbf16> to vector<32x128xf32>
    %c0_7 = arith.constant 0 : index
    %c0_8 = arith.constant 0 : index
    %12 = vector.load %arg8[%c0_7, %c0_8] : memref<1x128xf32, #tpu.memory_space<vmem>>, vector<1x128xf32>
    %13 = vector.broadcast %12 : vector<1x128xf32> to vector<32x128xf32>
    %14 = arith.mulf %11, %13 : vector<32x128xf32>
    %c0_9 = arith.constant 0 : index
    %c0_10 = arith.constant 0 : index
    %15 = vector.load %arg9[%c0_9, %c0_10] : memref<1x128xf32, #tpu.memory_space<vmem>>, vector<1x128xf32>
    %16 = vector.broadcast %15 : vector<1x128xf32> to vector<32x128xf32>
    %17 = arith.addf %14, %16 : vector<32x128xf32>
    %cst_11 = arith.constant 0.000000e+00 : f32
    %18 = vector.broadcast %cst_11 : f32 to vector<32x128xf32>
    %19 = arith.maximumf %17, %18 : vector<32x128xf32>
    %c0_12 = arith.constant 0 : index
    %c0_13 = arith.constant 0 : index
    %20 = vector.load %arg4[%c0_12, %c0_13] : memref<32x64xbf16, #tpu.memory_space<vmem>>, vector<32x64xbf16>
    %21 = arith.extf %20 : vector<32x64xbf16> to vector<32x64xf32>
    %c0_14 = arith.constant 0 : index
    %c0_15 = arith.constant 0 : index
    %22 = vector.load %arg10[%c0_14, %c0_15] : memref<1x64xf32, #tpu.memory_space<vmem>>, vector<1x64xf32>
    %23 = vector.broadcast %22 : vector<1x64xf32> to vector<32x64xf32>
    %24 = arith.mulf %21, %23 : vector<32x64xf32>
    %c0_16 = arith.constant 0 : index
    %c0_17 = arith.constant 0 : index
    %25 = vector.load %arg11[%c0_16, %c0_17] : memref<1x64xf32, #tpu.memory_space<vmem>>, vector<1x64xf32>
    %26 = vector.broadcast %25 : vector<1x64xf32> to vector<32x64xf32>
    %27 = arith.addf %24, %26 : vector<32x64xf32>
    %cst_18 = arith.constant 0.000000e+00 : f32
    %28 = vector.broadcast %cst_18 : f32 to vector<32x64xf32>
    %29 = arith.maximumf %27, %28 : vector<32x64xf32>
    %30 = arith.truncf %9 : vector<32x512xf32> to vector<32x512xbf16>
    %c0_19 = arith.constant 0 : index
    %c0_20 = arith.constant 0 : index
    %31 = vector.load %arg12[%c0_19, %c0_20] : memref<512x1024xbf16, #tpu.memory_space<vmem>>, vector<512x1024xbf16>
    %cst_21 = arith.constant dense<0.000000e+00> : vector<32x1024xf32>
    %32 = tpu.matmul %30, %31, %cst_21 {dimension_numbers = #tpu.dot_dimension_numbers<[1], [0], [0], [1], [0, 0, 1, 1], [], []>} : vector<32x512xbf16>, vector<512x1024xbf16>, vector<32x1024xf32> -> vector<32x1024xf32>
    %33 = arith.truncf %19 : vector<32x128xf32> to vector<32x128xbf16>
    %c0_22 = arith.constant 0 : index
    %c0_23 = arith.constant 0 : index
    %34 = vector.load %arg13[%c0_22, %c0_23] : memref<128x1024xbf16, #tpu.memory_space<vmem>>, vector<128x1024xbf16>
    %cst_24 = arith.constant dense<0.000000e+00> : vector<32x1024xf32>
    %35 = tpu.matmul %33, %34, %cst_24 {dimension_numbers = #tpu.dot_dimension_numbers<[1], [0], [0], [1], [0, 0, 1, 1], [], []>} : vector<32x128xbf16>, vector<128x1024xbf16>, vector<32x1024xf32> -> vector<32x1024xf32>
    %36 = arith.addf %32, %35 : vector<32x1024xf32>
    %37 = arith.truncf %29 : vector<32x64xf32> to vector<32x64xbf16>
    %c0_25 = arith.constant 0 : index
    %c0_26 = arith.constant 0 : index
    %38 = vector.load %arg14[%c0_25, %c0_26] : memref<64x1024xbf16, #tpu.memory_space<vmem>>, vector<64x1024xbf16>
    %cst_27 = arith.constant dense<0.000000e+00> : vector<32x1024xf32>
    %39 = tpu.matmul %37, %38, %cst_27 {dimension_numbers = #tpu.dot_dimension_numbers<[1], [0], [0], [1], [0, 0, 1, 1], [], []>} : vector<32x64xbf16>, vector<64x1024xbf16>, vector<32x1024xf32> -> vector<32x1024xf32>
    %40 = arith.addf %36, %39 : vector<32x1024xf32>
    %c0_28 = arith.constant 0 : index
    %c0_29 = arith.constant 0 : index
    %41 = vector.load %arg5[%c0_28, %c0_29] : memref<32x24xbf16, #tpu.memory_space<vmem>>, vector<32x24xbf16>
    %c0_30 = arith.constant 0 : index
    %c0_31 = arith.constant 0 : index
    %42 = vector.load %arg15[%c0_30, %c0_31] : memref<24x1024xbf16, #tpu.memory_space<vmem>>, vector<24x1024xbf16>
    %cst_32 = arith.constant dense<0.000000e+00> : vector<32x1024xf32>
    %43 = tpu.matmul %41, %42, %cst_32 {dimension_numbers = #tpu.dot_dimension_numbers<[1], [0], [0], [1], [0, 0, 1, 1], [], []>} : vector<32x24xbf16>, vector<24x1024xbf16>, vector<32x1024xf32> -> vector<32x1024xf32>
    %44 = arith.addf %40, %43 : vector<32x1024xf32>
    %c0_33 = arith.constant 0 : index
    %c0_34 = arith.constant 0 : index
    %45 = vector.load %arg16[%c0_33, %c0_34] : memref<1x1024xf32, #tpu.memory_space<vmem>>, vector<1x1024xf32>
    %46 = vector.broadcast %45 : vector<1x1024xf32> to vector<32x1024xf32>
    %47 = arith.addf %44, %46 : vector<32x1024xf32>
    %c0_i32 = arith.constant 0 : i32
    %48 = arith.cmpi eq, %arg1, %c0_i32 : i32
    %49 = arith.extui %48 : i1 to i32
    %c0_i32_35 = arith.constant 0 : i32
    %50 = arith.cmpi ne, %49, %c0_i32_35 : i32
    scf.if %50 {
      %c0_38 = arith.constant 0 : index
      %c0_39 = arith.constant 0 : index
      %54 = vector.load %arg17[%c0_38, %c0_39] : memref<32x1024xf32, #tpu.memory_space<vmem>>, vector<32x1024xf32>
      tpu.vector_store %arg17[%c0_38, %c0_39], %47 {strides = array<i32>} : memref<32x1024xf32, #tpu.memory_space<vmem>>, vector<32x1024xf32>,
    } else {
    }
    %c0_i32_36 = arith.constant 0 : i32
    %51 = arith.cmpi ne, %arg1, %c0_i32_36 : i32
    %52 = arith.extui %51 : i1 to i32
    %c0_i32_37 = arith.constant 0 : i32
    %53 = arith.cmpi ne, %52, %c0_i32_37 : i32
    scf.if %53 {
      %c0_38 = arith.constant 0 : index
      %c0_39 = arith.constant 0 : index
      %54 = vector.load %arg17[%c0_38, %c0_39] : memref<32x1024xf32, #tpu.memory_space<vmem>>, vector<32x1024xf32>
      %55 = arith.maximumf %54, %47 : vector<32x1024xf32>
      %c0_40 = arith.constant 0 : index
      %c0_41 = arith.constant 0 : index
      %56 = vector.load %arg17[%c0_40, %c0_41] : memref<32x1024xf32, #tpu.memory_space<vmem>>, vector<32x1024xf32>
      tpu.vector_store %arg17[%c0_40, %c0_41], %55 {strides = array<i32>} : memref<32x1024xf32, #tpu.memory_space<vmem>>, vector<32x1024xf32>,
    } else {
    }
    return
  }
  func.func @transform_0(%arg0: i32, %arg1: i32) -> (i32, i32) {
    %c1_i32 = arith.constant 1 : i32
    %0 = arith.muli %arg1, %c1_i32 : i32
    %1 = arith.addi %0, %arg0 : i32
    %c0_i32 = arith.constant 0 : i32
    %c0_i32_0 = arith.constant 0 : i32
    return %1, %c0_i32 : i32, i32
  }
  func.func @transform_1(%arg0: i32, %arg1: i32) -> (i32, i32) {
    %c1_i32 = arith.constant 1 : i32
    %0 = arith.muli %arg1, %c1_i32 : i32
    %1 = arith.addi %0, %arg0 : i32
    %c0_i32 = arith.constant 0 : i32
    %c0_i32_0 = arith.constant 0 : i32
    return %1, %c0_i32 : i32, i32
  }
  func.func @transform_2(%arg0: i32, %arg1: i32) -> (i32, i32) {
    %c1_i32 = arith.constant 1 : i32
    %0 = arith.muli %arg1, %c1_i32 : i32
    %1 = arith.addi %0, %arg0 : i32
    %c0_i32 = arith.constant 0 : i32
    %c0_i32_0 = arith.constant 0 : i32
    return %1, %c0_i32 : i32, i32
  }
  func.func @transform_3(%arg0: i32, %arg1: i32) -> (i32, i32) {
    %c1_i32 = arith.constant 1 : i32
    %0 = arith.muli %arg1, %c1_i32 : i32
    %1 = arith.addi %0, %arg0 : i32
    %c0_i32 = arith.constant 0 : i32
    %c0_i32_0 = arith.constant 0 : i32
    return %1, %c0_i32 : i32, i32
  }
  func.func @transform_4(%arg0: i32, %arg1: i32) -> (i32, i32) {
    %c0_i32 = arith.constant 0 : i32
    %c0_i32_0 = arith.constant 0 : i32
    %c0_i32_1 = arith.constant 0 : i32
    return %c0_i32, %c0_i32_0 : i32, i32
  }
  func.func @transform_5(%arg0: i32, %arg1: i32) -> (i32, i32) {
    %c0_i32 = arith.constant 0 : i32
    %c0_i32_0 = arith.constant 0 : i32
    %c0_i32_1 = arith.constant 0 : i32
    return %c0_i32, %c0_i32_0 : i32, i32
  }
  func.func @transform_6(%arg0: i32, %arg1: i32) -> (i32, i32) {
    %c0_i32 = arith.constant 0 : i32
    %c0_i32_0 = arith.constant 0 : i32
    %c0_i32_1 = arith.constant 0 : i32
    return %c0_i32, %c0_i32_0 : i32, i32
  }
  func.func @transform_7(%arg0: i32, %arg1: i32) -> (i32, i32) {
    %c0_i32 = arith.constant 0 : i32
    %c0_i32_0 = arith.constant 0 : i32
    %c0_i32_1 = arith.constant 0 : i32
    return %c0_i32, %c0_i32_0 : i32, i32
  }
  func.func @transform_8(%arg0: i32, %arg1: i32) -> (i32, i32) {
    %c0_i32 = arith.constant 0 : i32
    %c0_i32_0 = arith.constant 0 : i32
    %c0_i32_1 = arith.constant 0 : i32
    return %c0_i32, %c0_i32_0 : i32, i32
  }
  func.func @transform_9(%arg0: i32, %arg1: i32) -> (i32, i32) {
    %c0_i32 = arith.constant 0 : i32
    %c0_i32_0 = arith.constant 0 : i32
    %c0_i32_1 = arith.constant 0 : i32
    return %c0_i32, %c0_i32_0 : i32, i32
  }
  func.func @transform_10(%arg0: i32, %arg1: i32) -> (i32, i32) {
    %c0_i32 = arith.constant 0 : i32
    %c0_i32_0 = arith.constant 0 : i32
    %c0_i32_1 = arith.constant 0 : i32
    return %c0_i32, %c0_i32_0 : i32, i32
  }
  func.func @transform_11(%arg0: i32, %arg1: i32) -> (i32, i32) {
    %c0_i32 = arith.constant 0 : i32
    %c0_i32_0 = arith.constant 0 : i32
    %c0_i32_1 = arith.constant 0 : i32
    return %c0_i32, %c0_i32_0 : i32, i32
  }
  func.func @transform_12(%arg0: i32, %arg1: i32) -> (i32, i32) {
    %c0_i32 = arith.constant 0 : i32
    %c0_i32_0 = arith.constant 0 : i32
    %c0_i32_1 = arith.constant 0 : i32
    return %c0_i32, %c0_i32_0 : i32, i32
  }
  func.func @transform_13(%arg0: i32, %arg1: i32) -> (i32, i32) {
    %c0_i32 = arith.constant 0 : i32
    %c0_i32_0 = arith.constant 0 : i32
    %c0_i32_1 = arith.constant 0 : i32
    return %c0_i32, %c0_i32_0 : i32, i32
  }
  func.func @transform_14(%arg0: i32, %arg1: i32) -> (i32, i32) {
    %c0_i32 = arith.constant 0 : i32
    %c0_i32_0 = arith.constant 0 : i32
    %c0_i32_1 = arith.constant 0 : i32
    return %c0_i32, %c0_i32_0 : i32, i32
  }
  func.func @transform_15(%arg0: i32, %arg1: i32) -> (i32, i32) {
    %c0_i32 = arith.constant 0 : i32
    %c0_i32_0 = arith.constant 0 : i32
    return %arg0, %c0_i32 : i32, i32
  }
}

module attributes {stable_mosaic.version = 11 : i64} {
  func.func @_seg1_kernel(%arg0: i32, %arg1: memref<32x1024xbf16, #tpu.memory_space<vmem>>, %arg2: memref<32x256xf32, #tpu.memory_space<vmem>>, %arg3: memref<1024x256xbf16, #tpu.memory_space<vmem>>, %arg4: memref<32x256xbf16, #tpu.memory_space<vmem>>, %arg5: memref<1x2x256xf32, #tpu.memory_space<vmem>>) attributes {dimension_semantics = [#tpu.dimension_semantics<parallel>], iteration_bounds = array<i64: 1>, scalar_prefetch = 0 : i64, scratch_operands = 0 : i64, tpu.core_type = #tpu.core_type<tc>, window_params = [{transform_indices = @transform_0, window_bounds = array<i64: 32, 1024>}, {transform_indices = @transform_1, window_bounds = array<i64: 32, 256>}, {pipeline_mode = #tpu.pipeline_mode<synchronous>, transform_indices = @transform_2, window_bounds = array<i64: 1024, 256>}, {transform_indices = @transform_3, window_bounds = array<i64: 32, 256>}, {transform_indices = @transform_4, window_bounds = array<i64: 1, 2, 256>}]} {
    %c0 = arith.constant 0 : index
    %c0_0 = arith.constant 0 : index
    %0 = vector.load %arg1[%c0, %c0_0] : memref<32x1024xbf16, #tpu.memory_space<vmem>>, vector<32x1024xbf16>
    %c0_1 = arith.constant 0 : index
    %c0_2 = arith.constant 0 : index
    %1 = vector.load %arg3[%c0_1, %c0_2] : memref<1024x256xbf16, #tpu.memory_space<vmem>>, vector<1024x256xbf16>
    %cst = arith.constant dense<0.000000e+00> : vector<32x256xf32>
    %2 = tpu.matmul %0, %1, %cst {dimension_numbers = #tpu.dot_dimension_numbers<[1], [0], [0], [1], [0, 0, 1, 1], [], []>} : vector<32x1024xbf16>, vector<1024x256xbf16>, vector<32x256xf32> -> vector<32x256xf32>
    %c0_3 = arith.constant 0 : index
    %c0_4 = arith.constant 0 : index
    %3 = vector.load %arg2[%c0_3, %c0_4] : memref<32x256xf32, #tpu.memory_space<vmem>>, vector<32x256xf32>
    %4 = arith.addf %2, %3 : vector<32x256xf32>
    %cst_5 = arith.constant 0.000000e+00 : f32
    %5 = vector.broadcast %cst_5 : f32 to vector<32x256xf32>
    %6 = arith.maximumf %4, %5 : vector<32x256xf32>
    %cst_6 = arith.constant dense<0.000000e+00> : vector<256xf32>
    %7 = vector.multi_reduction <add>, %6, %cst_6 [0] : vector<32x256xf32> to vector<256xf32>
    %8 = vector.shape_cast %7 : vector<256xf32> to vector<1x256xf32>
    %c0_7 = arith.constant 0 : index
    %c0_8 = arith.constant 0 : index
    %c0_9 = arith.constant 0 : index
    %9 = vector.load %arg5[%c0_7, %c0_8, %c0_9] : memref<1x2x256xf32, #tpu.memory_space<vmem>>, vector<1x1x256xf32>
    %10 = vector.shape_cast %9 : vector<1x1x256xf32> to vector<1x256xf32>
    %11 = vector.shape_cast %8 : vector<1x256xf32> to vector<1x1x256xf32>
    tpu.vector_store %arg5[%c0_7, %c0_8, %c0_9], %11 {strides = array<i32>} : memref<1x2x256xf32, #tpu.memory_space<vmem>>, vector<1x1x256xf32>,
    %12 = arith.mulf %6, %6 : vector<32x256xf32>
    %cst_10 = arith.constant dense<0.000000e+00> : vector<256xf32>
    %13 = vector.multi_reduction <add>, %12, %cst_10 [0] : vector<32x256xf32> to vector<256xf32>
    %14 = vector.shape_cast %13 : vector<256xf32> to vector<1x256xf32>
    %c0_11 = arith.constant 0 : index
    %c1 = arith.constant 1 : index
    %c0_12 = arith.constant 0 : index
    %15 = vector.load %arg5[%c0_11, %c1, %c0_12] : memref<1x2x256xf32, #tpu.memory_space<vmem>>, vector<1x1x256xf32>
    %16 = vector.shape_cast %15 : vector<1x1x256xf32> to vector<1x256xf32>
    %17 = vector.shape_cast %14 : vector<1x256xf32> to vector<1x1x256xf32>
    tpu.vector_store %arg5[%c0_11, %c1, %c0_12], %17 {strides = array<i32>} : memref<1x2x256xf32, #tpu.memory_space<vmem>>, vector<1x1x256xf32>,
    %18 = arith.truncf %6 : vector<32x256xf32> to vector<32x256xbf16>
    %c0_13 = arith.constant 0 : index
    %c0_14 = arith.constant 0 : index
    %19 = vector.load %arg4[%c0_13, %c0_14] : memref<32x256xbf16, #tpu.memory_space<vmem>>, vector<32x256xbf16>
    tpu.vector_store %arg4[%c0_13, %c0_14], %18 {strides = array<i32>} : memref<32x256xbf16, #tpu.memory_space<vmem>>, vector<32x256xbf16>,
    return
  }
  func.func @transform_0(%arg0: i32) -> (i32, i32) {
    %c0_i32 = arith.constant 0 : i32
    %c0_i32_0 = arith.constant 0 : i32
    return %arg0, %c0_i32 : i32, i32
  }
  func.func @transform_1(%arg0: i32) -> (i32, i32) {
    %c0_i32 = arith.constant 0 : i32
    %c0_i32_0 = arith.constant 0 : i32
    return %arg0, %c0_i32 : i32, i32
  }
  func.func @transform_2(%arg0: i32) -> (i32, i32) {
    %c0_i32 = arith.constant 0 : i32
    %c0_i32_0 = arith.constant 0 : i32
    %c0_i32_1 = arith.constant 0 : i32
    return %c0_i32, %c0_i32_0 : i32, i32
  }
  func.func @transform_3(%arg0: i32) -> (i32, i32) {
    %c0_i32 = arith.constant 0 : i32
    %c0_i32_0 = arith.constant 0 : i32
    return %arg0, %c0_i32 : i32, i32
  }
  func.func @transform_4(%arg0: i32) -> (i32, i32, i32) {
    %c0_i32 = arith.constant 0 : i32
    %c0_i32_0 = arith.constant 0 : i32
    %c0_i32_1 = arith.constant 0 : i32
    return %arg0, %c0_i32, %c0_i32_0 : i32, i32, i32
  }
}

module attributes {stable_mosaic.version = 11 : i64} {
  func.func @_seg2_kernel(%arg0: i32, %arg1: memref<32x256xbf16, #tpu.memory_space<vmem>>, %arg2: memref<1x256xf32, #tpu.memory_space<vmem>>, %arg3: memref<1x256xf32, #tpu.memory_space<vmem>>, %arg4: memref<256x256xbf16, #tpu.memory_space<vmem>>, %arg5: memref<1x256xf32, #tpu.memory_space<vmem>>, %arg6: memref<32x256xbf16, #tpu.memory_space<vmem>>, %arg7: memref<1x2x256xf32, #tpu.memory_space<vmem>>) attributes {dimension_semantics = [#tpu.dimension_semantics<parallel>], iteration_bounds = array<i64: 1>, scalar_prefetch = 0 : i64, scratch_operands = 0 : i64, tpu.core_type = #tpu.core_type<tc>, window_params = [{transform_indices = @transform_0, window_bounds = array<i64: 32, 256>}, {pipeline_mode = #tpu.pipeline_mode<synchronous>, transform_indices = @transform_1, window_bounds = array<i64: 1, 256>}, {pipeline_mode = #tpu.pipeline_mode<synchronous>, transform_indices = @transform_2, window_bounds = array<i64: 1, 256>}, {pipeline_mode = #tpu.pipeline_mode<synchronous>, transform_indices = @transform_3, window_bounds = array<i64: 256, 256>}, {pipeline_mode = #tpu.pipeline_mode<synchronous>, transform_indices = @transform_4, window_bounds = array<i64: 1, 256>}, {transform_indices = @transform_5, window_bounds = array<i64: 32, 256>}, {transform_indices = @transform_6, window_bounds = array<i64: 1, 2, 256>}]} {
    %c0 = arith.constant 0 : index
    %c0_0 = arith.constant 0 : index
    %0 = vector.load %arg1[%c0, %c0_0] : memref<32x256xbf16, #tpu.memory_space<vmem>>, vector<32x256xbf16>
    %1 = arith.extf %0 : vector<32x256xbf16> to vector<32x256xf32>
    %c0_1 = arith.constant 0 : index
    %c0_2 = arith.constant 0 : index
    %2 = vector.load %arg2[%c0_1, %c0_2] : memref<1x256xf32, #tpu.memory_space<vmem>>, vector<1x256xf32>
    %3 = vector.broadcast %2 : vector<1x256xf32> to vector<32x256xf32>
    %4 = arith.mulf %1, %3 : vector<32x256xf32>
    %c0_3 = arith.constant 0 : index
    %c0_4 = arith.constant 0 : index
    %5 = vector.load %arg3[%c0_3, %c0_4] : memref<1x256xf32, #tpu.memory_space<vmem>>, vector<1x256xf32>
    %6 = vector.broadcast %5 : vector<1x256xf32> to vector<32x256xf32>
    %7 = arith.addf %4, %6 : vector<32x256xf32>
    %8 = arith.truncf %7 : vector<32x256xf32> to vector<32x256xbf16>
    %c0_5 = arith.constant 0 : index
    %c0_6 = arith.constant 0 : index
    %9 = vector.load %arg4[%c0_5, %c0_6] : memref<256x256xbf16, #tpu.memory_space<vmem>>, vector<256x256xbf16>
    %cst = arith.constant dense<0.000000e+00> : vector<32x256xf32>
    %10 = tpu.matmul %8, %9, %cst {dimension_numbers = #tpu.dot_dimension_numbers<[1], [0], [0], [1], [0, 0, 1, 1], [], []>} : vector<32x256xbf16>, vector<256x256xbf16>, vector<32x256xf32> -> vector<32x256xf32>
    %c0_7 = arith.constant 0 : index
    %c0_8 = arith.constant 0 : index
    %11 = vector.load %arg5[%c0_7, %c0_8] : memref<1x256xf32, #tpu.memory_space<vmem>>, vector<1x256xf32>
    %12 = vector.broadcast %11 : vector<1x256xf32> to vector<32x256xf32>
    %13 = arith.addf %10, %12 : vector<32x256xf32>
    %cst_9 = arith.constant 0.000000e+00 : f32
    %14 = vector.broadcast %cst_9 : f32 to vector<32x256xf32>
    %15 = arith.maximumf %13, %14 : vector<32x256xf32>
    %cst_10 = arith.constant dense<0.000000e+00> : vector<256xf32>
    %16 = vector.multi_reduction <add>, %15, %cst_10 [0] : vector<32x256xf32> to vector<256xf32>
    %17 = vector.shape_cast %16 : vector<256xf32> to vector<1x256xf32>
    %c0_11 = arith.constant 0 : index
    %c0_12 = arith.constant 0 : index
    %c0_13 = arith.constant 0 : index
    %18 = vector.load %arg7[%c0_11, %c0_12, %c0_13] : memref<1x2x256xf32, #tpu.memory_space<vmem>>, vector<1x1x256xf32>
    %19 = vector.shape_cast %18 : vector<1x1x256xf32> to vector<1x256xf32>
    %20 = vector.shape_cast %17 : vector<1x256xf32> to vector<1x1x256xf32>
    tpu.vector_store %arg7[%c0_11, %c0_12, %c0_13], %20 {strides = array<i32>} : memref<1x2x256xf32, #tpu.memory_space<vmem>>, vector<1x1x256xf32>,
    %21 = arith.mulf %15, %15 : vector<32x256xf32>
    %cst_14 = arith.constant dense<0.000000e+00> : vector<256xf32>
    %22 = vector.multi_reduction <add>, %21, %cst_14 [0] : vector<32x256xf32> to vector<256xf32>
    %23 = vector.shape_cast %22 : vector<256xf32> to vector<1x256xf32>
    %c0_15 = arith.constant 0 : index
    %c1 = arith.constant 1 : index
    %c0_16 = arith.constant 0 : index
    %24 = vector.load %arg7[%c0_15, %c1, %c0_16] : memref<1x2x256xf32, #tpu.memory_space<vmem>>, vector<1x1x256xf32>
    %25 = vector.shape_cast %24 : vector<1x1x256xf32> to vector<1x256xf32>
    %26 = vector.shape_cast %23 : vector<1x256xf32> to vector<1x1x256xf32>
    tpu.vector_store %arg7[%c0_15, %c1, %c0_16], %26 {strides = array<i32>} : memref<1x2x256xf32, #tpu.memory_space<vmem>>, vector<1x1x256xf32>,
    %27 = arith.truncf %15 : vector<32x256xf32> to vector<32x256xbf16>
    %c0_17 = arith.constant 0 : index
    %c0_18 = arith.constant 0 : index
    %28 = vector.load %arg6[%c0_17, %c0_18] : memref<32x256xbf16, #tpu.memory_space<vmem>>, vector<32x256xbf16>
    tpu.vector_store %arg6[%c0_17, %c0_18], %27 {strides = array<i32>} : memref<32x256xbf16, #tpu.memory_space<vmem>>, vector<32x256xbf16>,
    return
  }
  func.func @transform_0(%arg0: i32) -> (i32, i32) {
    %c0_i32 = arith.constant 0 : i32
    %c0_i32_0 = arith.constant 0 : i32
    return %arg0, %c0_i32 : i32, i32
  }
  func.func @transform_1(%arg0: i32) -> (i32, i32) {
    %c0_i32 = arith.constant 0 : i32
    %c0_i32_0 = arith.constant 0 : i32
    %c0_i32_1 = arith.constant 0 : i32
    return %c0_i32, %c0_i32_0 : i32, i32
  }
  func.func @transform_2(%arg0: i32) -> (i32, i32) {
    %c0_i32 = arith.constant 0 : i32
    %c0_i32_0 = arith.constant 0 : i32
    %c0_i32_1 = arith.constant 0 : i32
    return %c0_i32, %c0_i32_0 : i32, i32
  }
  func.func @transform_3(%arg0: i32) -> (i32, i32) {
    %c0_i32 = arith.constant 0 : i32
    %c0_i32_0 = arith.constant 0 : i32
    %c0_i32_1 = arith.constant 0 : i32
    return %c0_i32, %c0_i32_0 : i32, i32
  }
  func.func @transform_4(%arg0: i32) -> (i32, i32) {
    %c0_i32 = arith.constant 0 : i32
    %c0_i32_0 = arith.constant 0 : i32
    %c0_i32_1 = arith.constant 0 : i32
    return %c0_i32, %c0_i32_0 : i32, i32
  }
  func.func @transform_5(%arg0: i32) -> (i32, i32) {
    %c0_i32 = arith.constant 0 : i32
    %c0_i32_0 = arith.constant 0 : i32
    return %arg0, %c0_i32 : i32, i32
  }
  func.func @transform_6(%arg0: i32) -> (i32, i32, i32) {
    %c0_i32 = arith.constant 0 : i32
    %c0_i32_0 = arith.constant 0 : i32
    %c0_i32_1 = arith.constant 0 : i32
    return %arg0, %c0_i32, %c0_i32_0 : i32, i32, i32
  }
}

module attributes {stable_mosaic.version = 11 : i64} {
  func.func @_seg_head_kernel(%arg0: i32, %arg1: memref<32x256xbf16, #tpu.memory_space<vmem>>, %arg2: memref<1x256xf32, #tpu.memory_space<vmem>>, %arg3: memref<1x256xf32, #tpu.memory_space<vmem>>, %arg4: memref<256x128xbf16, #tpu.memory_space<vmem>>, %arg5: memref<1x128xf32, #tpu.memory_space<vmem>>, %arg6: memref<128x50xbf16, #tpu.memory_space<vmem>>, %arg7: memref<1x50xf32, #tpu.memory_space<vmem>>, %arg8: memref<32x50xf32, #tpu.memory_space<vmem>>) attributes {dimension_semantics = [#tpu.dimension_semantics<parallel>], iteration_bounds = array<i64: 1>, scalar_prefetch = 0 : i64, scratch_operands = 0 : i64, tpu.core_type = #tpu.core_type<tc>, window_params = [{transform_indices = @transform_0, window_bounds = array<i64: 32, 256>}, {pipeline_mode = #tpu.pipeline_mode<synchronous>, transform_indices = @transform_1, window_bounds = array<i64: 1, 256>}, {pipeline_mode = #tpu.pipeline_mode<synchronous>, transform_indices = @transform_2, window_bounds = array<i64: 1, 256>}, {pipeline_mode = #tpu.pipeline_mode<synchronous>, transform_indices = @transform_3, window_bounds = array<i64: 256, 128>}, {pipeline_mode = #tpu.pipeline_mode<synchronous>, transform_indices = @transform_4, window_bounds = array<i64: 1, 128>}, {pipeline_mode = #tpu.pipeline_mode<synchronous>, transform_indices = @transform_5, window_bounds = array<i64: 128, 50>}, {pipeline_mode = #tpu.pipeline_mode<synchronous>, transform_indices = @transform_6, window_bounds = array<i64: 1, 50>}, {transform_indices = @transform_7, window_bounds = array<i64: 32, 50>}]} {
    %c0 = arith.constant 0 : index
    %c0_0 = arith.constant 0 : index
    %0 = vector.load %arg1[%c0, %c0_0] : memref<32x256xbf16, #tpu.memory_space<vmem>>, vector<32x256xbf16>
    %1 = arith.extf %0 : vector<32x256xbf16> to vector<32x256xf32>
    %c0_1 = arith.constant 0 : index
    %c0_2 = arith.constant 0 : index
    %2 = vector.load %arg2[%c0_1, %c0_2] : memref<1x256xf32, #tpu.memory_space<vmem>>, vector<1x256xf32>
    %3 = vector.broadcast %2 : vector<1x256xf32> to vector<32x256xf32>
    %4 = arith.mulf %1, %3 : vector<32x256xf32>
    %c0_3 = arith.constant 0 : index
    %c0_4 = arith.constant 0 : index
    %5 = vector.load %arg3[%c0_3, %c0_4] : memref<1x256xf32, #tpu.memory_space<vmem>>, vector<1x256xf32>
    %6 = vector.broadcast %5 : vector<1x256xf32> to vector<32x256xf32>
    %7 = arith.addf %4, %6 : vector<32x256xf32>
    %cst = arith.constant 0.000000e+00 : f32
    %8 = vector.broadcast %cst : f32 to vector<32x256xf32>
    %9 = arith.maximumf %7, %8 : vector<32x256xf32>
    %10 = arith.truncf %9 : vector<32x256xf32> to vector<32x256xbf16>
    %c0_5 = arith.constant 0 : index
    %c0_6 = arith.constant 0 : index
    %11 = vector.load %arg4[%c0_5, %c0_6] : memref<256x128xbf16, #tpu.memory_space<vmem>>, vector<256x128xbf16>
    %cst_7 = arith.constant dense<0.000000e+00> : vector<32x128xf32>
    %12 = tpu.matmul %10, %11, %cst_7 {dimension_numbers = #tpu.dot_dimension_numbers<[1], [0], [0], [1], [0, 0, 1, 1], [], []>} : vector<32x256xbf16>, vector<256x128xbf16>, vector<32x128xf32> -> vector<32x128xf32>
    %c0_8 = arith.constant 0 : index
    %c0_9 = arith.constant 0 : index
    %13 = vector.load %arg5[%c0_8, %c0_9] : memref<1x128xf32, #tpu.memory_space<vmem>>, vector<1x128xf32>
    %14 = vector.broadcast %13 : vector<1x128xf32> to vector<32x128xf32>
    %15 = arith.addf %12, %14 : vector<32x128xf32>
    %cst_10 = arith.constant 0.000000e+00 : f32
    %16 = vector.broadcast %cst_10 : f32 to vector<32x128xf32>
    %17 = arith.maximumf %15, %16 : vector<32x128xf32>
    %18 = arith.truncf %17 : vector<32x128xf32> to vector<32x128xbf16>
    %c0_11 = arith.constant 0 : index
    %c0_12 = arith.constant 0 : index
    %19 = vector.load %arg6[%c0_11, %c0_12] : memref<128x50xbf16, #tpu.memory_space<vmem>>, vector<128x50xbf16>
    %cst_13 = arith.constant dense<0.000000e+00> : vector<32x50xf32>
    %20 = tpu.matmul %18, %19, %cst_13 {dimension_numbers = #tpu.dot_dimension_numbers<[1], [0], [0], [1], [0, 0, 1, 1], [], []>} : vector<32x128xbf16>, vector<128x50xbf16>, vector<32x50xf32> -> vector<32x50xf32>
    %c0_14 = arith.constant 0 : index
    %c0_15 = arith.constant 0 : index
    %21 = vector.load %arg7[%c0_14, %c0_15] : memref<1x50xf32, #tpu.memory_space<vmem>>, vector<1x50xf32>
    %22 = vector.broadcast %21 : vector<1x50xf32> to vector<32x50xf32>
    %23 = arith.addf %20, %22 : vector<32x50xf32>
    %cst_16 = arith.constant dense<0xFF800000> : vector<32xf32>
    %24 = vector.multi_reduction <maximumf>, %23, %cst_16 [1] : vector<32x50xf32> to vector<32xf32>
    %25 = vector.shape_cast %24 : vector<32xf32> to vector<32x1xf32>
    %26 = vector.broadcast %25 : vector<32x1xf32> to vector<32x50xf32>
    %27 = arith.subf %23, %26 : vector<32x50xf32>
    %28 = math.exp %27 : vector<32x50xf32>
    %cst_17 = arith.constant dense<0.000000e+00> : vector<32xf32>
    %29 = vector.multi_reduction <add>, %28, %cst_17 [1] : vector<32x50xf32> to vector<32xf32>
    %30 = vector.shape_cast %29 : vector<32xf32> to vector<32x1xf32>
    %31 = math.log %30 : vector<32x1xf32>
    %32 = arith.addf %25, %31 : vector<32x1xf32>
    %33 = vector.broadcast %32 : vector<32x1xf32> to vector<32x50xf32>
    %34 = arith.subf %23, %33 : vector<32x50xf32>
    %c0_18 = arith.constant 0 : index
    %c0_19 = arith.constant 0 : index
    %35 = vector.load %arg8[%c0_18, %c0_19] : memref<32x50xf32, #tpu.memory_space<vmem>>, vector<32x50xf32>
    tpu.vector_store %arg8[%c0_18, %c0_19], %34 {strides = array<i32>} : memref<32x50xf32, #tpu.memory_space<vmem>>, vector<32x50xf32>,
    return
  }
  func.func @transform_0(%arg0: i32) -> (i32, i32) {
    %c0_i32 = arith.constant 0 : i32
    %c0_i32_0 = arith.constant 0 : i32
    return %arg0, %c0_i32 : i32, i32
  }
  func.func @transform_1(%arg0: i32) -> (i32, i32) {
    %c0_i32 = arith.constant 0 : i32
    %c0_i32_0 = arith.constant 0 : i32
    %c0_i32_1 = arith.constant 0 : i32
    return %c0_i32, %c0_i32_0 : i32, i32
  }
  func.func @transform_2(%arg0: i32) -> (i32, i32) {
    %c0_i32 = arith.constant 0 : i32
    %c0_i32_0 = arith.constant 0 : i32
    %c0_i32_1 = arith.constant 0 : i32
    return %c0_i32, %c0_i32_0 : i32, i32
  }
  func.func @transform_3(%arg0: i32) -> (i32, i32) {
    %c0_i32 = arith.constant 0 : i32
    %c0_i32_0 = arith.constant 0 : i32
    %c0_i32_1 = arith.constant 0 : i32
    return %c0_i32, %c0_i32_0 : i32, i32
  }
  func.func @transform_4(%arg0: i32) -> (i32, i32) {
    %c0_i32 = arith.constant 0 : i32
    %c0_i32_0 = arith.constant 0 : i32
    %c0_i32_1 = arith.constant 0 : i32
    return %c0_i32, %c0_i32_0 : i32, i32
  }
  func.func @transform_5(%arg0: i32) -> (i32, i32) {
    %c0_i32 = arith.constant 0 : i32
    %c0_i32_0 = arith.constant 0 : i32
    %c0_i32_1 = arith.constant 0 : i32
    return %c0_i32, %c0_i32_0 : i32, i32
  }
  func.func @transform_6(%arg0: i32) -> (i32, i32) {
    %c0_i32 = arith.constant 0 : i32
    %c0_i32_0 = arith.constant 0 : i32
    %c0_i32_1 = arith.constant 0 : i32
    return %c0_i32, %c0_i32_0 : i32, i32
  }
  func.func @transform_7(%arg0: i32) -> (i32, i32) {
    %c0_i32 = arith.constant 0 : i32
    %c0_i32_0 = arith.constant 0 : i32
    return %arg0, %c0_i32 : i32, i32
  }
}

</mosaic_0001>

<bundles_post_ra>
// kernel: trianglenet_seg_forward.7
= control target key start
LH: loop header
LB: loop body
LE: loop exit
PB: predicated region body
PF: predicated region fallthrough
CT: control target
= control target key end

     0   :  { %vm107_vm0 = vcmask 1043456   ;;  %vm82_vm1 = vcmask 195584   ;;  %vm366_vm2 = vcmask 519168   ;;  %vm208_vm3 = vcmask 523264   ;;  %s689_s1 = inlined_call_operand.vmem [shape: bf16[24,64], index: 1, kind: input, shape index: {}]   ;;  %s690_s0 = inlined_call_operand.vmem [shape: bf16[128,24], index: 0, kind: input, shape index: {}]   ;;  %s691_s2 = inlined_call_operand.vmem [shape: bf16[128,64], index: 2, kind: output, shape index: {0}]   ;;  %s692_s3 = inlined_call_operand.vmem [shape: f32[1,2,64], index: 3, kind: output, shape index: {1}]  }
   0x1   :  { %v477_v0 = vld [vmem:[%s689_s1] sm:$0xff]   ;;  %v478_v1 = vld [vmem:[%s689_s1 + $0x8] ss:$0 sps:$4 sm:$0xff]   ;;  %v481_v5 = vld [vmem:[%s690_s0 + $0x10] sm:$0xff]   ;;  %vm246_vm4 = vcmask 516096  }
   0x2   :  { %451 = vmatprep.subr.bf16.mxu0 %v477_v0  ;;  %v479_v2 = vld [vmem:[%s690_s0] sm:$0xff]   ;;  %471 = vmatprep.subr.bf16.mxu1 %v477_v0  ;;  %v109_v3 = vsel %vm107_vm0, %v478_v1, 0  ;;  %v480_v4 = vld [vmem:[%s690_s0 + $0x8] sm:$0xff]   ;;  %v485_v8 = vld [vmem:[%s690_s0 + $0x30] sm:$0xff]  }
   0x3   :  { %452 = vmatpush3.bf16.msra.mxu0 %v477_v0  ;;  %473 = vmatpush3.bf16.msra.mxu1 %v477_v0  ;;  %v483_v6 = vld [vmem:[%s690_s0 + $0x20] sm:$0xff]   ;;  %v484_v7 = vld [vmem:[%s690_s0 + $0x28] sm:$0xff]   ;;  %v482_v9 = vld [vmem:[%s690_s0 + $0x18] sm:$0xff]  }
   0x4   :  { %475 = vmatprep.subr.msk.bf16.mxu0 %vm107_vm0, %v478_v1  ;;  %455 = vmatprep.mubr.msk.bf16.mxu0 %vm82_vm1, %v479_v2  ;;  %v486_v10 = vld [vmem:[%s690_s0 + $0x38] sm:$0xff]  }
   0x5   :  { %476 = vmatprep.subr.msk.bf16.mxu1 %vm107_vm0, %v478_v1  ;;  %463 = vmatprep.mubr.msk.bf16.mxu1 %vm82_vm1, %v483_v6 }
   0x7   :  { %454 = vmatpush3.bf16.msra.mxu0 %v109_v3  ;;  %474 = vmatpush3.bf16.msra.mxu1 %v109_v3 }
   0xa   :  { %456 = vmatmul.mubr.msk.bf16.vlgmr.msra.gmra.mrb[0].mxu0 %vm82_vm1, %v480_v4  ;;  %464 = vmatmul.mubr.msk.bf16.vlgmr.msra.gmra.mrb[0].mxu1 %vm82_vm1, %v484_v7 }
   0xb   :  { %459 = vmatprep.mubr.msk.bf16.mxu0 %vm82_vm1, %v481_v5  ;;  %467 = vmatprep.mubr.msk.bf16.mxu1 %vm82_vm1, %v485_v8 }
  0x12   :  { %460 = vmatmul.mubr.msk.bf16.gmra.mrb[4].mxu0 %vm82_vm1, %v482_v9  ;;  %468 = vmatmul.mubr.msk.bf16.gmra.mrb[4].mxu1 %vm82_vm1, %v486_v10 }
  0xdd   :  { %v457_v11 = vpop.f32.mrb[0].mxu0  ;;  %v545_v12 = vpop.f32.mrb[0].mxu1 }
  0xde   :  { %v427_v13 = vpack.c.bf16 %v457_v11, %v457_v11  ;;  %v145_v14 = vpop.f32.mrb[1].mxu0  ;;  %v547_v15 = vpop.f32.mrb[1].mxu1  ;;  %v250_v20 = vmul.f32 %v457_v11, %v457_v11  ;;  %v435_v30 = vpack.c.bf16 %v545_v12, %v545_v12  ;;  %v212_v31 = vsel %vm208_vm3, %v457_v11, 0.0 }
  0xdf   :  { %v248_v16 = vmul.f32 %v145_v14, %v145_v14  ;;  %v425_v17 = vpack.c.bf16 %v145_v14, %v145_v14  ;;  %v458_v18 = vpop.f32.mrb[2].mxu0  ;;  %v549_v19 = vpop.f32.mrb[2].mxu1  ;;  %v209_v24 = vsel %vm208_vm3, %v145_v14, 0.0  ;;  %v433_v34 = vpack.c.bf16 %v547_v15, %v547_v15 }
  0xe0   :  { %369 = vst.msk [vmem:[%s691_s2 + $0x8] sm:$0xf] %vm366_vm2, %v427_v13  ;;  %v428_v21 = vpack.c.bf16 %v458_v18, %v458_v18  ;;  %v148_v22 = vpop.f32.mrb[3].mxu0  ;;  %v555_v23 = vpop.f32.mrb[3].mxu1  ;;  %v251_v28 = vmul.f32 %v458_v18, %v458_v18  ;;  %377 = vst.msk [vmem:[%s691_s2 + $0x28] sm:$0xf] %vm366_vm2, %v435_v30  ;;  %v436_v39 = vpack.c.bf16 %v549_v19, %v549_v19 }
  0xe1   :  { %367 = vst.msk [vmem:[%s691_s2] sm:$0xf] %vm366_vm2, %v425_v17  ;;  %v210_v25 = vsel %vm208_vm3, %v148_v22, 0.0  ;;  %v249_v26 = vmul.f32 %v148_v22, %v148_v22  ;;  %v426_v27 = vpack.c.bf16 %v148_v22, %v148_v22  ;;  %v264_v32 = vsel %vm208_vm3, %v248_v16, 0.0  ;;  %375 = vst.msk [vmem:[%s691_s2 + $0x20] sm:$0xf] %vm366_vm2, %v433_v34 }
  0xe2   :  { %370 = vst.msk [vmem:[%s691_s2 + $0xc] sm:$0xf] %vm366_vm2, %v428_v21  ;;  %v211_v29 = vadd.f32 %v210_v25, %v209_v24  ;;  %v267_v37 = vsel %vm208_vm3, %v250_v20, 0.0  ;;  %v214_v41 = vsel %vm208_vm3, %v458_v18, 0.0  ;;  %v269_v42 = vsel %vm208_vm3, %v251_v28, 0.0 }
  0xe3   :  { %v265_v33 = vsel %vm208_vm3, %v249_v26, 0.0  ;;  %368 = vst.msk [vmem:[%s691_s2 + $0x4] sm:$0xf] %vm366_vm2, %v426_v27  ;;  %378 = vst.msk [vmem:[%s691_s2 + $0x2c] sm:$0xf] %vm366_vm2, %v436_v39  ;;  %v256_v1 = vmul.f32 %v547_v15, %v547_v15  ;;  %v434_v2 = vpack.c.bf16 %v555_v23, %v555_v23  ;;  %v224_v11 = vsel %vm208_vm3, %v547_v15, 0.0 }
  0xe4   :  { %v213_v35 = vadd.f32 %v212_v31, %v211_v29  ;;  %v266_v36 = vadd.f32 %v265_v33, %v264_v32  ;;  %v257_v21 = vmul.f32 %v555_v23, %v555_v23  ;;  %v258_v25 = vmul.f32 %v545_v12, %v545_v12 }
  0xe5   :  { %v461_v38 = vpop.f32.mrb[4].mxu0  ;;  %v589_v40 = vpop.f32.mrb[4].mxu1  ;;  %376 = vst.msk [vmem:[%s691_s2 + $0x24] sm:$0xf] %vm366_vm2, %v434_v2  ;;  %v279_v20 = vsel %vm208_vm3, %v256_v1, 0.0  ;;  %v226_v26 = vsel %vm208_vm3, %v555_v23, 0.0  ;;  %v259_v30 = vmul.f32 %v549_v19, %v549_v19 }
  0xe6   :  { %v268_v43 = vadd.f32 %v267_v37, %v266_v36  ;;  %v431_v44 = vpack.c.bf16 %v461_v38, %v461_v38  ;;  %v161_v45 = vpop.f32.mrb[5].mxu0  ;;  %v193_v46 = vpop.f32.mrb[5].mxu1  ;;  %v215_v47 = vadd.f32 %v214_v41, %v213_v35  ;;  %v254_v60 = vmul.f32 %v461_v38, %v461_v38 }
  0xe7   :  { %v216_v48 = vsel %vm208_vm3, %v161_v45, 0.0  ;;  %v252_v49 = vmul.f32 %v161_v45, %v161_v45  ;;  %v429_v50 = vpack.c.bf16 %v161_v45, %v161_v45  ;;  %v462_v51 = vpop.f32.mrb[6].mxu0  ;;  %v598_v52 = vpop.f32.mrb[6].mxu1  ;;  %v220_v3 = vsel %vm208_vm3, %v461_v38, 0.0 }
  0xe8   :  { %373 = vst.msk [vmem:[%s691_s2 + $0x18] sm:$0xf] %vm366_vm2, %v431_v44  ;;  %v270_v53 = vadd.f32 %v269_v42, %v268_v43  ;;  %v164_v54 = vpop.f32.mrb[7].mxu0  ;;  %v196_v55 = vpop.f32.mrb[7].mxu1  ;;  %v217_v56 = vadd.f32 %v216_v48, %v215_v47  ;;  %v432_v58 = vpack.c.bf16 %v462_v51, %v462_v51  ;;  %v255_v4 = vmul.f32 %v462_v51, %v462_v51 }
  0xe9   :  { %v271_v57 = vsel %vm208_vm3, %v252_v49, 0.0  ;;  %371 = vst.msk [vmem:[%s691_s2 + $0x10] sm:$0xf] %vm366_vm2, %v429_v50  ;;  %v218_v59 = vsel %vm208_vm3, %v164_v54, 0.0  ;;  %v253_v62 = vmul.f32 %v164_v54, %v164_v54  ;;  %v430_v63 = vpack.c.bf16 %v164_v54, %v164_v54 }
  0xea   :  { %v272_v61 = vadd.f32 %v271_v57, %v270_v53  ;;  %374 = vst.msk [vmem:[%s691_s2 + $0x1c] sm:$0xf] %vm366_vm2, %v432_v58  ;;  %v219_v0 = vadd.f32 %v218_v59, %v217_v56  ;;  %v439_v6 = vpack.c.bf16 %v589_v40, %v589_v40  ;;  %v275_v9 = vsel %vm208_vm3, %v254_v60, 0.0 }
  0xeb   :  { %v273_v5 = vsel %vm208_vm3, %v253_v62, 0.0  ;;  %372 = vst.msk [vmem:[%s691_s2 + $0x14] sm:$0xf] %vm366_vm2, %v430_v63  ;;  %v222_v10 = vsel %vm208_vm3, %v462_v51, 0.0  ;;  %v437_v13 = vpack.c.bf16 %v193_v46, %v193_v46  ;;  %v440_v17 = vpack.c.bf16 %v598_v52, %v598_v52 }
  0xec   :  { %v221_v7 = vadd.f32 %v220_v3, %v219_v0  ;;  %v274_v8 = vadd.f32 %v273_v5, %v272_v61  ;;  %381 = vst.msk [vmem:[%s691_s2 + $0x38] sm:$0xf] %vm366_vm2, %v439_v6  ;;  %v277_v18 = vsel %vm208_vm3, %v255_v4, 0.0  ;;  %v438_v15 = vpack.c.bf16 %v196_v55, %v196_v55 }
  0xed   :  { %379 = vst.msk [vmem:[%s691_s2 + $0x30] sm:$0xf] %vm366_vm2, %v437_v13  ;;  %382 = vst.msk [vmem:[%s691_s2 + $0x3c] sm:$0xf] %vm366_vm2, %v440_v17  ;;  %v228_v29 = vsel %vm208_vm3, %v545_v12, 0.0  ;;  %v281_v31 = vsel %vm208_vm3, %v257_v21, 0.0  ;;  %v260_v32 = vmul.f32 %v193_v46, %v193_v46  ;;  %v261_v41 = vmul.f32 %v196_v55, %v196_v55 }
  0xee   :  { %v276_v14 = vadd.f32 %v275_v9, %v274_v8  ;;  %v223_v16 = vadd.f32 %v222_v10, %v221_v7  ;;  %380 = vst.msk [vmem:[%s691_s2 + $0x34] sm:$0xf] %vm366_vm2, %v438_v15  ;;  %v283_v23 = vsel %vm208_vm3, %v258_v25, 0.0  ;;  %v230_v35 = vsel %vm208_vm3, %v549_v19, 0.0 }
  0xef   :  { %v232_v36 = vsel %vm208_vm3, %v193_v46, 0.0  ;;  %v285_v39 = vsel %vm208_vm3, %v259_v30, 0.0  ;;  %v287_v12 = vsel %vm208_vm3, %v260_v32, 0.0  ;;  %v262_v44 = vmul.f32 %v589_v40, %v589_v40 }
  0xf0   :  { %v225_v22 = vadd.f32 %v224_v11, %v223_v16  ;;  %v278_v24 = vadd.f32 %v277_v18, %v276_v14  ;;  %v234_v45 = vsel %vm208_vm3, %v196_v55, 0.0  ;;  %v236_v19 = vsel %vm208_vm3, %v589_v40, 0.0 }
  0xf1   :  { %v263_v46 = vmul.f32 %v598_v52, %v598_v52  ;;  %v289_v49 = vsel %vm208_vm3, %v261_v41, 0.0  ;;  %v291_v53 = vsel %vm208_vm3, %v262_v44, 0.0  ;;  %v238_v54 = vsel %vm208_vm3, %v598_v52, 0.0 }
  0xf2   :  { %v280_v27 = vadd.f32 %v279_v20, %v278_v24  ;;  %v227_v28 = vadd.f32 %v226_v26, %v225_v22 }
  0xf3   :  { %v293_v55 = vsel %vm208_vm3, %v263_v46, 0.0 }
  0xf4   :  { %v229_v33 = vadd.f32 %v228_v29, %v227_v28  ;;  %v282_v34 = vadd.f32 %v281_v31, %v280_v27 }
  0xf6   :  { %v284_v37 = vadd.f32 %v283_v23, %v282_v34  ;;  %v231_v38 = vadd.f32 %v230_v35, %v229_v33 }
  0xf8   :  { %v233_v42 = vadd.f32 %v232_v36, %v231_v38  ;;  %v286_v43 = vadd.f32 %v285_v39, %v284_v37 }
  0xfa   :  { %v288_v47 = vadd.f32 %v287_v12, %v286_v43  ;;  %v235_v48 = vadd.f32 %v234_v45, %v233_v42 }
  0xfc   :  { %v237_v50 = vadd.f32 %v236_v19, %v235_v48  ;;  %v290_v51 = vadd.f32 %v289_v49, %v288_v47 }
  0xfe   :  { %v239_v56 = vadd.f32 %v238_v54, %v237_v50  ;;  %v292_v57 = vadd.f32 %v291_v53, %v290_v51 }
 0x100   :  { %v240_v58 = vrot.slane %v239_v56, 4  ;;  %v294_v59 = vadd.f32 %v293_v55, %v292_v57 }
 0x102   :  { %v241_v60 = vadd.f32 %v240_v58, %v239_v56  ;;  %v295_v40 = vrot.slane %v294_v59, 4 }
 0x104   :  { %v242_v61 = vrot.slane %v241_v60, 2  ;;  %v296_v62 = vadd.f32 %v295_v40, %v294_v59 }
 0x106   :  { %v243_v63 = vadd.f32 %v242_v61, %v241_v60  ;;  %v297_v0 = vrot.slane %v296_v62, 2 }
 0x108   :  { %v244_v1 = vrot.slane %v243_v63, 1  ;;  %v298_v2 = vadd.f32 %v297_v0, %v296_v62 }
 0x10a   :  { %v245_v3 = vadd.f32 %v244_v1, %v243_v63  ;;  %v299_v4 = vrot.slane %v298_v2, 1 }
 0x10c   :  { %247 = vst.msk [vmem:[%s692_s3] sm:$0x1] %vm246_vm4, %v245_v3  ;;  %v300_v52 = vadd.f32 %v299_v4, %v298_v2 }
 0x10e   :  { %301 = vst.msk [vmem:[%s692_s3 + $0x1] sm:$0x1] %vm246_vm4, %v300_v52 }

// kernel: trianglenet_seg_forward.8
= control target key start
LH: loop header
LB: loop body
LE: loop exit
PB: predicated region body
PF: predicated region fallthrough
CT: control target
= control target key end

     0   :  { %vm229_vm0 = vcmask 1043456   ;;  %vm204_vm1 = vcmask 195584   ;;  %vm354_vm2 = vcmask 523264   ;;  %s1065_s4 = inlined_call_operand.vmem [shape: bf16[64,128], index: 4, kind: input, shape index: {}]   ;;  %s1066_s5 = inlined_call_operand.vmem [shape: bf16[24,128], index: 5, kind: input, shape index: {}]   ;;  %s1067_s1 = inlined_call_operand.vmem [shape: bf16[128,24], index: 1, kind: input, shape index: {}]   ;;  %s1068_s0 = inlined_call_operand.vmem [shape: bf16[128,64], index: 0, kind: input, shape index: {}]   ;;  %s1069_s2 = inlined_call_operand.vmem [shape: f32[1,64], index: 2, kind: input, shape index: {}]   ;;  %s1070_s3 = inlined_call_operand.vmem [shape: f32[1,64], index: 3, kind: input, shape index: {}]   ;;  %s1071_s6 = inlined_call_operand.vmem [shape: bf16[128,128], index: 6, kind: output, shape index: {0}]   ;;  %s1072_s7 = inlined_call_operand.vmem [shape: f32[1,2,128], index: 7, kind: output, shape index: {1}]  }
   0x1   :  { %v857_v0 = vld [vmem:[%s1065_s4] sm:$0xff]   ;;  %v858_v1 = vld [vmem:[%s1065_s4 + $0x8] sm:$0xff]   ;;  %v861_v4 = vld [vmem:[%s1065_s4 + $0x10] sm:$0xff]  }
   0x2   :  { %816 = vmatprep.subr.bf16.mxu0 %v857_v0  ;;  %v859_v2 = vld [vmem:[%s1066_s5] sm:$0xff]   ;;  %v860_v3 = vld [vmem:[%s1066_s5 + $0x8] ss:$0 sps:$4 sm:$0xff]   ;;  %v863_v7 = vld [vmem:[%s1065_s4 + $0x18] sm:$0xff]  }
   0x3   :  { %817 = vmatpush3.bf16.msra.mxu0 %v857_v0  ;;  %796 = vmatprep.subr.bf16.mxu1 %v859_v2  ;;  %v862_v5 = vld [vmem:[%s1067_s1] sm:$0xff]   ;;  %v231_v6 = vsel %vm229_vm0, %v860_v3, 0  ;;  %v864_v9 = vld [vmem:[%s1067_s1 + $0x8] sm:$0xff]   ;;  %v865_v19 = vld [vmem:[%s1067_s1 + $0x10] sm:$0xff]  }
   0x4   :  { %818 = vmatprep.subr.bf16.mxu0 %v858_v1  ;;  %797 = vmatpush3.bf16.msra.mxu1 %v859_v2  ;;  %v689_v8 = vld [vmem:[%s1068_s0] sm:$0xff]   ;;  %v760_v13 = vld [vmem:[%s1068_s0 + $0x8] sm:$0xff]   ;;  %v761_v22 = vld [vmem:[%s1068_s0 + $0x10] sm:$0xff]  }
   0x5   :  { %856 = vmatprep.subr.msk.bf16.mxu1 %vm229_vm0, %v860_v3  ;;  %800 = vmatprep.mubr.msk.bf16.mxu1 %vm204_vm1, %v862_v5  ;;  %v690_v10 = vunpack.c.l.bf16 %v689_v8  ;;  %v691_v11 = vunpack.c.h.bf16 %v689_v8  ;;  %v942_v12 = vld [vmem:[%s1069_s2] ss:$0 sm:$0xff]  ;;  %v694_v15 = vunpack.c.l.bf16 %v760_v13  ;;  %v695_v16 = vunpack.c.h.bf16 %v760_v13  ;;  %v762_v23 = vld [vmem:[%s1068_s0 + $0x18] sm:$0xff]   ;;  %v764_v37 = vld [vmem:[%s1068_s0 + $0x28] sm:$0xff]  }
   0x6   :  { %v950_v14 = vld [vmem:[%s1070_s3] ss:$0 sm:$0xff]  ;;  %v698_v26 = vunpack.c.l.bf16 %v761_v22  ;;  %v699_v27 = vunpack.c.h.bf16 %v761_v22  ;;  %v702_v30 = vunpack.c.l.bf16 %v762_v23  ;;  %v703_v31 = vunpack.c.h.bf16 %v762_v23  ;;  %v866_v47 = vld [vmem:[%s1067_s1 + $0x18] sm:$0xff]   ;;  %v765_v51 = vld [vmem:[%s1068_s0 + $0x30] sm:$0xff]  }
   0x7   :  { %819 = vmatpush3.bf16.msra.mxu0 %v858_v1  ;;  %v65_v17 = vmul.f32 %v690_v10, %v942_v12  ;;  %v66_v18 = vmul.f32 %v691_v11, %v942_v12  ;;  %v67_v20 = vmul.f32 %v694_v15, %v942_v12  ;;  %v68_v21 = vmul.f32 %v695_v16, %v942_v12  ;;  %v763_v32 = vld [vmem:[%s1068_s0 + $0x20] sm:$0xff]   ;;  %v766_v61 = vld [vmem:[%s1068_s0 + $0x38] sm:$0xff]  }
   0x8   :  { %820 = vmatprep.subr.bf16.mxu0 %v861_v4  ;;  %799 = vmatpush3.bf16.msra.mxu1 %v231_v6  ;;  %v69_v35 = vmul.f32 %v698_v26, %v942_v12  ;;  %v70_v36 = vmul.f32 %v699_v27, %v942_v12  ;;  %v71_v40 = vmul.f32 %v702_v30, %v942_v12  ;;  %v706_v45 = vunpack.c.l.bf16 %v763_v32  ;;  %v867_v54 = vld [vmem:[%s1067_s1 + $0x20] sm:$0xff]  }
   0x9   :  { %v88_v24 = vadd.f32 %v950_v14, %v65_v17  ;;  %v89_v25 = vadd.f32 %v950_v14, %v66_v18  ;;  %v90_v28 = vadd.f32 %v950_v14, %v67_v20  ;;  %v91_v29 = vadd.f32 %v950_v14, %v68_v21  ;;  %v868_v17 = vld [vmem:[%s1067_s1 + $0x28] sm:$0xff]   ;;  %v869_v20 = vld [vmem:[%s1067_s1 + $0x30] sm:$0xff]  }
   0xa   :  { %v72_v41 = vmul.f32 %v703_v31, %v942_v12  ;;  %v92_v43 = vadd.f32 %v950_v14, %v69_v35  ;;  %v93_v44 = vadd.f32 %v950_v14, %v70_v36  ;;  %v94_v48 = vadd.f32 %v950_v14, %v71_v40  ;;  %v870_v31 = vld [vmem:[%s1067_s1 + $0x38] sm:$0xff]  }
   0xb   :  { %821 = vmatpush3.bf16.msra.mxu0 %v861_v4  ;;  %801 = vmatmul.mubr.msk.bf16.vlgmr.msra.gmra.mrb[0].mxu1 %vm204_vm1, %v864_v9  ;;  %v104_v33 = vmax.f32 %v88_v24, 0.0  ;;  %v105_v34 = vmax.f32 %v89_v25, 0.0  ;;  %v106_v38 = vmax.f32 %v90_v28, 0.0  ;;  %v107_v39 = vmax.f32 %v91_v29, 0.0 }
   0xc   :  { %822 = vmatprep.subr.bf16.mxu0 %v863_v7  ;;  %804 = vmatprep.mubr.msk.bf16.mxu1 %vm204_vm1, %v865_v19  ;;  %v95_v49 = vadd.f32 %v950_v14, %v72_v41  ;;  %v707_v50 = vunpack.c.h.bf16 %v763_v32  ;;  %v108_v52 = vmax.f32 %v92_v43, 0.0  ;;  %v109_v53 = vmax.f32 %v93_v44, 0.0 }
   0xd   :  { %v120_v42 = vpack.c.bf16 %v105_v34, %v104_v33  ;;  %v121_v46 = vpack.c.bf16 %v107_v39, %v106_v38  ;;  %v73_v55 = vmul.f32 %v706_v45, %v942_v12  ;;  %v710_v56 = vunpack.c.l.bf16 %v764_v37 }
   0xe   :  { %v110_v57 = vmax.f32 %v94_v48, 0.0  ;;  %v111_v58 = vmax.f32 %v95_v49, 0.0  ;;  %v74_v59 = vmul.f32 %v707_v50, %v942_v12  ;;  %v711_v60 = vunpack.c.h.bf16 %v764_v37 }
   0xf   :  { %823 = vmatpush3.bf16.msra.mxu0 %v863_v7  ;;  %824 = vmatprep.mubr.msk.bf16.mxu0 %vm354_vm2, %v120_v42  ;;  %v122_v62 = vpack.c.bf16 %v109_v53, %v108_v52  ;;  %v96_v63 = vadd.f32 %v950_v14, %v73_v55  ;;  %v75_v0 = vmul.f32 %v710_v56, %v942_v12  ;;  %v714_v1 = vunpack.c.l.bf16 %v765_v51 }
  0x10   :  { %v123_v2 = vpack.c.bf16 %v111_v58, %v110_v57  ;;  %v97_v3 = vadd.f32 %v950_v14, %v74_v59  ;;  %v76_v4 = vmul.f32 %v711_v60, %v942_v12  ;;  %v715_v5 = vunpack.c.h.bf16 %v765_v51 }
  0x11   :  { %v112_v6 = vmax.f32 %v96_v63, 0.0  ;;  %v98_v7 = vadd.f32 %v950_v14, %v75_v0  ;;  %v77_v8 = vmul.f32 %v714_v1, %v942_v12  ;;  %v718_v9 = vunpack.c.l.bf16 %v766_v61 }
  0x12   :  { %825 = vmatmul.mubr.msk.bf16.vlgmr.msra.gmra.mrb[0].mxu0 %vm354_vm2, %v121_v46  ;;  %v113_v10 = vmax.f32 %v97_v3, 0.0  ;;  %v99_v11 = vadd.f32 %v950_v14, %v76_v4  ;;  %v78_v13 = vmul.f32 %v715_v5, %v942_v12  ;;  %v719_v15 = vunpack.c.h.bf16 %v766_v61 }
  0x13   :  { %805 = vmatmul.mubr.msk.bf16.gmra.mrb[4].mxu1 %vm204_vm1, %v866_v47  ;;  %828 = vmatprep.mubr.msk.bf16.mxu0 %vm354_vm2, %v122_v62  ;;  %v100_v16 = vadd.f32 %v950_v14, %v77_v8  ;;  %v114_v21 = vmax.f32 %v98_v7, 0.0  ;;  %v79_v23 = vmul.f32 %v718_v9, %v942_v12 }
  0x14   :  { %808 = vmatprep.mubr.msk.bf16.mxu1 %vm204_vm1, %v867_v54  ;;  %v124_v18 = vpack.c.bf16 %v113_v10, %v112_v6  ;;  %v101_v19 = vadd.f32 %v950_v14, %v78_v13  ;;  %v115_v22 = vmax.f32 %v99_v11, 0.0  ;;  %v80_v24 = vmul.f32 %v719_v15, %v942_v12 }
  0x15   :  { %v116_v25 = vmax.f32 %v100_v16, 0.0  ;;  %v102_v28 = vadd.f32 %v950_v14, %v79_v23 }
  0x16   :  { %v117_v26 = vmax.f32 %v101_v19, 0.0  ;;  %v125_v27 = vpack.c.bf16 %v115_v22, %v114_v21  ;;  %v103_v29 = vadd.f32 %v950_v14, %v80_v24 }
  0x17   :  { %v118_v12 = vmax.f32 %v102_v28, 0.0 }
  0x18   :  { %v126_v30 = vpack.c.bf16 %v117_v26, %v116_v25  ;;  %v119_v32 = vmax.f32 %v103_v29, 0.0 }
  0x1a   :  { %829 = vmatmul.mubr.msk.bf16.gmra.mrb[4].mxu0 %vm354_vm2, %v123_v2  ;;  %v127_v33 = vpack.c.bf16 %v119_v32, %v118_v12 }
  0x1b   :  { %832 = vmatprep.mubr.msk.bf16.mxu0 %vm354_vm2, %v124_v18  ;;  %809 = vmatmul.mubr.msk.bf16.gmra.mrb[8].mxu1 %vm204_vm1, %v868_v17 }
  0x1c   :  { %812 = vmatprep.mubr.msk.bf16.mxu1 %vm204_vm1, %v869_v20 }
  0x22   :  { %833 = vmatmul.mubr.msk.bf16.gmra.mrb[8].mxu0 %vm354_vm2, %v125_v27 }
  0x23   :  { %836 = vmatprep.mubr.msk.bf16.mxu0 %vm354_vm2, %v126_v30  ;;  %813 = vmatmul.mubr.msk.bf16.gmra.mrb[12].mxu1 %vm204_vm1, %v870_v31 }
  0x2a   :  { %837 = vmatmul.mubr.msk.bf16.gmra.mrb[12].mxu0 %vm354_vm2, %v127_v33 }
  0xde   :  { %v802_v34 = vpop.f32.mrb[0].mxu1 }
  0xdf   :  { %v267_v35 = vpop.f32.mrb[1].mxu1 }
  0xe0   :  { %v803_v36 = vpop.f32.mrb[2].mxu1 }
  0xe1   :  { %v270_v14 = vpop.f32.mrb[3].mxu1 }
  0xe5   :  { %v826_v37 = vpop.f32.mrb[0].mxu0 }
  0xe6   :  { %v422_v38 = vadd.f32 %v826_v37, %v802_v34  ;;  %v413_v39 = vpop.f32.mrb[1].mxu0  ;;  %v806_v42 = vpop.f32.mrb[4].mxu1 }
  0xe7   :  { %v414_v40 = vadd.f32 %v413_v39, %v267_v35  ;;  %v827_v41 = vpop.f32.mrb[2].mxu0  ;;  %v283_v45 = vpop.f32.mrb[5].mxu1 }
  0xe8   :  { %v425_v43 = vadd.f32 %v827_v41, %v803_v36  ;;  %v416_v44 = vpop.f32.mrb[3].mxu0  ;;  %v807_v47 = vpop.f32.mrb[6].mxu1  ;;  %v500_v54 = vmul.f32 %v422_v38, %v422_v38 }
  0xe9   :  { %v417_v46 = vadd.f32 %v416_v44, %v270_v14  ;;  %v286_v49 = vpop.f32.mrb[7].mxu1  ;;  %v498_v50 = vmul.f32 %v414_v40, %v414_v40 }
  0xea   :  { %v728_v48 = vpack.c.bf16 %v425_v43, %v422_v38  ;;  %v501_v60 = vmul.f32 %v425_v43, %v425_v43 }
  0xeb   :  { %v476_v51 = vadd.f32 %v417_v46, %v414_v40  ;;  %v499_v52 = vmul.f32 %v417_v46, %v417_v46  ;;  %v723_v53 = vpack.c.bf16 %v417_v46, %v414_v40 }
  0xec   :  { %767 = vst [vmem:[%s1071_s6 + $0x8] sm:$0xff] %v728_v48  }
  0xed   :  { %v477_v55 = vadd.f32 %v476_v51, %v422_v38  ;;  %v514_v56 = vadd.f32 %v499_v52, %v498_v50  ;;  %724 = vst [vmem:[%s1071_s6] sm:$0xff] %v723_v53   ;;  %v830_v57 = vpop.f32.mrb[4].mxu0 }
  0xee   :  { %v438_v58 = vadd.f32 %v830_v57, %v806_v42  ;;  %v429_v59 = vpop.f32.mrb[5].mxu0  ;;  %v810_v1 = vpop.f32.mrb[8].mxu1 }
  0xef   :  { %v515_v61 = vadd.f32 %v514_v56, %v500_v54  ;;  %v430_v62 = vadd.f32 %v429_v59, %v283_v45  ;;  %v478_v63 = vadd.f32 %v477_v55, %v425_v43  ;;  %v831_v0 = vpop.f32.mrb[6].mxu0  ;;  %v299_v4 = vpop.f32.mrb[9].mxu1 }
  0xf0   :  { %v441_v2 = vadd.f32 %v831_v0, %v807_v47  ;;  %v432_v3 = vpop.f32.mrb[7].mxu0  ;;  %v811_v9 = vpop.f32.mrb[10].mxu1  ;;  %v504_v18 = vmul.f32 %v438_v58, %v438_v58 }
  0xf1   :  { %v479_v5 = vadd.f32 %v478_v63, %v430_v62  ;;  %v502_v6 = vmul.f32 %v430_v62, %v430_v62  ;;  %v516_v7 = vadd.f32 %v515_v61, %v501_v60  ;;  %v433_v8 = vadd.f32 %v432_v3, %v286_v49  ;;  %v302_v11 = vpop.f32.mrb[11].mxu1 }
  0xf2   :  { %v738_v10 = vpack.c.bf16 %v441_v2, %v438_v58  ;;  %v505_v24 = vmul.f32 %v441_v2, %v441_v2 }
  0xf3   :  { %v517_v13 = vadd.f32 %v516_v7, %v502_v6  ;;  %v480_v15 = vadd.f32 %v479_v5, %v433_v8  ;;  %v503_v16 = vmul.f32 %v433_v8, %v433_v8  ;;  %v733_v17 = vpack.c.bf16 %v433_v8, %v430_v62 }
  0xf4   :  { %769 = vst [vmem:[%s1071_s6 + $0x18] sm:$0xff] %v738_v10  }
  0xf5   :  { %v481_v19 = vadd.f32 %v480_v15, %v438_v58  ;;  %v518_v20 = vadd.f32 %v517_v13, %v503_v16  ;;  %768 = vst [vmem:[%s1071_s6 + $0x10] sm:$0xff] %v733_v17   ;;  %v834_v21 = vpop.f32.mrb[8].mxu0 }
  0xf6   :  { %v454_v22 = vadd.f32 %v834_v21, %v810_v1  ;;  %v445_v23 = vpop.f32.mrb[9].mxu0  ;;  %v814_v29 = vpop.f32.mrb[12].mxu1 }
  0xf7   :  { %v519_v25 = vadd.f32 %v518_v20, %v504_v18  ;;  %v446_v26 = vadd.f32 %v445_v23, %v299_v4  ;;  %v482_v27 = vadd.f32 %v481_v19, %v441_v2  ;;  %v835_v28 = vpop.f32.mrb[10].mxu0  ;;  %v315_v12 = vpop.f32.mrb[13].mxu1 }
  0xf8   :  { %v457_v30 = vadd.f32 %v835_v28, %v811_v9  ;;  %v448_v31 = vpop.f32.mrb[11].mxu0  ;;  %v815_v36 = vpop.f32.mrb[14].mxu1  ;;  %v508_v42 = vmul.f32 %v454_v22, %v454_v22 }
  0xf9   :  { %v483_v32 = vadd.f32 %v482_v27, %v446_v26  ;;  %v506_v33 = vmul.f32 %v446_v26, %v446_v26  ;;  %v520_v34 = vadd.f32 %v519_v25, %v505_v24  ;;  %v449_v35 = vadd.f32 %v448_v31, %v302_v11  ;;  %v318_v37 = vpop.f32.mrb[15].mxu1 }
  0xfa   :  { %v748_v14 = vpack.c.bf16 %v457_v30, %v454_v22  ;;  %v509_v48 = vmul.f32 %v457_v30, %v457_v30 }
  0xfb   :  { %v521_v38 = vadd.f32 %v520_v34, %v506_v33  ;;  %v484_v39 = vadd.f32 %v483_v32, %v449_v35  ;;  %v507_v40 = vmul.f32 %v449_v35, %v449_v35  ;;  %v743_v41 = vpack.c.bf16 %v449_v35, %v446_v26 }
  0xfc   :  { %771 = vst [vmem:[%s1071_s6 + $0x28] sm:$0xff] %v748_v14  }
  0xfd   :  { %v485_v43 = vadd.f32 %v484_v39, %v454_v22  ;;  %v522_v44 = vadd.f32 %v521_v38, %v507_v40  ;;  %770 = vst [vmem:[%s1071_s6 + $0x20] sm:$0xff] %v743_v41   ;;  %v838_v45 = vpop.f32.mrb[12].mxu0 }
  0xfe   :  { %v470_v46 = vadd.f32 %v838_v45, %v814_v29  ;;  %v461_v47 = vpop.f32.mrb[13].mxu0 }
  0xff   :  { %v523_v49 = vadd.f32 %v522_v44, %v508_v42  ;;  %v462_v50 = vadd.f32 %v461_v47, %v315_v12  ;;  %v486_v51 = vadd.f32 %v485_v43, %v457_v30  ;;  %v839_v52 = vpop.f32.mrb[14].mxu0 }
 0x100   :  { %v473_v53 = vadd.f32 %v839_v52, %v815_v36  ;;  %v464_v54 = vpop.f32.mrb[15].mxu0  ;;  %v512_v0 = vmul.f32 %v470_v46, %v470_v46 }
 0x101   :  { %v487_v55 = vadd.f32 %v486_v51, %v462_v50  ;;  %v510_v56 = vmul.f32 %v462_v50, %v462_v50  ;;  %v524_v57 = vadd.f32 %v523_v49, %v509_v48  ;;  %v465_v58 = vadd.f32 %v464_v54, %v318_v37 }
 0x102   :  { %v758_v59 = vpack.c.bf16 %v473_v53, %v470_v46  ;;  %v513_v3 = vmul.f32 %v473_v53, %v473_v53 }
 0x103   :  { %v525_v60 = vadd.f32 %v524_v57, %v510_v56  ;;  %v488_v61 = vadd.f32 %v487_v55, %v465_v58  ;;  %v511_v62 = vmul.f32 %v465_v58, %v465_v58  ;;  %v753_v63 = vpack.c.bf16 %v465_v58, %v462_v50 }
 0x104   :  { %773 = vst [vmem:[%s1071_s6 + $0x38] sm:$0xff] %v758_v59  }
 0x105   :  { %v489_v1 = vadd.f32 %v488_v61, %v470_v46  ;;  %v526_v2 = vadd.f32 %v525_v60, %v511_v62  ;;  %772 = vst [vmem:[%s1071_s6 + $0x30] sm:$0xff] %v753_v63  }
 0x107   :  { %v490_v4 = vadd.f32 %v489_v1, %v473_v53  ;;  %v527_v5 = vadd.f32 %v526_v2, %v512_v0 }
 0x109   :  { %v491_v6 = vrot.slane %v490_v4, 4  ;;  %v528_v7 = vadd.f32 %v527_v5, %v513_v3 }
 0x10b   :  { %v492_v8 = vadd.f32 %v491_v6, %v490_v4  ;;  %v529_v9 = vrot.slane %v528_v7, 4 }
 0x10d   :  { %v493_v10 = vrot.slane %v492_v8, 2  ;;  %v530_v11 = vadd.f32 %v529_v9, %v528_v7 }
 0x10f   :  { %v494_v13 = vadd.f32 %v493_v10, %v492_v8  ;;  %v531_v15 = vrot.slane %v530_v11, 2 }
 0x111   :  { %v495_v16 = vrot.slane %v494_v13, 1  ;;  %v532_v17 = vadd.f32 %v531_v15, %v530_v11 }
 0x113   :  { %v496_v18 = vadd.f32 %v495_v16, %v494_v13  ;;  %v533_v19 = vrot.slane %v532_v17, 1 }
 0x115   :  { %497 = vst [vmem:[%s1072_s7] sm:$0x1] %v496_v18  ;;  %v534_v20 = vadd.f32 %v533_v19, %v532_v17 }
 0x117   :  { %535 = vst [vmem:[%s1072_s7 + $0x1] sm:$0x1] %v534_v20 }

// kernel: trianglenet_seg_forward.9
= control target key start
LH: loop header
LB: loop body
LE: loop exit
PB: predicated region body
PF: predicated region fallthrough
CT: control target
= control target key end

     0   :  { %v1735_v1 = vmov 0   ;;  %vm277_vm0 = vcmask 1043456   ;;  %vm252_vm1 = vcmask 195584   ;;  %s2156_s5 = inlined_call_operand.vmem [shape: bf16[24,512], index: 5, kind: input, shape index: {}]   ;;  %s2157_s1 = inlined_call_operand.vmem [shape: bf16[128,24], index: 1, kind: input, shape index: {}]   ;;  %s2158_s4 = inlined_call_operand.vmem [shape: bf16[128,512], index: 4, kind: input, shape index: {}]   ;;  %s2159_s0 = inlined_call_operand.vmem [shape: bf16[128,128], index: 0, kind: input, shape index: {}]   ;;  %s2160_s2 = inlined_call_operand.vmem [shape: f32[1,128], index: 2, kind: input, shape index: {}]   ;;  %s2161_s3 = inlined_call_operand.vmem [shape: f32[1,128], index: 3, kind: input, shape index: {}]   ;;  %s2162_s6 = inlined_call_operand.vmem [shape: bf16[128,512], index: 6, kind: output, shape index: {0}]   ;;  %s2163_s7 = inlined_call_operand.vmem [shape: f32[1,2,512], index: 7, kind: output, shape index: {1}]  }
   0x1   :  { %v1669_v0 = vld [vmem:[%s2156_s5 + $0x4] ss:$16 sps:$4 sm:$0xff]   ;;  %322 = vmatprep.mubr.bf16.mxu0 %v1735_v1  ;;  %435 = vmatprep.mubr.bf16.mxu1 %v1735_v1  ;;  %v1671_v2 = vld [vmem:[%s2156_s5 + $0xc] ss:$16 sps:$4 sm:$0xff]   ;;  %v1673_v3 = vld [vmem:[%s2156_s5] ss:$16 sps:$4 sm:$0xff]  }
   0x2   :  { %290 = vmatprep.subr.bf16.mxu0 %v1669_v0  ;;  %v1674_v4 = vld [vmem:[%s2156_s5 + $0x8] ss:$16 sps:$4 sm:$0xff]   ;;  %v180_v5 = vld [vmem:[%s2156_s5 + $0x20] sm:$0xff]  ;;  %403 = vmatprep.subr.bf16.mxu1 %v1671_v2  ;;  %v1685_v15 = vld [vmem:[%s2158_s4 + $0xc] ss:$16 sps:$4 sm:$0xff]  }
   0x3   :  { %v1446_v6 = vcombine.high %v180_v5, %v180_v5  ;;  %v181_v7 = vld [vmem:[%s2156_s5 + $0x28] sm:$0xff]  ;;  %v1445_v8 = vcombine.low %v180_v5, %v180_v5  ;;  %291 = vmatpush1.bf16.msra.mxu0 %v1673_v3  ;;  %404 = vmatpush1.bf16.msra.mxu1 %v1674_v4  ;;  %v1682_v12 = vld [vmem:[%s2158_s4 + $0x4] ss:$16 sps:$4 sm:$0xff]   ;;  %v1680_v16 = vld [vmem:[%s2158_s4] ss:$16 sps:$4 sm:$0xff]  }
   0x4   :  { %v1448_v9 = vcombine.high %v181_v7, %v181_v7  ;;  %v1447_v10 = vcombine.low %v181_v7, %v181_v7  ;;  %v1679_v14 = vld [vmem:[%s2157_s1] sm:$0xff]   ;;  %v1683_v17 = vld [vmem:[%s2158_s4 + $0x8] ss:$16 sps:$4 sm:$0xff]   ;;  %v1692_v19 = vld [vmem:[%s2158_s4 + $0x2c] ss:$16 sps:$4 sm:$0xff]  }
   0x5   :  { %1449 = vmatprep.subr.msk.bf16.mxu0 %vm277_vm0, %v1446_v6  ;;  %v279_v11 = vsel %vm277_vm0, %v1445_v8, 0  ;;  %v1689_v18 = vld [vmem:[%s2158_s4 + $0x24] ss:$16 sps:$4 sm:$0xff]   ;;  %v1687_v20 = vld [vmem:[%s2158_s4 + $0x20] ss:$16 sps:$4 sm:$0xff]   ;;  %v1686_v24 = vld [vmem:[%s2157_s1 + $0x8] sm:$0xff]  }
   0x6   :  { %1458 = vmatprep.subr.msk.bf16.mxu1 %vm277_vm0, %v1448_v9  ;;  %v285_v13 = vsel %vm277_vm0, %v1447_v10, 0  ;;  %v1690_v21 = vld [vmem:[%s2158_s4 + $0x28] ss:$16 sps:$4 sm:$0xff]   ;;  %v1696_v22 = vld [vmem:[%s2158_s4 + $0x44] ss:$16 sps:$4 sm:$0xff]  }
   0x7   :  { %293 = vmatpush1.bf16.msra.mxu0 %v279_v11  ;;  %406 = vmatpush1.bf16.msra.mxu1 %v285_v13  ;;  %v1699_v23 = vld [vmem:[%s2158_s4 + $0x4c] ss:$16 sps:$4 sm:$0xff]   ;;  %v1694_v25 = vld [vmem:[%s2158_s4 + $0x40] ss:$16 sps:$4 sm:$0xff]   ;;  %v1697_v26 = vld [vmem:[%s2158_s4 + $0x48] ss:$16 sps:$4 sm:$0xff]  }
   0x8   :  { %676 = vmatprep.subr.bf16.mxu0 %v1682_v12  ;;  %789 = vmatprep.subr.bf16.mxu1 %v1685_v15  ;;  %v1703_v27 = vld [vmem:[%s2158_s4 + $0x64] ss:$16 sps:$4 sm:$0xff]   ;;  %v1706_v28 = vld [vmem:[%s2158_s4 + $0x6c] ss:$16 sps:$4 sm:$0xff]   ;;  %v1701_v29 = vld [vmem:[%s2158_s4 + $0x60] ss:$16 sps:$4 sm:$0xff]  }
   0x9   :  { %v1704_v30 = vld [vmem:[%s2158_s4 + $0x68] ss:$16 sps:$4 sm:$0xff]   ;;  %v1710_v31 = vld [vmem:[%s2158_s4 + $0x84] ss:$16 sps:$4 sm:$0xff]   ;;  %v1713_v32 = vld [vmem:[%s2158_s4 + $0x8c] ss:$16 sps:$4 sm:$0xff]  }
   0xa   :  { %1450 = vmatmul.mubr.msk.bf16.vlgmr.msra.gmra.mrb[0].mxu0 %vm252_vm1, %v1679_v14  ;;  %1459 = vmatmul.mubr.msk.bf16.vlgmr.msra.gmra.mrb[0].mxu1 %vm252_vm1, %v1679_v14  ;;  %v1693_v33 = vld [vmem:[%s2157_s1 + $0x10] sm:$0xff]   ;;  %v1711_v35 = vld [vmem:[%s2158_s4 + $0x88] ss:$16 sps:$4 sm:$0xff]   ;;  %v1720_v37 = vld [vmem:[%s2158_s4 + $0xac] ss:$16 sps:$4 sm:$0xff]  }
   0xb   :  { %677 = vmatpush1.bf16.msra.mxu0 %v1680_v16  ;;  %790 = vmatpush1.bf16.msra.mxu1 %v1683_v17  ;;  %v1708_v34 = vld [vmem:[%s2158_s4 + $0x80] ss:$16 sps:$4 sm:$0xff]   ;;  %v1717_v36 = vld [vmem:[%s2158_s4 + $0xa4] ss:$16 sps:$4 sm:$0xff]   ;;  %v1718_v39 = vld [vmem:[%s2158_s4 + $0xa8] ss:$16 sps:$4 sm:$0xff]  }
   0xc   :  { %332 = vmatprep.mubr.bf16.mxu0 %v1735_v1  ;;  %445 = vmatprep.mubr.bf16.mxu1 %v1735_v1  ;;  %v1715_v38 = vld [vmem:[%s2158_s4 + $0xa0] ss:$16 sps:$4 sm:$0xff]   ;;  %v1724_v40 = vld [vmem:[%s2158_s4 + $0xc4] ss:$16 sps:$4 sm:$0xff]   ;;  %v1727_v41 = vld [vmem:[%s2158_s4 + $0xcc] ss:$16 sps:$4 sm:$0xff]  }
   0xd   :  { %678 = vmatprep.subr.bf16.mxu0 %v1689_v18  ;;  %791 = vmatprep.subr.bf16.mxu1 %v1692_v19  ;;  %v1700_v42 = vld [vmem:[%s2157_s1 + $0x18] sm:$0xff]   ;;  %v1722_v43 = vld [vmem:[%s2158_s4 + $0xc0] ss:$16 sps:$4 sm:$0xff]   ;;  %v1731_v45 = vld [vmem:[%s2158_s4 + $0xe4] ss:$16 sps:$4 sm:$0xff]  }
   0xe   :  { %v1725_v44 = vld [vmem:[%s2158_s4 + $0xc8] ss:$16 sps:$4 sm:$0xff]   ;;  %v1734_v46 = vld [vmem:[%s2158_s4 + $0xec] ss:$16 sps:$4 sm:$0xff]   ;;  %v1729_v47 = vld [vmem:[%s2158_s4 + $0xe0] ss:$16 sps:$4 sm:$0xff]  }
   0xf   :  { %679 = vmatpush1.bf16.msra.mxu0 %v1687_v20  ;;  %792 = vmatpush1.bf16.msra.mxu1 %v1690_v21  ;;  %v1732_v48 = vld [vmem:[%s2158_s4 + $0xe8] ss:$16 sps:$4 sm:$0xff]   ;;  %v1707_v49 = vld [vmem:[%s2157_s1 + $0x20] sm:$0xff]   ;;  %v1721_v52 = vld [vmem:[%s2157_s1 + $0x30] sm:$0xff]  }
  0x10   :  { %680 = vmatprep.subr.bf16.mxu0 %v1696_v22  ;;  %793 = vmatprep.subr.bf16.mxu1 %v1699_v23  ;;  %v1714_v50 = vld [vmem:[%s2157_s1 + $0x28] sm:$0xff]   ;;  %v1565_v51 = vld [vmem:[%s2159_s0] sm:$0xff]   ;;  %v1728_v60 = vld [vmem:[%s2157_s1 + $0x38] sm:$0xff]  }
  0x11   :  { %v1566_v53 = vunpack.c.l.bf16 %v1565_v51  ;;  %v1567_v54 = vunpack.c.h.bf16 %v1565_v51  ;;  %v1944_v55 = vld [vmem:[%s2160_s2] ss:$0 sm:$0xff]  ;;  %v1596_v59 = vld [vmem:[%s2159_s0 + $0x8] sm:$0xff]   ;;  %v1597_v6 = vld [vmem:[%s2159_s0 + $0x10] sm:$0xff]  }
  0x12   :  { %1451 = vmatmul.mubr.msk.bf16.gmra.mrb[4].mxu0 %vm252_vm1, %v1686_v24  ;;  %1460 = vmatmul.mubr.msk.bf16.gmra.mrb[4].mxu1 %vm252_vm1, %v1686_v24  ;;  %v1955_v58 = vld [vmem:[%s2161_s3] ss:$0 sm:$0xff]  ;;  %v1570_v63 = vunpack.c.l.bf16 %v1596_v59  ;;  %v1571_v0 = vunpack.c.h.bf16 %v1596_v59  ;;  %v1574_v7 = vunpack.c.l.bf16 %v1597_v6  ;;  %v1575_v11 = vunpack.c.h.bf16 %v1597_v6  ;;  %v1598_v16 = vld [vmem:[%s2159_s0 + $0x18] sm:$0xff]  }
  0x13   :  { %342 = vmatprep.mubr.bf16.mxu0 %v1735_v1  ;;  %455 = vmatprep.mubr.bf16.mxu1 %v1735_v1  ;;  %v65_v56 = vmul.f32 %v1566_v53, %v1944_v55  ;;  %v66_v57 = vmul.f32 %v1567_v54, %v1944_v55  ;;  %v1578_v17 = vunpack.c.l.bf16 %v1598_v16  ;;  %v1579_v21 = vunpack.c.h.bf16 %v1598_v16 }
  0x14   :  { %681 = vmatpush1.bf16.msra.mxu0 %v1694_v25  ;;  %794 = vmatpush1.bf16.msra.mxu1 %v1697_v26  ;;  %v67_v4 = vmul.f32 %v1570_v63, %v1944_v55  ;;  %v68_v5 = vmul.f32 %v1571_v0, %v1944_v55  ;;  %v69_v14 = vmul.f32 %v1574_v7, %v1944_v55  ;;  %v1599_v26 = vld [vmem:[%s2159_s0 + $0x20] sm:$0xff]  }
  0x15   :  { %682 = vmatprep.subr.bf16.mxu0 %v1703_v27  ;;  %795 = vmatprep.subr.bf16.mxu1 %v1706_v28  ;;  %v88_v61 = vadd.f32 %v1955_v58, %v65_v56  ;;  %v89_v62 = vadd.f32 %v1955_v58, %v66_v57  ;;  %v70_v15 = vmul.f32 %v1575_v11, %v1944_v55  ;;  %v1582_v27 = vunpack.c.l.bf16 %v1599_v26  ;;  %v1602_v57 = vld [vmem:[%s2159_s0 + $0x38] sm:$0xff]  }
  0x16   :  { %v90_v9 = vadd.f32 %v1955_v58, %v67_v4  ;;  %v91_v10 = vadd.f32 %v1955_v58, %v68_v5  ;;  %v92_v19 = vadd.f32 %v1955_v58, %v69_v14  ;;  %v71_v24 = vmul.f32 %v1578_v17, %v1944_v55 }
  0x17   :  { %v104_v2 = vmax.f32 %v88_v61, 0.0  ;;  %v105_v3 = vmax.f32 %v89_v62, 0.0  ;;  %v93_v20 = vadd.f32 %v1955_v58, %v70_v15  ;;  %v72_v25 = vmul.f32 %v1579_v21, %v1944_v55 }
  0x18   :  { %683 = vmatpush1.bf16.msra.mxu0 %v1701_v29  ;;  %796 = vmatpush1.bf16.msra.mxu1 %v1704_v30  ;;  %v106_v12 = vmax.f32 %v90_v9, 0.0  ;;  %v107_v13 = vmax.f32 %v91_v10, 0.0  ;;  %v108_v22 = vmax.f32 %v92_v19, 0.0  ;;  %v94_v29 = vadd.f32 %v1955_v58, %v71_v24 }
  0x19   :  { %684 = vmatprep.subr.bf16.mxu0 %v1710_v31  ;;  %797 = vmatprep.subr.bf16.mxu1 %v1713_v32  ;;  %v120_v8 = vpack.c.bf16 %v105_v3, %v104_v2  ;;  %v109_v23 = vmax.f32 %v93_v20, 0.0  ;;  %v95_v30 = vadd.f32 %v1955_v58, %v72_v25  ;;  %v1583_v31 = vunpack.c.h.bf16 %v1599_v26 }
  0x1a   :  { %1452 = vmatmul.mubr.msk.bf16.gmra.mrb[8].mxu0 %vm252_vm1, %v1693_v33  ;;  %1461 = vmatmul.mubr.msk.bf16.gmra.mrb[8].mxu1 %vm252_vm1, %v1693_v33  ;;  %v121_v18 = vpack.c.bf16 %v107_v13, %v106_v12  ;;  %v73_v32 = vmul.f32 %v1582_v27, %v1944_v55  ;;  %v110_v33 = vmax.f32 %v94_v29, 0.0  ;;  %v1594_v59 = vunpack.c.l.bf16 %v1602_v57 }
  0x1b   :  { %352 = vmatprep.mubr.bf16.mxu0 %v1735_v1  ;;  %465 = vmatprep.mubr.bf16.mxu1 %v1735_v1  ;;  %v122_v28 = vpack.c.bf16 %v109_v23, %v108_v22  ;;  %v1595_v63 = vunpack.c.h.bf16 %v1602_v57 }
  0x1c   :  { %685 = vmatpush1.bf16.msra.mxu0 %v1708_v34  ;;  %798 = vmatpush1.bf16.msra.mxu1 %v1711_v35  ;;  %v111_v34 = vmax.f32 %v95_v30, 0.0  ;;  %v74_v35 = vmul.f32 %v1583_v31, %v1944_v55  ;;  %v79_v3 = vmul.f32 %v1594_v59, %v1944_v55 }
  0x1d   :  { %686 = vmatprep.subr.bf16.mxu0 %v1717_v36  ;;  %799 = vmatprep.subr.bf16.mxu1 %v1720_v37  ;;  %v1600_v36 = vld [vmem:[%s2159_s0 + $0x28] sm:$0xff]   ;;  %v96_v37 = vadd.f32 %v1955_v58, %v73_v32  ;;  %v80_v4 = vmul.f32 %v1595_v63, %v1944_v55 }
  0x1e   :  { %v102_v6 = vadd.f32 %v1955_v58, %v79_v3 }
  0x1f   :  { %v103_v7 = vadd.f32 %v1955_v58, %v80_v4 }
  0x20   :  { %687 = vmatpush1.bf16.msra.mxu0 %v1715_v38  ;;  %800 = vmatpush1.bf16.msra.mxu1 %v1718_v39  ;;  %v123_v38 = vpack.c.bf16 %v111_v34, %v110_v33  ;;  %v97_v39 = vadd.f32 %v1955_v58, %v74_v35 }
  0x21   :  { %688 = vmatprep.subr.bf16.mxu0 %v1724_v40  ;;  %801 = vmatprep.subr.bf16.mxu1 %v1727_v41  ;;  %v1586_v40 = vunpack.c.l.bf16 %v1600_v36  ;;  %v1587_v41 = vunpack.c.h.bf16 %v1600_v36  ;;  %v119_v9 = vmax.f32 %v103_v7, 0.0 }
  0x22   :  { %1453 = vmatmul.mubr.msk.bf16.gmra.mrb[12].mxu0 %vm252_vm1, %v1700_v42  ;;  %1462 = vmatmul.mubr.msk.bf16.gmra.mrb[12].mxu1 %vm252_vm1, %v1700_v42  ;;  %v112_v42 = vmax.f32 %v96_v37, 0.0 }
  0x23   :  { %362 = vmatprep.mubr.bf16.mxu0 %v1735_v1  ;;  %475 = vmatprep.mubr.bf16.mxu1 %v1735_v1 }
  0x24   :  { %689 = vmatpush1.bf16.msra.mxu0 %v1722_v43  ;;  %802 = vmatpush1.bf16.msra.mxu1 %v1725_v44  ;;  %v113_v43 = vmax.f32 %v97_v39, 0.0  ;;  %v75_v44 = vmul.f32 %v1586_v40, %v1944_v55 }
  0x25   :  { %690 = vmatprep.subr.bf16.mxu0 %v1731_v45  ;;  %803 = vmatprep.subr.bf16.mxu1 %v1734_v46  ;;  %v76_v45 = vmul.f32 %v1587_v41, %v1944_v55  ;;  %v1601_v46 = vld [vmem:[%s2159_s0 + $0x30] sm:$0xff]  }
  0x26   :  { %v1591_v51 = vunpack.c.h.bf16 %v1601_v46 }
  0x28   :  { %691 = vmatpush1.bf16.msra.mxu0 %v1729_v47  ;;  %804 = vmatpush1.bf16.msra.mxu1 %v1732_v48  ;;  %v1590_v47 = vunpack.c.l.bf16 %v1601_v46  ;;  %v124_v48 = vpack.c.bf16 %v113_v43, %v112_v42  ;;  %v78_v56 = vmul.f32 %v1591_v51, %v1944_v55 }
  0x2a   :  { %1454 = vmatmul.mubr.msk.bf16.gmra.mrb[16].mxu0 %vm252_vm1, %v1707_v49  ;;  %1463 = vmatmul.mubr.msk.bf16.gmra.mrb[16].mxu1 %vm252_vm1, %v1707_v49  ;;  %v98_v49 = vadd.f32 %v1955_v58, %v75_v44  ;;  %v77_v54 = vmul.f32 %v1590_v47, %v1944_v55  ;;  %v101_v62 = vadd.f32 %v1955_v58, %v78_v56 }
  0x2b   :  { %372 = vmatprep.mubr.bf16.mxu0 %v1735_v1  ;;  %485 = vmatprep.mubr.bf16.mxu1 %v1735_v1 }
  0x2c   :  { %v100_v61 = vadd.f32 %v1955_v58, %v77_v54  ;;  %v117_v2 = vmax.f32 %v101_v62, 0.0 }
  0x2e   :  { %v116_v0 = vmax.f32 %v100_v61, 0.0 }
  0x30   :  { %v126_v5 = vpack.c.bf16 %v117_v2, %v116_v0 }
  0x32   :  { %1455 = vmatmul.mubr.msk.bf16.gmra.mrb[20].mxu0 %vm252_vm1, %v1714_v50  ;;  %1464 = vmatmul.mubr.msk.bf16.gmra.mrb[20].mxu1 %vm252_vm1, %v1714_v50  ;;  %v99_v50 = vadd.f32 %v1955_v58, %v76_v45 }
  0x33   :  { %382 = vmatprep.mubr.bf16.mxu0 %v1735_v1  ;;  %495 = vmatprep.mubr.bf16.mxu1 %v1735_v1 }
  0x34   :  { %v115_v53 = vmax.f32 %v99_v50, 0.0 }
  0x3a   :  { %1456 = vmatmul.mubr.msk.bf16.gmra.mrb[24].mxu0 %vm252_vm1, %v1721_v52  ;;  %1465 = vmatmul.mubr.msk.bf16.gmra.mrb[24].mxu1 %vm252_vm1, %v1721_v52  ;;  %v114_v52 = vmax.f32 %v98_v49, 0.0 }
  0x3b   :  { %392 = vmatprep.mubr.bf16.mxu0 %v1735_v1  ;;  %505 = vmatprep.mubr.bf16.mxu1 %v1735_v1 }
  0x42   :  { %1457 = vmatmul.mubr.msk.bf16.gmra.mrb[28].mxu0 %vm252_vm1, %v1728_v60  ;;  %1466 = vmatmul.mubr.msk.bf16.gmra.mrb[28].mxu1 %vm252_vm1, %v1728_v60  ;;  %v125_v60 = vpack.c.bf16 %v115_v53, %v114_v52 }
  0x43   :  { %708 = vmatprep.mubr.bf16.mxu0 %v1735_v1  ;;  %821 = vmatprep.mubr.bf16.mxu1 %v1735_v1 }
  0x4a   :  { %709 = vmatmul.mubr.bf16.vlgmr.msra.gmra.mrb[0].mxu0 %v120_v8  ;;  %822 = vmatmul.mubr.bf16.vlgmr.msra.gmra.mrb[0].mxu1 %v120_v8  ;;  %v118_v8 = vmax.f32 %v102_v6, 0.0 }
  0x4b   :  { %718 = vmatprep.mubr.bf16.mxu0 %v1735_v1  ;;  %831 = vmatprep.mubr.bf16.mxu1 %v1735_v1 }
  0x4c   :  { %v127_v10 = vpack.c.bf16 %v119_v9, %v118_v8 }
  0x52   :  { %719 = vmatmul.mubr.bf16.gmra.mrb[4].mxu0 %v121_v18  ;;  %832 = vmatmul.mubr.bf16.gmra.mrb[4].mxu1 %v121_v18 }
  0x53   :  { %728 = vmatprep.mubr.bf16.mxu0 %v1735_v1  ;;  %841 = vmatprep.mubr.bf16.mxu1 %v1735_v1 }
  0x5a   :  { %729 = vmatmul.mubr.bf16.gmra.mrb[8].mxu0 %v122_v28  ;;  %842 = vmatmul.mubr.bf16.gmra.mrb[8].mxu1 %v122_v28 }
  0x5b   :  { %738 = vmatprep.mubr.bf16.mxu0 %v1735_v1  ;;  %851 = vmatprep.mubr.bf16.mxu1 %v1735_v1 }
  0x62   :  { %739 = vmatmul.mubr.bf16.gmra.mrb[12].mxu0 %v123_v38  ;;  %852 = vmatmul.mubr.bf16.gmra.mrb[12].mxu1 %v123_v38 }
  0x63   :  { %748 = vmatprep.mubr.bf16.mxu0 %v1735_v1  ;;  %861 = vmatprep.mubr.bf16.mxu1 %v1735_v1 }
  0x6a   :  { %749 = vmatmul.mubr.bf16.gmra.mrb[16].mxu0 %v124_v48  ;;  %862 = vmatmul.mubr.bf16.gmra.mrb[16].mxu1 %v124_v48 }
  0x6b   :  { %758 = vmatprep.mubr.bf16.mxu0 %v1735_v1  ;;  %871 = vmatprep.mubr.bf16.mxu1 %v1735_v1 }
  0x72   :  { %759 = vmatmul.mubr.bf16.gmra.mrb[20].mxu0 %v125_v60  ;;  %872 = vmatmul.mubr.bf16.gmra.mrb[20].mxu1 %v125_v60 }
  0x73   :  { %768 = vmatprep.mubr.bf16.mxu0 %v1735_v1  ;;  %881 = vmatprep.mubr.bf16.mxu1 %v1735_v1 }
  0x7a   :  { %769 = vmatmul.mubr.bf16.gmra.mrb[24].mxu0 %v126_v5  ;;  %882 = vmatmul.mubr.bf16.gmra.mrb[24].mxu1 %v126_v5 }
  0x7b   :  { %778 = vmatprep.mubr.bf16.mxu0 %v1735_v1  ;;  %891 = vmatprep.mubr.bf16.mxu1 %v1735_v1 }
  0x82   :  { %779 = vmatmul.mubr.bf16.gmra.mrb[28].mxu0 %v127_v10  ;;  %892 = vmatmul.mubr.bf16.gmra.mrb[28].mxu1 %v127_v10 }
 0x11d   :  { %v710_v55 = vpop.f32.mrb[0].mxu0  ;;  %v823_v11 = vpop.f32.mrb[0].mxu1 }
 0x11e   :  { %v1020_v12 = vmul.f32 %v710_v55, %v710_v55  ;;  %v1022_v13 = vmul.f32 %v823_v11, %v823_v11  ;;  %v712_v14 = vpop.f32.mrb[1].mxu0  ;;  %v825_v15 = vpop.f32.mrb[1].mxu1 }
 0x11f   :  { %v1021_v16 = vmul.f32 %v712_v14, %v712_v14  ;;  %v1532_v17 = vpack.c.bf16 %v712_v14, %v710_v55  ;;  %v1023_v58 = vmul.f32 %v825_v15, %v825_v15  ;;  %v1533_v18 = vpack.c.bf16 %v825_v15, %v823_v11  ;;  %v714_v19 = vpop.f32.mrb[2].mxu0  ;;  %v827_v20 = vpop.f32.mrb[2].mxu1 }
 0x120   :  { %v902_v21 = vadd.f32 %v714_v19, %v710_v55  ;;  %v1024_v22 = vmul.f32 %v714_v19, %v714_v19  ;;  %v944_v23 = vadd.f32 %v827_v20, %v823_v11  ;;  %v1026_v24 = vmul.f32 %v827_v20, %v827_v20  ;;  %v716_v1 = vpop.f32.mrb[3].mxu0  ;;  %v829_v25 = vpop.f32.mrb[3].mxu1 }
 0x121   :  { %1391 = vst [vmem:[%s2162_s6] sm:$0xff] %v1532_v17  ;;  %1392 = vst [vmem:[%s2162_s6 + $0x8] sm:$0xff] %v1533_v18  ;;  %v923_v26 = vadd.f32 %v716_v1, %v712_v14  ;;  %v1025_v27 = vmul.f32 %v716_v1, %v716_v1  ;;  %v1534_v28 = vpack.c.bf16 %v716_v1, %v714_v19 }
 0x122   :  { %v965_v29 = vadd.f32 %v829_v25, %v825_v15  ;;  %v1084_v30 = vadd.f32 %v1024_v22, %v1020_v12  ;;  %v1126_v31 = vadd.f32 %v1026_v24, %v1022_v13  ;;  %v1027_v32 = vmul.f32 %v829_v25, %v829_v25 }
 0x123   :  { %v1535_v33 = vpack.c.bf16 %v829_v25, %v827_v20  ;;  %v1105_v34 = vadd.f32 %v1025_v27, %v1021_v16  ;;  %1393 = vst [vmem:[%s2162_s6 + $0x10] sm:$0xff] %v1534_v28 }
 0x124   :  { %v1147_v35 = vadd.f32 %v1027_v32, %v1023_v58 }
 0x125   :  { %1394 = vst [vmem:[%s2162_s6 + $0x18] sm:$0xff] %v1535_v33  ;;  %v720_v36 = vpop.f32.mrb[4].mxu0  ;;  %v833_v37 = vpop.f32.mrb[4].mxu1 }
 0x126   :  { %v903_v38 = vadd.f32 %v902_v21, %v720_v36  ;;  %v1028_v39 = vmul.f32 %v720_v36, %v720_v36  ;;  %v945_v40 = vadd.f32 %v944_v23, %v833_v37  ;;  %v1030_v41 = vmul.f32 %v833_v37, %v833_v37  ;;  %v722_v42 = vpop.f32.mrb[5].mxu0  ;;  %v835_v43 = vpop.f32.mrb[5].mxu1 }
 0x127   :  { %v924_v44 = vadd.f32 %v923_v26, %v722_v42  ;;  %v1029_v45 = vmul.f32 %v722_v42, %v722_v42  ;;  %v1536_v46 = vpack.c.bf16 %v722_v42, %v720_v36  ;;  %v966_v47 = vadd.f32 %v965_v29, %v835_v43  ;;  %v724_v48 = vpop.f32.mrb[6].mxu0  ;;  %v837_v49 = vpop.f32.mrb[6].mxu1 }
 0x128   :  { %v1085_v50 = vadd.f32 %v1084_v30, %v1028_v39  ;;  %v1127_v51 = vadd.f32 %v1126_v31, %v1030_v41  ;;  %v1031_v52 = vmul.f32 %v835_v43, %v835_v43  ;;  %v1537_v53 = vpack.c.bf16 %v835_v43, %v833_v37  ;;  %v726_v54 = vpop.f32.mrb[7].mxu0  ;;  %v839_v56 = vpop.f32.mrb[7].mxu1 }
 0x129   :  { %v1106_v57 = vadd.f32 %v1105_v34, %v1029_v45  ;;  %1395 = vst [vmem:[%s2162_s6 + $0x20] sm:$0xff] %v1536_v46  ;;  %v904_v59 = vadd.f32 %v903_v38, %v724_v48  ;;  %v1032_v60 = vmul.f32 %v724_v48, %v724_v48  ;;  %v946_v61 = vadd.f32 %v945_v40, %v837_v49 }
 0x12a   :  { %v1148_v62 = vadd.f32 %v1147_v35, %v1031_v52  ;;  %1396 = vst [vmem:[%s2162_s6 + $0x28] sm:$0xff] %v1537_v53  ;;  %v1034_v63 = vmul.f32 %v837_v49, %v837_v49  ;;  %v925_v0 = vadd.f32 %v924_v44, %v726_v54  ;;  %v1033_v2 = vmul.f32 %v726_v54, %v726_v54 }
 0x12b   :  { %v1086_v3 = vadd.f32 %v1085_v50, %v1032_v60  ;;  %v1538_v4 = vpack.c.bf16 %v726_v54, %v724_v48  ;;  %v967_v5 = vadd.f32 %v966_v47, %v839_v56  ;;  %v1035_v6 = vmul.f32 %v839_v56, %v839_v56 }
 0x12c   :  { %v1128_v7 = vadd.f32 %v1127_v51, %v1034_v63  ;;  %v1107_v8 = vadd.f32 %v1106_v57, %v1033_v2  ;;  %v1539_v9 = vpack.c.bf16 %v839_v56, %v837_v49 }
 0x12d   :  { %1397 = vst [vmem:[%s2162_s6 + $0x30] sm:$0xff] %v1538_v4  ;;  %v1149_v10 = vadd.f32 %v1148_v62, %v1035_v6  ;;  %v730_v55 = vpop.f32.mrb[8].mxu0  ;;  %v843_v11 = vpop.f32.mrb[8].mxu1 }
 0x12e   :  { %1398 = vst [vmem:[%s2162_s6 + $0x38] sm:$0xff] %v1539_v9  ;;  %v905_v12 = vadd.f32 %v904_v59, %v730_v55  ;;  %v1036_v13 = vmul.f32 %v730_v55, %v730_v55  ;;  %v947_v14 = vadd.f32 %v946_v61, %v843_v11  ;;  %v1038_v15 = vmul.f32 %v843_v11, %v843_v11  ;;  %v732_v16 = vpop.f32.mrb[9].mxu0  ;;  %v845_v17 = vpop.f32.mrb[9].mxu1 }
 0x12f   :  { %v926_v58 = vadd.f32 %v925_v0, %v732_v16  ;;  %v1037_v18 = vmul.f32 %v732_v16, %v732_v16  ;;  %v1540_v19 = vpack.c.bf16 %v732_v16, %v730_v55  ;;  %v968_v20 = vadd.f32 %v967_v5, %v845_v17  ;;  %v734_v21 = vpop.f32.mrb[10].mxu0  ;;  %v847_v22 = vpop.f32.mrb[10].mxu1 }
 0x130   :  { %v1087_v23 = vadd.f32 %v1086_v3, %v1036_v13  ;;  %v1129_v24 = vadd.f32 %v1128_v7, %v1038_v15  ;;  %v1039_v1 = vmul.f32 %v845_v17, %v845_v17  ;;  %v1541_v25 = vpack.c.bf16 %v845_v17, %v843_v11  ;;  %v736_v26 = vpop.f32.mrb[11].mxu0  ;;  %v849_v27 = vpop.f32.mrb[11].mxu1 }
 0x131   :  { %v1108_v28 = vadd.f32 %v1107_v8, %v1037_v18  ;;  %1399 = vst [vmem:[%s2162_s6 + $0x40] sm:$0xff] %v1540_v19  ;;  %v906_v29 = vadd.f32 %v905_v12, %v734_v21  ;;  %v1040_v30 = vmul.f32 %v734_v21, %v734_v21  ;;  %v948_v31 = vadd.f32 %v947_v14, %v847_v22 }
 0x132   :  { %v1150_v32 = vadd.f32 %v1149_v10, %v1039_v1  ;;  %1400 = vst [vmem:[%s2162_s6 + $0x48] sm:$0xff] %v1541_v25  ;;  %v1042_v33 = vmul.f32 %v847_v22, %v847_v22  ;;  %v927_v34 = vadd.f32 %v926_v58, %v736_v26  ;;  %v1041_v35 = vmul.f32 %v736_v26, %v736_v26 }
 0x133   :  { %v1088_v36 = vadd.f32 %v1087_v23, %v1040_v30  ;;  %v1542_v37 = vpack.c.bf16 %v736_v26, %v734_v21  ;;  %v969_v38 = vadd.f32 %v968_v20, %v849_v27  ;;  %v1043_v39 = vmul.f32 %v849_v27, %v849_v27 }
 0x134   :  { %v1130_v40 = vadd.f32 %v1129_v24, %v1042_v33  ;;  %v1109_v41 = vadd.f32 %v1108_v28, %v1041_v35  ;;  %v1543_v42 = vpack.c.bf16 %v849_v27, %v847_v22 }
 0x135   :  { %1401 = vst [vmem:[%s2162_s6 + $0x50] sm:$0xff] %v1542_v37  ;;  %v1151_v43 = vadd.f32 %v1150_v32, %v1043_v39  ;;  %v740_v44 = vpop.f32.mrb[12].mxu0  ;;  %v853_v45 = vpop.f32.mrb[12].mxu1 }
 0x136   :  { %1402 = vst [vmem:[%s2162_s6 + $0x58] sm:$0xff] %v1543_v42  ;;  %v907_v46 = vadd.f32 %v906_v29, %v740_v44  ;;  %v1044_v47 = vmul.f32 %v740_v44, %v740_v44  ;;  %v949_v48 = vadd.f32 %v948_v31, %v853_v45  ;;  %v1046_v49 = vmul.f32 %v853_v45, %v853_v45  ;;  %v742_v50 = vpop.f32.mrb[13].mxu0  ;;  %v855_v51 = vpop.f32.mrb[13].mxu1 }
 0x137   :  { %v928_v52 = vadd.f32 %v927_v34, %v742_v50  ;;  %v1045_v53 = vmul.f32 %v742_v50, %v742_v50  ;;  %v1544_v54 = vpack.c.bf16 %v742_v50, %v740_v44  ;;  %v970_v56 = vadd.f32 %v969_v38, %v855_v51  ;;  %v744_v57 = vpop.f32.mrb[14].mxu0  ;;  %v857_v59 = vpop.f32.mrb[14].mxu1 }
 0x138   :  { %v1089_v60 = vadd.f32 %v1088_v36, %v1044_v47  ;;  %v1131_v61 = vadd.f32 %v1130_v40, %v1046_v49  ;;  %v1047_v62 = vmul.f32 %v855_v51, %v855_v51  ;;  %v1545_v63 = vpack.c.bf16 %v855_v51, %v853_v45  ;;  %v746_v0 = vpop.f32.mrb[15].mxu0  ;;  %v859_v2 = vpop.f32.mrb[15].mxu1 }
 0x139   :  { %v1110_v3 = vadd.f32 %v1109_v41, %v1045_v53  ;;  %1403 = vst [vmem:[%s2162_s6 + $0x60] sm:$0xff] %v1544_v54  ;;  %v908_v4 = vadd.f32 %v907_v46, %v744_v57  ;;  %v1048_v5 = vmul.f32 %v744_v57, %v744_v57  ;;  %v950_v6 = vadd.f32 %v949_v48, %v857_v59 }
 0x13a   :  { %v1152_v7 = vadd.f32 %v1151_v43, %v1047_v62  ;;  %1404 = vst [vmem:[%s2162_s6 + $0x68] sm:$0xff] %v1545_v63  ;;  %v1050_v8 = vmul.f32 %v857_v59, %v857_v59  ;;  %v929_v9 = vadd.f32 %v928_v52, %v746_v0  ;;  %v1049_v10 = vmul.f32 %v746_v0, %v746_v0 }
 0x13b   :  { %v1090_v55 = vadd.f32 %v1089_v60, %v1048_v5  ;;  %v1546_v11 = vpack.c.bf16 %v746_v0, %v744_v57  ;;  %v971_v12 = vadd.f32 %v970_v56, %v859_v2  ;;  %v1051_v13 = vmul.f32 %v859_v2, %v859_v2 }
 0x13c   :  { %v1132_v14 = vadd.f32 %v1131_v61, %v1050_v8  ;;  %v1111_v15 = vadd.f32 %v1110_v3, %v1049_v10  ;;  %v1547_v16 = vpack.c.bf16 %v859_v2, %v857_v59  ;;  %v1736_v54 = vmov 1966171168  }
 0x13d   :  { %1405 = vst [vmem:[%s2162_s6 + $0x70] sm:$0xff] %v1546_v11  ;;  %v1153_v17 = vadd.f32 %v1152_v7, %v1051_v13  ;;  %v750_v58 = vpop.f32.mrb[16].mxu0  ;;  %v863_v18 = vpop.f32.mrb[16].mxu1  ;;  %v2086_v56 = vunpack.c.l.s4 %v1736_v54  ;;  %v995_v57 = vlaneseq }
 0x13e   :  { %1406 = vst [vmem:[%s2162_s6 + $0x78] sm:$0xff] %v1547_v16  ;;  %v909_v19 = vadd.f32 %v908_v4, %v750_v58  ;;  %v1052_v20 = vmul.f32 %v750_v58, %v750_v58  ;;  %v951_v21 = vadd.f32 %v950_v6, %v863_v18  ;;  %v1054_v22 = vmul.f32 %v863_v18, %v863_v18  ;;  %v752_v23 = vpop.f32.mrb[17].mxu0  ;;  %v865_v24 = vpop.f32.mrb[17].mxu1 }
 0x13f   :  { %v930_v1 = vadd.f32 %v929_v9, %v752_v23  ;;  %v1053_v25 = vmul.f32 %v752_v23, %v752_v23  ;;  %v1548_v26 = vpack.c.bf16 %v752_v23, %v750_v58  ;;  %v972_v27 = vadd.f32 %v971_v12, %v865_v24  ;;  %v754_v28 = vpop.f32.mrb[18].mxu0  ;;  %v867_v29 = vpop.f32.mrb[18].mxu1 }
 0x140   :  { %v1091_v30 = vadd.f32 %v1090_v55, %v1052_v20  ;;  %v1133_v31 = vadd.f32 %v1132_v14, %v1054_v22  ;;  %v1055_v32 = vmul.f32 %v865_v24, %v865_v24  ;;  %v1549_v33 = vpack.c.bf16 %v865_v24, %v863_v18  ;;  %v756_v34 = vpop.f32.mrb[19].mxu0  ;;  %v869_v35 = vpop.f32.mrb[19].mxu1 }
 0x141   :  { %v1112_v36 = vadd.f32 %v1111_v15, %v1053_v25  ;;  %1407 = vst [vmem:[%s2162_s6 + $0x80] sm:$0xff] %v1548_v26  ;;  %v910_v37 = vadd.f32 %v909_v19, %v754_v28  ;;  %v1056_v38 = vmul.f32 %v754_v28, %v754_v28  ;;  %v952_v39 = vadd.f32 %v951_v21, %v867_v29 }
 0x142   :  { %v1154_v40 = vadd.f32 %v1153_v17, %v1055_v32  ;;  %1408 = vst [vmem:[%s2162_s6 + $0x88] sm:$0xff] %v1549_v33  ;;  %v1058_v41 = vmul.f32 %v867_v29, %v867_v29  ;;  %v931_v42 = vadd.f32 %v930_v1, %v756_v34  ;;  %v1057_v43 = vmul.f32 %v756_v34, %v756_v34 }
 0x143   :  { %v1092_v44 = vadd.f32 %v1091_v30, %v1056_v38  ;;  %v1550_v45 = vpack.c.bf16 %v756_v34, %v754_v28  ;;  %v973_v46 = vadd.f32 %v972_v27, %v869_v35  ;;  %v1059_v47 = vmul.f32 %v869_v35, %v869_v35 }
 0x144   :  { %v1134_v48 = vadd.f32 %v1133_v31, %v1058_v41  ;;  %v1113_v49 = vadd.f32 %v1112_v36, %v1057_v43  ;;  %v1551_v50 = vpack.c.bf16 %v869_v35, %v867_v29  ;;  %v994_v29 = vunpack.c.0.s8 %v2086_v56 }
 0x145   :  { %1409 = vst [vmem:[%s2162_s6 + $0x90] sm:$0xff] %v1550_v45  ;;  %v1155_v51 = vadd.f32 %v1154_v40, %v1059_v47  ;;  %v760_v52 = vpop.f32.mrb[20].mxu0  ;;  %v873_v53 = vpop.f32.mrb[20].mxu1  ;;  %v996_v30 = vshrl.u32 %v995_v57, 7  ;;  %vm1017_vm2 = vcmp.lt.s32.totalorder %v995_v57, 512 }
 0x146   :  { %1410 = vst [vmem:[%s2162_s6 + $0x98] sm:$0xff] %v1551_v50  ;;  %v911_v59 = vadd.f32 %v910_v37, %v760_v52  ;;  %v1060_v60 = vmul.f32 %v760_v52, %v760_v52  ;;  %v953_v61 = vadd.f32 %v952_v39, %v873_v53  ;;  %v1062_v62 = vmul.f32 %v873_v53, %v873_v53  ;;  %v762_v63 = vpop.f32.mrb[21].mxu0  ;;  %v875_v0 = vpop.f32.mrb[21].mxu1 }
 0x147   :  { %v932_v2 = vadd.f32 %v931_v42, %v762_v63  ;;  %v1061_v3 = vmul.f32 %v762_v63, %v762_v63  ;;  %v1552_v4 = vpack.c.bf16 %v762_v63, %v760_v52  ;;  %v974_v5 = vadd.f32 %v973_v46, %v875_v0  ;;  %v764_v6 = vpop.f32.mrb[22].mxu0  ;;  %v877_v7 = vpop.f32.mrb[22].mxu1 }
 0x148   :  { %v1093_v8 = vadd.f32 %v1092_v44, %v1060_v60  ;;  %v1135_v9 = vadd.f32 %v1134_v48, %v1062_v62  ;;  %v1063_v10 = vmul.f32 %v875_v0, %v875_v0  ;;  %v1553_v55 = vpack.c.bf16 %v875_v0, %v873_v53  ;;  %v766_v11 = vpop.f32.mrb[23].mxu0  ;;  %v879_v12 = vpop.f32.mrb[23].mxu1 }
 0x149   :  { %v1114_v13 = vadd.f32 %v1113_v49, %v1061_v3  ;;  %1411 = vst [vmem:[%s2162_s6 + $0xa0] sm:$0xff] %v1552_v4  ;;  %v912_v14 = vadd.f32 %v911_v59, %v764_v6  ;;  %v1064_v15 = vmul.f32 %v764_v6, %v764_v6  ;;  %v954_v16 = vadd.f32 %v953_v61, %v877_v7 }
 0x14a   :  { %v1156_v17 = vadd.f32 %v1155_v51, %v1063_v10  ;;  %1412 = vst [vmem:[%s2162_s6 + $0xa8] sm:$0xff] %v1553_v55  ;;  %v1066_v58 = vmul.f32 %v877_v7, %v877_v7  ;;  %v933_v18 = vadd.f32 %v932_v2, %v766_v11  ;;  %v1065_v19 = vmul.f32 %v766_v11, %v766_v11 }
 0x14b   :  { %v1094_v20 = vadd.f32 %v1093_v8, %v1064_v15  ;;  %v1554_v21 = vpack.c.bf16 %v766_v11, %v764_v6  ;;  %v975_v22 = vadd.f32 %v974_v5, %v879_v12  ;;  %v1067_v23 = vmul.f32 %v879_v12, %v879_v12 }
 0x14c   :  { %v1136_v24 = vadd.f32 %v1135_v9, %v1066_v58  ;;  %v1115_v1 = vadd.f32 %v1114_v13, %v1065_v19  ;;  %v1555_v25 = vpack.c.bf16 %v879_v12, %v877_v7  ;;  %v2114_v7 = vsub.s32 %v994_v29, %v996_v30 }
 0x14d   :  { %1413 = vst [vmem:[%s2162_s6 + $0xb0] sm:$0xff] %v1554_v21  ;;  %v1157_v26 = vadd.f32 %v1156_v17, %v1067_v23  ;;  %v770_v27 = vpop.f32.mrb[24].mxu0  ;;  %v883_v28 = vpop.f32.mrb[24].mxu1 }
 0x14e   :  { %1414 = vst [vmem:[%s2162_s6 + $0xb8] sm:$0xff] %v1555_v25  ;;  %v913_v31 = vadd.f32 %v912_v14, %v770_v27  ;;  %v1068_v32 = vmul.f32 %v770_v27, %v770_v27  ;;  %v955_v33 = vadd.f32 %v954_v16, %v883_v28  ;;  %v1070_v34 = vmul.f32 %v883_v28, %v883_v28  ;;  %v772_v35 = vpop.f32.mrb[25].mxu0  ;;  %v885_v36 = vpop.f32.mrb[25].mxu1 }
 0x14f   :  { %v934_v37 = vadd.f32 %v933_v18, %v772_v35  ;;  %v1069_v38 = vmul.f32 %v772_v35, %v772_v35  ;;  %v1556_v39 = vpack.c.bf16 %v772_v35, %v770_v27  ;;  %v976_v40 = vadd.f32 %v975_v22, %v885_v36  ;;  %v774_v41 = vpop.f32.mrb[26].mxu0  ;;  %v887_v42 = vpop.f32.mrb[26].mxu1 }
 0x150   :  { %v1095_v43 = vadd.f32 %v1094_v20, %v1068_v32  ;;  %v1137_v44 = vadd.f32 %v1136_v24, %v1070_v34  ;;  %v1071_v45 = vmul.f32 %v885_v36, %v885_v36  ;;  %v1557_v46 = vpack.c.bf16 %v885_v36, %v883_v28  ;;  %v776_v47 = vpop.f32.mrb[27].mxu0  ;;  %v889_v48 = vpop.f32.mrb[27].mxu1 }
 0x151   :  { %v1116_v49 = vadd.f32 %v1115_v1, %v1069_v38  ;;  %1415 = vst [vmem:[%s2162_s6 + $0xc0] sm:$0xff] %v1556_v39  ;;  %v914_v50 = vadd.f32 %v913_v31, %v774_v41  ;;  %v1072_v51 = vmul.f32 %v774_v41, %v774_v41  ;;  %v956_v52 = vadd.f32 %v955_v33, %v887_v42 }
 0x152   :  { %v1158_v53 = vadd.f32 %v1157_v26, %v1071_v45  ;;  %1416 = vst [vmem:[%s2162_s6 + $0xc8] sm:$0xff] %v1557_v46  ;;  %v1074_v54 = vmul.f32 %v887_v42, %v887_v42  ;;  %v935_v56 = vadd.f32 %v934_v37, %v776_v47  ;;  %v1073_v59 = vmul.f32 %v776_v47, %v776_v47 }
 0x153   :  { %v1096_v60 = vadd.f32 %v1095_v43, %v1072_v51  ;;  %v1558_v61 = vpack.c.bf16 %v776_v47, %v774_v41  ;;  %v977_v62 = vadd.f32 %v976_v40, %v889_v48  ;;  %v1075_v63 = vmul.f32 %v889_v48, %v889_v48 }
 0x154   :  { %v1138_v0 = vadd.f32 %v1137_v44, %v1074_v54  ;;  %v1117_v2 = vadd.f32 %v1116_v49, %v1073_v59  ;;  %v1559_v3 = vpack.c.bf16 %v889_v48, %v887_v42 }
 0x155   :  { %1417 = vst [vmem:[%s2162_s6 + $0xd0] sm:$0xff] %v1558_v61  ;;  %v1159_v4 = vadd.f32 %v1158_v53, %v1075_v63  ;;  %v780_v5 = vpop.f32.mrb[28].mxu0  ;;  %v893_v6 = vpop.f32.mrb[28].mxu1 }
 0x156   :  { %1418 = vst [vmem:[%s2162_s6 + $0xd8] sm:$0xff] %v1559_v3  ;;  %v915_v8 = vadd.f32 %v914_v50, %v780_v5  ;;  %v1076_v9 = vmul.f32 %v780_v5, %v780_v5  ;;  %v957_v10 = vadd.f32 %v956_v52, %v893_v6  ;;  %v1078_v55 = vmul.f32 %v893_v6, %v893_v6  ;;  %v782_v11 = vpop.f32.mrb[29].mxu0  ;;  %v895_v12 = vpop.f32.mrb[29].mxu1 }
 0x157   :  { %v936_v13 = vadd.f32 %v935_v56, %v782_v11  ;;  %v1077_v14 = vmul.f32 %v782_v11, %v782_v11  ;;  %v1560_v15 = vpack.c.bf16 %v782_v11, %v780_v5  ;;  %v978_v16 = vadd.f32 %v977_v62, %v895_v12  ;;  %v784_v17 = vpop.f32.mrb[30].mxu0  ;;  %v2119_v58 = vpop.f32.mrb[30].mxu1 }
 0x158   :  { %v1097_v18 = vadd.f32 %v1096_v60, %v1076_v9  ;;  %v1139_v19 = vadd.f32 %v1138_v0, %v1078_v55  ;;  %v1079_v20 = vmul.f32 %v895_v12, %v895_v12  ;;  %v1561_v21 = vpack.c.bf16 %v895_v12, %v893_v6  ;;  %v786_v22 = vpop.f32.mrb[31].mxu0  ;;  %v2121_v23 = vpop.f32.mrb[31].mxu1 }
 0x159   :  { %v1118_v24 = vadd.f32 %v1117_v2, %v1077_v14  ;;  %1419 = vst [vmem:[%s2162_s6 + $0xe0] sm:$0xff] %v1560_v15  ;;  %v916_v1 = vadd.f32 %v915_v8, %v784_v17  ;;  %v1080_v25 = vmul.f32 %v784_v17, %v784_v17  ;;  %v958_v26 = vadd.f32 %v957_v10, %v2119_v58 }
 0x15a   :  { %v1160_v27 = vadd.f32 %v1159_v4, %v1079_v20  ;;  %1420 = vst [vmem:[%s2162_s6 + $0xe8] sm:$0xff] %v1561_v21  ;;  %v1082_v28 = vmul.f32 %v2119_v58, %v2119_v58  ;;  %v937_v29 = vadd.f32 %v936_v13, %v786_v22  ;;  %v1081_v30 = vmul.f32 %v786_v22, %v786_v22 }
 0x15b   :  { %v917_v31 = vrot.slane %v916_v1, 4  ;;  %v1098_v32 = vadd.f32 %v1097_v18, %v1080_v25  ;;  %v959_v33 = vrot.slane %v958_v26, 4  ;;  %v1562_v34 = vpack.c.bf16 %v786_v22, %v784_v17 }
 0x15c   :  { %v1140_v35 = vadd.f32 %v1139_v19, %v1082_v28  ;;  %v938_v36 = vrot.slane %v937_v29, 4  ;;  %v1119_v37 = vadd.f32 %v1118_v24, %v1081_v30  ;;  %v979_v38 = vadd.f32 %v978_v16, %v2121_v23 }
 0x15d   :  { %v918_v39 = vadd.f32 %v917_v31, %v916_v1  ;;  %v1099_v40 = vrot.slane %v1098_v32, 4  ;;  %v960_v41 = vadd.f32 %v959_v33, %v958_v26  ;;  %1421 = vst [vmem:[%s2162_s6 + $0xf0] sm:$0xff] %v1562_v34  ;;  %v1083_v42 = vmul.f32 %v2121_v23, %v2121_v23 }
 0x15e   :  { %v1141_v43 = vrot.slane %v1140_v35, 4  ;;  %v939_v44 = vadd.f32 %v938_v36, %v937_v29  ;;  %v1120_v45 = vrot.slane %v1119_v37, 4  ;;  %v980_v46 = vrot.slane %v979_v38, 4 }
 0x15f   :  { %v919_v47 = vrot.slane %v918_v39, 2  ;;  %v1100_v48 = vadd.f32 %v1099_v40, %v1098_v32  ;;  %v961_v49 = vrot.slane %v960_v41, 2  ;;  %v1161_v50 = vadd.f32 %v1160_v27, %v1083_v42 }
 0x160   :  { %v1142_v51 = vadd.f32 %v1141_v43, %v1140_v35  ;;  %v940_v52 = vrot.slane %v939_v44, 2  ;;  %v1121_v53 = vadd.f32 %v1120_v45, %v1119_v37  ;;  %v981_v54 = vadd.f32 %v980_v46, %v979_v38 }
 0x161   :  { %v920_v56 = vadd.f32 %v919_v47, %v918_v39  ;;  %v1101_v59 = vrot.slane %v1100_v48, 2  ;;  %v962_v60 = vadd.f32 %v961_v49, %v960_v41  ;;  %v1162_v61 = vrot.slane %v1161_v50, 4 }
 0x162   :  { %v1143_v62 = vrot.slane %v1142_v51, 2  ;;  %v941_v63 = vadd.f32 %v940_v52, %v939_v44  ;;  %v1122_v0 = vrot.slane %v1121_v53, 2  ;;  %v982_v2 = vrot.slane %v981_v54, 2 }
 0x163   :  { %v921_v3 = vrot.slane %v920_v56, 1  ;;  %v1102_v4 = vadd.f32 %v1101_v59, %v1100_v48  ;;  %v963_v5 = vrot.slane %v962_v60, 1  ;;  %v1163_v6 = vadd.f32 %v1162_v61, %v1161_v50 }
 0x164   :  { %v1144_v8 = vadd.f32 %v1143_v62, %v1142_v51  ;;  %v942_v9 = vrot.slane %v941_v63, 1  ;;  %v1123_v10 = vadd.f32 %v1122_v0, %v1121_v53  ;;  %v983_v55 = vadd.f32 %v982_v2, %v981_v54 }
 0x165   :  { %v922_v11 = vadd.f32 %v921_v3, %v920_v56  ;;  %v1103_v12 = vrot.slane %v1102_v4, 1  ;;  %v964_v13 = vadd.f32 %v963_v5, %v962_v60  ;;  %v1164_v14 = vrot.slane %v1163_v6, 2 }
 0x166   :  { %v1145_v15 = vrot.slane %v1144_v8, 1  ;;  %v943_v16 = vadd.f32 %v942_v9, %v941_v63  ;;  %v1124_v17 = vrot.slane %v1123_v10, 1  ;;  %v984_v18 = vrot.slane %v983_v55, 1 }
 0x167   :  { %v1104_v19 = vadd.f32 %v1103_v12, %v1102_v4  ;;  %v1165_v20 = vadd.f32 %v1164_v14, %v1163_v6  ;;  %v1563_v21 = vpack.c.bf16 %v2121_v23, %v2119_v58 }
 0x168   :  { %v990_v22 = vcombine.low %v922_v11, %v943_v16  ;;  %v1125_v24 = vadd.f32 %v1124_v17, %v1123_v10  ;;  %v985_v1 = vadd.f32 %v984_v18, %v983_v55  ;;  %v1146_v25 = vadd.f32 %v1145_v15, %v1144_v8 }
 0x169   :  { %v1166_v26 = vrot.slane %v1165_v20, 1  ;;  %1422 = vst [vmem:[%s2162_s6 + $0xf8] sm:$0xff] %v1563_v21 }
 0x16a   :  { %v998_v27 = vrot.slane %v990_v22, %v2114_v7  ;;  %v1172_v28 = vcombine.low %v1104_v19, %v1125_v24  ;;  %v991_v29 = vcombine.low %v964_v13, %v985_v1 }
 0x16b   :  { %v1167_v30 = vadd.f32 %v1166_v26, %v1165_v20 }
 0x16c   :  { %v1005_v31 = vrot.slane %v991_v29, %v2114_v7  ;;  %v1180_v32 = vrot.slane %v1172_v28, %v2114_v7 }
 0x16d   :  { %v1173_v33 = vcombine.low %v1146_v25, %v1167_v30 }
 0x16e   :  { %v1006_v58 = vcombine.low %v998_v27, %v1005_v31 }
 0x16f   :  { %v1187_v23 = vrot.slane %v1173_v33, %v2114_v7 }
 0x170   :  { %v1013_v34 = vrot.slane %v1006_v58, %v2114_v7 }
 0x171   :  { %v1188_v35 = vcombine.low %v1180_v32, %v1187_v23 }
 0x172   :  { %1019 = vst.msk [vmem:[%s2163_s7] ss:$2 sm:$0xf] %vm1017_vm2, %v1013_v34 }
 0x173   :  { %v1195_v36 = vrot.slane %v1188_v35, %v2114_v7 }
 0x175   :  { %1499 = vst.msk [vmem:[%s2163_s7 + $0x1] ss:$2 sm:$0xf] %vm1017_vm2, %v1195_v36 }

// kernel: trianglenet_seg_forward.10
= control target key start
LH: loop header
LB: loop body
LE: loop exit
PB: predicated region body
PF: predicated region fallthrough
CT: control target
= control target key end

     0   :  { %s5177_s18 = smov 0   ;;  %s5179_s19 = smov 0   ;;  %s7017_s0 = inlined_call_operand.vmem [shape: bf16[128,512], index: 0, kind: input, shape index: {}]   ;;  %s7018_s1 = inlined_call_operand.vmem [shape: bf16[128,128], index: 1, kind: input, shape index: {}]   ;;  %s7019_s2 = inlined_call_operand.vmem [shape: bf16[128,64], index: 2, kind: input, shape index: {}]   ;;  %s7020_s3 = inlined_call_operand.vmem [shape: bf16[128,24], index: 3, kind: input, shape index: {}]   ;;  %s7021_s4 = inlined_call_operand.vmem [shape: f32[1,512], index: 4, kind: input, shape index: {}]   ;;  %s7022_s5 = inlined_call_operand.vmem [shape: f32[1,512], index: 5, kind: input, shape index: {}]   ;;  %s7023_s6 = inlined_call_operand.vmem [shape: f32[1,128], index: 6, kind: input, shape index: {}]   ;;  %s7024_s7 = inlined_call_operand.vmem [shape: f32[1,128], index: 7, kind: input, shape index: {}]   ;;  %s7025_s8 = inlined_call_operand.vmem [shape: f32[1,64], index: 8, kind: input, shape index: {}]   ;;  %s7026_s9 = inlined_call_operand.vmem [shape: f32[1,64], index: 9, kind: input, shape index: {}]   ;;  %s7027_s10 = inlined_call_operand.vmem [shape: bf16[512,1024], index: 10, kind: input, shape index: {}]   ;;  %s7028_s11 = inlined_call_operand.vmem [shape: bf16[128,1024], index: 11, kind: input, shape index: {}]   ;;  %s7029_s12 = inlined_call_operand.vmem [shape: bf16[64,1024], index: 12, kind: input, shape index: {}]   ;;  %s7030_s13 = inlined_call_operand.vmem [shape: bf16[24,1024], index: 13, kind: input, shape index: {}]   ;;  %s7031_s14 = inlined_call_operand.vmem [shape: f32[1,1024], index: 14, kind: input, shape index: {}]   ;;  %s7032_s15 = inlined_call_operand.vmem [shape: f32[32,1024], index: 15, kind: output, shape index: {}]  }
   0x1   :  { %s5181_s20 = smov 0  }
   0x2 LB: > { %7034 = sst [smem:[#allocation2_spill]] %s5090_s19  ;;  %s34_s21 = sadd.s32 1, %s5090_s19  ;;  %s5094_s20 = sphi %s5181_s20, %s25_s20   ;;  %s5090_s19 = sphi %s5179_s19, %s7037_s19   ;;  %s5086_s18 = sphi %s5177_s18, %s7036_s18  }
   0x3   : > { %p4480_p0 = scmp.ge.s32.totalorder %s5094_s20, 1  ;;  %p35_p1 = scmp.ge.s32.totalorder %s34_s21, 4 }
   0x4   : > { %p500_p2 = scmp.lt.s32.totalorder %s5094_s20, 5 }
   0x5   : > { %s7039_s21 = smov (%p35_p1, %s34_s21), 0 }
   0x6   : > { %7035 = sst [smem:[#allocation3_spill]] %s7039_s21  ;;  %p501_p3 = pnand %p4480_p0, %p500_p2 }
   0x7   : > { %v1060_v0 = vld [vmem:[%s7028_s11] sm:$0xff] (!%p501_p3)  ;;  %v1061_v2 = vld [vmem:[%s7028_s11 + $0x8] sm:$0xff] (!%p501_p3)  ;;  %s4481_s28 = sshll.u32 (!%p501_p3), %s5086_s18, 2  ;;  %v5096_v8 = vmov (!%p501_p3), 0   ;;  %vm3554_vm0 = vcmask (!%p501_p3), 523264   ;;  %vm3898_vm1 = vcmask (!%p501_p3), 1043456  }
   0x8   : > { %504 = sbr.rel (%p501_p3) target bundleno = 641 (0x281), region = 80  ;;  %v1064_v1 = vld [vmem:[%s7028_s11 + $0x20] sm:$0xff] (!%p501_p3)  ;;  %v1065_v4 = vld [vmem:[%s7028_s11 + $0x28] sm:$0xff] (!%p501_p3)  ;;  %1476 = vmatprep.mubr.bf16.mxu0 (!%p501_p3), %v5096_v8  ;;  %1529 = vmatprep.mubr.bf16.mxu1 (!%p501_p3), %v5096_v8  ;;  %p571_p4 = scmp.lt.s32.totalorder (!%p501_p3), %s4481_s28, 15  ;;  %vm3891_vm2 = vcmask (!%p501_p3), 195584  }
   0x9   : > { %v4495_v3 = vcombine.high (!%p501_p3), %v1060_v0, %v1064_v1  ;;  %v4494_v5 = vcombine.low (!%p501_p3), %v1060_v0, %v1064_v1  ;;  %v1068_v6 = vld [vmem:[%s7028_s11 + $0x40] sm:$0xff] (!%p501_p3)  ;;  %v4497_v9 = vcombine.high (!%p501_p3), %v1061_v2, %v1065_v4  ;;  %v4496_v10 = vcombine.low (!%p501_p3), %v1061_v2, %v1065_v4  ;;  %v1069_v12 = vld [vmem:[%s7028_s11 + $0x48] sm:$0xff] (!%p501_p3)  ;;  %p4884_p5 = scmp.ne.s32.totalorder (!%p501_p3), %s5086_s18, 0 }
   0xa   : > { %v1072_v7 = vld [vmem:[%s7028_s11 + $0x60] sm:$0xff] (!%p501_p3)  ;;  %v1073_v13 = vld [vmem:[%s7028_s11 + $0x68] sm:$0xff] (!%p501_p3) }
   0xb   : > { %v4503_v11 = vcombine.high (!%p501_p3), %v1068_v6, %v1072_v7  ;;  %v1076_v14 = vld [vmem:[%s7028_s11 + $0x80] sm:$0xff] (!%p501_p3)  ;;  %1444 = vmatprep.subr.bf16.mxu0 (!%p501_p3), %v4495_v3  ;;  %v4505_v15 = vcombine.high (!%p501_p3), %v1069_v12, %v1073_v13  ;;  %v1077_v17 = vld [vmem:[%s7028_s11 + $0x88] sm:$0xff] (!%p501_p3)  ;;  %1497 = vmatprep.subr.bf16.mxu1 (!%p501_p3), %v4497_v9  ;;  %v4502_v19 = vcombine.low (!%p501_p3), %v1068_v6, %v1072_v7 }
   0xc   : > { %v1080_v16 = vld [vmem:[%s7028_s11 + $0xa0] sm:$0xff] (!%p501_p3)  ;;  %v1081_v18 = vld [vmem:[%s7028_s11 + $0xa8] sm:$0xff] (!%p501_p3)  ;;  %1445 = vmatpush1.bf16.msra.mxu0 (!%p501_p3), %v4494_v5  ;;  %1498 = vmatpush1.bf16.msra.mxu1 (!%p501_p3), %v4496_v10  ;;  %v4504_v20 = vcombine.low (!%p501_p3), %v1069_v12, %v1073_v13  ;;  %v1062_v12 = vld [vmem:[%s7028_s11 + $0x10] sm:$0xff] (!%p501_p3) }
   0xd   : > { %1446 = vmatprep.subr.bf16.mxu0 (!%p501_p3), %v4503_v11  ;;  %v4511_v21 = vcombine.high (!%p501_p3), %v1076_v14, %v1080_v16  ;;  %1499 = vmatprep.subr.bf16.mxu1 (!%p501_p3), %v4505_v15  ;;  %v4513_v22 = vcombine.high (!%p501_p3), %v1077_v17, %v1081_v18  ;;  %v1084_v23 = vld [vmem:[%s7028_s11 + $0xc0] sm:$0xff] (!%p501_p3)  ;;  %v1085_v25 = vld [vmem:[%s7028_s11 + $0xc8] sm:$0xff] (!%p501_p3)  ;;  %v4510_v27 = vcombine.low (!%p501_p3), %v1076_v14, %v1080_v16  ;;  %v1066_v13 = vld [vmem:[%s7028_s11 + $0x30] sm:$0xff] (!%p501_p3) }
   0xe   : > { %v1088_v24 = vld [vmem:[%s7028_s11 + $0xe0] sm:$0xff] (!%p501_p3)  ;;  %v1089_v26 = vld [vmem:[%s7028_s11 + $0xe8] sm:$0xff] (!%p501_p3)  ;;  %v4512_v28 = vcombine.low (!%p501_p3), %v1077_v17, %v1081_v18  ;;  %v1063_v14 = vld [vmem:[%s7028_s11 + $0x18] sm:$0xff] (!%p501_p3) }
   0xf   : > { %s7041_s28 = smov (!%p571_p4, %s4481_s28), 15  ;;  %v4519_v29 = vcombine.high %v1084_v23, %v1088_v24  ;;  %v4521_v30 = vcombine.high %v1085_v25, %v1089_v26  ;;  %v1092_v31 = vld [vmem:[%s7028_s11 + $0x100] sm:$0xff]  ;;  %v1093_v33 = vld [vmem:[%s7028_s11 + $0x108] sm:$0xff]  ;;  %v4518_v35 = vcombine.low %v1084_v23, %v1088_v24  ;;  %v4520_v37 = vcombine.low %v1085_v25, %v1089_v26  ;;  %v1067_v15 = vld [vmem:[%s7028_s11 + $0x38] sm:$0xff] }
  0x10   : > { %s5245_s16 = sshll.u32 %s7041_s28, 2  ;;  %1447 = vmatpush1.bf16.msra.mxu0 %v4502_v19  ;;  %1500 = vmatpush1.bf16.msra.mxu1 %v4504_v20  ;;  %v1096_v32 = vld [vmem:[%s7028_s11 + $0x120] sm:$0xff]  ;;  %v1097_v34 = vld [vmem:[%s7028_s11 + $0x128] sm:$0xff]  ;;  %v4501_v23 = vcombine.high %v1063_v14, %v1067_v15  ;;  %v1070_v24 = vld [vmem:[%s7028_s11 + $0x50] sm:$0xff]  ;;  %s4890_s26 = sshll.u32 %s7041_s28, 4 }
  0x11   : > { %1448 = vmatprep.subr.bf16.mxu0 %v4511_v21  ;;  %s5257_s27 = scalar_lea.vmem %s7018_s1, %s5245_s16  ;;  %1501 = vmatprep.subr.bf16.mxu1 %v4513_v22  ;;  %v4527_v38 = vcombine.high %v1092_v31, %v1096_v32  ;;  %v4529_v39 = vcombine.high %v1093_v33, %v1097_v34  ;;  %v1100_v40 = vld [vmem:[%s7028_s11 + $0x140] sm:$0xff]  ;;  %v1101_v42 = vld [vmem:[%s7028_s11 + $0x148] sm:$0xff]  ;;  %v4526_v46 = vcombine.low %v1092_v31, %v1096_v32  ;;  %v1074_v25 = vld [vmem:[%s7028_s11 + $0x70] sm:$0xff]  ;;  %s5417_s25 = scalar_lea.vmem %s7017_s0, %s4890_s26 }
  0x12   : > { %v4892_v36 = vld [vmem:[%s5257_s27] sm:$0xff]   ;;  %v1105_v43 = vld [vmem:[%s7028_s11 + $0x168] sm:$0xff]  ;;  %v4528_v48 = vcombine.low %v1093_v33, %v1097_v34  ;;  %v4499_v22 = vcombine.high %v1062_v12, %v1066_v13  ;;  %v4498_v31 = vcombine.low %v1062_v12, %v1066_v13  ;;  %v4500_v32 = vcombine.low %v1063_v14, %v1067_v15  ;;  %v1115_v12 = vld [vmem:[%s7028_s11 + $0x1b8] sm:$0xff]  ;;  %s5511_s21 = scalar_lea.vmem %s7020_s3, %s5245_s16  ;;  %s6383_s24 = scalar_lea.vmem %s7019_s2, %s5245_s16 }
  0x13   : > { %v1104_v41 = vld [vmem:[%s7028_s11 + $0x160] sm:$0xff]  ;;  %v4893_v44 = vunpack.c.l.bf16 %v4892_v36  ;;  %v4894_v45 = vunpack.c.h.bf16 %v4892_v36  ;;  %v4537_v50 = vcombine.high %v1101_v42, %v1105_v43  ;;  %v1109_v53 = vld [vmem:[%s7028_s11 + $0x188] sm:$0xff]  ;;  %v4536_v59 = vcombine.low %v1101_v42, %v1105_v43  ;;  %v1082_v36 = vld [vmem:[%s7028_s11 + $0xb0] sm:$0xff] }
  0x14   : > { %1449 = vmatpush1.bf16.msra.mxu0 %v4510_v27  ;;  %1502 = vmatpush1.bf16.msra.mxu1 %v4512_v28  ;;  %v4490_v47 = vld [vmem:[%s7023_s6] ss:$0 sm:$0xff]  ;;  %v4535_v49 = vcombine.high %v1100_v40, %v1104_v41  ;;  %v1113_v54 = vld [vmem:[%s7028_s11 + $0x1a8] sm:$0xff]  ;;  %v4534_v57 = vcombine.low %v1100_v40, %v1104_v41  ;;  %v1071_v27 = vld [vmem:[%s7028_s11 + $0x58] sm:$0xff]  ;;  %v4507_v33 = vcombine.high %v1070_v24, %v1074_v25 }
  0x15   : > { %1450 = vmatprep.subr.bf16.mxu0 %v4519_v29  ;;  %1503 = vmatprep.subr.bf16.mxu1 %v4521_v30  ;;  %v1108_v51 = vld [vmem:[%s7028_s11 + $0x180] sm:$0xff]  ;;  %v741_v55 = vmul.f32 %v4893_v44, %v4490_v47  ;;  %v742_v56 = vmul.f32 %v4894_v45, %v4490_v47  ;;  %v4907_v61 = vld [vmem:[%s5257_s27 + $0x8] sm:$0xff]   ;;  %v4545_v62 = vcombine.high %v1109_v53, %v1113_v54  ;;  %v1075_v28 = vld [vmem:[%s7028_s11 + $0x78] sm:$0xff] }
  0x16   : > { %v1112_v52 = vld [vmem:[%s7028_s11 + $0x1a0] sm:$0xff]  ;;  %v1117_v1 = vld [vmem:[%s7028_s11 + $0x1c8] sm:$0xff]  ;;  %v4897_v5 = vunpack.c.l.bf16 %v4907_v61  ;;  %v4898_v6 = vunpack.c.h.bf16 %v4907_v61  ;;  %v4544_v9 = vcombine.low %v1109_v53, %v1113_v54  ;;  %v4509_v34 = vcombine.high %v1071_v27, %v1075_v28  ;;  %v1086_v45 = vld [vmem:[%s7028_s11 + $0xd0] sm:$0xff] }
  0x17   : > { %v4491_v58 = vld [vmem:[%s7024_s7] ss:$0 sm:$0xff]  ;;  %v4543_v60 = vcombine.high %v1108_v51, %v1112_v52  ;;  %v1121_v2 = vld [vmem:[%s7028_s11 + $0x1e8] sm:$0xff]  ;;  %v4542_v7 = vcombine.low %v1108_v51, %v1112_v52  ;;  %v4506_v41 = vcombine.low %v1070_v24, %v1074_v25  ;;  %v4508_v42 = vcombine.low %v1071_v27, %v1075_v28  ;;  %v1094_v54 = vld [vmem:[%s7028_s11 + $0x110] sm:$0xff] }
  0x18   : > { %1451 = vmatpush1.bf16.msra.mxu0 %v4518_v35  ;;  %1504 = vmatpush1.bf16.msra.mxu1 %v4520_v37  ;;  %v1116_v63 = vld [vmem:[%s7028_s11 + $0x1c0] sm:$0xff]  ;;  %v752_v3 = vadd.f32 %v4491_v58, %v741_v55  ;;  %v753_v4 = vadd.f32 %v4491_v58, %v742_v56  ;;  %v4553_v11 = vcombine.high %v1117_v1, %v1121_v2  ;;  %v1078_v35 = vld [vmem:[%s7028_s11 + $0x90] sm:$0xff]  ;;  %v1079_v37 = vld [vmem:[%s7028_s11 + $0x98] sm:$0xff] }
  0x19   : > { %1452 = vmatprep.subr.bf16.mxu0 %v4527_v38  ;;  %1505 = vmatprep.subr.bf16.mxu1 %v4529_v39  ;;  %v1120_v0 = vld [vmem:[%s7028_s11 + $0x1e0] sm:$0xff]  ;;  %v743_v18 = vmul.f32 %v4897_v5, %v4490_v47  ;;  %v744_v19 = vmul.f32 %v4898_v6, %v4490_v47  ;;  %v4552_v21 = vcombine.low %v1117_v1, %v1121_v2  ;;  %v1083_v38 = vld [vmem:[%s7028_s11 + $0xb8] sm:$0xff]  ;;  %v1098_v55 = vld [vmem:[%s7028_s11 + $0x130] sm:$0xff] }
  0x1a   : > { %v4551_v10 = vcombine.high %v1116_v63, %v1120_v0  ;;  %v756_v16 = vmax.f32 %v752_v3, 0.0  ;;  %v757_v17 = vmax.f32 %v753_v4, 0.0  ;;  %v4550_v20 = vcombine.low %v1116_v63, %v1120_v0  ;;  %v1087_v47 = vld [vmem:[%s7028_s11 + $0xd8] sm:$0xff]  ;;  %v1106_v63 = vld [vmem:[%s7028_s11 + $0x170] sm:$0xff]  ;;  %v5443_v24 = vld [vmem:[%s7021_s4] sm:$0xf] }
  0x1b   : > { %v754_v29 = vadd.f32 %v4491_v58, %v743_v18  ;;  %v755_v30 = vadd.f32 %v4491_v58, %v744_v19  ;;  %v4515_v43 = vcombine.high %v1078_v35, %v1082_v36  ;;  %v4517_v44 = vcombine.high %v1079_v37, %v1083_v38  ;;  %v1095_v56 = vld [vmem:[%s7028_s11 + $0x118] sm:$0xff]  ;;  %v1122_v18 = vld [vmem:[%s7028_s11 + $0x1f0] sm:$0xff] }
  0x1c   : > { %1453 = vmatpush1.bf16.msra.mxu0 %v4526_v46  ;;  %1506 = vmatpush1.bf16.msra.mxu1 %v4528_v48  ;;  %v5333_v26 = vpack.c.bf16 %v757_v17, %v756_v16  ;;  %v1090_v46 = vld [vmem:[%s7028_s11 + $0xf0] sm:$0xff]  ;;  %v1091_v48 = vld [vmem:[%s7028_s11 + $0xf8] sm:$0xff]  ;;  %v4516_v51 = vcombine.low %v1079_v37, %v1083_v38  ;;  %v636_v0 = vlaneseq  ;;  %v4530_v3 = vcombine.low %v1094_v54, %v1098_v55  ;;  %v5466_v37 = vld [vmem:[%s7022_s5] sm:$0xf] }
  0x1d   : > { %1454 = vmatprep.subr.bf16.mxu0 %v4535_v49  ;;  %1507 = vmatprep.subr.bf16.mxu1 %v4537_v50  ;;  %v758_v39 = vmax.f32 %v754_v29, 0.0  ;;  %v759_v40 = vmax.f32 %v755_v30, 0.0  ;;  %v4514_v50 = vcombine.low %v1078_v35, %v1082_v36  ;;  %v4523_v52 = vcombine.high %v1086_v45, %v1090_v46  ;;  %v1103_v1 = vld [vmem:[%s7028_s11 + $0x158] sm:$0xff]  ;;  %v1118_v16 = vld [vmem:[%s7028_s11 + $0x1d0] sm:$0xff]  ;;  %v802_v30 = vld [vmem:[%s7027_s10] sm:$0xff] }
  0x1e   : > { %v4525_v53 = vcombine.high %v1087_v47, %v1091_v48  ;;  %v4522_v58 = vcombine.low %v1086_v45, %v1090_v46  ;;  %v1107_v2 = vld [vmem:[%s7028_s11 + $0x178] sm:$0xff]  ;;  %v4555_v28 = vcombine.high %v1118_v16, %v1122_v18  ;;  %v803_v35 = vld [vmem:[%s7027_s10 + $0x8] sm:$0xff]  ;;  %v4554_v38 = vcombine.low %v1118_v16, %v1122_v18 }
  0x1f   : > { %v5369_v49 = vpack.c.bf16 %v759_v40, %v758_v39  ;;  %v4541_v6 = vcombine.high %v1103_v1, %v1107_v2  ;;  %v4540_v14 = vcombine.low %v1103_v1, %v1107_v2  ;;  %v1119_v19 = vld [vmem:[%s7028_s11 + $0x1d8] sm:$0xff]  ;;  %v807_v36 = vld [vmem:[%s7027_s10 + $0x28] sm:$0xff] }
  0x20   : > { %1455 = vmatpush1.bf16.msra.mxu0 %v4534_v57  ;;  %1508 = vmatpush1.bf16.msra.mxu1 %v4536_v59  ;;  %v1099_v57 = vld [vmem:[%s7028_s11 + $0x138] sm:$0xff]  ;;  %v4524_v59 = vcombine.low %v1087_v47, %v1091_v48  ;;  %v811_v47 = vld [vmem:[%s7027_s10 + $0x48] sm:$0xff] }
  0x21   : > { %1456 = vmatprep.subr.bf16.mxu0 %v4543_v60  ;;  %1509 = vmatprep.subr.bf16.mxu1 %v4545_v62  ;;  %v4531_v60 = vcombine.high %v1094_v54, %v1098_v55  ;;  %v4533_v61 = vcombine.high %v1095_v56, %v1099_v57  ;;  %v1102_v62 = vld [vmem:[%s7028_s11 + $0x150] sm:$0xff]  ;;  %v4532_v4 = vcombine.low %v1095_v56, %v1099_v57  ;;  %v815_v48 = vld [vmem:[%s7027_s10 + $0x68] sm:$0xff]  ;;  %v818_v54 = vld [vmem:[%s7027_s10 + $0x80] sm:$0xff] }
  0x22   : > { %v4539_v5 = vcombine.high %v1102_v62, %v1106_v63  ;;  %v4538_v13 = vcombine.low %v1102_v62, %v1106_v63  ;;  %v822_v55 = vld [vmem:[%s7027_s10 + $0xa0] sm:$0xff]  ;;  %v613_v62 = vld [vmem:[%s5417_s25 + $0x18] sm:$0xff] }
  0x23   : > { %v4575_v1 = vcombine.high %v818_v54, %v822_v55 }
  0x24   : > { %1457 = vmatpush1.bf16.msra.mxu0 %v4542_v7  ;;  %1510 = vmatpush1.bf16.msra.mxu1 %v4544_v9  ;;  %v1110_v7 = vld [vmem:[%s7028_s11 + $0x190] sm:$0xff] }
  0x25   : > { %1458 = vmatprep.subr.bf16.mxu0 %v4551_v10  ;;  %1511 = vmatprep.subr.bf16.mxu1 %v4553_v11  ;;  %v1114_v9 = vld [vmem:[%s7028_s11 + $0x1b0] sm:$0xff]  ;;  %v5406_v10 = vshrl.u32 %v636_v0, 7  ;;  %v1111_v11 = vld [vmem:[%s7028_s11 + $0x198] sm:$0xff]  ;;  %v4568_v0 = vcombine.low %v811_v47, %v815_v48 }
  0x26   : > { %v4547_v15 = vcombine.high %v1110_v7, %v1114_v9  ;;  %v4549_v17 = vcombine.high %v1111_v11, %v1115_v12  ;;  %v4546_v25 = vcombine.low %v1110_v7, %v1114_v9  ;;  %v4548_v27 = vcombine.low %v1111_v11, %v1115_v12  ;;  %v831_v9 = vld [vmem:[%s7027_s10 + $0xe8] sm:$0xff] }
  0x27   : > { %v5505_v63 = vsub.s32 3, %v5406_v10  ;;  %v625_v11 = vunpack.c.h.bf16 %v613_v62  ;;  %v5528_v12 = vsub.s32 2, %v5406_v10 }
  0x28   : > { %1459 = vmatpush1.bf16.msra.mxu0 %v4550_v20  ;;  %1512 = vmatpush1.bf16.msra.mxu1 %v4552_v21  ;;  %v1123_v20 = vld [vmem:[%s7028_s11 + $0x1f8] sm:$0xff]  ;;  %v5432_v21 = vsub.s32 1, %v5406_v10 }
  0x29   : > { %1550 = vmatprep.subr.bf16.mxu0 %v4499_v22  ;;  %1603 = vmatprep.subr.bf16.mxu1 %v4501_v23  ;;  %v5435_v22 = vld [vmem:[%s5417_s25] sm:$0xff]  ;;  %v5438_v23 = vld [vmem:[%s5417_s25 + $0x10] sm:$0xff]  ;;  %v4557_v29 = vcombine.high %v1119_v19, %v1123_v20  ;;  %v4556_v39 = vcombine.low %v1119_v19, %v1123_v20  ;;  %v624_v19 = vunpack.c.l.bf16 %v613_v62 }
  0x2a   : > { %v5478_v46 = vrot.slane %v5466_v37, %v5432_v21  ;;  %v854_v62 = vld [vmem:[%s7027_s10 + $0x1a0] sm:$0xff] }
  0x2b   : > { %1477 = vmatmul.mubr.bf16.vlgmr.msra.gmra.mrb[0].mxu0 %v5333_v26  ;;  %1530 = vmatmul.mubr.bf16.vlgmr.msra.gmra.mrb[0].mxu1 %v5333_v26 }
  0x2c   : > { %1551 = vmatpush1.bf16.msra.mxu0 %v4498_v31  ;;  %1604 = vmatpush1.bf16.msra.mxu1 %v4500_v32  ;;  %v806_v31 = vld [vmem:[%s7027_s10 + $0x20] sm:$0xff]  ;;  %v619_v32 = vunpack.c.h.bf16 %v5435_v22 }
  0x2d   : > { %1552 = vmatprep.subr.bf16.mxu0 %v4507_v33  ;;  %1605 = vmatprep.subr.bf16.mxu1 %v4509_v34  ;;  %v623_v33 = vunpack.c.h.bf16 %v5438_v23  ;;  %v5455_v34 = vrot.slane %v5443_v24, %v5432_v21  ;;  %v4559_v40 = vcombine.high %v802_v30, %v806_v31 }
  0x2e   : > { %1486 = vmatprep.mubr.bf16.mxu0 %v5096_v8  ;;  %1539 = vmatprep.mubr.bf16.mxu1 %v5096_v8 }
  0x2f   : > { %v661_v45 = vmul.f32 %v5455_v34, %v623_v33  ;;  %v839_v33 = vld [vmem:[%s7027_s10 + $0x128] sm:$0xff] }
  0x30   : > { %1553 = vmatpush1.bf16.msra.mxu0 %v4506_v41  ;;  %1606 = vmatpush1.bf16.msra.mxu1 %v4508_v42  ;;  %v4561_v41 = vcombine.high %v803_v35, %v807_v36  ;;  %v810_v42 = vld [vmem:[%s7027_s10 + $0x40] sm:$0xff] }
  0x31   : > { %1554 = vmatprep.subr.bf16.mxu0 %v4515_v43  ;;  %1607 = vmatprep.subr.bf16.mxu1 %v4517_v44  ;;  %v814_v43 = vld [vmem:[%s7027_s10 + $0x60] sm:$0xff]  ;;  %v657_v44 = vmul.f32 %v5455_v34, %v619_v32  ;;  %v699_v57 = vadd.f32 %v5478_v46, %v661_v45  ;;  %v835_v32 = vld [vmem:[%s7027_s10 + $0x108] sm:$0xff] }
  0x32   : > { %v842_v45 = vld [vmem:[%s7027_s10 + $0x140] sm:$0xff] }
  0x33   : > { %1487 = vmatmul.mubr.bf16.gmra.mrb[4].mxu0 %v5369_v49  ;;  %1540 = vmatmul.mubr.bf16.gmra.mrb[4].mxu1 %v5369_v49  ;;  %v695_v56 = vadd.f32 %v5478_v46, %v657_v44  ;;  %v4593_v44 = vcombine.high %v835_v32, %v839_v33 }
  0x34   : > { %1555 = vmatpush1.bf16.msra.mxu0 %v4514_v50  ;;  %1608 = vmatpush1.bf16.msra.mxu1 %v4516_v51  ;;  %v4558_v50 = vcombine.low %v802_v30, %v806_v31  ;;  %v4560_v51 = vcombine.low %v803_v35, %v807_v36  ;;  %v5557_v35 = vrot.slane %v5443_v24, %v5528_v12 }
  0x35   : > { %1556 = vmatprep.subr.bf16.mxu0 %v4523_v52  ;;  %1609 = vmatprep.subr.bf16.mxu1 %v4525_v53  ;;  %v4567_v52 = vcombine.high %v810_v42, %v814_v43  ;;  %v4569_v53 = vcombine.high %v811_v47, %v815_v48  ;;  %v5561_v36 = vrot.slane %v5466_v37, %v5528_v12 }
  0x36   : > { %1582 = vmatprep.mubr.bf16.mxu0 %v5096_v8  ;;  %1635 = vmatprep.mubr.bf16.mxu1 %v5096_v8 }
  0x38   : > { %1557 = vmatpush1.bf16.msra.mxu0 %v4522_v58  ;;  %1610 = vmatpush1.bf16.msra.mxu1 %v4524_v59  ;;  %v819_v58 = vld [vmem:[%s7027_s10 + $0x88] sm:$0xff] }
  0x39   : > { %1558 = vmatprep.subr.bf16.mxu0 %v4531_v60  ;;  %1611 = vmatprep.subr.bf16.mxu1 %v4533_v61  ;;  %v823_v59 = vld [vmem:[%s7027_s10 + $0xa8] sm:$0xff]  ;;  %v4566_v61 = vcombine.low %v810_v42, %v814_v43  ;;  %v662_v43 = vmul.f32 %v5557_v35, %v624_v19  ;;  %v866_v19 = vld [vmem:[%s7027_s10 + $0x200] sm:$0xff] }
  0x3a   : > { %v611_v60 = vld [vmem:[%s5417_s25 + $0x8] sm:$0xff]  ;;  %v4577_v2 = vcombine.high %v819_v58, %v823_v59  ;;  %v4576_v16 = vcombine.low %v819_v58, %v823_v59 }
  0x3b   : > { %v621_v7 = vunpack.c.h.bf16 %v611_v60  ;;  %v620_v18 = vunpack.c.l.bf16 %v611_v60 }
  0x3c   : > { %1559 = vmatpush1.bf16.msra.mxu0 %v4530_v3  ;;  %1612 = vmatpush1.bf16.msra.mxu1 %v4532_v4  ;;  %v830_v3 = vld [vmem:[%s7027_s10 + $0xe0] sm:$0xff]  ;;  %v827_v4 = vld [vmem:[%s7027_s10 + $0xc8] sm:$0xff] }
  0x3d   : > { %1560 = vmatprep.subr.bf16.mxu0 %v4539_v5  ;;  %1613 = vmatprep.subr.bf16.mxu1 %v4541_v6  ;;  %v711_v5 = vmax.f32 %v695_v56, 0.0  ;;  %v715_v6 = vmax.f32 %v699_v57, 0.0  ;;  %v4585_v20 = vcombine.high %v827_v4, %v831_v9  ;;  %v658_v42 = vmul.f32 %v5557_v35, %v620_v18 }
  0x3e   : > { %v4592_v56 = vcombine.low %v835_v32, %v839_v33  ;;  %v874_v33 = vld [vmem:[%s7027_s10 + $0x240] sm:$0xff] }
  0x40   : > { %1561 = vmatpush1.bf16.msra.mxu0 %v4538_v13  ;;  %1614 = vmatpush1.bf16.msra.mxu1 %v4540_v14  ;;  %v4574_v13 = vcombine.low %v818_v54, %v822_v55  ;;  %v5532_v14 = vrot.slane %v5443_v24, %v5505_v63 }
  0x41   : > { %1562 = vmatprep.subr.bf16.mxu0 %v4547_v15  ;;  %1615 = vmatprep.subr.bf16.mxu1 %v4549_v17  ;;  %v5536_v15 = vrot.slane %v5466_v37, %v5505_v63 }
  0x42   : > { %v663_v30 = vmul.f32 %v5532_v14, %v625_v11  ;;  %v863_v11 = vld [vmem:[%s7027_s10 + $0x1e8] sm:$0xff] }
  0x44   : > { %1563 = vmatpush1.bf16.msra.mxu0 %v4546_v25  ;;  %1616 = vmatpush1.bf16.msra.mxu1 %v4548_v27  ;;  %v834_v25 = vld [vmem:[%s7027_s10 + $0x100] sm:$0xff] }
  0x45   : > { %1564 = vmatprep.subr.bf16.mxu0 %v4555_v28  ;;  %1617 = vmatprep.subr.bf16.mxu1 %v4557_v29  ;;  %v838_v27 = vld [vmem:[%s7027_s10 + $0x120] sm:$0xff]  ;;  %v5544_v28 = vpack.c.bf16 %v715_v6, %v711_v5  ;;  %v659_v29 = vmul.f32 %v5532_v14, %v621_v7 }
  0x46   : > { %v4590_v54 = vcombine.low %v834_v25, %v838_v27  ;;  %v858_v6 = vld [vmem:[%s7027_s10 + $0x1c0] sm:$0xff] }
  0x47   : > { %v862_v7 = vld [vmem:[%s7027_s10 + $0x1e0] sm:$0xff] }
  0x48   : > { %1565 = vmatpush1.bf16.msra.mxu0 %v4554_v38  ;;  %1618 = vmatpush1.bf16.msra.mxu1 %v4556_v39  ;;  %v4584_v38 = vcombine.low %v827_v4, %v831_v9  ;;  %v697_v39 = vadd.f32 %v5536_v15, %v659_v29  ;;  %v859_v9 = vld [vmem:[%s7027_s10 + $0x1c8] sm:$0xff]  ;;  %v4614_v29 = vcombine.low %v858_v6, %v862_v7 }
  0x49   : > { %2936 = vmatprep.subr.bf16.mxu0 %v4559_v40  ;;  %3042 = vmatprep.subr.bf16.mxu1 %v4561_v41  ;;  %v701_v40 = vadd.f32 %v5536_v15, %v663_v30  ;;  %v4591_v41 = vcombine.high %v834_v25, %v838_v27  ;;  %v4617_v18 = vcombine.high %v859_v9, %v863_v11  ;;  %v867_v25 = vld [vmem:[%s7027_s10 + $0x208] sm:$0xff] }
  0x4a   : > { %v713_v47 = vmax.f32 %v697_v39, 0.0  ;;  %v871_v27 = vld [vmem:[%s7027_s10 + $0x228] sm:$0xff]  ;;  %v4616_v30 = vcombine.low %v859_v9, %v863_v11 }
  0x4b   : > { %1583 = vmatmul.mubr.bf16.vlgmr.msra.gmra.mrb[8].mxu0 %v5333_v26  ;;  %1636 = vmatmul.mubr.bf16.vlgmr.msra.gmra.mrb[8].mxu1 %v5333_v26  ;;  %v826_v26 = vld [vmem:[%s7027_s10 + $0xc0] sm:$0xff]  ;;  %v717_v48 = vmax.f32 %v701_v40, 0.0  ;;  %v4625_v32 = vcombine.high %v867_v25, %v871_v27  ;;  %v875_v39 = vld [vmem:[%s7027_s10 + $0x248] sm:$0xff] }
  0x4c   : > { %2937 = vmatpush1.bf16.msra.mxu0 %v4558_v50  ;;  %3043 = vmatpush1.bf16.msra.mxu1 %v4560_v51  ;;  %v4583_v17 = vcombine.high %v826_v26, %v830_v3  ;;  %v4582_v31 = vcombine.low %v826_v26, %v830_v3  ;;  %v843_v50 = vld [vmem:[%s7027_s10 + $0x148] sm:$0xff] }
  0x4d   : > { %2938 = vmatprep.subr.bf16.mxu0 %v4567_v52  ;;  %3044 = vmatprep.subr.bf16.mxu1 %v4569_v53  ;;  %v847_v51 = vld [vmem:[%s7027_s10 + $0x168] sm:$0xff]  ;;  %v696_v52 = vadd.f32 %v5561_v36, %v658_v42  ;;  %v700_v53 = vadd.f32 %v5561_v36, %v662_v43  ;;  %v5584_v55 = vpack.c.bf16 %v717_v48, %v713_v47 }
  0x4e   : > { %1592 = vmatprep.mubr.bf16.mxu0 %v5096_v8  ;;  %1645 = vmatprep.mubr.bf16.mxu1 %v5096_v8  ;;  %v4601_v60 = vcombine.high %v843_v50, %v847_v51  ;;  %v4600_v3 = vcombine.low %v843_v50, %v847_v51  ;;  %v879_v40 = vld [vmem:[%s7027_s10 + $0x268] sm:$0xff]  ;;  %v4624_v42 = vcombine.low %v867_v25, %v871_v27  ;;  %v5702_v27 = vld [vmem:[%s7027_s10 + $0x380] sm:$0xff] }
  0x4f   : > { %v712_v58 = vmax.f32 %v696_v52, 0.0  ;;  %v716_v59 = vmax.f32 %v700_v53, 0.0  ;;  %v883_v47 = vld [vmem:[%s7027_s10 + $0x288] sm:$0xff]  ;;  %v4632_v51 = vcombine.low %v875_v39, %v879_v40 }
  0x50   : > { %2939 = vmatpush1.bf16.msra.mxu0 %v4566_v61  ;;  %3045 = vmatpush1.bf16.msra.mxu1 %v4568_v0  ;;  %v850_v61 = vld [vmem:[%s7027_s10 + $0x180] sm:$0xff]  ;;  %v851_v0 = vld [vmem:[%s7027_s10 + $0x188] sm:$0xff] }
  0x51   : > { %2940 = vmatprep.subr.bf16.mxu0 %v4575_v1  ;;  %3046 = vmatprep.subr.bf16.mxu1 %v4577_v2  ;;  %v855_v1 = vld [vmem:[%s7027_s10 + $0x1a8] sm:$0xff]  ;;  %v5598_v2 = vpack.c.bf16 %v716_v59, %v712_v58  ;;  %v4607_v4 = vcombine.high %v850_v61, %v854_v62 }
  0x52   : > { %v4609_v5 = vcombine.high %v851_v0, %v855_v1  ;;  %v887_v48 = vld [vmem:[%s7027_s10 + $0x2a8] sm:$0xff] }
  0x53   : > { %1593 = vmatmul.mubr.bf16.gmra.mrb[12].mxu0 %v5369_v49  ;;  %1646 = vmatmul.mubr.bf16.gmra.mrb[12].mxu1 %v5369_v49  ;;  %v846_v49 = vld [vmem:[%s7027_s10 + $0x160] sm:$0xff]  ;;  %v4641_v53 = vcombine.high %v883_v47, %v887_v48  ;;  %v895_v58 = vld [vmem:[%s7027_s10 + $0x2e8] sm:$0xff] }
  0x54   : > { %2941 = vmatpush1.bf16.msra.mxu0 %v4574_v13  ;;  %3047 = vmatpush1.bf16.msra.mxu1 %v4576_v16  ;;  %v4599_v57 = vcombine.high %v842_v45, %v846_v49  ;;  %v4598_v26 = vcombine.low %v842_v45, %v846_v49  ;;  %v4606_v13 = vcombine.low %v850_v61, %v854_v62  ;;  %v882_v45 = vld [vmem:[%s7027_s10 + $0x280] sm:$0xff] }
  0x55   : > { %2942 = vmatprep.subr.bf16.mxu0 %v4583_v17  ;;  %3048 = vmatprep.subr.bf16.mxu1 %v4585_v20  ;;  %v4608_v16 = vcombine.low %v851_v0, %v855_v1  ;;  %v4615_v17 = vcombine.high %v858_v6, %v862_v7  ;;  %v870_v20 = vld [vmem:[%s7027_s10 + $0x220] sm:$0xff]  ;;  %v4640_v61 = vcombine.low %v883_v47, %v887_v48  ;;  %v618_v6 = vunpack.c.l.bf16 %v5435_v22 }
  0x56   : > { %2968 = vmatprep.mubr.bf16.mxu0 %v5544_v28  ;;  %3074 = vmatprep.mubr.bf16.mxu1 %v5544_v28  ;;  %v886_v49 = vld [vmem:[%s7027_s10 + $0x2a0] sm:$0xff] }
  0x57   : > { %v4639_v52 = vcombine.high %v882_v45, %v886_v49  ;;  %v4638_v59 = vcombine.low %v882_v45, %v886_v49  ;;  %v898_v1 = vld [vmem:[%s7027_s10 + $0x300] sm:$0xff]  ;;  %v617_v45 = vld [vmem:[%s5417_s25 + $0x38] sm:$0xff] }
  0x58   : > { %2943 = vmatpush1.bf16.msra.mxu0 %v4582_v31  ;;  %3049 = vmatpush1.bf16.msra.mxu1 %v4584_v38  ;;  %v4623_v31 = vcombine.high %v866_v19, %v870_v20  ;;  %v878_v38 = vld [vmem:[%s7027_s10 + $0x260] sm:$0xff] }
  0x59   : > { %2944 = vmatprep.subr.bf16.mxu0 %v4591_v41  ;;  %3050 = vmatprep.subr.bf16.mxu1 %v4593_v44  ;;  %v4622_v41 = vcombine.low %v866_v19, %v870_v20  ;;  %v4631_v43 = vcombine.high %v874_v33, %v878_v38  ;;  %v4633_v44 = vcombine.high %v875_v39, %v879_v40  ;;  %v910_v22 = vld [vmem:[%s7027_s10 + $0x360] sm:$0xff]  ;;  %v5722_v39 = vld [vmem:[%s7027_s10 + $0x3a8] sm:$0xff] }
  0x5a   : > { %v4630_v50 = vcombine.low %v874_v33, %v878_v38  ;;  %v5694_v19 = vld [vmem:[%s5417_s25 + $0x20] sm:$0xff]  ;;  %v5717_v38 = vld [vmem:[%s7027_s10 + $0x388] sm:$0xff] }
  0x5c   : > { %2945 = vmatpush1.bf16.msra.mxu0 %v4590_v54  ;;  %3051 = vmatpush1.bf16.msra.mxu1 %v4592_v56  ;;  %v890_v54 = vld [vmem:[%s7027_s10 + $0x2c0] sm:$0xff] }
  0x5d   : > { %2946 = vmatprep.subr.bf16.mxu0 %v4599_v57  ;;  %3052 = vmatprep.subr.bf16.mxu1 %v4601_v60  ;;  %v894_v56 = vld [vmem:[%s7027_s10 + $0x2e0] sm:$0xff]  ;;  %v891_v57 = vld [vmem:[%s7027_s10 + $0x2c8] sm:$0xff]  ;;  %v5661_v60 = vsub.s32 0, %v5406_v10 }
  0x5e   : > { %v4647_v62 = vcombine.high %v890_v54, %v894_v56  ;;  %v4649_v0 = vcombine.high %v891_v57, %v895_v58  ;;  %v4648_v9 = vcombine.low %v891_v57, %v895_v58  ;;  %v926_v57 = vld [vmem:[%s7027_s10 + $0x3e0] sm:$0xff] }
  0x5f   : > { %v5678_v7 = vrot.slane %v5443_v24, %v5661_v60  ;;  %v907_v24 = vld [vmem:[%s7027_s10 + $0x348] sm:$0xff] }
  0x60   : > { %2947 = vmatpush1.bf16.msra.mxu0 %v4598_v26  ;;  %3053 = vmatpush1.bf16.msra.mxu1 %v4600_v3  ;;  %v902_v26 = vld [vmem:[%s7027_s10 + $0x320] sm:$0xff]  ;;  %v899_v3 = vld [vmem:[%s7027_s10 + $0x308] sm:$0xff] }
  0x61   : > { %2948 = vmatprep.subr.bf16.mxu0 %v4607_v4  ;;  %3054 = vmatprep.subr.bf16.mxu1 %v4609_v5  ;;  %v903_v4 = vld [vmem:[%s7027_s10 + $0x328] sm:$0xff]  ;;  %v4646_v5 = vcombine.low %v890_v54, %v894_v56  ;;  %v4655_v11 = vcombine.high %v898_v1, %v902_v26  ;;  %v4654_v20 = vcombine.low %v898_v1, %v902_v26  ;;  %v632_v54 = vunpack.c.l.bf16 %v617_v45  ;;  %v922_v56 = vld [vmem:[%s7027_s10 + $0x3c0] sm:$0xff] }
  0x62   : > { %v4656_v25 = vcombine.low %v899_v3, %v903_v4 }
  0x64   : > { %2949 = vmatpush1.bf16.msra.mxu0 %v4606_v13  ;;  %3055 = vmatpush1.bf16.msra.mxu1 %v4608_v16  ;;  %v622_v13 = vunpack.c.l.bf16 %v5438_v23  ;;  %v4657_v16 = vcombine.high %v899_v3, %v903_v4  ;;  %v5697_v23 = vld [vmem:[%s5417_s25 + $0x30] sm:$0xff]  ;;  %v670_v4 = vmul.f32 %v5557_v35, %v632_v54  ;;  %v946_v54 = vld [vmem:[%s7027_s10 + $0x480] sm:$0xff] }
  0x65   : > { %2950 = vmatprep.subr.bf16.mxu0 %v4615_v17  ;;  %3056 = vmatprep.subr.bf16.mxu1 %v4617_v18  ;;  %v906_v17 = vld [vmem:[%s7027_s10 + $0x340] sm:$0xff]  ;;  %v911_v18 = vld [vmem:[%s7027_s10 + $0x368] sm:$0xff] }
  0x66   : > { %v4663_v33 = vcombine.high %v906_v17, %v910_v22  ;;  %v660_v40 = vmul.f32 %v5678_v7, %v622_v13  ;;  %v4679_v13 = vcombine.high %v922_v56, %v926_v57 }
  0x68   : > { %2951 = vmatpush1.bf16.msra.mxu0 %v4614_v29  ;;  %3057 = vmatpush1.bf16.msra.mxu1 %v4616_v30  ;;  %v5707_v29 = vld [vmem:[%s7027_s10 + $0x3a0] sm:$0xff]  ;;  %v656_v30 = vmul.f32 %v5678_v7, %v618_v6 }
  0x69   : > { %2952 = vmatprep.subr.bf16.mxu0 %v4623_v31  ;;  %3058 = vmatprep.subr.bf16.mxu1 %v4625_v32  ;;  %v5712_v31 = vrot.slane %v5466_v37, %v5661_v60  ;;  %v4662_v32 = vcombine.low %v906_v17, %v910_v22  ;;  %v4665_v37 = vcombine.high %v907_v24, %v911_v18 }
  0x6a   : > { %v4670_v49 = vcombine.low %v5702_v27, %v5707_v29  ;;  %v4671_v47 = vcombine.high %v5702_v27, %v5707_v29  ;;  %v935_v27 = vld [vmem:[%s7027_s10 + $0x428] sm:$0xff] }
  0x6b   : > { %v698_v58 = vadd.f32 %v5712_v31, %v660_v40 }
  0x6c   : > { %2953 = vmatpush1.bf16.msra.mxu0 %v4622_v41  ;;  %3059 = vmatpush1.bf16.msra.mxu1 %v4624_v42  ;;  %v4664_v41 = vcombine.low %v907_v24, %v911_v18  ;;  %v627_v42 = vunpack.c.h.bf16 %v5694_v19  ;;  %v934_v18 = vld [vmem:[%s7027_s10 + $0x420] sm:$0xff] }
  0x6d   : > { %2954 = vmatprep.subr.bf16.mxu0 %v4631_v43  ;;  %3060 = vmatprep.subr.bf16.mxu1 %v4633_v44  ;;  %v631_v43 = vunpack.c.h.bf16 %v5697_v23  ;;  %v615_v44 = vld [vmem:[%s5417_s25 + $0x28] sm:$0xff]  ;;  %v714_v29 = vmax.f32 %v698_v58, 0.0 }
  0x6e   : > { %v629_v48 = vunpack.c.h.bf16 %v615_v44  ;;  %v665_v1 = vmul.f32 %v5455_v34, %v627_v42  ;;  %v951_v58 = vld [vmem:[%s7027_s10 + $0x4a8] sm:$0xff] }
  0x6f   : > { %v669_v26 = vmul.f32 %v5455_v34, %v631_v43  ;;  %v708_v34 = vadd.f32 %v5561_v36, %v670_v4  ;;  %v958_v4 = vld [vmem:[%s7027_s10 + $0x4e0] sm:$0xff] }
  0x70   : > { %2955 = vmatpush1.bf16.msra.mxu0 %v4630_v50  ;;  %3061 = vmatpush1.bf16.msra.mxu1 %v4632_v51  ;;  %v633_v50 = vunpack.c.h.bf16 %v617_v45  ;;  %v4673_v51 = vcombine.high %v5717_v38, %v5722_v39  ;;  %v939_v45 = vld [vmem:[%s7027_s10 + $0x448] sm:$0xff] }
  0x71   : > { %2956 = vmatprep.subr.bf16.mxu0 %v4639_v52  ;;  %3062 = vmatprep.subr.bf16.mxu1 %v4641_v53  ;;  %v694_v52 = vadd.f32 %v5712_v31, %v656_v30  ;;  %v628_v53 = vunpack.c.l.bf16 %v615_v44 }
  0x73   : > { %v666_v3 = vmul.f32 %v5557_v35, %v628_v53  ;;  %v710_v17 = vmax.f32 %v694_v52, 0.0 }
  0x74   : > { %2957 = vmatpush1.bf16.msra.mxu0 %v4638_v59  ;;  %3063 = vmatpush1.bf16.msra.mxu1 %v4640_v61  ;;  %v667_v59 = vmul.f32 %v5532_v14, %v629_v48  ;;  %v671_v61 = vmul.f32 %v5532_v14, %v633_v50  ;;  %v630_v14 = vunpack.c.l.bf16 %v5697_v23  ;;  %v707_v23 = vadd.f32 %v5478_v46, %v669_v26 }
  0x75   : > { %2958 = vmatprep.subr.bf16.mxu0 %v4647_v62  ;;  %3064 = vmatprep.subr.bf16.mxu1 %v4649_v0  ;;  %v923_v62 = vld [vmem:[%s7027_s10 + $0x3c8] sm:$0xff]  ;;  %v5789_v44 = vpack.c.bf16 %v714_v29, %v710_v17 }
  0x76   : > { %v927_v0 = vld [vmem:[%s7027_s10 + $0x3e8] sm:$0xff]  ;;  %v705_v6 = vadd.f32 %v5536_v15, %v667_v59  ;;  %v723_v43 = vmax.f32 %v707_v23, 0.0  ;;  %v970_v23 = vld [vmem:[%s7027_s10 + $0x540] sm:$0xff] }
  0x77   : > { %v4681_v35 = vcombine.high %v923_v62, %v927_v0  ;;  %v963_v17 = vld [vmem:[%s7027_s10 + $0x508] sm:$0xff] }
  0x78   : > { %2959 = vmatpush1.bf16.msra.mxu0 %v4646_v5  ;;  %3065 = vmatpush1.bf16.msra.mxu1 %v4648_v9  ;;  %v626_v5 = vunpack.c.l.bf16 %v5694_v19  ;;  %v709_v9 = vadd.f32 %v5536_v15, %v671_v61  ;;  %v721_v22 = vmax.f32 %v705_v6, 0.0  ;;  %v930_v15 = vld [vmem:[%s7027_s10 + $0x400] sm:$0xff]  ;;  %v703_v19 = vadd.f32 %v5478_v46, %v665_v1 }
  0x79   : > { %2960 = vmatprep.subr.bf16.mxu0 %v4655_v11  ;;  %3066 = vmatprep.subr.bf16.mxu1 %v4657_v16  ;;  %v4672_v11 = vcombine.low %v5717_v38, %v5722_v39  ;;  %v704_v16 = vadd.f32 %v5561_v36, %v666_v3  ;;  %v4678_v38 = vcombine.low %v922_v56, %v926_v57  ;;  %v950_v56 = vld [vmem:[%s7027_s10 + $0x4a0] sm:$0xff] }
  0x7a   : > { %v725_v24 = vmax.f32 %v709_v9, 0.0  ;;  %v664_v30 = vmul.f32 %v5678_v7, %v626_v5  ;;  %v4680_v39 = vcombine.low %v923_v62, %v927_v0  ;;  %v4687_v40 = vcombine.high %v930_v15, %v934_v18  ;;  %v954_v3 = vld [vmem:[%s7027_s10 + $0x4c0] sm:$0xff]  ;;  %v955_v5 = vld [vmem:[%s7027_s10 + $0x4c8] sm:$0xff] }
  0x7b   : > { %v720_v36 = vmax.f32 %v704_v16, 0.0  ;;  %v719_v42 = vmax.f32 %v703_v19, 0.0  ;;  %v4686_v50 = vcombine.low %v930_v15, %v934_v18  ;;  %v4703_v1 = vcombine.high %v946_v54, %v950_v56 }
  0x7c   : > { %2961 = vmatpush1.bf16.msra.mxu0 %v4654_v20  ;;  %3067 = vmatpush1.bf16.msra.mxu1 %v4656_v25  ;;  %v724_v20 = vmax.f32 %v708_v34, 0.0  ;;  %v931_v25 = vld [vmem:[%s7027_s10 + $0x408] sm:$0xff]  ;;  %v4702_v9 = vcombine.low %v946_v54, %v950_v56  ;;  %v962_v34 = vld [vmem:[%s7027_s10 + $0x500] sm:$0xff] }
  0x7d   : > { %2962 = vmatprep.subr.bf16.mxu0 %v4663_v33  ;;  %3068 = vmatprep.subr.bf16.mxu1 %v4665_v37  ;;  %v5779_v33 = vpack.c.bf16 %v725_v24, %v721_v22  ;;  %v938_v37 = vld [vmem:[%s7027_s10 + $0x440] sm:$0xff]  ;;  %v5805_v57 = vpack.c.bf16 %v723_v43, %v719_v42  ;;  %v967_v22 = vld [vmem:[%s7027_s10 + $0x528] sm:$0xff]  ;;  %v4710_v24 = vcombine.low %v954_v3, %v958_v4 }
  0x7e   : > { %v5781_v46 = vpack.c.bf16 %v724_v20, %v720_v36  ;;  %v4721_v19 = vcombine.high %v963_v17, %v967_v22  ;;  %v974_v36 = vld [vmem:[%s7027_s10 + $0x560] sm:$0xff]  ;;  %v971_v20 = vld [vmem:[%s7027_s10 + $0x548] sm:$0xff]  ;;  %v4720_v29 = vcombine.low %v963_v17, %v967_v22 }
  0x7f   : > { %v994_v54 = vld [vmem:[%s7027_s10 + $0x600] sm:$0xff] }
  0x80   : > { %2963 = vmatpush1.bf16.msra.mxu0 %v4662_v32  ;;  %3069 = vmatpush1.bf16.msra.mxu1 %v4664_v41  ;;  %v668_v32 = vmul.f32 %v5678_v7, %v630_v14  ;;  %v4689_v41 = vcombine.high %v931_v25, %v935_v27  ;;  %v942_v7 = vld [vmem:[%s7027_s10 + $0x460] sm:$0xff]  ;;  %v959_v14 = vld [vmem:[%s7027_s10 + $0x4e8] sm:$0xff] }
  0x81   : > { %2964 = vmatprep.subr.bf16.mxu0 %v4671_v47  ;;  %3070 = vmatprep.subr.bf16.mxu1 %v4673_v51  ;;  %v702_v47 = vadd.f32 %v5712_v31, %v664_v30  ;;  %v4688_v51 = vcombine.low %v931_v25, %v935_v27  ;;  %v4695_v52 = vcombine.high %v938_v37, %v942_v7  ;;  %v975_v25 = vld [vmem:[%s7027_s10 + $0x568] sm:$0xff]  ;;  %v998_v56 = vld [vmem:[%s7027_s10 + $0x620] sm:$0xff] }
  0x82   : > { %v706_v48 = vadd.f32 %v5712_v31, %v668_v32  ;;  %v947_v31 = vld [vmem:[%s7027_s10 + $0x488] sm:$0xff]  ;;  %v4694_v62 = vcombine.low %v938_v37, %v942_v7  ;;  %v4713_v16 = vcombine.high %v955_v5, %v959_v14  ;;  %v4712_v15 = vcombine.low %v955_v5, %v959_v14 }
  0x83   : > { %v718_v59 = vmax.f32 %v702_v47, 0.0  ;;  %v4705_v26 = vcombine.high %v947_v31, %v951_v58  ;;  %v4727_v30 = vcombine.high %v970_v23, %v974_v36  ;;  %v4729_v32 = vcombine.high %v971_v20, %v975_v25  ;;  %v987_v47 = vld [vmem:[%s7027_s10 + $0x5c8] sm:$0xff] }
  0x84   : > { %2965 = vmatpush1.bf16.msra.mxu0 %v4670_v49  ;;  %3071 = vmatpush1.bf16.msra.mxu1 %v4672_v11  ;;  %v943_v49 = vld [vmem:[%s7027_s10 + $0x468] sm:$0xff]  ;;  %v722_v61 = vmax.f32 %v706_v48, 0.0  ;;  %v4704_v11 = vcombine.low %v947_v31, %v951_v58  ;;  %v4726_v37 = vcombine.low %v970_v23, %v974_v36  ;;  %v4728_v7 = vcombine.low %v971_v20, %v975_v25 }
  0x85   : > { %2966 = vmatprep.subr.bf16.mxu0 %v4679_v13  ;;  %3072 = vmatprep.subr.bf16.mxu1 %v4681_v35  ;;  %v4697_v53 = vcombine.high %v939_v45, %v943_v49  ;;  %v4696_v0 = vcombine.low %v939_v45, %v943_v49  ;;  %v4711_v13 = vcombine.high %v954_v3, %v958_v4  ;;  %v966_v35 = vld [vmem:[%s7027_s10 + $0x520] sm:$0xff]  ;;  %v991_v48 = vld [vmem:[%s7027_s10 + $0x5e8] sm:$0xff] }
  0x86   : > { %v5829_v6 = vpack.c.bf16 %v722_v61, %v718_v59  ;;  %v4719_v18 = vcombine.high %v962_v34, %v966_v35  ;;  %v4718_v27 = vcombine.low %v962_v34, %v966_v35  ;;  %v986_v45 = vld [vmem:[%s7027_s10 + $0x5c0] sm:$0xff]  ;;  %v995_v31 = vld [vmem:[%s7027_s10 + $0x608] sm:$0xff]  ;;  %v4744_v61 = vcombine.low %v987_v47, %v991_v48 }
  0x87   : > { %v990_v49 = vld [vmem:[%s7027_s10 + $0x5e0] sm:$0xff]  ;;  %v999_v58 = vld [vmem:[%s7027_s10 + $0x628] sm:$0xff]  ;;  %v4750_v5 = vcombine.low %v994_v54, %v998_v56 }
  0x88   : > { %2967 = vmatpush1.bf16.msra.mxu0 %v4678_v38  ;;  %3073 = vmatpush1.bf16.msra.mxu1 %v4680_v39  ;;  %v978_v38 = vld [vmem:[%s7027_s10 + $0x580] sm:$0xff]  ;;  %v4742_v59 = vcombine.low %v986_v45, %v990_v49  ;;  %v1003_v3 = vld [vmem:[%s7027_s10 + $0x648] sm:$0xff]  ;;  %v4752_v14 = vcombine.low %v995_v31, %v999_v58 }
  0x89   : > { %2989 = vmatprep.subr.bf16.mxu0 %v4687_v40  ;;  %3095 = vmatprep.subr.bf16.mxu1 %v4689_v41  ;;  %v982_v39 = vld [vmem:[%s7027_s10 + $0x5a0] sm:$0xff]  ;;  %v979_v40 = vld [vmem:[%s7027_s10 + $0x588] sm:$0xff] }
  0x8a   : > { %v983_v41 = vld [vmem:[%s7027_s10 + $0x5a8] sm:$0xff]  ;;  %v4735_v42 = vcombine.high %v978_v38, %v982_v39 }
  0x8b   : > { %2969 = vmatmul.mubr.bf16.vlgmr.msra.gmra.mrb[0].mxu0 %v5789_v44  ;;  %3075 = vmatmul.mubr.bf16.vlgmr.msra.gmra.mrb[0].mxu1 %v5789_v44  ;;  %v4737_v43 = vcombine.high %v979_v40, %v983_v41  ;;  %v1007_v4 = vld [vmem:[%s7027_s10 + $0x668] sm:$0xff] }
  0x8c   : > { %2990 = vmatpush1.bf16.msra.mxu0 %v4686_v50  ;;  %3096 = vmatpush1.bf16.msra.mxu1 %v4688_v51  ;;  %v4734_v50 = vcombine.low %v978_v38, %v982_v39  ;;  %v4736_v51 = vcombine.low %v979_v40, %v983_v41  ;;  %v1011_v34 = vld [vmem:[%s7027_s10 + $0x688] sm:$0xff]  ;;  %v4760_v22 = vcombine.low %v1003_v3, %v1007_v4 }
  0x8d   : > { %2991 = vmatprep.subr.bf16.mxu0 %v4695_v52  ;;  %3097 = vmatprep.subr.bf16.mxu1 %v4697_v53  ;;  %v4743_v52 = vcombine.high %v986_v45, %v990_v49  ;;  %v4745_v53 = vcombine.high %v987_v47, %v991_v48  ;;  %v1015_v35 = vld [vmem:[%s7027_s10 + $0x6a8] sm:$0xff] }
  0x8e   : > { %2978 = vmatprep.mubr.bf16.mxu0 %v5805_v57  ;;  %3084 = vmatprep.mubr.bf16.mxu1 %v5805_v57  ;;  %v1019_v23 = vld [vmem:[%s7027_s10 + $0x6c8] sm:$0xff]  ;;  %v4768_v25 = vcombine.low %v1011_v34, %v1015_v35 }
  0x8f   : > { %v1023_v36 = vld [vmem:[%s7027_s10 + $0x6e8] sm:$0xff] }
  0x90   : > { %2992 = vmatpush1.bf16.msra.mxu0 %v4694_v62  ;;  %3098 = vmatpush1.bf16.msra.mxu1 %v4696_v0  ;;  %v4751_v62 = vcombine.high %v994_v54, %v998_v56  ;;  %v4753_v0 = vcombine.high %v995_v31, %v999_v58  ;;  %v1027_v38 = vld [vmem:[%s7027_s10 + $0x708] sm:$0xff]  ;;  %v4776_v41 = vcombine.low %v1019_v23, %v1023_v36 }
  0x91   : > { %2993 = vmatprep.subr.bf16.mxu0 %v4703_v1  ;;  %3099 = vmatprep.subr.bf16.mxu1 %v4705_v26  ;;  %v1002_v1 = vld [vmem:[%s7027_s10 + $0x640] sm:$0xff]  ;;  %v1031_v39 = vld [vmem:[%s7027_s10 + $0x728] sm:$0xff] }
  0x92   : > { %v1006_v26 = vld [vmem:[%s7027_s10 + $0x660] sm:$0xff]  ;;  %v1035_v45 = vld [vmem:[%s7027_s10 + $0x748] sm:$0xff]  ;;  %v4784_v48 = vcombine.low %v1027_v38, %v1031_v39 }
  0x93   : > { %2979 = vmatmul.mubr.bf16.gmra.mrb[4].mxu0 %v5829_v6  ;;  %3085 = vmatmul.mubr.bf16.gmra.mrb[4].mxu1 %v5829_v6  ;;  %v4758_v17 = vcombine.low %v1002_v1, %v1006_v26  ;;  %v1039_v49 = vld [vmem:[%s7027_s10 + $0x768] sm:$0xff] }
  0x94   : > { %2994 = vmatpush1.bf16.msra.mxu0 %v4702_v9  ;;  %3100 = vmatpush1.bf16.msra.mxu1 %v4704_v11  ;;  %v4759_v9 = vcombine.high %v1002_v1, %v1006_v26  ;;  %v4761_v11 = vcombine.high %v1003_v3, %v1007_v4  ;;  %v1043_v54 = vld [vmem:[%s7027_s10 + $0x788] sm:$0xff]  ;;  %v4792_v58 = vcombine.low %v1035_v45, %v1039_v49 }
  0x95   : > { %2995 = vmatprep.subr.bf16.mxu0 %v4711_v13  ;;  %3101 = vmatprep.subr.bf16.mxu1 %v4713_v16  ;;  %v1010_v13 = vld [vmem:[%s7027_s10 + $0x680] sm:$0xff]  ;;  %v1047_v56 = vld [vmem:[%s7027_s10 + $0x7a8] sm:$0xff] }
  0x96   : > { %3021 = vmatprep.mubr.bf16.mxu0 %v5584_v55  ;;  %3127 = vmatprep.mubr.bf16.mxu1 %v5584_v55  ;;  %v1014_v16 = vld [vmem:[%s7027_s10 + $0x6a0] sm:$0xff]  ;;  %v1051_v1 = vld [vmem:[%s7027_s10 + $0x7c8] sm:$0xff]  ;;  %v4800_v4 = vcombine.low %v1043_v54, %v1047_v56 }
  0x97   : > { %v4766_v20 = vcombine.low %v1010_v13, %v1014_v16  ;;  %v1055_v26 = vld [vmem:[%s7027_s10 + $0x7e8] sm:$0xff] }
  0x98   : > { %2996 = vmatpush1.bf16.msra.mxu0 %v4710_v24  ;;  %3102 = vmatpush1.bf16.msra.mxu1 %v4712_v15  ;;  %v4767_v24 = vcombine.high %v1010_v13, %v1014_v16  ;;  %v4769_v15 = vcombine.high %v1011_v34, %v1015_v35  ;;  %v805_v13 = vld [vmem:[%s7027_s10 + $0x18] sm:$0xff]  ;;  %v4808_v35 = vcombine.low %v1051_v1, %v1055_v26 }
  0x99   : > { %2997 = vmatprep.subr.bf16.mxu0 %v4719_v18  ;;  %3103 = vmatprep.subr.bf16.mxu1 %v4721_v19  ;;  %v1018_v18 = vld [vmem:[%s7027_s10 + $0x6c0] sm:$0xff]  ;;  %v809_v16 = vld [vmem:[%s7027_s10 + $0x38] sm:$0xff] }
  0x9a   : > { %v1022_v19 = vld [vmem:[%s7027_s10 + $0x6e0] sm:$0xff] }
  0x9b   : > { %v4774_v40 = vcombine.low %v1018_v18, %v1022_v19 }
  0x9c   : > { %2998 = vmatpush1.bf16.msra.mxu0 %v4718_v27  ;;  %3104 = vmatpush1.bf16.msra.mxu1 %v4720_v29  ;;  %v4775_v27 = vcombine.high %v1018_v18, %v1022_v19  ;;  %v4777_v29 = vcombine.high %v1019_v23, %v1023_v36  ;;  %v813_v18 = vld [vmem:[%s7027_s10 + $0x58] sm:$0xff]  ;;  %v4564_v36 = vcombine.low %v805_v13, %v809_v16 }
  0x9d   : > { %2999 = vmatprep.subr.bf16.mxu0 %v4727_v30  ;;  %3105 = vmatprep.subr.bf16.mxu1 %v4729_v32  ;;  %v1026_v30 = vld [vmem:[%s7027_s10 + $0x700] sm:$0xff]  ;;  %v817_v19 = vld [vmem:[%s7027_s10 + $0x78] sm:$0xff] }
  0x9e   : > { %v1030_v32 = vld [vmem:[%s7027_s10 + $0x720] sm:$0xff] }
  0x9f   : > { %v4782_v47 = vcombine.low %v1026_v30, %v1030_v32 }
  0xa0   : > { %3000 = vmatpush1.bf16.msra.mxu0 %v4726_v37  ;;  %3106 = vmatpush1.bf16.msra.mxu1 %v4728_v7  ;;  %v4783_v37 = vcombine.high %v1026_v30, %v1030_v32  ;;  %v4785_v7 = vcombine.high %v1027_v38, %v1031_v39  ;;  %v821_v30 = vld [vmem:[%s7027_s10 + $0x98] sm:$0xff]  ;;  %v4572_v39 = vcombine.low %v813_v18, %v817_v19 }
  0xa1   : > { %3001 = vmatprep.subr.bf16.mxu0 %v4735_v42  ;;  %3107 = vmatprep.subr.bf16.mxu1 %v4737_v43  ;;  %v1034_v42 = vld [vmem:[%s7027_s10 + $0x740] sm:$0xff]  ;;  %v825_v32 = vld [vmem:[%s7027_s10 + $0xb8] sm:$0xff] }
  0xa2   : > { %v1038_v43 = vld [vmem:[%s7027_s10 + $0x760] sm:$0xff] }
  0xa3   : > { %v4790_v31 = vcombine.low %v1034_v42, %v1038_v43 }
  0xa4   : > { %3002 = vmatpush1.bf16.msra.mxu0 %v4734_v50  ;;  %3108 = vmatpush1.bf16.msra.mxu1 %v4736_v51  ;;  %v4791_v50 = vcombine.high %v1034_v42, %v1038_v43  ;;  %v4793_v51 = vcombine.high %v1035_v45, %v1039_v49  ;;  %v829_v42 = vld [vmem:[%s7027_s10 + $0xd8] sm:$0xff]  ;;  %v4580_v49 = vcombine.low %v821_v30, %v825_v32 }
  0xa5   : > { %3003 = vmatprep.subr.bf16.mxu0 %v4743_v52  ;;  %3109 = vmatprep.subr.bf16.mxu1 %v4745_v53  ;;  %v1042_v52 = vld [vmem:[%s7027_s10 + $0x780] sm:$0xff]  ;;  %v833_v43 = vld [vmem:[%s7027_s10 + $0xf8] sm:$0xff] }
  0xa6   : > { %v1046_v53 = vld [vmem:[%s7027_s10 + $0x7a0] sm:$0xff] }
  0xa7   : > { %v4798_v3 = vcombine.low %v1042_v52, %v1046_v53 }
  0xa8   : > { %3004 = vmatpush1.bf16.msra.mxu0 %v4742_v59  ;;  %3110 = vmatpush1.bf16.msra.mxu1 %v4744_v61  ;;  %v4799_v59 = vcombine.high %v1042_v52, %v1046_v53  ;;  %v4801_v61 = vcombine.high %v1043_v54, %v1047_v56  ;;  %v837_v52 = vld [vmem:[%s7027_s10 + $0x118] sm:$0xff]  ;;  %v4588_v56 = vcombine.low %v829_v42, %v833_v43 }
  0xa9   : > { %3005 = vmatprep.subr.bf16.mxu0 %v4751_v62  ;;  %3111 = vmatprep.subr.bf16.mxu1 %v4753_v0  ;;  %v1050_v62 = vld [vmem:[%s7027_s10 + $0x7c0] sm:$0xff]  ;;  %v841_v53 = vld [vmem:[%s7027_s10 + $0x138] sm:$0xff] }
  0xaa   : > { %v1054_v0 = vld [vmem:[%s7027_s10 + $0x7e0] sm:$0xff] }
  0xab   : > { %v4806_v34 = vcombine.low %v1050_v62, %v1054_v0 }
  0xac   : > { %3006 = vmatpush1.bf16.msra.mxu0 %v4750_v5  ;;  %3112 = vmatpush1.bf16.msra.mxu1 %v4752_v14  ;;  %v4807_v5 = vcombine.high %v1050_v62, %v1054_v0  ;;  %v4809_v14 = vcombine.high %v1051_v1, %v1055_v26  ;;  %v845_v62 = vld [vmem:[%s7027_s10 + $0x158] sm:$0xff]  ;;  %v4596_v26 = vcombine.low %v837_v52, %v841_v53 }
  0xad   : > { %3007 = vmatprep.subr.bf16.mxu0 %v4759_v9  ;;  %3113 = vmatprep.subr.bf16.mxu1 %v4761_v11  ;;  %v804_v9 = vld [vmem:[%s7027_s10 + $0x10] sm:$0xff]  ;;  %v849_v0 = vld [vmem:[%s7027_s10 + $0x178] sm:$0xff] }
  0xae   : > { %v808_v11 = vld [vmem:[%s7027_s10 + $0x30] sm:$0xff] }
  0xaf   : > { %v4562_v23 = vcombine.low %v804_v9, %v808_v11 }
  0xb0   : > { %3008 = vmatpush1.bf16.msra.mxu0 %v4758_v17  ;;  %3114 = vmatpush1.bf16.msra.mxu1 %v4760_v22  ;;  %v4563_v17 = vcombine.high %v804_v9, %v808_v11  ;;  %v4565_v22 = vcombine.high %v805_v13, %v809_v16  ;;  %v857_v9 = vld [vmem:[%s7027_s10 + $0x1b8] sm:$0xff]  ;;  %v4604_v13 = vcombine.low %v845_v62, %v849_v0 }
  0xb1   : > { %3009 = vmatprep.subr.bf16.mxu0 %v4767_v24  ;;  %3115 = vmatprep.subr.bf16.mxu1 %v4769_v15  ;;  %v812_v24 = vld [vmem:[%s7027_s10 + $0x50] sm:$0xff] }
  0xb2   : > { %v816_v15 = vld [vmem:[%s7027_s10 + $0x70] sm:$0xff] }
  0xb3   : > { %v4570_v38 = vcombine.low %v812_v24, %v816_v15 }
  0xb4   : > { %3010 = vmatpush1.bf16.msra.mxu0 %v4766_v20  ;;  %3116 = vmatpush1.bf16.msra.mxu1 %v4768_v25  ;;  %v4571_v20 = vcombine.high %v812_v24, %v816_v15  ;;  %v4573_v25 = vcombine.high %v813_v18, %v817_v19  ;;  %v865_v24 = vld [vmem:[%s7027_s10 + $0x1f8] sm:$0xff] }
  0xb5   : > { %3011 = vmatprep.subr.bf16.mxu0 %v4775_v27  ;;  %3117 = vmatprep.subr.bf16.mxu1 %v4777_v29  ;;  %v820_v27 = vld [vmem:[%s7027_s10 + $0x90] sm:$0xff] }
  0xb6   : > { %v824_v29 = vld [vmem:[%s7027_s10 + $0xb0] sm:$0xff] }
  0xb7   : > { %v4578_v45 = vcombine.low %v820_v27, %v824_v29 }
  0xb8   : > { %3012 = vmatpush1.bf16.msra.mxu0 %v4774_v40  ;;  %3118 = vmatpush1.bf16.msra.mxu1 %v4776_v41  ;;  %v4579_v40 = vcombine.high %v820_v27, %v824_v29  ;;  %v4581_v41 = vcombine.high %v821_v30, %v825_v32  ;;  %v873_v27 = vld [vmem:[%s7027_s10 + $0x238] sm:$0xff] }
  0xb9   : > { %3013 = vmatprep.subr.bf16.mxu0 %v4783_v37  ;;  %3119 = vmatprep.subr.bf16.mxu1 %v4785_v7  ;;  %v828_v37 = vld [vmem:[%s7027_s10 + $0xd0] sm:$0xff] }
  0xba   : > { %v832_v7 = vld [vmem:[%s7027_s10 + $0xf0] sm:$0xff] }
  0xbb   : > { %v4586_v54 = vcombine.low %v828_v37, %v832_v7 }
  0xbc   : > { %3014 = vmatpush1.bf16.msra.mxu0 %v4782_v47  ;;  %3120 = vmatpush1.bf16.msra.mxu1 %v4784_v48  ;;  %v4587_v47 = vcombine.high %v828_v37, %v832_v7  ;;  %v4589_v48 = vcombine.high %v829_v42, %v833_v43  ;;  %v881_v37 = vld [vmem:[%s7027_s10 + $0x278] sm:$0xff] }
  0xbd   : > { %3015 = vmatprep.subr.bf16.mxu0 %v4791_v50  ;;  %3121 = vmatprep.subr.bf16.mxu1 %v4793_v51  ;;  %v836_v50 = vld [vmem:[%s7027_s10 + $0x110] sm:$0xff] }
  0xbe   : > { %v840_v51 = vld [vmem:[%s7027_s10 + $0x130] sm:$0xff] }
  0xbf   : > { %v4594_v1 = vcombine.low %v836_v50, %v840_v51 }
  0xc0   : > { %3016 = vmatpush1.bf16.msra.mxu0 %v4790_v31  ;;  %3122 = vmatpush1.bf16.msra.mxu1 %v4792_v58  ;;  %v4595_v31 = vcombine.high %v836_v50, %v840_v51  ;;  %v4597_v58 = vcombine.high %v837_v52, %v841_v53  ;;  %v889_v50 = vld [vmem:[%s7027_s10 + $0x2b8] sm:$0xff] }
  0xc1   : > { %3017 = vmatprep.subr.bf16.mxu0 %v4799_v59  ;;  %3123 = vmatprep.subr.bf16.mxu1 %v4801_v61  ;;  %v844_v59 = vld [vmem:[%s7027_s10 + $0x150] sm:$0xff] }
  0xc2   : > { %v848_v61 = vld [vmem:[%s7027_s10 + $0x170] sm:$0xff] }
  0xc3   : > { %v4602_v11 = vcombine.low %v844_v59, %v848_v61 }
  0xc4   : > { %3018 = vmatpush1.bf16.msra.mxu0 %v4798_v3  ;;  %3124 = vmatpush1.bf16.msra.mxu1 %v4800_v4  ;;  %v4603_v3 = vcombine.high %v844_v59, %v848_v61  ;;  %v4605_v4 = vcombine.high %v845_v62, %v849_v0  ;;  %v897_v59 = vld [vmem:[%s7027_s10 + $0x2f8] sm:$0xff] }
  0xc5   : > { %3019 = vmatprep.subr.bf16.mxu0 %v4807_v5  ;;  %3125 = vmatprep.subr.bf16.mxu1 %v4809_v14  ;;  %v852_v5 = vld [vmem:[%s7027_s10 + $0x190] sm:$0xff] }
  0xc6   : > { %v856_v14 = vld [vmem:[%s7027_s10 + $0x1b0] sm:$0xff] }
  0xc7   : > { %v4611_v16 = vcombine.high %v852_v5, %v856_v14  ;;  %v4610_v15 = vcombine.low %v852_v5, %v856_v14  ;;  %v905_v5 = vld [vmem:[%s7027_s10 + $0x338] sm:$0xff] }
  0xc8   : > { %3020 = vmatpush1.bf16.msra.mxu0 %v4806_v34  ;;  %3126 = vmatpush1.bf16.msra.mxu1 %v4808_v35  ;;  %v860_v35 = vld [vmem:[%s7027_s10 + $0x1d0] sm:$0xff] }
  0xc9   : > { %3148 = vmatprep.subr.bf16.mxu0 %v4563_v17  ;;  %3254 = vmatprep.subr.bf16.mxu1 %v4565_v22  ;;  %v864_v17 = vld [vmem:[%s7027_s10 + $0x1f0] sm:$0xff]  ;;  %v861_v22 = vld [vmem:[%s7027_s10 + $0x1d8] sm:$0xff] }
  0xca   : > { %v4619_v19 = vcombine.high %v860_v35, %v864_v17  ;;  %v4618_v29 = vcombine.low %v860_v35, %v864_v17  ;;  %v4620_v30 = vcombine.low %v861_v22, %v865_v24  ;;  %v913_v35 = vld [vmem:[%s7027_s10 + $0x378] sm:$0xff] }
  0xcb   : > { %3022 = vmatmul.mubr.bf16.vlgmr.msra.gmra.mrb[0].mxu0 %v5598_v2  ;;  %3128 = vmatmul.mubr.bf16.vlgmr.msra.gmra.mrb[0].mxu1 %v5598_v2 }
  0xcc   : > { %3149 = vmatpush1.bf16.msra.mxu0 %v4562_v23  ;;  %3255 = vmatpush1.bf16.msra.mxu1 %v4564_v36  ;;  %v4621_v23 = vcombine.high %v861_v22, %v865_v24  ;;  %v868_v36 = vld [vmem:[%s7027_s10 + $0x210] sm:$0xff] }
  0xcd   : > { %3150 = vmatprep.subr.bf16.mxu0 %v4571_v20  ;;  %3256 = vmatprep.subr.bf16.mxu1 %v4573_v25  ;;  %v872_v20 = vld [vmem:[%s7027_s10 + $0x230] sm:$0xff]  ;;  %v869_v25 = vld [vmem:[%s7027_s10 + $0x218] sm:$0xff] }
  0xce   : > { %3031 = vmatprep.mubr.bf16.mxu0 %v5779_v33  ;;  %3137 = vmatprep.mubr.bf16.mxu1 %v5779_v33  ;;  %v4627_v32 = vcombine.high %v868_v36, %v872_v20  ;;  %v4626_v7 = vcombine.low %v868_v36, %v872_v20  ;;  %v4628_v42 = vcombine.low %v869_v25, %v873_v27  ;;  %v921_v36 = vld [vmem:[%s7027_s10 + $0x3b8] sm:$0xff] }
  0xd0   : > { %3151 = vmatpush1.bf16.msra.mxu0 %v4570_v38  ;;  %3257 = vmatpush1.bf16.msra.mxu1 %v4572_v39  ;;  %v4629_v38 = vcombine.high %v869_v25, %v873_v27  ;;  %v876_v39 = vld [vmem:[%s7027_s10 + $0x250] sm:$0xff] }
  0xd1   : > { %3152 = vmatprep.subr.bf16.mxu0 %v4579_v40  ;;  %3258 = vmatprep.subr.bf16.mxu1 %v4581_v41  ;;  %v880_v40 = vld [vmem:[%s7027_s10 + $0x270] sm:$0xff]  ;;  %v877_v41 = vld [vmem:[%s7027_s10 + $0x258] sm:$0xff] }
  0xd2   : > { %v4635_v43 = vcombine.high %v876_v39, %v880_v40  ;;  %v4634_v51 = vcombine.low %v876_v39, %v880_v40  ;;  %v4636_v52 = vcombine.low %v877_v41, %v881_v37  ;;  %v929_v39 = vld [vmem:[%s7027_s10 + $0x3f8] sm:$0xff] }
  0xd3   : > { %3032 = vmatmul.mubr.bf16.gmra.mrb[4].mxu0 %v5781_v46  ;;  %3138 = vmatmul.mubr.bf16.gmra.mrb[4].mxu1 %v5781_v46 }
  0xd4   : > { %3153 = vmatpush1.bf16.msra.mxu0 %v4578_v45  ;;  %3259 = vmatpush1.bf16.msra.mxu1 %v4580_v49  ;;  %v4637_v45 = vcombine.high %v877_v41, %v881_v37  ;;  %v884_v49 = vld [vmem:[%s7027_s10 + $0x290] sm:$0xff] }
  0xd5   : > { %3154 = vmatprep.subr.bf16.mxu0 %v4587_v47  ;;  %3260 = vmatprep.subr.bf16.mxu1 %v4589_v48  ;;  %v888_v47 = vld [vmem:[%s7027_s10 + $0x2b0] sm:$0xff]  ;;  %v885_v48 = vld [vmem:[%s7027_s10 + $0x298] sm:$0xff] }
  0xd6   : > { %3180 = vmatprep.mubr.bf16.mxu0 %v5544_v28  ;;  %3286 = vmatprep.mubr.bf16.mxu1 %v5544_v28  ;;  %v853_v28 = vld [vmem:[%s7027_s10 + $0x198] sm:$0xff]  ;;  %v4643_v53 = vcombine.high %v884_v49, %v888_v47  ;;  %v4642_v61 = vcombine.low %v884_v49, %v888_v47  ;;  %v4644_v62 = vcombine.low %v885_v48, %v889_v50 }
  0xd7   : > { %v4613_v34 = vcombine.high %v853_v28, %v857_v9  ;;  %v4612_v18 = vcombine.low %v853_v28, %v857_v9  ;;  %v937_v49 = vld [vmem:[%s7027_s10 + $0x438] sm:$0xff] }
  0xd8   : > { %3155 = vmatpush1.bf16.msra.mxu0 %v4586_v54  ;;  %3261 = vmatpush1.bf16.msra.mxu1 %v4588_v56  ;;  %v4645_v54 = vcombine.high %v885_v48, %v889_v50  ;;  %v892_v56 = vld [vmem:[%s7027_s10 + $0x2d0] sm:$0xff] }
  0xd9   : > { %3156 = vmatprep.subr.bf16.mxu0 %v4595_v31  ;;  %3262 = vmatprep.subr.bf16.mxu1 %v4597_v58  ;;  %v896_v31 = vld [vmem:[%s7027_s10 + $0x2f0] sm:$0xff]  ;;  %v893_v58 = vld [vmem:[%s7027_s10 + $0x2d8] sm:$0xff] }
  0xda   : > { %v4651_v0 = vcombine.high %v892_v56, %v896_v31  ;;  %v4650_v14 = vcombine.low %v892_v56, %v896_v31  ;;  %v4652_v28 = vcombine.low %v893_v58, %v897_v59  ;;  %v945_v56 = vld [vmem:[%s7027_s10 + $0x478] sm:$0xff] }
  0xdc   : > { %3157 = vmatpush1.bf16.msra.mxu0 %v4594_v1  ;;  %3263 = vmatpush1.bf16.msra.mxu1 %v4596_v26  ;;  %v4653_v1 = vcombine.high %v893_v58, %v897_v59  ;;  %v900_v26 = vld [vmem:[%s7027_s10 + $0x310] sm:$0xff] }
  0xdd   : > { %3158 = vmatprep.subr.bf16.mxu0 %v4603_v3  ;;  %3264 = vmatprep.subr.bf16.mxu1 %v4605_v4  ;;  %v904_v3 = vld [vmem:[%s7027_s10 + $0x330] sm:$0xff]  ;;  %v901_v4 = vld [vmem:[%s7027_s10 + $0x318] sm:$0xff] }
  0xde   : > { %v4659_v9 = vcombine.high %v900_v26, %v904_v3  ;;  %v4658_v17 = vcombine.low %v900_v26, %v904_v3  ;;  %v4660_v22 = vcombine.low %v901_v4, %v905_v5  ;;  %v953_v26 = vld [vmem:[%s7027_s10 + $0x4b8] sm:$0xff] }
  0xe0   : > { %3159 = vmatpush1.bf16.msra.mxu0 %v4602_v11  ;;  %3265 = vmatpush1.bf16.msra.mxu1 %v4604_v13  ;;  %v4661_v11 = vcombine.high %v901_v4, %v905_v5  ;;  %v908_v13 = vld [vmem:[%s7027_s10 + $0x350] sm:$0xff] }
  0xe1   : > { %3160 = vmatprep.subr.bf16.mxu0 %v4611_v16  ;;  %3266 = vmatprep.subr.bf16.mxu1 %v4613_v34  ;;  %v912_v16 = vld [vmem:[%s7027_s10 + $0x370] sm:$0xff]  ;;  %v909_v34 = vld [vmem:[%s7027_s10 + $0x358] sm:$0xff] }
  0xe2   : > { %v4667_v24 = vcombine.high %v908_v13, %v912_v16  ;;  %v4666_v20 = vcombine.low %v908_v13, %v912_v16  ;;  %v4668_v25 = vcombine.low %v909_v34, %v913_v35 }
  0xe4   : > { %3161 = vmatpush1.bf16.msra.mxu0 %v4610_v15  ;;  %3267 = vmatpush1.bf16.msra.mxu1 %v4612_v18  ;;  %v4669_v15 = vcombine.high %v909_v34, %v913_v35  ;;  %v916_v18 = vld [vmem:[%s7027_s10 + $0x390] sm:$0xff] }
  0xe5   : > { %3162 = vmatprep.subr.bf16.mxu0 %v4619_v19  ;;  %3268 = vmatprep.subr.bf16.mxu1 %v4621_v23  ;;  %v920_v19 = vld [vmem:[%s7027_s10 + $0x3b0] sm:$0xff]  ;;  %v917_v23 = vld [vmem:[%s7027_s10 + $0x398] sm:$0xff] }
  0xe6   : > { %v4675_v27 = vcombine.high %v916_v18, %v920_v19  ;;  %v4674_v40 = vcombine.low %v916_v18, %v920_v19  ;;  %v4676_v41 = vcombine.low %v917_v23, %v921_v36 }
  0xe8   : > { %3163 = vmatpush1.bf16.msra.mxu0 %v4618_v29  ;;  %3269 = vmatpush1.bf16.msra.mxu1 %v4620_v30  ;;  %v4677_v29 = vcombine.high %v917_v23, %v921_v36  ;;  %v924_v30 = vld [vmem:[%s7027_s10 + $0x3d0] sm:$0xff] }
  0xe9   : > { %3164 = vmatprep.subr.bf16.mxu0 %v4627_v32  ;;  %3270 = vmatprep.subr.bf16.mxu1 %v4629_v38  ;;  %v928_v32 = vld [vmem:[%s7027_s10 + $0x3f0] sm:$0xff]  ;;  %v925_v38 = vld [vmem:[%s7027_s10 + $0x3d8] sm:$0xff] }
  0xea   : > { %v4683_v37 = vcombine.high %v924_v30, %v928_v32  ;;  %v4682_v47 = vcombine.low %v924_v30, %v928_v32  ;;  %v4684_v48 = vcombine.low %v925_v38, %v929_v39  ;;  %v972_v36 = vld [vmem:[%s7027_s10 + $0x550] sm:$0xff] }
  0xec   : > { %3165 = vmatpush1.bf16.msra.mxu0 %v4626_v7  ;;  %3271 = vmatpush1.bf16.msra.mxu1 %v4628_v42  ;;  %v4685_v7 = vcombine.high %v925_v38, %v929_v39  ;;  %v932_v42 = vld [vmem:[%s7027_s10 + $0x410] sm:$0xff] }
  0xed   : > { %3166 = vmatprep.subr.bf16.mxu0 %v4635_v43  ;;  %3272 = vmatprep.subr.bf16.mxu1 %v4637_v45  ;;  %v936_v43 = vld [vmem:[%s7027_s10 + $0x430] sm:$0xff]  ;;  %v933_v45 = vld [vmem:[%s7027_s10 + $0x418] sm:$0xff] }
  0xee   : > { %v4691_v50 = vcombine.high %v932_v42, %v936_v43  ;;  %v4690_v31 = vcombine.low %v932_v42, %v936_v43  ;;  %v4692_v58 = vcombine.low %v933_v45, %v937_v49  ;;  %v980_v38 = vld [vmem:[%s7027_s10 + $0x590] sm:$0xff] }
  0xef   : > { %v984_v39 = vld [vmem:[%s7027_s10 + $0x5b0] sm:$0xff] }
  0xf0   : > { %3167 = vmatpush1.bf16.msra.mxu0 %v4634_v51  ;;  %3273 = vmatpush1.bf16.msra.mxu1 %v4636_v52  ;;  %v4693_v51 = vcombine.high %v933_v45, %v937_v49  ;;  %v940_v52 = vld [vmem:[%s7027_s10 + $0x450] sm:$0xff]  ;;  %v989_v49 = vld [vmem:[%s7027_s10 + $0x5d8] sm:$0xff] }
  0xf1   : > { %3168 = vmatprep.subr.bf16.mxu0 %v4643_v53  ;;  %3274 = vmatprep.subr.bf16.mxu1 %v4645_v54  ;;  %v944_v53 = vld [vmem:[%s7027_s10 + $0x470] sm:$0xff]  ;;  %v941_v54 = vld [vmem:[%s7027_s10 + $0x458] sm:$0xff] }
  0xf2   : > { %v4699_v59 = vcombine.high %v940_v52, %v944_v53  ;;  %v4698_v3 = vcombine.low %v940_v52, %v944_v53  ;;  %v4700_v4 = vcombine.low %v941_v54, %v945_v56  ;;  %v988_v43 = vld [vmem:[%s7027_s10 + $0x5d0] sm:$0xff] }
  0xf3   : > { %v992_v45 = vld [vmem:[%s7027_s10 + $0x5f0] sm:$0xff] }
  0xf4   : > { %3169 = vmatpush1.bf16.msra.mxu0 %v4642_v61  ;;  %3275 = vmatpush1.bf16.msra.mxu1 %v4644_v62  ;;  %v4701_v61 = vcombine.high %v941_v54, %v945_v56  ;;  %v948_v62 = vld [vmem:[%s7027_s10 + $0x490] sm:$0xff]  ;;  %v997_v56 = vld [vmem:[%s7027_s10 + $0x618] sm:$0xff] }
  0xf5   : > { %3170 = vmatprep.subr.bf16.mxu0 %v4651_v0  ;;  %3276 = vmatprep.subr.bf16.mxu1 %v4653_v1  ;;  %v952_v0 = vld [vmem:[%s7027_s10 + $0x4b0] sm:$0xff]  ;;  %v949_v1 = vld [vmem:[%s7027_s10 + $0x498] sm:$0xff] }
  0xf6   : > { %v4707_v5 = vcombine.high %v948_v62, %v952_v0  ;;  %v4706_v13 = vcombine.low %v948_v62, %v952_v0  ;;  %v4708_v16 = vcombine.low %v949_v1, %v953_v26  ;;  %v996_v53 = vld [vmem:[%s7027_s10 + $0x610] sm:$0xff] }
  0xf7   : > { %v1000_v54 = vld [vmem:[%s7027_s10 + $0x630] sm:$0xff] }
  0xf8   : > { %3171 = vmatpush1.bf16.msra.mxu0 %v4650_v14  ;;  %3277 = vmatpush1.bf16.msra.mxu1 %v4652_v28  ;;  %v4709_v14 = vcombine.high %v949_v1, %v953_v26  ;;  %v956_v28 = vld [vmem:[%s7027_s10 + $0x4d0] sm:$0xff]  ;;  %v1005_v26 = vld [vmem:[%s7027_s10 + $0x658] sm:$0xff] }
  0xf9   : > { %3172 = vmatprep.subr.bf16.mxu0 %v4659_v9  ;;  %3278 = vmatprep.subr.bf16.mxu1 %v4661_v11  ;;  %v960_v9 = vld [vmem:[%s7027_s10 + $0x4f0] sm:$0xff]  ;;  %v961_v11 = vld [vmem:[%s7027_s10 + $0x4f8] sm:$0xff] }
  0xfa   : > { %v4715_v34 = vcombine.high %v956_v28, %v960_v9  ;;  %v1004_v0 = vld [vmem:[%s7027_s10 + $0x650] sm:$0xff] }
  0xfb   : > { %v1008_v1 = vld [vmem:[%s7027_s10 + $0x670] sm:$0xff] }
  0xfc   : > { %3173 = vmatpush1.bf16.msra.mxu0 %v4658_v17  ;;  %3279 = vmatpush1.bf16.msra.mxu1 %v4660_v22  ;;  %v964_v17 = vld [vmem:[%s7027_s10 + $0x510] sm:$0xff] }
  0xfd   : > { %3174 = vmatprep.subr.bf16.mxu0 %v4667_v24  ;;  %3280 = vmatprep.subr.bf16.mxu1 %v4669_v15  ;;  %v968_v22 = vld [vmem:[%s7027_s10 + $0x530] sm:$0xff]  ;;  %v969_v24 = vld [vmem:[%s7027_s10 + $0x538] sm:$0xff]  ;;  %v4714_v15 = vcombine.low %v956_v28, %v960_v9 }
  0xfe   : > { %v4723_v19 = vcombine.high %v964_v17, %v968_v22  ;;  %v1012_v9 = vld [vmem:[%s7027_s10 + $0x690] sm:$0xff] }
 0x100   : > { %3175 = vmatpush1.bf16.msra.mxu0 %v4666_v20  ;;  %3281 = vmatpush1.bf16.msra.mxu1 %v4668_v25  ;;  %v976_v20 = vld [vmem:[%s7027_s10 + $0x570] sm:$0xff]  ;;  %v977_v25 = vld [vmem:[%s7027_s10 + $0x578] sm:$0xff] }
 0x101   : > { %3176 = vmatprep.subr.bf16.mxu0 %v4675_v27  ;;  %3282 = vmatprep.subr.bf16.mxu1 %v4677_v29  ;;  %v4722_v27 = vcombine.low %v964_v17, %v968_v22  ;;  %v4731_v30 = vcombine.high %v972_v36, %v976_v20  ;;  %v1020_v22 = vld [vmem:[%s7027_s10 + $0x6d0] sm:$0xff] }
 0x104   : > { %3177 = vmatpush1.bf16.msra.mxu0 %v4674_v40  ;;  %3283 = vmatpush1.bf16.msra.mxu1 %v4676_v41  ;;  %v985_v40 = vld [vmem:[%s7027_s10 + $0x5b8] sm:$0xff]  ;;  %v4730_v41 = vcombine.low %v972_v36, %v976_v20  ;;  %v1028_v20 = vld [vmem:[%s7027_s10 + $0x710] sm:$0xff] }
 0x105   : > { %3178 = vmatprep.subr.bf16.mxu0 %v4683_v37  ;;  %3284 = vmatprep.subr.bf16.mxu1 %v4685_v7  ;;  %v4739_v7 = vcombine.high %v980_v38, %v984_v39 }
 0x108   : > { %3179 = vmatpush1.bf16.msra.mxu0 %v4682_v47  ;;  %3285 = vmatpush1.bf16.msra.mxu1 %v4684_v48  ;;  %v993_v47 = vld [vmem:[%s7027_s10 + $0x5f8] sm:$0xff]  ;;  %v4738_v48 = vcombine.low %v980_v38, %v984_v39  ;;  %v1036_v39 = vld [vmem:[%s7027_s10 + $0x750] sm:$0xff] }
 0x109   : > { %3201 = vmatprep.subr.bf16.mxu0 %v4691_v50  ;;  %3307 = vmatprep.subr.bf16.mxu1 %v4693_v51  ;;  %v4747_v51 = vcombine.high %v988_v43, %v992_v45  ;;  %v4749_v52 = vcombine.high %v989_v49, %v993_v47 }
 0x10b   : > { %3181 = vmatmul.mubr.bf16.vlgmr.msra.gmra.mrb[8].mxu0 %v5789_v44  ;;  %3287 = vmatmul.mubr.bf16.vlgmr.msra.gmra.mrb[8].mxu1 %v5789_v44  ;;  %v957_v44 = vld [vmem:[%s7027_s10 + $0x4d8] sm:$0xff] }
 0x10c   : > { %3202 = vmatpush1.bf16.msra.mxu0 %v4690_v31  ;;  %3308 = vmatpush1.bf16.msra.mxu1 %v4692_v58  ;;  %v4717_v35 = vcombine.high %v957_v44, %v961_v11  ;;  %v4716_v18 = vcombine.low %v957_v44, %v961_v11  ;;  %v1001_v31 = vld [vmem:[%s7027_s10 + $0x638] sm:$0xff]  ;;  %v4746_v58 = vcombine.low %v988_v43, %v992_v45  ;;  %v1016_v44 = vld [vmem:[%s7027_s10 + $0x6b0] sm:$0xff] }
 0x10d   : > { %3203 = vmatprep.subr.bf16.mxu0 %v4699_v59  ;;  %3309 = vmatprep.subr.bf16.mxu1 %v4701_v61  ;;  %v4748_v59 = vcombine.low %v989_v49, %v993_v47  ;;  %v4755_v61 = vcombine.high %v996_v53, %v1000_v54  ;;  %v4757_v62 = vcombine.high %v997_v56, %v1001_v31  ;;  %v1013_v11 = vld [vmem:[%s7027_s10 + $0x698] sm:$0xff]  ;;  %v1044_v45 = vld [vmem:[%s7027_s10 + $0x790] sm:$0xff] }
 0x10e   : > { %3190 = vmatprep.mubr.bf16.mxu0 %v5805_v57  ;;  %3296 = vmatprep.mubr.bf16.mxu1 %v5805_v57  ;;  %v965_v57 = vld [vmem:[%s7027_s10 + $0x518] sm:$0xff]  ;;  %v1048_v49 = vld [vmem:[%s7027_s10 + $0x7b0] sm:$0xff] }
 0x10f   : > { %v4725_v23 = vcombine.high %v965_v57, %v969_v24  ;;  %v4724_v29 = vcombine.low %v965_v57, %v969_v24  ;;  %v1024_v57 = vld [vmem:[%s7027_s10 + $0x6f0] sm:$0xff]  ;;  %v1021_v24 = vld [vmem:[%s7027_s10 + $0x6d8] sm:$0xff] }
 0x110   : > { %3204 = vmatpush1.bf16.msra.mxu0 %v4698_v3  ;;  %3310 = vmatpush1.bf16.msra.mxu1 %v4700_v4  ;;  %v1009_v3 = vld [vmem:[%s7027_s10 + $0x678] sm:$0xff]  ;;  %v4754_v4 = vcombine.low %v996_v53, %v1000_v54  ;;  %v1052_v54 = vld [vmem:[%s7027_s10 + $0x7d0] sm:$0xff] }
 0x111   : > { %3205 = vmatprep.subr.bf16.mxu0 %v4707_v5  ;;  %3311 = vmatprep.subr.bf16.mxu1 %v4709_v14  ;;  %v4756_v5 = vcombine.low %v997_v56, %v1001_v31  ;;  %v4763_v14 = vcombine.high %v1004_v0, %v1008_v1  ;;  %v4765_v28 = vcombine.high %v1005_v26, %v1009_v3  ;;  %v1045_v47 = vld [vmem:[%s7027_s10 + $0x798] sm:$0xff]  ;;  %v1056_v56 = vld [vmem:[%s7027_s10 + $0x7f0] sm:$0xff] }
 0x112   : > { %v1053_v31 = vld [vmem:[%s7027_s10 + $0x7d8] sm:$0xff] }
 0x113   : > { %3191 = vmatmul.mubr.bf16.gmra.mrb[12].mxu0 %v5829_v6  ;;  %3297 = vmatmul.mubr.bf16.gmra.mrb[12].mxu1 %v5829_v6  ;;  %v973_v6 = vld [vmem:[%s7027_s10 + $0x558] sm:$0xff] }
 0x114   : > { %3206 = vmatpush1.bf16.msra.mxu0 %v4706_v13  ;;  %3312 = vmatpush1.bf16.msra.mxu1 %v4708_v16  ;;  %v4733_v32 = vcombine.high %v973_v6, %v977_v25  ;;  %v4732_v37 = vcombine.low %v973_v6, %v977_v25  ;;  %v1017_v13 = vld [vmem:[%s7027_s10 + $0x6b8] sm:$0xff]  ;;  %v4762_v16 = vcombine.low %v1004_v0, %v1008_v1  ;;  %v1032_v6 = vld [vmem:[%s7027_s10 + $0x730] sm:$0xff]  ;;  %v3362_v1 = vld [vmem:[%s7029_s12] sm:$0xff] }
 0x115   : > { %3207 = vmatprep.subr.bf16.mxu0 %v4715_v34  ;;  %3313 = vmatprep.subr.bf16.mxu1 %v4717_v35  ;;  %v4764_v34 = vcombine.low %v1005_v26, %v1009_v3  ;;  %v4771_v35 = vcombine.high %v1012_v9, %v1016_v44  ;;  %v4773_v17 = vcombine.high %v1013_v11, %v1017_v13  ;;  %v1029_v25 = vld [vmem:[%s7027_s10 + $0x718] sm:$0xff]  ;;  %v3366_v26 = vld [vmem:[%s7029_s12 + $0x20] sm:$0xff]  ;;  %v3363_v3 = vld [vmem:[%s7029_s12 + $0x8] sm:$0xff] }
 0x116   : > { %3233 = vmatprep.mubr.bf16.mxu0 %v5584_v55  ;;  %3339 = vmatprep.mubr.bf16.mxu1 %v5584_v55  ;;  %v981_v55 = vld [vmem:[%s7027_s10 + $0x598] sm:$0xff] }
 0x117   : > { %v4741_v42 = vcombine.high %v981_v55, %v985_v40  ;;  %v4740_v50 = vcombine.low %v981_v55, %v985_v40  ;;  %v1040_v55 = vld [vmem:[%s7027_s10 + $0x770] sm:$0xff]  ;;  %v1037_v40 = vld [vmem:[%s7027_s10 + $0x758] sm:$0xff] }
 0x118   : > { %3208 = vmatpush1.bf16.msra.mxu0 %v4714_v15  ;;  %3314 = vmatpush1.bf16.msra.mxu1 %v4716_v18  ;;  %v1025_v15 = vld [vmem:[%s7027_s10 + $0x6f8] sm:$0xff]  ;;  %v4770_v18 = vcombine.low %v1012_v9, %v1016_v44  ;;  %v4815_v9 = vcombine.high %v3362_v1, %v3366_v26 }
 0x119   : > { %3209 = vmatprep.subr.bf16.mxu0 %v4723_v19  ;;  %3315 = vmatprep.subr.bf16.mxu1 %v4725_v23  ;;  %v4772_v19 = vcombine.low %v1013_v11, %v1017_v13  ;;  %v4779_v23 = vcombine.high %v1020_v22, %v1024_v57  ;;  %v4781_v36 = vcombine.high %v1021_v24, %v1025_v15  ;;  %v3370_v11 = vld [vmem:[%s7029_s12 + $0x40] sm:$0xff] }
 0x11a   : > { %v3374_v13 = vld [vmem:[%s7029_s12 + $0x60] sm:$0xff] }
 0x11c   : > { %3210 = vmatpush1.bf16.msra.mxu0 %v4722_v27  ;;  %3316 = vmatpush1.bf16.msra.mxu1 %v4724_v29  ;;  %v1033_v27 = vld [vmem:[%s7027_s10 + $0x738] sm:$0xff]  ;;  %v4778_v29 = vcombine.low %v1020_v22, %v1024_v57  ;;  %v4814_v22 = vcombine.low %v3362_v1, %v3366_v26  ;;  %v4492_v57 = vld [vmem:[%s7025_s8] ss:$0 sm:$0xff]  ;;  %v3376_v1 = vld [vmem:[%s7029_s12 + $0x70] sm:$0xff] }
 0x11d   : > { %3211 = vmatprep.subr.bf16.mxu0 %v4731_v30  ;;  %3317 = vmatprep.subr.bf16.mxu1 %v4733_v32  ;;  %v4780_v30 = vcombine.low %v1021_v24, %v1025_v15  ;;  %v4787_v32 = vcombine.high %v1028_v20, %v1032_v6  ;;  %v4789_v38 = vcombine.high %v1029_v25, %v1033_v27  ;;  %v3373_v26 = vld [vmem:[%s7029_s12 + $0x58] sm:$0xff] }
 0x11e   : > { %v4823_v15 = vcombine.high %v3370_v11, %v3374_v13 }
 0x120   : > { %3212 = vmatpush1.bf16.msra.mxu0 %v4730_v41  ;;  %3318 = vmatpush1.bf16.msra.mxu1 %v4732_v37  ;;  %v1041_v41 = vld [vmem:[%s7027_s10 + $0x778] sm:$0xff]  ;;  %v4786_v37 = vcombine.low %v1028_v20, %v1032_v6  ;;  %v3383_v20 = vld [vmem:[%s7029_s12 + $0xa8] sm:$0xff] }
 0x121   : > { %3213 = vmatprep.subr.bf16.mxu0 %v4739_v7  ;;  %3319 = vmatprep.subr.bf16.mxu1 %v4741_v42  ;;  %v4788_v7 = vcombine.low %v1029_v25, %v1033_v27  ;;  %v4795_v42 = vcombine.high %v1036_v39, %v1040_v55  ;;  %v4797_v43 = vcombine.high %v1037_v40, %v1041_v41 }
 0x122   : > { %v4822_v27 = vcombine.low %v3370_v11, %v3374_v13  ;;  %v3380_v11 = vld [vmem:[%s7029_s12 + $0x90] sm:$0xff] }
 0x123   : > { %v3384_v13 = vld [vmem:[%s7029_s12 + $0xb0] sm:$0xff] }
 0x124   : > { %3214 = vmatpush1.bf16.msra.mxu0 %v4738_v48  ;;  %3320 = vmatpush1.bf16.msra.mxu1 %v4740_v50  ;;  %v1049_v48 = vld [vmem:[%s7027_s10 + $0x7b8] sm:$0xff]  ;;  %v4794_v50 = vcombine.low %v1036_v39, %v1040_v55  ;;  %v3386_v55 = vld [vmem:[%s7029_s12 + $0xc0] sm:$0xff] }
 0x125   : > { %3215 = vmatprep.subr.bf16.mxu0 %v4747_v51  ;;  %3321 = vmatprep.subr.bf16.mxu1 %v4749_v52  ;;  %v4796_v51 = vcombine.low %v1037_v40, %v1041_v41  ;;  %v4803_v52 = vcombine.high %v1044_v45, %v1048_v49  ;;  %v4805_v53 = vcombine.high %v1045_v47, %v1049_v48  ;;  %v3387_v40 = vld [vmem:[%s7029_s12 + $0xc8] sm:$0xff] }
 0x126   : > { %v3391_v41 = vld [vmem:[%s7029_s12 + $0xe8] sm:$0xff] }
 0x128   : > { %3216 = vmatpush1.bf16.msra.mxu0 %v4746_v58  ;;  %3322 = vmatpush1.bf16.msra.mxu1 %v4748_v59  ;;  %v1057_v58 = vld [vmem:[%s7027_s10 + $0x7f8] sm:$0xff]  ;;  %v4802_v59 = vcombine.low %v1044_v45, %v1048_v49 }
 0x129   : > { %3217 = vmatprep.subr.bf16.mxu0 %v4755_v61  ;;  %3323 = vmatprep.subr.bf16.mxu1 %v4757_v62  ;;  %v4804_v61 = vcombine.low %v1045_v47, %v1049_v48  ;;  %v4811_v62 = vcombine.high %v1052_v54, %v1056_v56  ;;  %v4813_v0 = vcombine.high %v1053_v31, %v1057_v58  ;;  %v3364_v48 = vld [vmem:[%s7029_s12 + $0x10] sm:$0xff] }
 0x12c   : > { %3218 = vmatpush1.bf16.msra.mxu0 %v4754_v4  ;;  %3324 = vmatpush1.bf16.msra.mxu1 %v4756_v5  ;;  %v3367_v4 = vld [vmem:[%s7029_s12 + $0x28] sm:$0xff]  ;;  %v4900_v5 = vld [vmem:[%s6383_s24] sm:$0xff]  }
 0x12d   : > { %3219 = vmatprep.subr.bf16.mxu0 %v4763_v14  ;;  %3325 = vmatprep.subr.bf16.mxu1 %v4765_v28  ;;  %v4810_v14 = vcombine.low %v1052_v54, %v1056_v56  ;;  %v4812_v28 = vcombine.low %v1053_v31, %v1057_v58  ;;  %v4817_v44 = vcombine.high %v3363_v3, %v3367_v4  ;;  %v3369_v54 = vld [vmem:[%s7029_s12 + $0x38] sm:$0xff] }
 0x12e   : > { %v4816_v24 = vcombine.low %v3363_v3, %v3367_v4  ;;  %v3377_v3 = vld [vmem:[%s7029_s12 + $0x78] sm:$0xff] }
 0x130   : > { %3220 = vmatpush1.bf16.msra.mxu0 %v4762_v16  ;;  %3326 = vmatpush1.bf16.msra.mxu1 %v4764_v34  ;;  %v4901_v16 = vunpack.c.l.bf16 %v4900_v5  ;;  %v4902_v34 = vunpack.c.h.bf16 %v4900_v5 }
 0x131   : > { %3221 = vmatprep.subr.bf16.mxu0 %v4771_v35  ;;  %3327 = vmatprep.subr.bf16.mxu1 %v4773_v17  ;;  %v3371_v35 = vld [vmem:[%s7029_s12 + $0x48] sm:$0xff] }
 0x132   : > { %v3375_v17 = vld [vmem:[%s7029_s12 + $0x68] sm:$0xff]  ;;  %v775_v6 = vmul.f32 %v4901_v16, %v4492_v57  ;;  %v776_v25 = vmul.f32 %v4902_v34, %v4492_v57 }
 0x134   : > { %3222 = vmatpush1.bf16.msra.mxu0 %v4770_v18  ;;  %3328 = vmatpush1.bf16.msra.mxu1 %v4772_v19  ;;  %v4825_v18 = vcombine.high %v3371_v35, %v3375_v17  ;;  %v3378_v19 = vld [vmem:[%s7029_s12 + $0x80] sm:$0xff] }
 0x135   : > { %3223 = vmatprep.subr.bf16.mxu0 %v4779_v23  ;;  %3329 = vmatprep.subr.bf16.mxu1 %v4781_v36  ;;  %v3382_v23 = vld [vmem:[%s7029_s12 + $0xa0] sm:$0xff]  ;;  %v3379_v36 = vld [vmem:[%s7029_s12 + $0x88] sm:$0xff] }
 0x136   : > { %v4833_v39 = vcombine.high %v3379_v36, %v3383_v20  ;;  %v4830_v45 = vcombine.low %v3378_v19, %v3382_v23  ;;  %v4832_v49 = vcombine.low %v3379_v36, %v3383_v20  ;;  %v3389_v36 = vld [vmem:[%s7029_s12 + $0xd8] sm:$0xff] }
 0x137   : > { %v3393_v20 = vld [vmem:[%s7029_s12 + $0xf8] sm:$0xff] }
 0x138   : > { %3224 = vmatpush1.bf16.msra.mxu0 %v4778_v29  ;;  %3330 = vmatpush1.bf16.msra.mxu1 %v4780_v30  ;;  %v4493_v29 = vld [vmem:[%s7026_s9] ss:$0 sm:$0xff]  ;;  %v4908_v30 = vld [vmem:[%s6383_s24 + $0x8] sm:$0xff]  }
 0x139   : > { %3225 = vmatprep.subr.bf16.mxu0 %v4787_v32  ;;  %3331 = vmatprep.subr.bf16.mxu1 %v4789_v38  ;;  %v4824_v32 = vcombine.low %v3371_v35, %v3375_v17  ;;  %v4831_v38 = vcombine.high %v3378_v19, %v3382_v23  ;;  %v3381_v35 = vld [vmem:[%s7029_s12 + $0x98] sm:$0xff]  ;;  %v3392_v19 = vld [vmem:[%s7029_s12 + $0xf0] sm:$0xff] }
 0x13a   : > { %v3385_v17 = vld [vmem:[%s7029_s12 + $0xb8] sm:$0xff] }
 0x13c   : > { %3226 = vmatpush1.bf16.msra.mxu0 %v4786_v37  ;;  %3332 = vmatpush1.bf16.msra.mxu1 %v4788_v7  ;;  %v786_v37 = vadd.f32 %v4493_v29, %v775_v6  ;;  %v787_v7 = vadd.f32 %v4493_v29, %v776_v25  ;;  %v4834_v6 = vcombine.low %v3380_v11, %v3384_v13 }
 0x13d   : > { %3227 = vmatprep.subr.bf16.mxu0 %v4795_v42  ;;  %3333 = vmatprep.subr.bf16.mxu1 %v4797_v43  ;;  %v4905_v42 = vunpack.c.l.bf16 %v4908_v30  ;;  %v4906_v43 = vunpack.c.h.bf16 %v4908_v30  ;;  %v4836_v25 = vcombine.low %v3381_v35, %v3385_v17  ;;  %v3809_v30 = vld [vmem:[%s7030_s13] sm:$0xff] }
 0x13f   : > { %v777_v56 = vmul.f32 %v4905_v42, %v4492_v57  ;;  %v778_v31 = vmul.f32 %v4906_v43, %v4492_v57  ;;  %v4828_v57 = vcombine.low %v3373_v26, %v3377_v3 }
 0x140   : > { %3228 = vmatpush1.bf16.msra.mxu0 %v4794_v50  ;;  %3334 = vmatpush1.bf16.msra.mxu1 %v4796_v51  ;;  %v3368_v50 = vld [vmem:[%s7029_s12 + $0x30] sm:$0xff]  ;;  %v790_v51 = vmax.f32 %v786_v37, 0.0  ;;  %v3817_v37 = vld [vmem:[%s7030_s13 + $0x40] sm:$0xff] }
 0x141   : > { %3229 = vmatprep.subr.bf16.mxu0 %v4803_v52  ;;  %3335 = vmatprep.subr.bf16.mxu1 %v4805_v53  ;;  %v791_v52 = vmax.f32 %v787_v7, 0.0  ;;  %v3365_v53 = vld [vmem:[%s7029_s12 + $0x18] sm:$0xff]  ;;  %v788_v4 = vadd.f32 %v4493_v29, %v777_v56  ;;  %v789_v5 = vadd.f32 %v4493_v29, %v778_v31  ;;  %v4845_v29 = vcombine.high %v3389_v36, %v3393_v20  ;;  %v3818_v7 = vld [vmem:[%s7030_s13 + $0x48] sm:$0xff] }
 0x143   : > { %v792_v16 = vmax.f32 %v788_v4, 0.0  ;;  %v793_v34 = vmax.f32 %v789_v5, 0.0 }
 0x144   : > { %3230 = vmatpush1.bf16.msra.mxu0 %v4802_v59  ;;  %3336 = vmatpush1.bf16.msra.mxu1 %v4804_v61  ;;  %v4840_v59 = vcombine.low %v3387_v40, %v3391_v41  ;;  %v4819_v61 = vcombine.high %v3364_v48, %v3368_v50 }
 0x145   : > { %3231 = vmatprep.subr.bf16.mxu0 %v4811_v62  ;;  %3337 = vmatprep.subr.bf16.mxu1 %v4813_v0  ;;  %v4821_v62 = vcombine.high %v3365_v53, %v3369_v54  ;;  %v3372_v0 = vld [vmem:[%s7029_s12 + $0x50] sm:$0xff]  ;;  %v3361_v23 = vpack.c.bf16 %v793_v34, %v792_v16 }
 0x148   : > { %3232 = vmatpush1.bf16.msra.mxu0 %v4810_v14  ;;  %3338 = vmatpush1.bf16.msra.mxu1 %v4812_v28  ;;  %v4818_v14 = vcombine.low %v3364_v48, %v3368_v50  ;;  %v4820_v28 = vcombine.low %v3365_v53, %v3369_v54  ;;  %v3815_v48 = vld [vmem:[%s7030_s13 + $0x30] sm:$0xff]  ;;  %v4867_v50 = vcombine.high %v3818_v7, %v3818_v7 }
 0x149   : > { %3561 = vmatprep.subr.bf16.mxu0 %v4815_v9  ;;  %3614 = vmatprep.subr.bf16.mxu1 %v4817_v44  ;;  %v4827_v9 = vcombine.high %v3372_v0, %v3376_v1  ;;  %v4829_v44 = vcombine.high %v3373_v26, %v3377_v3 }
 0x14b   : > { %3234 = vmatmul.mubr.bf16.vlgmr.msra.gmra.mrb[8].mxu0 %v5598_v2  ;;  %3340 = vmatmul.mubr.bf16.vlgmr.msra.gmra.mrb[8].mxu1 %v5598_v2  ;;  %v3390_v2 = vld [vmem:[%s7029_s12 + $0xe0] sm:$0xff] }
 0x14c   : > { %3562 = vmatpush1.bf16.msra.mxu0 %v4814_v22  ;;  %3615 = vmatpush1.bf16.msra.mxu1 %v4816_v24  ;;  %v4839_v47 = vcombine.high %v3386_v55, %v3390_v2  ;;  %v4838_v58 = vcombine.low %v3386_v55, %v3390_v2  ;;  %v4826_v22 = vcombine.low %v3372_v0, %v3376_v1 }
 0x14d   : > { %3563 = vmatprep.subr.bf16.mxu0 %v4823_v15  ;;  %3616 = vmatprep.subr.bf16.mxu1 %v4825_v18  ;;  %v4835_v24 = vcombine.high %v3380_v11, %v3384_v13  ;;  %v4837_v15 = vcombine.high %v3381_v35, %v3385_v17  ;;  %v3388_v18 = vld [vmem:[%s7029_s12 + $0xd0] sm:$0xff]  ;;  %v4844_v2 = vcombine.low %v3389_v36, %v3393_v20 }
 0x14e   : > { %3243 = vmatprep.mubr.bf16.mxu0 %v5779_v33  ;;  %3349 = vmatprep.mubr.bf16.mxu1 %v5779_v33  ;;  %v4841_v33 = vcombine.high %v3387_v40, %v3391_v41  ;;  %v4842_v55 = vcombine.low %v3388_v18, %v3392_v19 }
 0x150   : > { %3564 = vmatpush1.bf16.msra.mxu0 %v4822_v27  ;;  %3617 = vmatpush1.bf16.msra.mxu1 %v4824_v32  ;;  %v4843_v27 = vcombine.high %v3388_v18, %v3392_v19  ;;  %v3813_v32 = vld [vmem:[%s7030_s13 + $0x20] sm:$0xff] }
 0x151   : > { %3565 = vmatprep.subr.bf16.mxu0 %v4831_v38  ;;  %3618 = vmatprep.subr.bf16.mxu1 %v4833_v39  ;;  %v3810_v38 = vld [vmem:[%s7030_s13 + $0x8] sm:$0xff]  ;;  %v4857_v40 = vcombine.high %v3809_v30, %v3813_v32  ;;  %v4856_v42 = vcombine.low %v3809_v30, %v3813_v32 }
 0x152   : > { %v3814_v39 = vld [vmem:[%s7030_s13 + $0x28] sm:$0xff] }
 0x153   : > { %3244 = vmatmul.mubr.bf16.gmra.mrb[12].mxu0 %v5781_v46  ;;  %3350 = vmatmul.mubr.bf16.gmra.mrb[12].mxu1 %v5781_v46  ;;  %v6467_v46 = vpack.c.bf16 %v791_v52, %v790_v51  ;;  %v4859_v41 = vcombine.high %v3810_v38, %v3814_v39  ;;  %v4858_v43 = vcombine.low %v3810_v38, %v3814_v39  ;;  %v3812_v51 = vld [vmem:[%s7030_s13 + $0x18] sm:$0xff]  ;;  %v4195_v39 = vsub.s32 6, %v5406_v10 }
 0x154   : > { %3566 = vmatpush1.bf16.msra.mxu0 %v4830_v45  ;;  %3619 = vmatpush1.bf16.msra.mxu1 %v4832_v49  ;;  %v4864_v45 = vcombine.low %v3817_v37, %v3817_v37  ;;  %v4865_v49 = vcombine.high %v3817_v37, %v3817_v37  ;;  %v3816_v52 = vld [vmem:[%s7030_s13 + $0x38] sm:$0xff] }
 0x155   : > { %3567 = vmatprep.subr.bf16.mxu0 %v4839_v47  ;;  %3620 = vmatprep.subr.bf16.mxu1 %v4841_v33  ;;  %v4866_v47 = vcombine.low %v3818_v7, %v3818_v7  ;;  %v3811_v33 = vld [vmem:[%s7030_s13 + $0x10] sm:$0xff]  ;;  %v4863_v31 = vcombine.high %v3812_v51, %v3816_v52  ;;  %v4862_v0 = vcombine.low %v3812_v51, %v3816_v52  ;;  %v4199_v7 = vsub.s32 7, %v5406_v10 }
 0x156   : > { %3593 = vmatprep.mubr.bf16.mxu0 %v5096_v8  ;;  %3646 = vmatprep.mubr.bf16.mxu1 %v5096_v8  ;;  %v3900_v53 = vsel %vm3898_vm1, %v4864_v45, 0  ;;  %v4861_v54 = vcombine.high %v3811_v33, %v3815_v48 }
 0x157   : > { %v3906_v56 = vsel %vm3898_vm1, %v4866_v47, 0 }
 0x158   : > { %3568 = vmatpush1.bf16.msra.mxu0 %v4838_v58  ;;  %3621 = vmatpush1.bf16.msra.mxu1 %v4840_v59  ;;  %v3819_v58 = vld [vmem:[%s7030_s13 + $0x50] sm:$0xff]  ;;  %v5066_v59 = vld [vmem:[%s5511_s21] sm:$0xff]  }
 0x159   : > { %3667 = vmatprep.subr.bf16.mxu0 %v4819_v61  ;;  %3720 = vmatprep.subr.bf16.mxu1 %v4821_v62  ;;  %v3820_v61 = vld [vmem:[%s7030_s13 + $0x58] sm:$0xff]  ;;  %v4860_v62 = vcombine.low %v3811_v33, %v3815_v48  ;;  %v4868_v1 = vcombine.low %v3819_v58, %v3819_v58 }
 0x15a   : > { %v4870_v26 = vcombine.low %v3820_v61, %v3820_v61  ;;  %v4871_v3 = vcombine.high %v3820_v61, %v3820_v61 }
 0x15b   : > { %4846 = vmatmul.mubr.msk.bf16.vlgmr.msra.gmra.mrb[0].mxu0 %vm3554_vm0, %v6467_v46  ;;  %4848 = vmatmul.mubr.msk.bf16.vlgmr.msra.gmra.mrb[0].mxu1 %vm3554_vm0, %v6467_v46  ;;  %v3912_v4 = vsel %vm3898_vm1, %v4868_v1, 0 }
 0x15c   : > { %3668 = vmatpush1.bf16.msra.mxu0 %v4818_v14  ;;  %3721 = vmatpush1.bf16.msra.mxu1 %v4820_v28  ;;  %v3918_v5 = vsel %vm3898_vm1, %v4870_v26, 0  ;;  %v5067_v14 = vld [vmem:[%s5511_s21 + $0x8] sm:$0xff]   ;;  %v4167_v28 = vld [vmem:[%s7031_s14] sm:$0xff] }
 0x15d   : > { %3669 = vmatprep.subr.bf16.mxu0 %v4827_v9  ;;  %3722 = vmatprep.subr.bf16.mxu1 %v4829_v44  ;;  %v4172_v9 = vrot.slane %v4167_v28, %v5661_v60  ;;  %v4180_v44 = vrot.slane %v4167_v28, %v5528_v12  ;;  %v4176_v11 = vrot.slane %v4167_v28, %v5432_v21 }
 0x15e   : > { %3603 = vmatprep.mubr.bf16.mxu0 %v5096_v8  ;;  %3656 = vmatprep.mubr.bf16.mxu1 %v5096_v8  ;;  %v4184_v13 = vrot.slane %v4167_v28, %v5505_v63  ;;  %v4196_v33 = vrot.slane %v4167_v28, %v4195_v39 }
 0x160   : > { %3670 = vmatpush1.bf16.msra.mxu0 %v4826_v22  ;;  %3723 = vmatpush1.bf16.msra.mxu1 %v4828_v57 }
 0x161   : > { %3671 = vmatprep.subr.bf16.mxu0 %v4835_v24  ;;  %3724 = vmatprep.subr.bf16.mxu1 %v4837_v15 }
 0x163   : > { %4847 = vmatmul.mubr.msk.bf16.gmra.mrb[4].mxu0 %vm3554_vm0, %v3361_v23  ;;  %4849 = vmatmul.mubr.msk.bf16.gmra.mrb[4].mxu1 %vm3554_vm0, %v3361_v23 }
 0x164   : > { %3672 = vmatpush1.bf16.msra.mxu0 %v4834_v6  ;;  %3725 = vmatpush1.bf16.msra.mxu1 %v4836_v25 }
 0x165   : > { %3673 = vmatprep.subr.bf16.mxu0 %v4843_v27  ;;  %3726 = vmatprep.subr.bf16.mxu1 %v4845_v29  ;;  %v4187_v27 = vsub.s32 4, %v5406_v10 }
 0x166   : > { %3699 = vmatprep.mubr.bf16.mxu0 %v5096_v8  ;;  %3752 = vmatprep.mubr.bf16.mxu1 %v5096_v8 }
 0x167   : > { %v4188_v47 = vrot.slane %v4167_v28, %v4187_v27 }
 0x168   : > { %3674 = vmatpush1.bf16.msra.mxu0 %v4842_v55  ;;  %3727 = vmatpush1.bf16.msra.mxu1 %v4844_v2  ;;  %v4191_v55 = vsub.s32 5, %v5406_v10 }
 0x169   : > { %3923 = vmatprep.subr.bf16.mxu0 %v4857_v40  ;;  %3976 = vmatprep.subr.bf16.mxu1 %v4859_v41 }
 0x16a   : > { %v4192_v48 = vrot.slane %v4167_v28, %v4191_v55 }
 0x16b   : > { %4850 = vmatmul.mubr.msk.bf16.vlgmr.msra.gmra.mrb[8].mxu0 %vm3554_vm0, %v6467_v46  ;;  %4852 = vmatmul.mubr.msk.bf16.vlgmr.msra.gmra.mrb[8].mxu1 %vm3554_vm0, %v6467_v46  ;;  %v4869_v46 = vcombine.high %v3819_v58, %v3819_v58 }
 0x16c   : > { %3924 = vmatpush1.bf16.msra.mxu0 %v4856_v42  ;;  %3977 = vmatpush1.bf16.msra.mxu1 %v4858_v43 }
 0x16d   : > { %3709 = vmatprep.mubr.bf16.mxu0 %v5096_v8  ;;  %3762 = vmatprep.mubr.bf16.mxu1 %v5096_v8 }
 0x16e   : > { %4872 = vmatprep.subr.msk.bf16.mxu0 %vm3898_vm1, %v4865_v49  ;;  %4875 = vmatprep.subr.msk.bf16.mxu1 %vm3898_vm1, %v4867_v50  ;;  %v4200_v50 = vrot.slane %v4167_v28, %v4199_v7 }
 0x170   : > { %3926 = vmatpush1.bf16.msra.mxu0 %v3900_v53  ;;  %3979 = vmatpush1.bf16.msra.mxu1 %v3906_v56 }
 0x171   : > { %4029 = vmatprep.subr.bf16.mxu0 %v4861_v54  ;;  %4082 = vmatprep.subr.bf16.mxu1 %v4863_v31 }
 0x173   : > { %4851 = vmatmul.mubr.msk.bf16.gmra.mrb[12].mxu0 %vm3554_vm0, %v3361_v23  ;;  %4853 = vmatmul.mubr.msk.bf16.gmra.mrb[12].mxu1 %vm3554_vm0, %v3361_v23 }
 0x174   : > { %3955 = vmatprep.mubr.bf16.mxu0 %v5096_v8  ;;  %4008 = vmatprep.mubr.bf16.mxu1 %v5096_v8 }
 0x17b   : > { %4873 = vmatmul.mubr.msk.bf16.vlgmr.msra.gmra.mrb[0].mxu0 %vm3891_vm2, %v5066_v59  ;;  %4876 = vmatmul.mubr.msk.bf16.vlgmr.msra.gmra.mrb[0].mxu1 %vm3891_vm2, %v5066_v59 }
 0x17c   : > { %4030 = vmatpush1.bf16.msra.mxu0 %v4860_v62  ;;  %4083 = vmatpush1.bf16.msra.mxu1 %v4862_v0 }
 0x17d   : > { %3965 = vmatprep.mubr.bf16.mxu0 %v5096_v8  ;;  %4018 = vmatprep.mubr.bf16.mxu1 %v5096_v8 }
 0x17e   : > { %4878 = vmatprep.subr.msk.bf16.mxu0 %vm3898_vm1, %v4869_v46  ;;  %4881 = vmatprep.subr.msk.bf16.mxu1 %vm3898_vm1, %v4871_v3 }
 0x180   : > { %4032 = vmatpush1.bf16.msra.mxu0 %v3912_v4  ;;  %4085 = vmatpush1.bf16.msra.mxu1 %v3918_v5 }
 0x183   : > { %4874 = vmatmul.mubr.msk.bf16.gmra.mrb[4].mxu0 %vm3891_vm2, %v5067_v14  ;;  %4877 = vmatmul.mubr.msk.bf16.gmra.mrb[4].mxu1 %vm3891_vm2, %v5067_v14 }
 0x184   : > { %4061 = vmatprep.mubr.bf16.mxu0 %v5096_v8  ;;  %4114 = vmatprep.mubr.bf16.mxu1 %v5096_v8 }
 0x18b   : > { %4879 = vmatmul.mubr.msk.bf16.vlgmr.msra.gmra.mrb[8].mxu0 %vm3891_vm2, %v5066_v59  ;;  %4882 = vmatmul.mubr.msk.bf16.vlgmr.msra.gmra.mrb[8].mxu1 %vm3891_vm2, %v5066_v59 }
 0x18c   : > { %4071 = vmatprep.mubr.bf16.mxu0 %v5096_v8  ;;  %4124 = vmatprep.mubr.bf16.mxu1 %v5096_v8 }
 0x193   : > { %4880 = vmatmul.mubr.msk.bf16.gmra.mrb[12].mxu0 %vm3891_vm2, %v5067_v14  ;;  %4883 = vmatmul.mubr.msk.bf16.gmra.mrb[12].mxu1 %vm3891_vm2, %v5067_v14 }
 0x24e   : > { %v3957_v16 = vpop.f32.mrb[0].mxu0  ;;  %v4010_v8 = vpop.f32.mrb[0].mxu1 }
 0x24f   : > { %v6586_v34 = vadd.f32 %v4172_v9, %v3957_v16  ;;  %v3959_v35 = vpop.f32.mrb[1].mxu0  ;;  %v6588_v17 = vadd.f32 %v4180_v44, %v4010_v8  ;;  %v4012_v57 = vpop.f32.mrb[1].mxu1 }
 0x250   : > { %v6590_v22 = vadd.f32 %v4176_v11, %v3959_v35  ;;  %v3961_v24 = vpop.f32.mrb[2].mxu0  ;;  %v6592_v15 = vadd.f32 %v4184_v13, %v4012_v57  ;;  %v4014_v12 = vpop.f32.mrb[2].mxu1 }
 0x251   : > { %v6594_v60 = vadd.f32 %v4172_v9, %v3961_v24  ;;  %v3963_v18 = vpop.f32.mrb[3].mxu0  ;;  %v6596_v21 = vadd.f32 %v4180_v44, %v4014_v12  ;;  %v4016_v19 = vpop.f32.mrb[3].mxu1  ;;  %4245 = vst [vmem:[%s7032_s15] sm:$0xff] (!%p4884_p5), %v6586_v34  ;;  %4247 = vst [vmem:[%s7032_s15 + $0x10] sm:$0xff] (!%p4884_p5), %v6588_v17 }
 0x252   : > { %v6598_v63 = vadd.f32 %v4176_v11, %v3963_v18  ;;  %v6600_v23 = vadd.f32 %v4184_v13, %v4016_v19  ;;  %4246 = vst [vmem:[%s7032_s15 + $0x8] sm:$0xff] (!%p4884_p5), %v6590_v22  ;;  %4248 = vst [vmem:[%s7032_s15 + $0x18] sm:$0xff] (!%p4884_p5), %v6592_v15 }
 0x253   : > { %4253 = vst [vmem:[%s7032_s15 + $0x40] sm:$0xff] (!%p4884_p5), %v6594_v60  ;;  %4255 = vst [vmem:[%s7032_s15 + $0x50] sm:$0xff] (!%p4884_p5), %v6596_v21 }
 0x254   : > { %4254 = vst [vmem:[%s7032_s15 + $0x48] sm:$0xff] (!%p4884_p5), %v6598_v63  ;;  %4256 = vst [vmem:[%s7032_s15 + $0x58] sm:$0xff] (!%p4884_p5), %v6600_v23 }
 0x256   : > { %v3967_v36 = vpop.f32.mrb[4].mxu0  ;;  %v4020_v6 = vpop.f32.mrb[4].mxu1 }
 0x257   : > { %v6602_v20 = vadd.f32 %v4172_v9, %v3967_v36  ;;  %v3969_v25 = vpop.f32.mrb[5].mxu0  ;;  %v6605_v29 = vadd.f32 %v4180_v44, %v4020_v6  ;;  %v4022_v32 = vpop.f32.mrb[5].mxu1 }
 0x258   : > { %v6607_v30 = vadd.f32 %v4176_v11, %v3969_v25  ;;  %v3971_v38 = vpop.f32.mrb[6].mxu0  ;;  %v6611_v2 = vadd.f32 %v4184_v13, %v4022_v32  ;;  %v4024_v41 = vpop.f32.mrb[6].mxu1 }
 0x259   : > { %v6613_v40 = vadd.f32 %v4172_v9, %v3971_v38  ;;  %v3973_v37 = vpop.f32.mrb[7].mxu0  ;;  %v6616_v42 = vadd.f32 %v4180_v44, %v4024_v41  ;;  %v4026_v45 = vpop.f32.mrb[7].mxu1  ;;  %4261 = vst [vmem:[%s7032_s15 + $0x80] sm:$0xff] (!%p4884_p5), %v6602_v20  ;;  %4263 = vst [vmem:[%s7032_s15 + $0x90] sm:$0xff] (!%p4884_p5), %v6605_v29 }
 0x25a   : > { %v6618_v43 = vadd.f32 %v4176_v11, %v3973_v37  ;;  %v6620_v49 = vadd.f32 %v4184_v13, %v4026_v45  ;;  %4262 = vst [vmem:[%s7032_s15 + $0x88] sm:$0xff] (!%p4884_p5), %v6607_v30  ;;  %4264 = vst [vmem:[%s7032_s15 + $0x98] sm:$0xff] (!%p4884_p5), %v6611_v2 }
 0x25b   : > { %4269 = vst [vmem:[%s7032_s15 + $0xc0] sm:$0xff] (!%p4884_p5), %v6613_v40  ;;  %4271 = vst [vmem:[%s7032_s15 + $0xd0] sm:$0xff] (!%p4884_p5), %v6616_v42 }
 0x25c   : > { %4270 = vst [vmem:[%s7032_s15 + $0xc8] sm:$0xff] (!%p4884_p5), %v6618_v43  ;;  %4272 = vst [vmem:[%s7032_s15 + $0xd8] sm:$0xff] (!%p4884_p5), %v6620_v49 }
 0x25e   : > { %v4063_v51 = vpop.f32.mrb[8].mxu0  ;;  %v4116_v53 = vpop.f32.mrb[8].mxu1 }
 0x25f   : > { %v6622_v52 = vadd.f32 %v4188_v47, %v4063_v51  ;;  %v4065_v54 = vpop.f32.mrb[9].mxu0  ;;  %v6624_v56 = vadd.f32 %v4196_v33, %v4116_v53  ;;  %v4118_v10 = vpop.f32.mrb[9].mxu1 }
 0x260   : > { %v6626_v31 = vadd.f32 %v4192_v48, %v4065_v54  ;;  %v4067_v58 = vpop.f32.mrb[10].mxu0  ;;  %v6628_v59 = vadd.f32 %v4200_v50, %v4118_v10  ;;  %v4120_v62 = vpop.f32.mrb[10].mxu1 }
 0x261   : > { %v6630_v61 = vadd.f32 %v4188_v47, %v4067_v58  ;;  %v4069_v0 = vpop.f32.mrb[11].mxu0  ;;  %v6632_v1 = vadd.f32 %v4196_v33, %v4120_v62  ;;  %v4122_v26 = vpop.f32.mrb[11].mxu1  ;;  %4249 = vst [vmem:[%s7032_s15 + $0x20] sm:$0xff] (!%p4884_p5), %v6622_v52  ;;  %4251 = vst [vmem:[%s7032_s15 + $0x30] sm:$0xff] (!%p4884_p5), %v6624_v56 }
 0x262   : > { %v6634_v46 = vadd.f32 %v4192_v48, %v4069_v0  ;;  %v6636_v3 = vadd.f32 %v4200_v50, %v4122_v26  ;;  %4250 = vst [vmem:[%s7032_s15 + $0x28] sm:$0xff] (!%p4884_p5), %v6626_v31  ;;  %4252 = vst [vmem:[%s7032_s15 + $0x38] sm:$0xff] (!%p4884_p5), %v6628_v59 }
 0x263   : > { %4257 = vst [vmem:[%s7032_s15 + $0x60] sm:$0xff] (!%p4884_p5), %v6630_v61  ;;  %4259 = vst [vmem:[%s7032_s15 + $0x70] sm:$0xff] (!%p4884_p5), %v6632_v1 }
 0x264   : > { %4244 = sbr.rel (%p4884_p5) target bundleno = 621 (0x26d), region = 84  ;;  %4258 = vst [vmem:[%s7032_s15 + $0x68] sm:$0xff] (!%p4884_p5), %v6634_v46  ;;  %4260 = vst [vmem:[%s7032_s15 + $0x78] sm:$0xff] (!%p4884_p5), %v6636_v3 }
 0x266   : > { %v4073_v4 = vpop.f32.mrb[12].mxu0  ;;  %v4126_v14 = vpop.f32.mrb[12].mxu1 }
 0x267   : > { %v6638_v5 = vadd.f32 %v4188_v47, %v4073_v4  ;;  %v4075_v28 = vpop.f32.mrb[13].mxu0  ;;  %v6640_v9 = vadd.f32 %v4196_v33, %v4126_v14  ;;  %v4128_v11 = vpop.f32.mrb[13].mxu1 }
 0x268   : > { %v6642_v44 = vadd.f32 %v4192_v48, %v4075_v28  ;;  %v4077_v13 = vpop.f32.mrb[14].mxu0  ;;  %v6644_v16 = vadd.f32 %v4200_v50, %v4128_v11  ;;  %v4130_v35 = vpop.f32.mrb[14].mxu1 }
 0x269   : > { %v6646_v8 = vadd.f32 %v4188_v47, %v4077_v13  ;;  %v4079_v57 = vpop.f32.mrb[15].mxu0  ;;  %v6648_v24 = vadd.f32 %v4196_v33, %v4130_v35  ;;  %v4132_v18 = vpop.f32.mrb[15].mxu1  ;;  %4265 = vst [vmem:[%s7032_s15 + $0xa0] sm:$0xff] (!%p4884_p5), %v6638_v5  ;;  %4267 = vst [vmem:[%s7032_s15 + $0xb0] sm:$0xff] (!%p4884_p5), %v6640_v9 }
 0x26a   : > { %v6650_v12 = vadd.f32 %v4192_v48, %v4079_v57  ;;  %v6652_v19 = vadd.f32 %v4200_v50, %v4132_v18  ;;  %4266 = vst [vmem:[%s7032_s15 + $0xa8] sm:$0xff] (!%p4884_p5), %v6642_v44  ;;  %4268 = vst [vmem:[%s7032_s15 + $0xb8] sm:$0xff] (!%p4884_p5), %v6644_v16 }
 0x26b   : > { %4273 = vst [vmem:[%s7032_s15 + $0xe0] sm:$0xff] %v6646_v8  ;;  %4275 = vst [vmem:[%s7032_s15 + $0xf0] sm:$0xff] %v6648_v24 }
 0x26c   : > { %4274 = vst [vmem:[%s7032_s15 + $0xe8] sm:$0xff] %v6650_v12  ;;  %4276 = vst [vmem:[%s7032_s15 + $0xf8] sm:$0xff] %v6652_v19 }
 0x26d PF: > { %p4885_p6 = scmp.eq.s32.totalorder %s5086_s18, 0 }
 0x26e   : > { %v4281_v36 = vld [vmem:[%s7032_s15] sm:$0xff] (!%p4885_p6)  ;;  %v4282_v6 = vld [vmem:[%s7032_s15 + $0x8] sm:$0xff] (!%p4885_p6)  ;;  %v4283_v25 = vld [vmem:[%s7032_s15 + $0x10] sm:$0xff] (!%p4885_p6) }
 0x26f   : > { %4280 = sbr.rel (%p4885_p6) target bundleno = 641 (0x281), region = 88  ;;  %v4313_v27 = vmax.f32 (!%p4885_p6), %v4281_v36, %v6586_v34  ;;  %v4314_v32 = vmax.f32 (!%p4885_p6), %v4282_v6, %v6590_v22  ;;  %v4315_v38 = vmax.f32 (!%p4885_p6), %v4283_v25, %v6588_v17  ;;  %v4284_v39 = vld [vmem:[%s7032_s15 + $0x18] sm:$0xff] (!%p4885_p6)  ;;  %v4285_v55 = vld [vmem:[%s7032_s15 + $0x20] sm:$0xff] (!%p4885_p6)  ;;  %v4286_v41 = vld [vmem:[%s7032_s15 + $0x28] sm:$0xff] (!%p4885_p6) }
 0x270   : > { %v4316_v37 = vmax.f32 (!%p4885_p6), %v4284_v39, %v6592_v15  ;;  %v4317_v34 = vmax.f32 (!%p4885_p6), %v4285_v55, %v6622_v52  ;;  %v4318_v22 = vmax.f32 (!%p4885_p6), %v4286_v41, %v6626_v31  ;;  %v4287_v17 = vld [vmem:[%s7032_s15 + $0x30] sm:$0xff] (!%p4885_p6)  ;;  %v4288_v7 = vld [vmem:[%s7032_s15 + $0x38] sm:$0xff] (!%p4885_p6)  ;;  %v4289_v45 = vld [vmem:[%s7032_s15 + $0x40] sm:$0xff] (!%p4885_p6) }
 0x271   : > { %4345 = vst [vmem:[%s7032_s15] sm:$0xff] (!%p4885_p6), %v4313_v27  ;;  %4346 = vst [vmem:[%s7032_s15 + $0x8] sm:$0xff] (!%p4885_p6), %v4314_v32  ;;  %v4319_v15 = vmax.f32 (!%p4885_p6), %v4287_v17, %v6624_v56  ;;  %v4320_v47 = vmax.f32 (!%p4885_p6), %v4288_v7, %v6628_v59  ;;  %v4321_v33 = vmax.f32 (!%p4885_p6), %v4289_v45, %v6594_v60  ;;  %v4290_v48 = vld [vmem:[%s7032_s15 + $0x48] sm:$0xff] (!%p4885_p6)  ;;  %v4291_v50 = vld [vmem:[%s7032_s15 + $0x50] sm:$0xff] (!%p4885_p6) }
 0x272   : > { %4347 = vst [vmem:[%s7032_s15 + $0x10] sm:$0xff] (!%p4885_p6), %v4315_v38  ;;  %v4292_v51 = vld [vmem:[%s7032_s15 + $0x58] sm:$0xff] (!%p4885_p6)  ;;  %4348 = vst [vmem:[%s7032_s15 + $0x18] sm:$0xff] (!%p4885_p6), %v4316_v37  ;;  %v4322_v60 = vmax.f32 (!%p4885_p6), %v4290_v48, %v6598_v63  ;;  %v4323_v52 = vmax.f32 (!%p4885_p6), %v4291_v50, %v6596_v21  ;;  %v4293_v54 = vld [vmem:[%s7032_s15 + $0x60] sm:$0xff] (!%p4885_p6) }
 0x273   : > { %4349 = vst [vmem:[%s7032_s15 + $0x20] sm:$0xff] (!%p4885_p6), %v4317_v34  ;;  %4350 = vst [vmem:[%s7032_s15 + $0x28] sm:$0xff] (!%p4885_p6), %v4318_v22  ;;  %v4324_v53 = vmax.f32 (!%p4885_p6), %v4292_v51, %v6600_v23  ;;  %v4294_v56 = vld [vmem:[%s7032_s15 + $0x68] sm:$0xff] (!%p4885_p6)  ;;  %v4295_v31 = vld [vmem:[%s7032_s15 + $0x70] sm:$0xff] (!%p4885_p6)  ;;  %v4325_v21 = vmax.f32 (!%p4885_p6), %v4293_v54, %v6630_v61 }
 0x274   : > { %4351 = vst [vmem:[%s7032_s15 + $0x30] sm:$0xff] (!%p4885_p6), %v4319_v15  ;;  %4352 = vst [vmem:[%s7032_s15 + $0x38] sm:$0xff] (!%p4885_p6), %v4320_v47  ;;  %v4326_v63 = vmax.f32 (!%p4885_p6), %v4294_v56, %v6634_v46  ;;  %v4327_v23 = vmax.f32 (!%p4885_p6), %v4295_v31, %v6632_v1  ;;  %v4296_v10 = vld [vmem:[%s7032_s15 + $0x78] sm:$0xff] (!%p4885_p6)  ;;  %v4297_v58 = vld [vmem:[%s7032_s15 + $0x80] sm:$0xff] (!%p4885_p6) }
 0x275   : > { %4353 = vst [vmem:[%s7032_s15 + $0x40] sm:$0xff] (!%p4885_p6), %v4321_v33  ;;  %v4298_v59 = vld [vmem:[%s7032_s15 + $0x88] sm:$0xff] (!%p4885_p6)  ;;  %4354 = vst [vmem:[%s7032_s15 + $0x48] sm:$0xff] (!%p4885_p6), %v4322_v60  ;;  %v4328_v61 = vmax.f32 (!%p4885_p6), %v4296_v10, %v6636_v3  ;;  %v4329_v62 = vmax.f32 (!%p4885_p6), %v4297_v58, %v6602_v20  ;;  %v4299_v1 = vld [vmem:[%s7032_s15 + $0x90] sm:$0xff] (!%p4885_p6) }
 0x276   : > { %4355 = vst [vmem:[%s7032_s15 + $0x50] sm:$0xff] %v4323_v52  ;;  %4356 = vst [vmem:[%s7032_s15 + $0x58] sm:$0xff] %v4324_v53  ;;  %v4330_v0 = vmax.f32 %v4298_v59, %v6607_v30  ;;  %v4300_v46 = vld [vmem:[%s7032_s15 + $0x98] sm:$0xff]  ;;  %v4301_v26 = vld [vmem:[%s7032_s15 + $0xa0] sm:$0xff]  ;;  %v4331_v20 = vmax.f32 %v4299_v1, %v6605_v29 }
 0x277   : > { %4357 = vst [vmem:[%s7032_s15 + $0x60] sm:$0xff] %v4325_v21  ;;  %4358 = vst [vmem:[%s7032_s15 + $0x68] sm:$0xff] %v4326_v63  ;;  %v4332_v30 = vmax.f32 %v4300_v46, %v6611_v2  ;;  %v4333_v3 = vmax.f32 %v4301_v26, %v6638_v5  ;;  %v4302_v4 = vld [vmem:[%s7032_s15 + $0xa8] sm:$0xff]  ;;  %v4303_v14 = vld [vmem:[%s7032_s15 + $0xb0] sm:$0xff] }
 0x278   : > { %4359 = vst [vmem:[%s7032_s15 + $0x70] sm:$0xff] %v4327_v23  ;;  %v4304_v28 = vld [vmem:[%s7032_s15 + $0xb8] sm:$0xff]  ;;  %4360 = vst [vmem:[%s7032_s15 + $0x78] sm:$0xff] %v4328_v61  ;;  %v4334_v29 = vmax.f32 %v4302_v4, %v6642_v44  ;;  %v4335_v2 = vmax.f32 %v4303_v14, %v6640_v9  ;;  %v4305_v11 = vld [vmem:[%s7032_s15 + $0xc0] sm:$0xff] }
 0x279   : > { %4361 = vst [vmem:[%s7032_s15 + $0x80] sm:$0xff] %v4329_v62  ;;  %4362 = vst [vmem:[%s7032_s15 + $0x88] sm:$0xff] %v4330_v0  ;;  %v4336_v5 = vmax.f32 %v4304_v28, %v6644_v16  ;;  %v4306_v13 = vld [vmem:[%s7032_s15 + $0xc8] sm:$0xff]  ;;  %v4307_v35 = vld [vmem:[%s7032_s15 + $0xd0] sm:$0xff]  ;;  %v4337_v9 = vmax.f32 %v4305_v11, %v6613_v40 }
 0x27a   : > { %4363 = vst [vmem:[%s7032_s15 + $0x90] sm:$0xff] %v4331_v20  ;;  %4364 = vst [vmem:[%s7032_s15 + $0x98] sm:$0xff] %v4332_v30  ;;  %v4338_v44 = vmax.f32 %v4306_v13, %v6618_v43  ;;  %v4339_v16 = vmax.f32 %v4307_v35, %v6616_v42  ;;  %v4308_v57 = vld [vmem:[%s7032_s15 + $0xd8] sm:$0xff]  ;;  %v4309_v18 = vld [vmem:[%s7032_s15 + $0xe0] sm:$0xff] }
 0x27b   : > { %4365 = vst [vmem:[%s7032_s15 + $0xa0] sm:$0xff] %v4333_v3  ;;  %v4310_v36 = vld [vmem:[%s7032_s15 + $0xe8] sm:$0xff]  ;;  %4366 = vst [vmem:[%s7032_s15 + $0xa8] sm:$0xff] %v4334_v29  ;;  %v4340_v40 = vmax.f32 %v4308_v57, %v6620_v49  ;;  %v4341_v42 = vmax.f32 %v4309_v18, %v6646_v8  ;;  %v4311_v6 = vld [vmem:[%s7032_s15 + $0xf0] sm:$0xff] }
 0x27c   : > { %4367 = vst [vmem:[%s7032_s15 + $0xb0] sm:$0xff] %v4335_v2  ;;  %4368 = vst [vmem:[%s7032_s15 + $0xb8] sm:$0xff] %v4336_v5  ;;  %v4342_v43 = vmax.f32 %v4310_v36, %v6650_v12  ;;  %v4312_v25 = vld [vmem:[%s7032_s15 + $0xf8] sm:$0xff]  ;;  %v4343_v49 = vmax.f32 %v4311_v6, %v6648_v24 }
 0x27d   : > { %4369 = vst [vmem:[%s7032_s15 + $0xc0] sm:$0xff] %v4337_v9  ;;  %4370 = vst [vmem:[%s7032_s15 + $0xc8] sm:$0xff] %v4338_v44  ;;  %v4344_v8 = vmax.f32 %v4312_v25, %v6652_v19 }
 0x27e   : > { %4371 = vst [vmem:[%s7032_s15 + $0xd0] sm:$0xff] %v4339_v16  ;;  %4372 = vst [vmem:[%s7032_s15 + $0xd8] sm:$0xff] %v4340_v40 }
 0x27f   : > { %4373 = vst [vmem:[%s7032_s15 + $0xe0] sm:$0xff] %v4341_v42  ;;  %4374 = vst [vmem:[%s7032_s15 + $0xe8] sm:$0xff] %v4342_v43 }
 0x280   : > { %4375 = vst [vmem:[%s7032_s15 + $0xf0] sm:$0xff] %v4343_v49  ;;  %4376 = vst [vmem:[%s7032_s15 + $0xf8] sm:$0xff] %v4344_v8 }
 0x281 PF: > { %s25_s20 = sadd.s32 1, %s5094_s20   ;;  %s7036_s18 = sld [smem:[#allocation2_spill]] }
 0x282   : > { %p22_p7 = scmp.ge.s32.totalorder %s25_s20, 6   ;;  %s7037_s19 = sld [smem:[#allocation3_spill]] }
 0x284   :  { %24 = sbr.rel (!%p22_p7) target bundleno = 2 (0x2), region = 127 }

// kernel: trianglenet_seg_forward.11
= control target key start
LH: loop header
LB: loop body
LE: loop exit
PB: predicated region body
PF: predicated region fallthrough
CT: control target
= control target key end

     0   :  { %s2125_s2 = inlined_call_operand.vmem [shape: bf16[1024,256], index: 2, kind: input, shape index: {}]   ;;  %s2126_s0 = inlined_call_operand.vmem [shape: bf16[32,1024], index: 0, kind: input, shape index: {}]   ;;  %s2127_s1 = inlined_call_operand.vmem [shape: f32[32,256], index: 1, kind: input, shape index: {}]   ;;  %s2128_s3 = inlined_call_operand.vmem [shape: bf16[32,256], index: 3, kind: output, shape index: {0}]   ;;  %s2129_s4 = inlined_call_operand.vmem [shape: f32[1,2,256], index: 4, kind: output, shape index: {1}]  }
   0x1   :  { %v1417_v0 = vld [vmem:[%s2125_s2 + $0x4] ss:$8 sps:$4 sm:$0xff]   ;;  %v1421_v2 = vld [vmem:[%s2125_s2] ss:$8 sps:$4 sm:$0xff]   ;;  %v1423_v4 = vld [vmem:[%s2125_s2 + $0x14] ss:$8 sps:$4 sm:$0xff]  }
   0x2   :  { %v1419_v1 = vld [vmem:[%s2125_s2 + $0x204] ss:$8 sps:$4 sm:$0xff]   ;;  %888 = vmatprep.subr.bf16.mxu1 %v1417_v0  ;;  %v1422_v3 = vld [vmem:[%s2125_s2 + $0x200] ss:$8 sps:$4 sm:$0xff]   ;;  %v1425_v5 = vld [vmem:[%s2125_s2 + $0x214] ss:$8 sps:$4 sm:$0xff]  }
   0x3   :  { %994 = vmatprep.subr.bf16.mxu0 %v1419_v1  ;;  %889 = vmatpush1.bf16.msra.mxu1 %v1421_v2  ;;  %v1427_v6 = vld [vmem:[%s2125_s2 + $0x10] ss:$8 sps:$4 sm:$0xff]   ;;  %v1429_v8 = vld [vmem:[%s2125_s2 + $0x24] ss:$8 sps:$4 sm:$0xff]   ;;  %v1433_v10 = vld [vmem:[%s2125_s2 + $0x20] ss:$8 sps:$4 sm:$0xff]  }
   0x4   :  { %995 = vmatpush1.bf16.msra.mxu0 %v1422_v3  ;;  %890 = vmatprep.subr.bf16.mxu1 %v1423_v4  ;;  %v1428_v7 = vld [vmem:[%s2125_s2 + $0x210] ss:$8 sps:$4 sm:$0xff]   ;;  %v1431_v9 = vld [vmem:[%s2125_s2 + $0x224] ss:$8 sps:$4 sm:$0xff]   ;;  %v1434_v11 = vld [vmem:[%s2125_s2 + $0x220] ss:$8 sps:$4 sm:$0xff]  }
   0x5   :  { %996 = vmatprep.subr.bf16.mxu0 %v1425_v5  ;;  %v1435_v12 = vld [vmem:[%s2125_s2 + $0x34] ss:$8 sps:$4 sm:$0xff]   ;;  %v1439_v14 = vld [vmem:[%s2125_s2 + $0x30] ss:$8 sps:$4 sm:$0xff]   ;;  %v1441_v16 = vld [vmem:[%s2125_s2 + $0x44] ss:$8 sps:$4 sm:$0xff]  }
   0x6   :  { %v1437_v13 = vld [vmem:[%s2125_s2 + $0x234] ss:$8 sps:$4 sm:$0xff]   ;;  %v1440_v15 = vld [vmem:[%s2125_s2 + $0x230] ss:$8 sps:$4 sm:$0xff]   ;;  %v1443_v17 = vld [vmem:[%s2125_s2 + $0x244] ss:$8 sps:$4 sm:$0xff]  }
   0x7   :  { %891 = vmatpush1.bf16.msra.mxu1 %v1427_v6  ;;  %v1445_v18 = vld [vmem:[%s2125_s2 + $0x40] ss:$8 sps:$4 sm:$0xff]   ;;  %v1447_v20 = vld [vmem:[%s2125_s2 + $0x54] ss:$8 sps:$4 sm:$0xff]   ;;  %v1451_v22 = vld [vmem:[%s2125_s2 + $0x50] ss:$8 sps:$4 sm:$0xff]  }
   0x8   :  { %997 = vmatpush1.bf16.msra.mxu0 %v1428_v7  ;;  %892 = vmatprep.subr.bf16.mxu1 %v1429_v8  ;;  %v1446_v19 = vld [vmem:[%s2125_s2 + $0x240] ss:$8 sps:$4 sm:$0xff]   ;;  %v1449_v21 = vld [vmem:[%s2125_s2 + $0x254] ss:$8 sps:$4 sm:$0xff]   ;;  %v1452_v23 = vld [vmem:[%s2125_s2 + $0x250] ss:$8 sps:$4 sm:$0xff]  }
   0x9   :  { %998 = vmatprep.subr.bf16.mxu0 %v1431_v9  ;;  %v1453_v24 = vld [vmem:[%s2125_s2 + $0x64] ss:$8 sps:$4 sm:$0xff]   ;;  %v1457_v26 = vld [vmem:[%s2125_s2 + $0x60] ss:$8 sps:$4 sm:$0xff]   ;;  %v1459_v28 = vld [vmem:[%s2125_s2 + $0x74] ss:$8 sps:$4 sm:$0xff]  }
   0xa   :  { %v1455_v25 = vld [vmem:[%s2125_s2 + $0x264] ss:$8 sps:$4 sm:$0xff]   ;;  %v1458_v27 = vld [vmem:[%s2125_s2 + $0x260] ss:$8 sps:$4 sm:$0xff]   ;;  %v1461_v29 = vld [vmem:[%s2125_s2 + $0x274] ss:$8 sps:$4 sm:$0xff]  }
   0xb   :  { %893 = vmatpush1.bf16.msra.mxu1 %v1433_v10  ;;  %v1463_v30 = vld [vmem:[%s2125_s2 + $0x70] ss:$8 sps:$4 sm:$0xff]   ;;  %v1465_v32 = vld [vmem:[%s2125_s2 + $0x84] ss:$8 sps:$4 sm:$0xff]   ;;  %v1469_v34 = vld [vmem:[%s2125_s2 + $0x80] ss:$8 sps:$4 sm:$0xff]  }
   0xc   :  { %999 = vmatpush1.bf16.msra.mxu0 %v1434_v11  ;;  %894 = vmatprep.subr.bf16.mxu1 %v1435_v12  ;;  %v1464_v31 = vld [vmem:[%s2125_s2 + $0x270] ss:$8 sps:$4 sm:$0xff]   ;;  %v1467_v33 = vld [vmem:[%s2125_s2 + $0x284] ss:$8 sps:$4 sm:$0xff]   ;;  %v1470_v35 = vld [vmem:[%s2125_s2 + $0x280] ss:$8 sps:$4 sm:$0xff]  }
   0xd   :  { %1000 = vmatprep.subr.bf16.mxu0 %v1437_v13  ;;  %v1471_v36 = vld [vmem:[%s2125_s2 + $0x94] ss:$8 sps:$4 sm:$0xff]   ;;  %v1475_v38 = vld [vmem:[%s2125_s2 + $0x90] ss:$8 sps:$4 sm:$0xff]   ;;  %v1477_v40 = vld [vmem:[%s2125_s2 + $0xa4] ss:$8 sps:$4 sm:$0xff]  }
   0xe   :  { %v1473_v37 = vld [vmem:[%s2125_s2 + $0x294] ss:$8 sps:$4 sm:$0xff]   ;;  %v1476_v39 = vld [vmem:[%s2125_s2 + $0x290] ss:$8 sps:$4 sm:$0xff]   ;;  %v1479_v41 = vld [vmem:[%s2125_s2 + $0x2a4] ss:$8 sps:$4 sm:$0xff]  }
   0xf   :  { %895 = vmatpush1.bf16.msra.mxu1 %v1439_v14  ;;  %v1481_v42 = vld [vmem:[%s2125_s2 + $0xa0] ss:$8 sps:$4 sm:$0xff]   ;;  %v1483_v44 = vld [vmem:[%s2125_s2 + $0xb4] ss:$8 sps:$4 sm:$0xff]   ;;  %v1487_v46 = vld [vmem:[%s2125_s2 + $0xb0] ss:$8 sps:$4 sm:$0xff]  }
  0x10   :  { %1001 = vmatpush1.bf16.msra.mxu0 %v1440_v15  ;;  %896 = vmatprep.subr.bf16.mxu1 %v1441_v16  ;;  %v1482_v43 = vld [vmem:[%s2125_s2 + $0x2a0] ss:$8 sps:$4 sm:$0xff]   ;;  %v1485_v45 = vld [vmem:[%s2125_s2 + $0x2b4] ss:$8 sps:$4 sm:$0xff]   ;;  %v1488_v47 = vld [vmem:[%s2125_s2 + $0x2b0] ss:$8 sps:$4 sm:$0xff]  }
  0x11   :  { %1002 = vmatprep.subr.bf16.mxu0 %v1443_v17  ;;  %v16_v48 = vld [vmem:[%s2126_s0] sm:$0xff]  ;;  %v18_v53 = vld [vmem:[%s2126_s0 + $0x10] sm:$0xff] }
  0x12   :  { %v20_v49 = vld [vmem:[%s2126_s0 + $0x20] sm:$0xff]  ;;  %v22_v54 = vld [vmem:[%s2126_s0 + $0x30] sm:$0xff] }
  0x13   :  { %897 = vmatpush1.bf16.msra.mxu1 %v1445_v18  ;;  %v1489_v50 = vld [vmem:[%s2125_s2 + $0xc4] ss:$8 sps:$4 sm:$0xff]   ;;  %v1232_v52 = vcombine.high %v16_v48, %v20_v49  ;;  %v1236_v55 = vcombine.high %v18_v53, %v22_v54  ;;  %v1493_v56 = vld [vmem:[%s2125_s2 + $0xc0] ss:$8 sps:$4 sm:$0xff]   ;;  %v1495_v58 = vld [vmem:[%s2125_s2 + $0xd4] ss:$8 sps:$4 sm:$0xff]   ;;  %v1231_v8 = vcombine.low %v16_v48, %v20_v49  ;;  %v1235_v10 = vcombine.low %v18_v53, %v22_v54 }
  0x14   :  { %1003 = vmatpush1.bf16.msra.mxu0 %v1446_v19  ;;  %898 = vmatprep.subr.bf16.mxu1 %v1447_v20  ;;  %v1491_v51 = vld [vmem:[%s2125_s2 + $0x2c4] ss:$8 sps:$4 sm:$0xff]   ;;  %v1494_v57 = vld [vmem:[%s2125_s2 + $0x2c0] ss:$8 sps:$4 sm:$0xff]   ;;  %v1497_v59 = vld [vmem:[%s2125_s2 + $0x2d4] ss:$8 sps:$4 sm:$0xff]  }
  0x15   :  { %1004 = vmatprep.subr.bf16.mxu0 %v1449_v21  ;;  %920 = vmatprep.mubr.bf16.mxu1 %v1232_v52  ;;  %v1499_v60 = vld [vmem:[%s2125_s2 + $0xd0] ss:$8 sps:$4 sm:$0xff]   ;;  %v1501_v62 = vld [vmem:[%s2125_s2 + $0xe4] ss:$8 sps:$4 sm:$0xff]   ;;  %v1505_v0 = vld [vmem:[%s2125_s2 + $0xe0] ss:$8 sps:$4 sm:$0xff]  }
  0x16   :  { %1026 = vmatprep.mubr.bf16.mxu0 %v1236_v55  ;;  %v1500_v61 = vld [vmem:[%s2125_s2 + $0x2d0] ss:$8 sps:$4 sm:$0xff]   ;;  %v1503_v63 = vld [vmem:[%s2125_s2 + $0x2e4] ss:$8 sps:$4 sm:$0xff]   ;;  %v1506_v1 = vld [vmem:[%s2125_s2 + $0x2e0] ss:$8 sps:$4 sm:$0xff]  }
  0x17   :  { %899 = vmatpush1.bf16.msra.mxu1 %v1451_v22  ;;  %v1507_v2 = vld [vmem:[%s2125_s2 + $0xf4] ss:$8 sps:$4 sm:$0xff]   ;;  %v1511_v4 = vld [vmem:[%s2125_s2 + $0xf0] ss:$8 sps:$4 sm:$0xff]   ;;  %v1515_v6 = vld [vmem:[%s2125_s2 + $0x104] ss:$8 sps:$4 sm:$0xff]  }
  0x18   :  { %1005 = vmatpush1.bf16.msra.mxu0 %v1452_v23  ;;  %900 = vmatprep.subr.bf16.mxu1 %v1453_v24  ;;  %v1509_v3 = vld [vmem:[%s2125_s2 + $0x2f4] ss:$8 sps:$4 sm:$0xff]   ;;  %v1512_v5 = vld [vmem:[%s2125_s2 + $0x2f0] ss:$8 sps:$4 sm:$0xff]   ;;  %v1518_v7 = vld [vmem:[%s2125_s2 + $0x304] ss:$8 sps:$4 sm:$0xff]  }
  0x19   :  { %1006 = vmatprep.subr.bf16.mxu0 %v1455_v25  ;;  %v1513_v9 = vld [vmem:[%s2125_s2 + $0x100] ss:$8 sps:$4 sm:$0xff]   ;;  %v1521_v12 = vld [vmem:[%s2125_s2 + $0x114] ss:$8 sps:$4 sm:$0xff]   ;;  %v1519_v14 = vld [vmem:[%s2125_s2 + $0x110] ss:$8 sps:$4 sm:$0xff]  }
  0x1a   :  { %v1516_v11 = vld [vmem:[%s2125_s2 + $0x300] ss:$8 sps:$4 sm:$0xff]   ;;  %v1524_v13 = vld [vmem:[%s2125_s2 + $0x314] ss:$8 sps:$4 sm:$0xff]   ;;  %v1522_v15 = vld [vmem:[%s2125_s2 + $0x310] ss:$8 sps:$4 sm:$0xff]  }
  0x1b   :  { %901 = vmatpush1.bf16.msra.mxu1 %v1457_v26  ;;  %v1527_v16 = vld [vmem:[%s2125_s2 + $0x124] ss:$8 sps:$4 sm:$0xff]   ;;  %v1525_v18 = vld [vmem:[%s2125_s2 + $0x120] ss:$8 sps:$4 sm:$0xff]   ;;  %v1533_v20 = vld [vmem:[%s2125_s2 + $0x134] ss:$8 sps:$4 sm:$0xff]  }
  0x1c   :  { %1007 = vmatpush1.bf16.msra.mxu0 %v1458_v27  ;;  %902 = vmatprep.subr.bf16.mxu1 %v1459_v28  ;;  %v1530_v17 = vld [vmem:[%s2125_s2 + $0x324] ss:$8 sps:$4 sm:$0xff]   ;;  %v1528_v19 = vld [vmem:[%s2125_s2 + $0x320] ss:$8 sps:$4 sm:$0xff]   ;;  %v1536_v21 = vld [vmem:[%s2125_s2 + $0x334] ss:$8 sps:$4 sm:$0xff]  }
  0x1d   :  { %1008 = vmatprep.subr.bf16.mxu0 %v1461_v29  ;;  %v1531_v22 = vld [vmem:[%s2125_s2 + $0x130] ss:$8 sps:$4 sm:$0xff]   ;;  %v1539_v24 = vld [vmem:[%s2125_s2 + $0x144] ss:$8 sps:$4 sm:$0xff]   ;;  %v1537_v26 = vld [vmem:[%s2125_s2 + $0x140] ss:$8 sps:$4 sm:$0xff]  }
  0x1e   :  { %v1534_v23 = vld [vmem:[%s2125_s2 + $0x330] ss:$8 sps:$4 sm:$0xff]   ;;  %v1542_v25 = vld [vmem:[%s2125_s2 + $0x344] ss:$8 sps:$4 sm:$0xff]   ;;  %v1540_v27 = vld [vmem:[%s2125_s2 + $0x340] ss:$8 sps:$4 sm:$0xff]  }
  0x1f   :  { %903 = vmatpush1.bf16.msra.mxu1 %v1463_v30  ;;  %v1545_v28 = vld [vmem:[%s2125_s2 + $0x154] ss:$8 sps:$4 sm:$0xff]   ;;  %v24_v30 = vld [vmem:[%s2126_s0 + $0x40] sm:$0xff]  ;;  %v1555_v52 = vld [vmem:[%s2125_s2 + $0x170] ss:$8 sps:$4 sm:$0xff]  }
  0x20   :  { %1009 = vmatpush1.bf16.msra.mxu0 %v1464_v31  ;;  %904 = vmatprep.subr.bf16.mxu1 %v1465_v32  ;;  %v1548_v29 = vld [vmem:[%s2125_s2 + $0x354] ss:$8 sps:$4 sm:$0xff]   ;;  %v28_v31 = vld [vmem:[%s2126_s0 + $0x60] sm:$0xff]  ;;  %v1558_v53 = vld [vmem:[%s2125_s2 + $0x370] ss:$8 sps:$4 sm:$0xff]  }
  0x21   :  { %1010 = vmatprep.subr.bf16.mxu0 %v1467_v33  ;;  %v1240_v32 = vcombine.high %v24_v30, %v28_v31  ;;  %v26_v33 = vld [vmem:[%s2126_s0 + $0x50] sm:$0xff]  ;;  %v1563_v54 = vld [vmem:[%s2125_s2 + $0x184] ss:$8 sps:$4 sm:$0xff]  }
  0x22   :  { %v1560_v48 = vld [vmem:[%s2125_s2 + $0x374] ss:$8 sps:$4 sm:$0xff]   ;;  %v1566_v55 = vld [vmem:[%s2125_s2 + $0x384] ss:$8 sps:$4 sm:$0xff]  }
  0x23   :  { %905 = vmatpush1.bf16.msra.mxu1 %v1469_v34  ;;  %v30_v34 = vld [vmem:[%s2126_s0 + $0x70] sm:$0xff] }
  0x24   :  { %1011 = vmatpush1.bf16.msra.mxu0 %v1470_v35  ;;  %906 = vmatprep.subr.bf16.mxu1 %v1471_v36  ;;  %v1543_v35 = vld [vmem:[%s2125_s2 + $0x150] ss:$8 sps:$4 sm:$0xff]  }
  0x25   :  { %1012 = vmatprep.subr.bf16.mxu0 %v1473_v37  ;;  %v1546_v36 = vld [vmem:[%s2125_s2 + $0x350] ss:$8 sps:$4 sm:$0xff]   ;;  %v1244_v37 = vcombine.high %v26_v33, %v30_v34 }
  0x27   :  { %907 = vmatpush1.bf16.msra.mxu1 %v1475_v38  ;;  %v1239_v38 = vcombine.low %v24_v30, %v28_v31 }
  0x28   :  { %1013 = vmatpush1.bf16.msra.mxu0 %v1476_v39  ;;  %908 = vmatprep.subr.bf16.mxu1 %v1477_v40  ;;  %v1243_v39 = vcombine.low %v26_v33, %v30_v34  ;;  %v1551_v40 = vld [vmem:[%s2125_s2 + $0x164] ss:$8 sps:$4 sm:$0xff]  }
  0x29   :  { %1014 = vmatprep.subr.bf16.mxu0 %v1479_v41  ;;  %v1554_v41 = vld [vmem:[%s2125_s2 + $0x364] ss:$8 sps:$4 sm:$0xff]  }
  0x2a   :  { %v161_v33 = vld [vmem:[%s2127_s1 + $0x8] sm:$0xff] }
  0x2b   :  { %909 = vmatpush1.bf16.msra.mxu1 %v1481_v42  ;;  %v1549_v42 = vld [vmem:[%s2125_s2 + $0x160] ss:$8 sps:$4 sm:$0xff]  }
  0x2c   :  { %1015 = vmatpush1.bf16.msra.mxu0 %v1482_v43  ;;  %910 = vmatprep.subr.bf16.mxu1 %v1483_v44  ;;  %v1552_v43 = vld [vmem:[%s2125_s2 + $0x360] ss:$8 sps:$4 sm:$0xff]  }
  0x2d   :  { %1016 = vmatprep.subr.bf16.mxu0 %v1485_v45  ;;  %v1938_v44 = vld [vmem:[%s2126_s0 + $0x8] sm:$0xff] }
  0x2e   :  { %v1943_v45 = vld [vmem:[%s2126_s0 + $0x28] sm:$0xff] }
  0x2f   :  { %911 = vmatpush1.bf16.msra.mxu1 %v1487_v46  ;;  %v1948_v46 = vld [vmem:[%s2126_s0 + $0x18] sm:$0xff]  ;;  %v1234_v49 = vcombine.high %v1938_v44, %v1943_v45 }
  0x30   :  { %1017 = vmatpush1.bf16.msra.mxu0 %v1488_v47  ;;  %912 = vmatprep.subr.bf16.mxu1 %v1489_v50  ;;  %v1557_v47 = vld [vmem:[%s2125_s2 + $0x174] ss:$8 sps:$4 sm:$0xff]  }
  0x31   :  { %1018 = vmatprep.subr.bf16.mxu0 %v1491_v51  ;;  %v1961_v50 = vld [vmem:[%s2126_s0 + $0x38] sm:$0xff] }
  0x32   :  { %v1238_v51 = vcombine.high %v1948_v46, %v1961_v50 }
  0x33   :  { %913 = vmatpush1.bf16.msra.mxu1 %v1493_v56  ;;  %v1561_v56 = vld [vmem:[%s2125_s2 + $0x180] ss:$8 sps:$4 sm:$0xff]  }
  0x34   :  { %1019 = vmatpush1.bf16.msra.mxu0 %v1494_v57  ;;  %914 = vmatprep.subr.bf16.mxu1 %v1495_v58  ;;  %v1564_v57 = vld [vmem:[%s2125_s2 + $0x380] ss:$8 sps:$4 sm:$0xff]   ;;  %v1569_v58 = vld [vmem:[%s2125_s2 + $0x194] ss:$8 sps:$4 sm:$0xff]  }
  0x35   :  { %1020 = vmatprep.subr.bf16.mxu0 %v1497_v59  ;;  %v1572_v59 = vld [vmem:[%s2125_s2 + $0x394] ss:$8 sps:$4 sm:$0xff]  }
  0x37   :  { %915 = vmatpush1.bf16.msra.mxu1 %v1499_v60  ;;  %v1567_v60 = vld [vmem:[%s2125_s2 + $0x190] ss:$8 sps:$4 sm:$0xff]  }
  0x38   :  { %1021 = vmatpush1.bf16.msra.mxu0 %v1500_v61  ;;  %916 = vmatprep.subr.bf16.mxu1 %v1501_v62  ;;  %v1570_v61 = vld [vmem:[%s2125_s2 + $0x390] ss:$8 sps:$4 sm:$0xff]   ;;  %v1575_v62 = vld [vmem:[%s2125_s2 + $0x1a4] ss:$8 sps:$4 sm:$0xff]  }
  0x39   :  { %1022 = vmatprep.subr.bf16.mxu0 %v1503_v63  ;;  %v1578_v63 = vld [vmem:[%s2125_s2 + $0x3a4] ss:$8 sps:$4 sm:$0xff]  }
  0x3b   :  { %917 = vmatpush1.bf16.msra.mxu1 %v1505_v0  ;;  %v1573_v0 = vld [vmem:[%s2125_s2 + $0x1a0] ss:$8 sps:$4 sm:$0xff]  }
  0x3c   :  { %1023 = vmatpush1.bf16.msra.mxu0 %v1506_v1  ;;  %918 = vmatprep.subr.bf16.mxu1 %v1507_v2  ;;  %v1576_v1 = vld [vmem:[%s2125_s2 + $0x3a0] ss:$8 sps:$4 sm:$0xff]   ;;  %v1581_v2 = vld [vmem:[%s2125_s2 + $0x1b4] ss:$8 sps:$4 sm:$0xff]  }
  0x3d   :  { %1024 = vmatprep.subr.bf16.mxu0 %v1509_v3  ;;  %v1584_v3 = vld [vmem:[%s2125_s2 + $0x3b4] ss:$8 sps:$4 sm:$0xff]  }
  0x3f   :  { %919 = vmatpush1.bf16.msra.mxu1 %v1511_v4  ;;  %v1579_v4 = vld [vmem:[%s2125_s2 + $0x1b0] ss:$8 sps:$4 sm:$0xff]  }
  0x40   :  { %1025 = vmatpush1.bf16.msra.mxu0 %v1512_v5  ;;  %941 = vmatprep.subr.bf16.mxu1 %v1515_v6  ;;  %v1582_v5 = vld [vmem:[%s2125_s2 + $0x3b0] ss:$8 sps:$4 sm:$0xff]   ;;  %v1587_v6 = vld [vmem:[%s2125_s2 + $0x1c4] ss:$8 sps:$4 sm:$0xff]  }
  0x41   :  { %1047 = vmatprep.subr.bf16.mxu0 %v1518_v7  ;;  %v1590_v7 = vld [vmem:[%s2125_s2 + $0x3c4] ss:$8 sps:$4 sm:$0xff]  }
  0x42   :  { %921 = vmatmul.mubr.bf16.vlgmr.msra.gmra.mrb[0].mxu1 %v1231_v8  ;;  %v1585_v8 = vld [vmem:[%s2125_s2 + $0x1c0] ss:$8 sps:$4 sm:$0xff]  }
  0x43   :  { %1027 = vmatmul.mubr.bf16.vlgmr.msra.gmra.mrb[0].mxu0 %v1235_v10  ;;  %942 = vmatpush1.bf16.msra.mxu1 %v1513_v9  ;;  %v1588_v9 = vld [vmem:[%s2125_s2 + $0x3c0] ss:$8 sps:$4 sm:$0xff]   ;;  %v1593_v10 = vld [vmem:[%s2125_s2 + $0x1d4] ss:$8 sps:$4 sm:$0xff]  }
  0x44   :  { %1048 = vmatpush1.bf16.msra.mxu0 %v1516_v11  ;;  %943 = vmatprep.subr.bf16.mxu1 %v1521_v12  ;;  %v1596_v11 = vld [vmem:[%s2125_s2 + $0x3d4] ss:$8 sps:$4 sm:$0xff]   ;;  %v1591_v12 = vld [vmem:[%s2125_s2 + $0x1d0] ss:$8 sps:$4 sm:$0xff]  }
  0x45   :  { %1049 = vmatprep.subr.bf16.mxu0 %v1524_v13  ;;  %930 = vmatprep.mubr.bf16.mxu1 %v1240_v32  ;;  %v1594_v13 = vld [vmem:[%s2125_s2 + $0x3d0] ss:$8 sps:$4 sm:$0xff]   ;;  %v160_v32 = vld [vmem:[%s2127_s1] sm:$0xff] }
  0x46   :  { %1036 = vmatprep.mubr.bf16.mxu0 %v1244_v37 }
  0x47   :  { %944 = vmatpush1.bf16.msra.mxu1 %v1519_v14  ;;  %v1599_v14 = vld [vmem:[%s2125_s2 + $0x1e4] ss:$8 sps:$4 sm:$0xff]  }
  0x48   :  { %1050 = vmatpush1.bf16.msra.mxu0 %v1522_v15  ;;  %945 = vmatprep.subr.bf16.mxu1 %v1527_v16  ;;  %v1602_v15 = vld [vmem:[%s2125_s2 + $0x3e4] ss:$8 sps:$4 sm:$0xff]   ;;  %v1597_v16 = vld [vmem:[%s2125_s2 + $0x1e0] ss:$8 sps:$4 sm:$0xff]  }
  0x49   :  { %1051 = vmatprep.subr.bf16.mxu0 %v1530_v17  ;;  %v1600_v17 = vld [vmem:[%s2125_s2 + $0x3e0] ss:$8 sps:$4 sm:$0xff]  }
  0x4a   :  { %931 = vmatmul.mubr.bf16.gmra.mrb[4].mxu1 %v1239_v38 }
  0x4b   :  { %946 = vmatpush1.bf16.msra.mxu1 %v1525_v18  ;;  %1037 = vmatmul.mubr.bf16.gmra.mrb[4].mxu0 %v1243_v39  ;;  %v1605_v18 = vld [vmem:[%s2125_s2 + $0x1f4] ss:$8 sps:$4 sm:$0xff]  }
  0x4c   :  { %1052 = vmatpush1.bf16.msra.mxu0 %v1528_v19  ;;  %947 = vmatprep.subr.bf16.mxu1 %v1533_v20  ;;  %v1608_v19 = vld [vmem:[%s2125_s2 + $0x3f4] ss:$8 sps:$4 sm:$0xff]   ;;  %v1603_v20 = vld [vmem:[%s2125_s2 + $0x1f0] ss:$8 sps:$4 sm:$0xff]  }
  0x4d   :  { %1053 = vmatprep.subr.bf16.mxu0 %v1536_v21  ;;  %973 = vmatprep.mubr.bf16.mxu1 %v1234_v49  ;;  %v1606_v21 = vld [vmem:[%s2125_s2 + $0x3f0] ss:$8 sps:$4 sm:$0xff]  }
  0x4e   :  { %1079 = vmatprep.mubr.bf16.mxu0 %v1238_v51 }
  0x4f   :  { %948 = vmatpush1.bf16.msra.mxu1 %v1531_v22  ;;  %v25_v22 = vld [vmem:[%s2126_s0 + $0x48] sm:$0xff] }
  0x50   :  { %1054 = vmatpush1.bf16.msra.mxu0 %v1534_v23  ;;  %949 = vmatprep.subr.bf16.mxu1 %v1539_v24  ;;  %v29_v23 = vld [vmem:[%s2126_s0 + $0x68] sm:$0xff]  ;;  %v27_v24 = vld [vmem:[%s2126_s0 + $0x58] sm:$0xff] }
  0x51   :  { %1055 = vmatprep.subr.bf16.mxu0 %v1542_v25  ;;  %v31_v25 = vld [vmem:[%s2126_s0 + $0x78] sm:$0xff]  ;;  %v1241_v30 = vcombine.low %v25_v22, %v29_v23 }
  0x52   :  { %v1245_v31 = vcombine.low %v27_v24, %v31_v25 }
  0x53   :  { %950 = vmatpush1.bf16.msra.mxu1 %v1537_v26  ;;  %v1233_v26 = vcombine.low %v1938_v44, %v1943_v45 }
  0x54   :  { %1056 = vmatpush1.bf16.msra.mxu0 %v1540_v27  ;;  %951 = vmatprep.subr.bf16.mxu1 %v1545_v28  ;;  %v1237_v27 = vcombine.low %v1948_v46, %v1961_v50  ;;  %v1242_v28 = vcombine.high %v25_v22, %v29_v23 }
  0x55   :  { %1057 = vmatprep.subr.bf16.mxu0 %v1548_v29  ;;  %v1246_v29 = vcombine.high %v27_v24, %v31_v25 }
  0x57   :  { %952 = vmatpush1.bf16.msra.mxu1 %v1543_v35 }
  0x58   :  { %1058 = vmatpush1.bf16.msra.mxu0 %v1546_v36  ;;  %953 = vmatprep.subr.bf16.mxu1 %v1551_v40  ;;  %v162_v36 = vld [vmem:[%s2127_s1 + $0x10] sm:$0xff]  ;;  %v163_v40 = vld [vmem:[%s2127_s1 + $0x18] sm:$0xff] }
  0x59   :  { %1059 = vmatprep.subr.bf16.mxu0 %v1554_v41 }
  0x5b   :  { %954 = vmatpush1.bf16.msra.mxu1 %v1549_v42 }
  0x5c   :  { %1060 = vmatpush1.bf16.msra.mxu0 %v1552_v43  ;;  %955 = vmatprep.subr.bf16.mxu1 %v1557_v47 }
  0x5d   :  { %1061 = vmatprep.subr.bf16.mxu0 %v1560_v48 }
  0x5f   :  { %956 = vmatpush1.bf16.msra.mxu1 %v1555_v52 }
  0x60   :  { %1062 = vmatpush1.bf16.msra.mxu0 %v1558_v53  ;;  %957 = vmatprep.subr.bf16.mxu1 %v1563_v54  ;;  %v164_v54 = vld [vmem:[%s2127_s1 + $0x20] sm:$0xff] }
  0x61   :  { %1063 = vmatprep.subr.bf16.mxu0 %v1566_v55 }
  0x63   :  { %958 = vmatpush1.bf16.msra.mxu1 %v1561_v56  ;;  %v165_v56 = vld [vmem:[%s2127_s1 + $0x28] sm:$0xff] }
  0x64   :  { %1064 = vmatpush1.bf16.msra.mxu0 %v1564_v57  ;;  %959 = vmatprep.subr.bf16.mxu1 %v1569_v58 }
  0x65   :  { %1065 = vmatprep.subr.bf16.mxu0 %v1572_v59 }
  0x67   :  { %960 = vmatpush1.bf16.msra.mxu1 %v1567_v60 }
  0x68   :  { %1066 = vmatpush1.bf16.msra.mxu0 %v1570_v61  ;;  %961 = vmatprep.subr.bf16.mxu1 %v1575_v62  ;;  %v166_v62 = vld [vmem:[%s2127_s1 + $0x30] sm:$0xff] }
  0x69   :  { %1067 = vmatprep.subr.bf16.mxu0 %v1578_v63 }
  0x6b   :  { %962 = vmatpush1.bf16.msra.mxu1 %v1573_v0 }
  0x6c   :  { %1068 = vmatpush1.bf16.msra.mxu0 %v1576_v1  ;;  %963 = vmatprep.subr.bf16.mxu1 %v1581_v2 }
  0x6d   :  { %1069 = vmatprep.subr.bf16.mxu0 %v1584_v3 }
  0x6f   :  { %964 = vmatpush1.bf16.msra.mxu1 %v1579_v4 }
  0x70   :  { %1070 = vmatpush1.bf16.msra.mxu0 %v1582_v5  ;;  %965 = vmatprep.subr.bf16.mxu1 %v1587_v6  ;;  %v167_v5 = vld [vmem:[%s2127_s1 + $0x38] sm:$0xff] }
  0x71   :  { %1071 = vmatprep.subr.bf16.mxu0 %v1590_v7 }
  0x73   :  { %966 = vmatpush1.bf16.msra.mxu1 %v1585_v8 }
  0x74   :  { %1072 = vmatpush1.bf16.msra.mxu0 %v1588_v9  ;;  %967 = vmatprep.subr.bf16.mxu1 %v1593_v10 }
  0x75   :  { %1073 = vmatprep.subr.bf16.mxu0 %v1596_v11 }
  0x77   :  { %968 = vmatpush1.bf16.msra.mxu1 %v1591_v12 }
  0x78   :  { %1074 = vmatpush1.bf16.msra.mxu0 %v1594_v13  ;;  %969 = vmatprep.subr.bf16.mxu1 %v1599_v14 }
  0x79   :  { %1075 = vmatprep.subr.bf16.mxu0 %v1602_v15 }
  0x7b   :  { %970 = vmatpush1.bf16.msra.mxu1 %v1597_v16 }
  0x7c   :  { %1076 = vmatpush1.bf16.msra.mxu0 %v1600_v17  ;;  %971 = vmatprep.subr.bf16.mxu1 %v1605_v18 }
  0x7d   :  { %1077 = vmatprep.subr.bf16.mxu0 %v1608_v19 }
  0x7f   :  { %972 = vmatpush1.bf16.msra.mxu1 %v1603_v20 }
  0x80   :  { %1078 = vmatpush1.bf16.msra.mxu0 %v1606_v21 }
  0x82   :  { %974 = vmatmul.mubr.bf16.vlgmr.msra.gmra.mrb[0].mxu1 %v1233_v26 }
  0x83   :  { %1080 = vmatmul.mubr.bf16.vlgmr.msra.gmra.mrb[0].mxu0 %v1237_v27  ;;  %983 = vmatprep.mubr.bf16.mxu1 %v1242_v28 }
  0x84   :  { %1089 = vmatprep.mubr.bf16.mxu0 %v1246_v29 }
  0x8a   :  { %984 = vmatmul.mubr.bf16.gmra.mrb[4].mxu1 %v1241_v30 }
  0x8b   :  { %1090 = vmatmul.mubr.bf16.gmra.mrb[4].mxu0 %v1245_v31 }
 0x155   :  { %v975_v34 = vpop.f32.mrb[0].mxu1 }
 0x156   :  { %v1081_v35 = vpop.f32.mrb[0].mxu0  ;;  %v1384_v37 = vadd.f32 %v975_v34, %v160_v32  ;;  %v977_v38 = vpop.f32.mrb[1].mxu1 }
 0x157   :  { %v1083_v39 = vpop.f32.mrb[1].mxu0  ;;  %v1386_v41 = vadd.f32 %v977_v38, %v161_v33  ;;  %v979_v42 = vpop.f32.mrb[2].mxu1 }
 0x158   :  { %v1085_v43 = vpop.f32.mrb[2].mxu0  ;;  %v1385_v44 = vadd.f32 %v1384_v37, %v1081_v35  ;;  %v1388_v45 = vadd.f32 %v979_v42, %v162_v36  ;;  %v981_v46 = vpop.f32.mrb[3].mxu1 }
 0x159   :  { %v1087_v47 = vpop.f32.mrb[3].mxu0  ;;  %v1387_v48 = vadd.f32 %v1386_v41, %v1083_v39  ;;  %v1390_v49 = vadd.f32 %v981_v46, %v163_v40 }
 0x15a   :  { %v1100_v50 = vmax.f32 %v1385_v44, 0.0  ;;  %v1389_v51 = vadd.f32 %v1388_v45, %v1085_v43  ;;  %v1609_v45 = vmov 1966171168  }
 0x15b   :  { %v1101_v52 = vmax.f32 %v1387_v48, 0.0  ;;  %v1391_v53 = vadd.f32 %v1390_v49, %v1087_v47  ;;  %v1130_v46 = vunpack.c.l.s4 %v1609_v45  ;;  %v1132_v47 = vlaneseq }
 0x15c   :  { %v1102_v55 = vmax.f32 %v1389_v51, 0.0  ;;  %v1149_v57 = vmul.f32 %v1100_v50, %v1100_v50 }
 0x15d   :  { %v1380_v58 = vpack.c.bf16 %v1101_v52, %v1100_v50  ;;  %v1103_v59 = vmax.f32 %v1391_v53, 0.0  ;;  %v985_v60 = vpop.f32.mrb[4].mxu1  ;;  %v1150_v63 = vmul.f32 %v1101_v52, %v1101_v52  ;;  %vm1146_vm0 = vcmp.lt.s32.totalorder %v1132_v47, 256 }
 0x15e   :  { %v1091_v61 = vpop.f32.mrb[4].mxu0  ;;  %v1108_v0 = vadd.f32 %v1102_v55, %v1100_v50  ;;  %v1151_v1 = vmul.f32 %v1102_v55, %v1102_v55  ;;  %v1392_v2 = vadd.f32 %v985_v60, %v164_v54  ;;  %v987_v3 = vpop.f32.mrb[5].mxu1 }
 0x15f   :  { %v1093_v4 = vpop.f32.mrb[5].mxu0  ;;  %1219 = vst [vmem:[%s2128_s3] sm:$0xff] %v1380_v58  ;;  %v1117_v6 = vadd.f32 %v1103_v59, %v1101_v52  ;;  %v1152_v7 = vmul.f32 %v1103_v59, %v1103_v59  ;;  %v1381_v8 = vpack.c.bf16 %v1103_v59, %v1102_v55  ;;  %v1394_v9 = vadd.f32 %v987_v3, %v165_v56  ;;  %v989_v10 = vpop.f32.mrb[6].mxu1 }
 0x160   :  { %v1095_v11 = vpop.f32.mrb[6].mxu0  ;;  %v1157_v12 = vadd.f32 %v1151_v1, %v1149_v57  ;;  %v1393_v13 = vadd.f32 %v1392_v2, %v1091_v61  ;;  %v1396_v14 = vadd.f32 %v989_v10, %v166_v62  ;;  %v991_v15 = vpop.f32.mrb[7].mxu1  ;;  %v1131_v56 = vunpack.c.0.s8 %v1130_v46 }
 0x161   :  { %v1097_v16 = vpop.f32.mrb[7].mxu0  ;;  %v1166_v17 = vadd.f32 %v1152_v7, %v1150_v63  ;;  %1220 = vst [vmem:[%s2128_s3 + $0x8] sm:$0xff] %v1381_v8  ;;  %v1395_v18 = vadd.f32 %v1394_v9, %v1093_v4  ;;  %v1398_v19 = vadd.f32 %v991_v15, %v167_v5  ;;  %v1133_v57 = vshrl.u32 %v1132_v47, 7 }
 0x162   :  { %v1104_v20 = vmax.f32 %v1393_v13, 0.0  ;;  %v1397_v21 = vadd.f32 %v1396_v14, %v1095_v11 }
 0x163   :  { %v1105_v22 = vmax.f32 %v1395_v18, 0.0  ;;  %v1399_v23 = vadd.f32 %v1398_v19, %v1097_v16  ;;  %v1134_v2 = vsub.s32 %v1131_v56, %v1133_v57 }
 0x164   :  { %v1109_v24 = vadd.f32 %v1108_v0, %v1104_v20  ;;  %v1153_v25 = vmul.f32 %v1104_v20, %v1104_v20  ;;  %v1106_v26 = vmax.f32 %v1397_v21, 0.0 }
 0x165   :  { %v1118_v27 = vadd.f32 %v1117_v6, %v1105_v22  ;;  %v1154_v28 = vmul.f32 %v1105_v22, %v1105_v22  ;;  %v1382_v29 = vpack.c.bf16 %v1105_v22, %v1104_v20  ;;  %v1107_v30 = vmax.f32 %v1399_v23, 0.0 }
 0x166   :  { %v1158_v31 = vadd.f32 %v1157_v12, %v1153_v25  ;;  %v1110_v32 = vadd.f32 %v1109_v24, %v1106_v26  ;;  %v1155_v33 = vmul.f32 %v1106_v26, %v1106_v26 }
 0x167   :  { %v1167_v34 = vadd.f32 %v1166_v17, %v1154_v28  ;;  %1221 = vst [vmem:[%s2128_s3 + $0x10] sm:$0xff] %v1382_v29  ;;  %v1119_v35 = vadd.f32 %v1118_v27, %v1107_v30  ;;  %v1156_v36 = vmul.f32 %v1107_v30, %v1107_v30  ;;  %v1383_v37 = vpack.c.bf16 %v1107_v30, %v1106_v26 }
 0x168   :  { %v1111_v38 = vrot.slane %v1110_v32, 4  ;;  %v1159_v39 = vadd.f32 %v1158_v31, %v1155_v33 }
 0x169   :  { %v1120_v40 = vrot.slane %v1119_v35, 4  ;;  %v1168_v41 = vadd.f32 %v1167_v34, %v1156_v36  ;;  %1222 = vst [vmem:[%s2128_s3 + $0x18] sm:$0xff] %v1383_v37 }
 0x16a   :  { %v1112_v42 = vadd.f32 %v1111_v38, %v1110_v32  ;;  %v1160_v43 = vrot.slane %v1159_v39, 4 }
 0x16b   :  { %v1121_v44 = vadd.f32 %v1120_v40, %v1119_v35  ;;  %v1169_v48 = vrot.slane %v1168_v41, 4 }
 0x16c   :  { %v1113_v49 = vrot.slane %v1112_v42, 2  ;;  %v1161_v50 = vadd.f32 %v1160_v43, %v1159_v39 }
 0x16d   :  { %v1122_v51 = vrot.slane %v1121_v44, 2  ;;  %v1170_v52 = vadd.f32 %v1169_v48, %v1168_v41 }
 0x16e   :  { %v1114_v53 = vadd.f32 %v1113_v49, %v1112_v42  ;;  %v1162_v54 = vrot.slane %v1161_v50, 2 }
 0x16f   :  { %v1123_v55 = vadd.f32 %v1122_v51, %v1121_v44  ;;  %v1171_v58 = vrot.slane %v1170_v52, 2 }
 0x170   :  { %v1115_v59 = vrot.slane %v1114_v53, 1  ;;  %v1163_v60 = vadd.f32 %v1162_v54, %v1161_v50 }
 0x171   :  { %v1124_v61 = vrot.slane %v1123_v55, 1  ;;  %v1172_v62 = vadd.f32 %v1171_v58, %v1170_v52 }
 0x172   :  { %v1116_v63 = vadd.f32 %v1115_v59, %v1114_v53  ;;  %v1164_v0 = vrot.slane %v1163_v60, 1 }
 0x173   :  { %v1125_v1 = vadd.f32 %v1124_v61, %v1123_v55  ;;  %v1173_v3 = vrot.slane %v1172_v62, 1 }
 0x174   :  { %v1165_v4 = vadd.f32 %v1164_v0, %v1163_v60 }
 0x175   :  { %v1128_v5 = vcombine.low %v1116_v63, %v1125_v1  ;;  %v1174_v6 = vadd.f32 %v1173_v3, %v1172_v62 }
 0x177   :  { %v1135_v7 = vrot.slane %v1128_v5, %v1134_v2  ;;  %v1177_v8 = vcombine.low %v1165_v4, %v1174_v6 }
 0x179   :  { %v1142_v9 = vrot.slane %v1135_v7, %v1134_v2  ;;  %v1184_v10 = vrot.slane %v1177_v8, %v1134_v2 }
 0x17b   :  { %1148 = vst.msk [vmem:[%s2129_s4] ss:$2 sm:$0x3] %vm1146_vm0, %v1142_v9  ;;  %v1191_v11 = vrot.slane %v1184_v10, %v1134_v2 }
 0x17d   :  { %1375 = vst.msk [vmem:[%s2129_s4 + $0x1] ss:$2 sm:$0x3] %vm1146_vm0, %v1191_v11 }

// kernel: trianglenet_seg_forward.12
= control target key start
LH: loop header
LB: loop body
LE: loop exit
PB: predicated region body
PF: predicated region fallthrough
CT: control target
= control target key end

     0   :  { %v36_v8 = vlaneseq  ;;  %s795_s3 = inlined_call_operand.vmem [shape: bf16[256,256], index: 3, kind: input, shape index: {}]   ;;  %s796_s0 = inlined_call_operand.vmem [shape: bf16[32,256], index: 0, kind: input, shape index: {}]   ;;  %s797_s1 = inlined_call_operand.vmem [shape: f32[1,256], index: 1, kind: input, shape index: {}]   ;;  %s798_s2 = inlined_call_operand.vmem [shape: f32[1,256], index: 2, kind: input, shape index: {}]   ;;  %s799_s4 = inlined_call_operand.vmem [shape: f32[1,256], index: 4, kind: input, shape index: {}]   ;;  %s800_s5 = inlined_call_operand.vmem [shape: bf16[32,256], index: 5, kind: output, shape index: {0}]   ;;  %s801_s6 = inlined_call_operand.vmem [shape: f32[1,2,256], index: 6, kind: output, shape index: {1}]  }
   0x1   :  { %v540_v0 = vld [vmem:[%s795_s3 + $0x4] ss:$8 sps:$4 sm:$0xff]   ;;  %v542_v1 = vld [vmem:[%s795_s3] ss:$8 sps:$4 sm:$0xff]   ;;  %v543_v2 = vld [vmem:[%s795_s3 + $0x14] ss:$8 sps:$4 sm:$0xff]  }
   0x2   :  { %282 = vmatprep.subr.bf16.mxu0 %v540_v0  ;;  %507 = vmatprep.subr.bf16.mxu1 %v540_v0  ;;  %v545_v3 = vld [vmem:[%s795_s3 + $0x10] ss:$8 sps:$4 sm:$0xff]   ;;  %v546_v4 = vld [vmem:[%s795_s3 + $0x24] ss:$8 sps:$4 sm:$0xff]   ;;  %v548_v5 = vld [vmem:[%s795_s3 + $0x20] ss:$8 sps:$4 sm:$0xff]  }
   0x3   :  { %283 = vmatpush1.bf16.msra.mxu0 %v542_v1  ;;  %523 = vmatpush1.bf16.msra.mxu1 %v542_v1  ;;  %v549_v6 = vld [vmem:[%s795_s3 + $0x34] ss:$8 sps:$4 sm:$0xff]   ;;  %v551_v7 = vld [vmem:[%s795_s3 + $0x30] ss:$8 sps:$4 sm:$0xff]   ;;  %v552_v9 = vld [vmem:[%s795_s3 + $0x44] ss:$8 sps:$4 sm:$0xff]  }
   0x4   :  { %284 = vmatprep.subr.bf16.mxu0 %v543_v2  ;;  %508 = vmatprep.subr.bf16.mxu1 %v543_v2  ;;  %v554_v10 = vld [vmem:[%s795_s3 + $0x40] ss:$8 sps:$4 sm:$0xff]   ;;  %v655_v11 = vshrl.u32 %v36_v8, 7  ;;  %v555_v12 = vld [vmem:[%s795_s3 + $0x54] ss:$8 sps:$4 sm:$0xff]   ;;  %vm381_vm0 = vcmp.lt.s32.totalorder %v36_v8, 256 }
   0x5   :  { %v557_v13 = vld [vmem:[%s795_s3 + $0x50] ss:$8 sps:$4 sm:$0xff]   ;;  %v558_v15 = vld [vmem:[%s795_s3 + $0x64] ss:$8 sps:$4 sm:$0xff]   ;;  %v684_v20 = vld [vmem:[%s797_s1] sm:$0x3] }
   0x6   :  { %v664_v14 = vsub.s32 1, %v655_v11  ;;  %v672_v16 = vld [vmem:[%s796_s0] sm:$0xff]  ;;  %v677_v17 = vld [vmem:[%s796_s0 + $0x8] sm:$0xff]  ;;  %v694_v22 = vld [vmem:[%s796_s0 + $0x10] sm:$0xff]  ;;  %v38_v50 = vsub.s32 0, %v655_v11 }
   0x7   :  { %285 = vmatpush1.bf16.msra.mxu0 %v545_v3  ;;  %524 = vmatpush1.bf16.msra.mxu1 %v545_v3  ;;  %v27_v18 = vunpack.c.h.bf16 %v672_v16  ;;  %v29_v19 = vunpack.c.h.bf16 %v677_v17  ;;  %v689_v21 = vld [vmem:[%s798_s2] sm:$0x3]  ;;  %v704_v25 = vld [vmem:[%s796_s0 + $0x18] sm:$0xff]  ;;  %v31_v28 = vunpack.c.h.bf16 %v694_v22  ;;  %v564_v37 = vld [vmem:[%s795_s3 + $0x84] ss:$8 sps:$4 sm:$0xff]   ;;  %v26_v53 = vunpack.c.l.bf16 %v672_v16 }
   0x8   :  { %286 = vmatprep.subr.bf16.mxu0 %v546_v4  ;;  %509 = vmatprep.subr.bf16.mxu1 %v546_v4  ;;  %v560_v23 = vld [vmem:[%s795_s3 + $0x60] ss:$8 sps:$4 sm:$0xff]   ;;  %v43_v24 = vrot.slane %v684_v20, %v664_v14  ;;  %v561_v26 = vld [vmem:[%s795_s3 + $0x74] ss:$8 sps:$4 sm:$0xff]   ;;  %v63_v27 = vrot.slane %v689_v21, %v664_v14  ;;  %v33_v29 = vunpack.c.h.bf16 %v704_v25  ;;  %v563_v34 = vld [vmem:[%s795_s3 + $0x70] ss:$8 sps:$4 sm:$0xff]   ;;  %v28_v54 = vunpack.c.l.bf16 %v677_v17 }
   0x9   :  { %v566_v42 = vld [vmem:[%s795_s3 + $0x80] ss:$8 sps:$4 sm:$0xff]   ;;  %v567_v43 = vld [vmem:[%s795_s3 + $0x94] ss:$8 sps:$4 sm:$0xff]   ;;  %v569_v44 = vld [vmem:[%s795_s3 + $0x90] ss:$8 sps:$4 sm:$0xff]   ;;  %v39_v55 = vrot.slane %v684_v20, %v38_v50  ;;  %v30_v56 = vunpack.c.l.bf16 %v694_v22  ;;  %v32_v57 = vunpack.c.l.bf16 %v704_v25  ;;  %v59_v60 = vrot.slane %v689_v21, %v38_v50 }
   0xa   :  { %v47_v30 = vmul.f32 %v43_v24, %v27_v18  ;;  %v49_v31 = vmul.f32 %v43_v24, %v29_v19  ;;  %v51_v32 = vmul.f32 %v43_v24, %v31_v28  ;;  %v53_v33 = vmul.f32 %v43_v24, %v33_v29  ;;  %v570_v45 = vld [vmem:[%s795_s3 + $0xa4] ss:$8 sps:$4 sm:$0xff]   ;;  %v572_v46 = vld [vmem:[%s795_s3 + $0xa0] ss:$8 sps:$4 sm:$0xff]   ;;  %v573_v47 = vld [vmem:[%s795_s3 + $0xb4] ss:$8 sps:$4 sm:$0xff]  }
   0xb   :  { %287 = vmatpush1.bf16.msra.mxu0 %v548_v5  ;;  %525 = vmatpush1.bf16.msra.mxu1 %v548_v5  ;;  %v575_v48 = vld [vmem:[%s795_s3 + $0xb0] ss:$8 sps:$4 sm:$0xff]   ;;  %v576_v49 = vld [vmem:[%s795_s3 + $0xc4] ss:$8 sps:$4 sm:$0xff]   ;;  %v578_v51 = vld [vmem:[%s795_s3 + $0xc0] ss:$8 sps:$4 sm:$0xff]   ;;  %v46_v61 = vmul.f32 %v39_v55, %v26_v53  ;;  %v48_v62 = vmul.f32 %v39_v55, %v28_v54  ;;  %v50_v63 = vmul.f32 %v39_v55, %v30_v56 }
   0xc   :  { %288 = vmatprep.subr.bf16.mxu0 %v549_v6  ;;  %510 = vmatprep.subr.bf16.mxu1 %v549_v6  ;;  %v67_v35 = vadd.f32 %v63_v27, %v47_v30  ;;  %v69_v36 = vadd.f32 %v63_v27, %v49_v31  ;;  %v71_v38 = vadd.f32 %v63_v27, %v51_v32  ;;  %v579_v52 = vld [vmem:[%s795_s3 + $0xd4] ss:$8 sps:$4 sm:$0xff]   ;;  %v581_v58 = vld [vmem:[%s795_s3 + $0xd0] ss:$8 sps:$4 sm:$0xff]   ;;  %v582_v59 = vld [vmem:[%s795_s3 + $0xe4] ss:$8 sps:$4 sm:$0xff]  }
   0xd   :  { %v73_v39 = vadd.f32 %v63_v27, %v53_v33  ;;  %v52_v0 = vmul.f32 %v39_v55, %v32_v57  ;;  %v584_v1 = vld [vmem:[%s795_s3 + $0xe0] ss:$8 sps:$4 sm:$0xff]   ;;  %v585_v2 = vld [vmem:[%s795_s3 + $0xf4] ss:$8 sps:$4 sm:$0xff]   ;;  %v66_v3 = vadd.f32 %v59_v60, %v46_v61  ;;  %v68_v4 = vadd.f32 %v59_v60, %v48_v62 }
   0xe   :  { %v75_v40 = vpack.c.bf16 %v69_v36, %v67_v35  ;;  %v70_v5 = vadd.f32 %v59_v60, %v50_v63 }
   0xf   :  { %289 = vmatpush1.bf16.msra.mxu0 %v551_v7  ;;  %526 = vmatpush1.bf16.msra.mxu1 %v551_v7  ;;  %v77_v41 = vpack.c.bf16 %v73_v39, %v71_v38  ;;  %v72_v6 = vadd.f32 %v59_v60, %v52_v0  ;;  %v587_v7 = vld [vmem:[%s795_s3 + $0xf0] ss:$8 sps:$4 sm:$0xff]  }
  0x10   :  { %290 = vmatprep.subr.bf16.mxu0 %v552_v9  ;;  %511 = vmatprep.subr.bf16.mxu1 %v552_v9  ;;  %v74_v9 = vpack.c.bf16 %v68_v4, %v66_v3 }
  0x11   :  { %314 = vmatprep.mubr.bf16.mxu0 %v75_v40  ;;  %324 = vmatprep.mubr.bf16.mxu1 %v77_v41 }
  0x13   :  { %291 = vmatpush1.bf16.msra.mxu0 %v554_v10  ;;  %527 = vmatpush1.bf16.msra.mxu1 %v554_v10  ;;  %v76_v10 = vpack.c.bf16 %v72_v6, %v70_v5  ;;  %v588_v5 = vmov 1966171168  }
  0x14   :  { %292 = vmatprep.subr.bf16.mxu0 %v555_v12  ;;  %512 = vmatprep.subr.bf16.mxu1 %v555_v12  ;;  %v110_v12 = vld [vmem:[%s799_s4] sm:$0x3]  ;;  %v365_v6 = vunpack.c.l.s4 %v588_v5 }
  0x17   :  { %293 = vmatpush1.bf16.msra.mxu0 %v557_v13  ;;  %528 = vmatpush1.bf16.msra.mxu1 %v557_v13  ;;  %v115_v13 = vrot.slane %v110_v12, %v38_v50 }
  0x18   :  { %294 = vmatprep.subr.bf16.mxu0 %v558_v15  ;;  %513 = vmatprep.subr.bf16.mxu1 %v558_v15  ;;  %v119_v15 = vrot.slane %v110_v12, %v664_v14 }
  0x1b   :  { %295 = vmatpush1.bf16.msra.mxu0 %v560_v23  ;;  %529 = vmatpush1.bf16.msra.mxu1 %v560_v23 }
  0x1c   :  { %296 = vmatprep.subr.bf16.mxu0 %v561_v26  ;;  %514 = vmatprep.subr.bf16.mxu1 %v561_v26 }
  0x1f   :  { %297 = vmatpush1.bf16.msra.mxu0 %v563_v34  ;;  %530 = vmatpush1.bf16.msra.mxu1 %v563_v34 }
  0x20   :  { %298 = vmatprep.subr.bf16.mxu0 %v564_v37  ;;  %515 = vmatprep.subr.bf16.mxu1 %v564_v37 }
  0x23   :  { %299 = vmatpush1.bf16.msra.mxu0 %v566_v42  ;;  %531 = vmatpush1.bf16.msra.mxu1 %v566_v42 }
  0x24   :  { %300 = vmatprep.subr.bf16.mxu0 %v567_v43  ;;  %516 = vmatprep.subr.bf16.mxu1 %v567_v43 }
  0x27   :  { %301 = vmatpush1.bf16.msra.mxu0 %v569_v44  ;;  %532 = vmatpush1.bf16.msra.mxu1 %v569_v44 }
  0x28   :  { %302 = vmatprep.subr.bf16.mxu0 %v570_v45  ;;  %517 = vmatprep.subr.bf16.mxu1 %v570_v45 }
  0x2b   :  { %303 = vmatpush1.bf16.msra.mxu0 %v572_v46  ;;  %533 = vmatpush1.bf16.msra.mxu1 %v572_v46 }
  0x2c   :  { %304 = vmatprep.subr.bf16.mxu0 %v573_v47  ;;  %518 = vmatprep.subr.bf16.mxu1 %v573_v47 }
  0x2f   :  { %305 = vmatpush1.bf16.msra.mxu0 %v575_v48  ;;  %534 = vmatpush1.bf16.msra.mxu1 %v575_v48 }
  0x30   :  { %306 = vmatprep.subr.bf16.mxu0 %v576_v49  ;;  %519 = vmatprep.subr.bf16.mxu1 %v576_v49 }
  0x33   :  { %307 = vmatpush1.bf16.msra.mxu0 %v578_v51  ;;  %535 = vmatpush1.bf16.msra.mxu1 %v578_v51 }
  0x34   :  { %308 = vmatprep.subr.bf16.mxu0 %v579_v52  ;;  %520 = vmatprep.subr.bf16.mxu1 %v579_v52 }
  0x37   :  { %309 = vmatpush1.bf16.msra.mxu0 %v581_v58  ;;  %536 = vmatpush1.bf16.msra.mxu1 %v581_v58 }
  0x38   :  { %310 = vmatprep.subr.bf16.mxu0 %v582_v59  ;;  %521 = vmatprep.subr.bf16.mxu1 %v582_v59 }
  0x3b   :  { %311 = vmatpush1.bf16.msra.mxu0 %v584_v1  ;;  %537 = vmatpush1.bf16.msra.mxu1 %v584_v1 }
  0x3c   :  { %312 = vmatprep.subr.bf16.mxu0 %v585_v2  ;;  %522 = vmatprep.subr.bf16.mxu1 %v585_v2 }
  0x3f   :  { %313 = vmatpush1.bf16.msra.mxu0 %v587_v7  ;;  %538 = vmatpush1.bf16.msra.mxu1 %v587_v7 }
  0x42   :  { %315 = vmatmul.mubr.bf16.vlgmr.msra.gmra.mrb[0].mxu0 %v74_v9  ;;  %325 = vmatmul.mubr.bf16.vlgmr.msra.gmra.mrb[0].mxu1 %v76_v10 }
 0x115   :  { %v316_v16 = vpop.f32.mrb[0].mxu0  ;;  %v326_v17 = vpop.f32.mrb[0].mxu1 }
 0x116   :  { %v317_v18 = vadd.f32 %v316_v16, %v115_v13  ;;  %v318_v19 = vpop.f32.mrb[1].mxu0  ;;  %v327_v20 = vadd.f32 %v326_v17, %v115_v13  ;;  %v328_v21 = vpop.f32.mrb[1].mxu1 }
 0x117   :  { %v319_v22 = vadd.f32 %v318_v19, %v119_v15  ;;  %v320_v23 = vpop.f32.mrb[2].mxu0  ;;  %v329_v24 = vadd.f32 %v328_v21, %v119_v15  ;;  %v330_v25 = vpop.f32.mrb[2].mxu1 }
 0x118   :  { %v335_v26 = vmax.f32 %v317_v18, 0.0  ;;  %v339_v27 = vmax.f32 %v327_v20, 0.0  ;;  %v321_v28 = vadd.f32 %v320_v23, %v115_v13  ;;  %v322_v29 = vpop.f32.mrb[3].mxu0  ;;  %v331_v30 = vadd.f32 %v330_v25, %v115_v13  ;;  %v332_v31 = vpop.f32.mrb[3].mxu1 }
 0x119   :  { %v336_v32 = vmax.f32 %v319_v22, 0.0  ;;  %v340_v33 = vmax.f32 %v329_v24, 0.0  ;;  %v323_v34 = vadd.f32 %v322_v29, %v119_v15  ;;  %v333_v14 = vadd.f32 %v332_v31, %v119_v15 }
 0x11a   :  { %v337_v35 = vmax.f32 %v321_v28, 0.0  ;;  %v384_v36 = vmul.f32 %v335_v26, %v335_v26  ;;  %v341_v39 = vmax.f32 %v331_v30, 0.0  ;;  %v388_v40 = vmul.f32 %v339_v27, %v339_v27 }
 0x11b   :  { %v503_v37 = vpack.c.bf16 %v336_v32, %v335_v26  ;;  %v505_v38 = vpack.c.bf16 %v340_v33, %v339_v27  ;;  %v338_v43 = vmax.f32 %v323_v34, 0.0  ;;  %v385_v44 = vmul.f32 %v336_v32, %v336_v32 }
 0x11c   :  { %v343_v41 = vadd.f32 %v337_v35, %v335_v26  ;;  %v386_v42 = vmul.f32 %v337_v35, %v337_v35  ;;  %v389_v45 = vmul.f32 %v340_v33, %v340_v33  ;;  %v342_v46 = vmax.f32 %v333_v14, 0.0 }
 0x11d   :  { %454 = vst [vmem:[%s800_s5] sm:$0xff] %v503_v37  ;;  %456 = vst [vmem:[%s800_s5 + $0x10] sm:$0xff] %v505_v38  ;;  %v352_v48 = vadd.f32 %v338_v43, %v336_v32  ;;  %v387_v49 = vmul.f32 %v338_v43, %v338_v43  ;;  %v504_v50 = vpack.c.bf16 %v338_v43, %v337_v35  ;;  %v366_v18 = vunpack.c.0.s8 %v365_v6 }
 0x11e   :  { %v392_v47 = vadd.f32 %v386_v42, %v384_v36  ;;  %v344_v51 = vadd.f32 %v343_v41, %v339_v27  ;;  %v506_v52 = vpack.c.bf16 %v342_v46, %v341_v39  ;;  %v390_v54 = vmul.f32 %v341_v39, %v341_v39 }
 0x11f   :  { %v401_v53 = vadd.f32 %v387_v49, %v385_v44  ;;  %455 = vst [vmem:[%s800_s5 + $0x8] sm:$0xff] %v504_v50  ;;  %v353_v56 = vadd.f32 %v352_v48, %v340_v33  ;;  %v391_v60 = vmul.f32 %v342_v46, %v342_v46  ;;  %v369_v27 = vsub.s32 %v366_v18, %v655_v11 }
 0x120   :  { %v393_v55 = vadd.f32 %v392_v47, %v388_v40  ;;  %v345_v57 = vadd.f32 %v344_v51, %v341_v39  ;;  %457 = vst [vmem:[%s800_s5 + $0x18] sm:$0xff] %v506_v52 }
 0x121   :  { %v354_v59 = vadd.f32 %v353_v56, %v342_v46  ;;  %v402_v61 = vadd.f32 %v401_v53, %v389_v45 }
 0x122   :  { %v394_v58 = vadd.f32 %v393_v55, %v390_v54  ;;  %v346_v62 = vrot.slane %v345_v57, 4 }
 0x123   :  { %v355_v0 = vrot.slane %v354_v59, 4  ;;  %v403_v1 = vadd.f32 %v402_v61, %v391_v60 }
 0x124   :  { %v395_v63 = vrot.slane %v394_v58, 4  ;;  %v347_v2 = vadd.f32 %v346_v62, %v345_v57 }
 0x125   :  { %v356_v4 = vadd.f32 %v355_v0, %v354_v59  ;;  %v404_v7 = vrot.slane %v403_v1, 4 }
 0x126   :  { %v396_v3 = vadd.f32 %v395_v63, %v394_v58  ;;  %v348_v9 = vrot.slane %v347_v2, 2 }
 0x127   :  { %v357_v12 = vrot.slane %v356_v4, 2  ;;  %v405_v13 = vadd.f32 %v404_v7, %v403_v1 }
 0x128   :  { %v397_v10 = vrot.slane %v396_v3, 2  ;;  %v349_v15 = vadd.f32 %v348_v9, %v347_v2 }
 0x129   :  { %v358_v17 = vadd.f32 %v357_v12, %v356_v4  ;;  %v406_v19 = vrot.slane %v405_v13, 2 }
 0x12a   :  { %v398_v16 = vadd.f32 %v397_v10, %v396_v3  ;;  %v350_v20 = vrot.slane %v349_v15, 1 }
 0x12b   :  { %v359_v22 = vrot.slane %v358_v17, 1  ;;  %v407_v23 = vadd.f32 %v406_v19, %v405_v13 }
 0x12c   :  { %v399_v21 = vrot.slane %v398_v16, 1  ;;  %v351_v24 = vadd.f32 %v350_v20, %v349_v15 }
 0x12d   :  { %v360_v26 = vadd.f32 %v359_v22, %v358_v17  ;;  %v408_v28 = vrot.slane %v407_v23, 1 }
 0x12e   :  { %v400_v25 = vadd.f32 %v399_v21, %v398_v16 }
 0x12f   :  { %v363_v29 = vcombine.low %v351_v24, %v360_v26  ;;  %v409_v30 = vadd.f32 %v408_v28, %v407_v23 }
 0x131   :  { %v370_v31 = vrot.slane %v363_v29, %v369_v27  ;;  %v412_v32 = vcombine.low %v400_v25, %v409_v30 }
 0x133   :  { %v377_v33 = vrot.slane %v370_v31, %v369_v27  ;;  %v419_v34 = vrot.slane %v412_v32, %v369_v27 }
 0x135   :  { %383 = vst.msk [vmem:[%s801_s6] ss:$2 sm:$0x3] %vm381_vm0, %v377_v33  ;;  %v426_v14 = vrot.slane %v419_v34, %v369_v27 }
 0x137   :  { %498 = vst.msk [vmem:[%s801_s6 + $0x1] ss:$2 sm:$0x3] %vm381_vm0, %v426_v14 }

// kernel: trianglenet_seg_forward.13
= control target key start
LH: loop header
LB: loop body
LE: loop exit
PB: predicated region body
PF: predicated region fallthrough
CT: control target
= control target key end

     0   :  { %v42_v5 = vlaneseq  ;;  %s799_s0 = inlined_call_operand.vmem [shape: bf16[32,256], index: 0, kind: input, shape index: {}]   ;;  %s800_s1 = inlined_call_operand.vmem [shape: f32[1,256], index: 1, kind: input, shape index: {}]   ;;  %s801_s2 = inlined_call_operand.vmem [shape: f32[1,256], index: 2, kind: input, shape index: {}]   ;;  %s802_s3 = inlined_call_operand.vmem [shape: bf16[256,128], index: 3, kind: input, shape index: {}]   ;;  %s803_s4 = inlined_call_operand.vmem [shape: f32[1,128], index: 4, kind: input, shape index: {}]   ;;  %s804_s5 = inlined_call_operand.vmem [shape: bf16[128,50], index: 5, kind: input, shape index: {}]   ;;  %s805_s6 = inlined_call_operand.vmem [shape: f32[1,50], index: 6, kind: input, shape index: {}]   ;;  %s806_s7 = inlined_call_operand.hbm [shape: f32[32,50], index: 7, kind: output, shape index: {}]  }
   0x1   :  { %v562_v0 = vld [vmem:[%s802_s3 + $0x40] sm:$0xff]   ;;  %v564_v2 = vld [vmem:[%s802_s3 + $0x48] sm:$0xff]   ;;  %v566_v4 = vld [vmem:[%s802_s3 + $0x50] sm:$0xff]  }
   0x2   :  { %v563_v1 = vld [vmem:[%s802_s3] sm:$0xff]   ;;  %501 = vmatprep.subr.bf16.mxu0 %v562_v0  ;;  %v565_v3 = vld [vmem:[%s802_s3 + $0x8] sm:$0xff]   ;;  %v567_v6 = vld [vmem:[%s802_s3 + $0x10] sm:$0xff]   ;;  %v43_v8 = vshrl.u32 %v42_v5, 7 }
   0x3   :  { %502 = vmatpush3.bf16.msra.mxu0 %v563_v1  ;;  %v568_v7 = vld [vmem:[%s802_s3 + $0x58] sm:$0xff]   ;;  %v570_v10 = vld [vmem:[%s802_s3 + $0x60] sm:$0xff]   ;;  %v572_v14 = vld [vmem:[%s802_s3 + $0x68] sm:$0xff]  }
   0x4   :  { %503 = vmatprep.subr.bf16.mxu0 %v564_v2  ;;  %v569_v9 = vld [vmem:[%s802_s3 + $0x18] sm:$0xff]   ;;  %v44_v11 = vsub.s32 0, %v43_v8  ;;  %v571_v12 = vld [vmem:[%s802_s3 + $0x20] sm:$0xff]   ;;  %v48_v13 = vsub.s32 1, %v43_v8  ;;  %v29_v16 = vld [vmem:[%s799_s0 + $0x8] sm:$0xff] }
   0x5   :  { %v28_v15 = vld [vmem:[%s799_s0] sm:$0xff]  ;;  %v573_v18 = vld [vmem:[%s802_s3 + $0x28] sm:$0xff]   ;;  %v34_v21 = vunpack.c.l.bf16 %v29_v16  ;;  %v35_v22 = vunpack.c.h.bf16 %v29_v16  ;;  %v30_v24 = vld [vmem:[%s799_s0 + $0x10] sm:$0xff] }
   0x6   :  { %v40_v17 = vld [vmem:[%s800_s1] sm:$0x3]  ;;  %v32_v19 = vunpack.c.l.bf16 %v28_v15  ;;  %v33_v20 = vunpack.c.h.bf16 %v28_v15  ;;  %v31_v25 = vld [vmem:[%s799_s0 + $0x18] sm:$0xff]  ;;  %v574_v31 = vld [vmem:[%s802_s3 + $0x70] sm:$0xff]   ;;  %v37_v32 = vunpack.c.h.bf16 %v30_v24  ;;  %v36_v42 = vunpack.c.l.bf16 %v30_v24 }
   0x7   :  { %504 = vmatpush3.bf16.msra.mxu0 %v565_v3  ;;  %v60_v23 = vld [vmem:[%s801_s2] sm:$0x3]  ;;  %v45_v26 = vrot.slane %v40_v17, %v44_v11  ;;  %v49_v27 = vrot.slane %v40_v17, %v48_v13  ;;  %v39_v33 = vunpack.c.h.bf16 %v31_v25  ;;  %v579_v38 = vld [vmem:[%s804_s5 + $0x8] sm:$0xff]   ;;  %v575_v39 = vld [vmem:[%s802_s3 + $0x30] sm:$0xff]   ;;  %v38_v43 = vunpack.c.l.bf16 %v31_v25 }
   0x8   :  { %505 = vmatprep.subr.bf16.mxu0 %v566_v4  ;;  %v65_v28 = vrot.slane %v60_v23, %v44_v11  ;;  %v69_v29 = vrot.slane %v60_v23, %v48_v13  ;;  %v578_v30 = vld [vmem:[%s804_s5] sm:$0xff]   ;;  %v580_v44 = vld [vmem:[%s804_s5 + $0x10] sm:$0xff]   ;;  %v576_v51 = vld [vmem:[%s802_s3 + $0x78] sm:$0xff]  }
   0x9   :  { %v53_v34 = vmul.f32 %v49_v27, %v33_v20  ;;  %v55_v35 = vmul.f32 %v49_v27, %v35_v22  ;;  %v52_v36 = vmul.f32 %v45_v26, %v32_v19  ;;  %v54_v37 = vmul.f32 %v45_v26, %v34_v21  ;;  %539 = vmatprep.subr.bf16.mxu1 %v578_v30 }
   0xa   :  { %v57_v40 = vmul.f32 %v49_v27, %v37_v32  ;;  %v59_v41 = vmul.f32 %v49_v27, %v39_v33  ;;  %540 = vmatpush3.bf16.msra.mxu1 %v578_v30  ;;  %v56_v54 = vmul.f32 %v45_v26, %v36_v42 }
   0xb   :  { %506 = vmatpush3.bf16.msra.mxu0 %v567_v6  ;;  %v73_v45 = vadd.f32 %v69_v29, %v53_v34  ;;  %v75_v46 = vadd.f32 %v69_v29, %v55_v35  ;;  %v72_v47 = vadd.f32 %v65_v28, %v52_v36  ;;  %v74_v48 = vadd.f32 %v65_v28, %v54_v37 }
   0xc   :  { %507 = vmatprep.subr.bf16.mxu0 %v568_v7  ;;  %v77_v49 = vadd.f32 %v69_v29, %v57_v40  ;;  %v79_v50 = vadd.f32 %v69_v29, %v59_v41  ;;  %541 = vmatprep.subr.bf16.mxu1 %v579_v38 }
   0xd   :  { %v81_v52 = vmax.f32 %v73_v45, 0.0  ;;  %v83_v53 = vmax.f32 %v75_v46, 0.0 }
   0xf   :  { %508 = vmatpush3.bf16.msra.mxu0 %v569_v9 }
  0x10   :  { %509 = vmatprep.subr.bf16.mxu0 %v570_v10 }
  0x13   :  { %510 = vmatpush3.bf16.msra.mxu0 %v571_v12 }
  0x14   :  { %511 = vmatprep.subr.bf16.mxu0 %v572_v14 }
  0x17   :  { %512 = vmatpush3.bf16.msra.mxu0 %v573_v18 }
  0x18   :  { %513 = vmatprep.subr.bf16.mxu0 %v574_v31 }
  0x19   :  { %12 = vsyncpa [#allocation3], 0  ;;  %v89_v55 = vpack.c.bf16 %v83_v53, %v81_v52  ;;  %v80_v56 = vmax.f32 %v72_v47, 0.0  ;;  %v82_v57 = vmax.f32 %v74_v48, 0.0  ;;  %v58_v58 = vmul.f32 %v45_v26, %v38_v43  ;;  %542 = vmatpush3.bf16.msra.mxu1 %v579_v38  ;;  %v577_v59 = vld [vmem:[%s802_s3 + $0x38] sm:$0xff]   ;;  %v582_v6 = vld [vmem:[%s804_s5 + $0x20] sm:$0xff]  }
  0x1a   :  { %v85_v60 = vmax.f32 %v77_v49, 0.0  ;;  %v87_v61 = vmax.f32 %v79_v50, 0.0  ;;  %543 = vmatprep.subr.bf16.mxu1 %v580_v44  ;;  %v76_v63 = vadd.f32 %v65_v28, %v56_v54  ;;  %v581_v5 = vld [vmem:[%s804_s5 + $0x18] sm:$0xff]   ;;  %v583_v7 = vld [vmem:[%s804_s5 + $0x28] sm:$0xff]   ;;  %v584_v8 = vld [vmem:[%s804_s5 + $0x30] sm:$0xff]   ;;  %vm402_vm0 = vcmask 408576  }
  0x1b   :  { %514 = vmatpush3.bf16.msra.mxu0 %v575_v39  ;;  %259 = vmatprep.mubr.bf16.mxu0 %v89_v55  ;;  %v88_v62 = vpack.c.bf16 %v82_v57, %v80_v56  ;;  %v78_v0 = vadd.f32 %v65_v28, %v58_v58  ;;  %v585_v9 = vld [vmem:[%s804_s5 + $0x38] sm:$0xff]   ;;  %v475_v12 = vld [vmem:[%s803_s4] ss:$0 sm:$0xff] }
  0x1c   :  { %515 = vmatprep.subr.bf16.mxu0 %v576_v51  ;;  %v91_v1 = vpack.c.bf16 %v87_v61, %v85_v60  ;;  %v84_v2 = vmax.f32 %v76_v63, 0.0  ;;  %v492_v33 = vld [vmem:[%s805_s6] ss:$0 sm:$0xff]  ;;  %s626_s6 = smov [#allocation2]  }
  0x1d   :  { %544 = vmatpush3.bf16.msra.mxu1 %v580_v44  ;;  %v86_v3 = vmax.f32 %v78_v0, 0.0  ;;  %s464_s13 = sshll.u32 %s626_s6, 4  ;;  %s465_s13 = int_to_ptr.vmem [resolvable:$true] %s464_s13 }
  0x1e   :  { %545 = vmatprep.subr.bf16.mxu1 %v581_v5  ;;  %s602_s1 = scalar_lea.vmem %s465_s13, 512  ;;  %p607_p1 = scmp.lt.s32.totalorder %s465_s13, %s465_s13 }
  0x1f   :  { %516 = vmatpush3.bf16.msra.mxu0 %v577_v59  ;;  %v90_v4 = vpack.c.bf16 %v86_v3, %v84_v2  ;;  %p603_p0 = scmp.ne.s32.totalorder %s465_s13, %s602_s1  ;;  %p608_p2 = scmp.lt.s32.totalorder %s602_s1, %s602_s1 }
  0x21   :  { %546 = vmatpush3.bf16.msra.mxu1 %v581_v5  ;;  %p609_p3 = por %p608_p2, %p607_p1 }
  0x22   :  { %260 = vmatmul.mubr.bf16.vlgmr.msra.gmra.mrb[0].mxu0 %v88_v62  ;;  %547 = vmatprep.subr.bf16.mxu1 %v582_v6 }
  0x23   :  { %267 = vmatprep.mubr.bf16.mxu0 %v91_v1  ;;  %p610_p4 = pnand %p609_p3, %p603_p0 }
  0x25   :  { %548 = vmatpush3.bf16.msra.mxu1 %v582_v6 }
  0x26   :  { %549 = vmatprep.subr.bf16.mxu1 %v583_v7 }
  0x29   :  { %550 = vmatpush3.bf16.msra.mxu1 %v583_v7 }
  0x2a   :  { %268 = vmatmul.mubr.bf16.gmra.mrb[4].mxu0 %v90_v4  ;;  %551 = vmatprep.subr.bf16.mxu1 %v584_v8 }
  0x2d   :  { %552 = vmatpush3.bf16.msra.mxu1 %v584_v8 }
  0x2e   :  { %553 = vmatprep.subr.bf16.mxu1 %v585_v9 }
  0x31   :  { %554 = vmatpush3.bf16.msra.mxu1 %v585_v9 }
  0xf5   :  { %v517_v10 = vpop.f32.mrb[0].mxu0 }
  0xf6   :  { %v518_v11 = vpop.f32.mrb[1].mxu0 }
  0xf7   :  { %v519_v13 = vadd.f32 %v518_v11, %v517_v10  ;;  %v520_v14 = vpop.f32.mrb[2].mxu0 }
  0xf8   :  { %v521_v15 = vpop.f32.mrb[3].mxu0 }
  0xf9   :  { %v522_v16 = vadd.f32 %v521_v15, %v520_v14  ;;  %v262_v17 = vadd.f32 %v519_v13, %v475_v12 }
  0xfb   :  { %v265_v18 = vadd.f32 %v522_v16, %v475_v12  ;;  %v276_v20 = vmax.f32 %v262_v17, 0.0 }
  0xfd   :  { %v523_v19 = vpop.f32.mrb[4].mxu0  ;;  %v277_v21 = vmax.f32 %v265_v18, 0.0 }
  0xfe   :  { %v524_v22 = vpop.f32.mrb[5].mxu0 }
  0xff   :  { %v525_v23 = vadd.f32 %v524_v22, %v523_v19  ;;  %v526_v24 = vpop.f32.mrb[6].mxu0  ;;  %v280_v25 = vpack.c.bf16 %v277_v21, %v276_v20 }
 0x100   :  { %v527_v26 = vpop.f32.mrb[7].mxu0 }
 0x101   :  { %v270_v27 = vadd.f32 %v525_v23, %v475_v12  ;;  %v528_v28 = vadd.f32 %v527_v26, %v526_v24  ;;  %555 = vmatprep.mubr.bf16.mxu1 %v280_v25 }
 0x103   :  { %v273_v29 = vadd.f32 %v528_v28, %v475_v12  ;;  %v278_v30 = vmax.f32 %v270_v27, 0.0 }
 0x105   :  { %v279_v31 = vmax.f32 %v273_v29, 0.0 }
 0x107   :  { %v281_v32 = vpack.c.bf16 %v279_v31, %v278_v30 }
 0x109   :  { %556 = vmatmul.mubr.bf16.vlgmr.msra.gmra.mrb[0].mxu1 %v281_v32 }
 0x1dc   :  { %v557_v34 = vpop.f32.mrb[0].mxu1 }
 0x1dd   :  { %v765_v35 = vadd.f32 %v557_v34, %v492_v33  ;;  %v387_v36 = vpop.f32.mrb[1].mxu1 }
 0x1de   :  { %v388_v37 = vadd.f32 %v492_v33, %v387_v36  ;;  %v558_v38 = vpop.f32.mrb[2].mxu1 }
 0x1df   :  { %v767_v39 = vadd.f32 %v558_v38, %v492_v33  ;;  %v390_v40 = vpop.f32.mrb[3].mxu1  ;;  %v409_v41 = vsel %vm402_vm0, %v765_v35, -inf }
 0x1e0   :  { %v391_v42 = vadd.f32 %v492_v33, %v390_v40  ;;  %410 = vmax.xlane.f32.xlu1 %v409_v41  ;;  %v403_v43 = vsel %vm402_vm0, %v388_v37, -inf }
 0x1e1   :  { %404 = vmax.xlane.f32.xlu0 %v403_v43  ;;  %v412_v44 = vsel %vm402_vm0, %v767_v39, -inf }
 0x1e2   :  { %v406_v45 = vsel %vm402_vm0, %v391_v42, -inf }
 0x1e4   :  { %413 = vmax.xlane.f32.xlu1 %v412_v44 }
 0x1e5   :  { %407 = vmax.xlane.f32.xlu0 %v406_v45 }
 0x26d   :  { %v411_v46 = vpop.xlane.xlu1 %410 }
 0x26e   :  { %v417_v47 = vsub.f32 %v765_v35, %v411_v46  ;;  %v405_v48 = vpop.xlane.xlu0 %404 }
 0x26f   :  { %v415_v49 = vsub.f32 %v388_v37, %v405_v48 }
 0x270   :  { %v423_v50 = vmul.f32 1.442695, %v417_v47 }
 0x271   :  { %v419_v51 = vmul.f32 1.442695, %v415_v49  ;;  %v414_v52 = vpop.xlane.xlu1 %413 }
 0x272   :  { %v418_v53 = vsub.f32 %v767_v39, %v414_v52  ;;  %v408_v54 = vpop.xlane.xlu0 %407 }
 0x273   :  { %586 = vpow2.f32 %v419_v51  ;;  %v416_v55 = vsub.f32 %v391_v42, %v408_v54 }
 0x274   :  { %588 = vpow2.f32 %v423_v50  ;;  %v425_v56 = vmul.f32 1.442695, %v418_v53 }
 0x275   :  { %v421_v57 = vmul.f32 1.442695, %v416_v55 }
 0x277   :  { %590 = vpow2.f32 %v421_v57 }
 0x278   :  { %592 = vpow2.f32 %v425_v56 }
 0x27d   :  { %v587_v58 = vpop.eup %586 }
 0x27e   :  { %v427_v59 = vsel %vm402_vm0, %v587_v58, 0.0  ;;  %v589_v60 = vpop.eup %588 }
 0x27f   :  { %428 = vadd.xlane.f32.xlu0 %v427_v59  ;;  %v433_v62 = vsel %vm402_vm0, %v589_v60, 0.0 }
 0x281   :  { %v591_v61 = vpop.eup %590 }
 0x282   :  { %v430_v63 = vsel %vm402_vm0, %v591_v61, 0.0  ;;  %v593_v0 = vpop.eup %592 }
 0x283   :  { %434 = vadd.xlane.f32.xlu0 %v433_v62  ;;  %431 = vadd.xlane.f32.xlu1 %v430_v63  ;;  %v436_v1 = vsel %vm402_vm0, %v593_v0, 0.0 }
 0x287   :  { %437 = vadd.xlane.f32.xlu1 %v436_v1 }
 0x30c   :  { %v429_v2 = vpop.xlane.xlu0 %428 }
 0x30d   :  { %594 = vlog2.f32 %v429_v2 }
 0x310   :  { %v432_v3 = vpop.xlane.xlu1 %431  ;;  %v435_v4 = vpop.xlane.xlu0 %434 }
 0x311   :  { %596 = vlog2.f32 %v432_v3 }
 0x312   :  { %598 = vlog2.f32 %v435_v4 }
 0x314   :  { %v438_v5 = vpop.xlane.xlu1 %437 }
 0x315   :  { %600 = vlog2.f32 %v438_v5 }
 0x317   :  { %v595_v6 = vpop.eup %594 }
 0x318   :  { %v440_v7 = vmul.f32 0.6931472, %v595_v6 }
 0x31a   :  { %v447_v8 = vadd.f32 %v440_v7, %v405_v48 }
 0x31b   :  { %v597_v9 = vpop.eup %596 }
 0x31c   :  { %v599_v10 = vpop.eup %598  ;;  %v451_v11 = vsub.f32 %v388_v37, %v447_v8  ;;  %v442_v12 = vmul.f32 0.6931472, %v597_v9 }
 0x31d   :  { %v444_v13 = vmul.f32 0.6931472, %v599_v10 }
 0x31e   :  { %455 = vst.msk [vmem:[#allocation2] sm:$0xff] %vm402_vm0, %v451_v11  ;;  %v448_v14 = vadd.f32 %v442_v12, %v408_v54 }
 0x31f   :  { %v601_v15 = vpop.eup %600  ;;  %v449_v16 = vadd.f32 %v444_v13, %v411_v46 }
 0x320   :  { %v452_v17 = vsub.f32 %v391_v42, %v448_v14  ;;  %v446_v18 = vmul.f32 0.6931472, %v601_v15 }
 0x321   :  { %v453_v19 = vsub.f32 %v765_v35, %v449_v16 }
 0x322   :  { %456 = vst.msk [vmem:[#allocation2 + $0x8] sm:$0xff] %vm402_vm0, %v452_v17  ;;  %v450_v20 = vadd.f32 %v446_v18, %v414_v52 }
 0x323   :  { %457 = vst.msk [vmem:[#allocation2 + $0x10] sm:$0xff] %vm402_vm0, %v453_v19 }
 0x324   :  { %v454_v21 = vsub.f32 %v767_v39, %v450_v20 }
 0x326   :  { %458 = vst.msk [vmem:[#allocation2 + $0x18] sm:$0xff] %vm402_vm0, %v454_v21 }
 0x327   :  { %613 = shalt.err (!%p610_p4)
}
 0x328   :  { %s614_s16 = scalar_lea.hbm %s806_s7, 512 }
 0x329   :  { %p615_p5 = scmp.ne.s32.totalorder %s806_s7, %s614_s16  ;;  %p618_p6 = scmp.lt.u32.totalorder %s614_s16, %s806_s7 }
 0x32b   :  { %p620_p7 = pnand %p618_p6, %p615_p5 }
 0x32d   :  { %623 = shalt.err (!%p620_p7)
}
 0x32e   :  { %s627_s19 = smov 128   ;;  %s628_s20 = smov 8  }
 0x32f   :  { %470 = dma.vmem_to_hbm [thread:$0]  %s465_s13, 512, %s806_s7, [#allocation3], %s627_s19, %s627_s19, %s628_s20  }
 0x330   :  { %624 = dma.done.wait [#allocation3], 512  }
 0x331   :  { %625 = vsyncadd [#allocation3], 4294966784 }
 0x332   :  { %474 = vsyncpa [#allocation3], 1 }

</bundles_post_ra>
